<compile_context>
chip_gen: v7x
topology: tpu7x:2x2x1
jax: 0.10.0
libtpu: 0.0.40
codegen_flags: <defaults>
</compile_context>

<pallas_src>
import math
import numpy as np
import jax
import jax.numpy as jnp
from jax import lax
from jax.experimental import pallas as pl
from jax.experimental.pallas import tpu as pltpu

D_MODEL = 128
N_HEADS = 8
HEAD_DIM = D_MODEL // N_HEADS
N_LAYERS = 2
TSP_DIM = 2
TSP_PAD = 8            # coordinate axis zero-padded to 8 (extra embed-weight rows are zero)
FF_DIM = 4 * D_MODEL
MAX_LEN = 100
LN_EPS = 1e-5
NEG = -1e30
SENTINEL = -1.0        # TODO(synk): module-level SENTINEL constant not shown in the spec; assumed -1.0


# ---------------------------------------------------------------------------
# shared math (used by the Pallas kernel with Refs and by the pure-JAX reference
# with arrays -- the indexing syntax works for both)
# ---------------------------------------------------------------------------

def _layernorm(x, g, b):
    mu = jnp.mean(x, axis=-1, keepdims=True)
    var = jnp.mean(jnp.square(x - mu), axis=-1, keepdims=True)
    return (x - mu) * lax.rsqrt(var + LN_EPS) * g + b


def _softmax(x, approx_recip):
    x = x - jnp.max(x, axis=-1, keepdims=True)
    e = jnp.exp(x)
    s = jnp.sum(e, axis=-1, keepdims=True)
    if approx_recip:
        return e * pl.reciprocal(s, approx=True)   # EUP slot; kernel path only
    return e / s


def _mha_core(q, k, v, b, s_q, s_k, w_o, b_o, bias, approx_recip):
    """Attention core on already-projected activations.

    q: (b*s_q, D) f32 (already scaled by 1/sqrt(hd)); k, v: (b*s_k, D) f32.
    bias is additive, broadcastable to (b, s_q, s_k).  Per-head scores/AV are 3-D
    einsums (K=hd=16); the heads are concatenated back to 128 lanes and projected
    with a single K=128 matmul against w_o (D, D)."""
    q3 = q.reshape(b, s_q, D_MODEL).astype(jnp.bfloat16)
    k3 = k.reshape(b, s_k, D_MODEL).astype(jnp.bfloat16)
    v3 = v.reshape(b, s_k, D_MODEL).astype(jnp.bfloat16)
    heads = []
    for h in range(N_HEADS):
        sl = slice(h * HEAD_DIM, (h + 1) * HEAD_DIM)
        s = jnp.einsum("bqd,bkd->bqk", q3[:, :, sl], k3[:, :, sl],
                       preferred_element_type=jnp.float32) + bias
        p = _softmax(s, approx_recip)
        heads.append(jnp.einsum("bqk,bkd->bqd", p.astype(jnp.bfloat16), v3[:, :, sl],
                                preferred_element_type=jnp.float32))
    o = jnp.concatenate(heads, axis=-1).reshape(b * s_q, D_MODEL)
    return jnp.dot(o.astype(jnp.bfloat16), w_o, preferred_element_type=jnp.float32) + b_o


def _forward_core(sel, mem, sel_mask, mem_mask,
                  causal, pe, emb_w, emb_b,
                  sa_w_qkv, sa_b_qkv, sa_w_o, sa_b_o,
                  ca_w_q, ca_b_q, ca_w_kv, ca_b_kv, ca_w_o, ca_b_o,
                  ln_g, ln_b, ff1_w, ff1_b, ff2_w, ff2_b,
                  hw1, hb1, hw2, hb2, *, approx_recip=False):
    """TspCritic forward for a block of b examples.
    sel: (b, S_t, TSP_PAD) f32, mem: (b, S_m, D) bf16,
    sel_mask/mem_mask: (b, 1, S) f32 (1.0 == padded).  Returns (b, S_t) f32."""
    b, s_t, _ = sel.shape
    s_m = mem.shape[1]
    D = D_MODEL
    scale = 1.0 / math.sqrt(HEAD_DIM)

    # embed(2*sel - 1) + positional encoding; fold batch into the matmul M-dim
    # TODO(synk): embedding could be hoisted out of the kernel (low-priority review item).
    sel2 = ((sel * 2.0 - 1.0).astype(jnp.bfloat16)).reshape(b * s_t, TSP_PAD)
    x = jnp.dot(sel2, emb_w[...], preferred_element_type=jnp.float32) + emb_b[...]
    x = (x.reshape(b, s_t, D) + pe[...][None, :, :]).reshape(b * s_t, D)

    # additive attention biases, built once per block
    self_bias = causal[...][None, :, :] + sel_mask * NEG        # (b, S_t, S_t)
    cross_bias = mem_mask * NEG                                 # (b, 1, S_m)

    mem2 = mem.reshape(b * s_m, D).astype(jnp.bfloat16)

    # post-LN TransformerDecoder stack (dropout = 0)
    for l in range(N_LAYERS):
        lg = ln_g[l]                                            # (3, D)
        lb = ln_b[l]

        # --- self-attention: fused QKV projection (128 -> 384) ---
        xb = x.astype(jnp.bfloat16)
        qkv = jnp.dot(xb, sa_w_qkv[l], preferred_element_type=jnp.float32) + sa_b_qkv[l]
        sa = _mha_core(qkv[:, 0:D] * scale, qkv[:, D:2 * D], qkv[:, 2 * D:3 * D],
                       b, s_t, s_t, sa_w_o[l], sa_b_o[l], self_bias, approx_recip)
        x = _layernorm(x + sa, lg[0:1, :], lb[0:1, :])

        # --- cross-attention: Q projection (128 -> 128) + fused KV projection (128 -> 256) ---
        xb = x.astype(jnp.bfloat16)
        q = (jnp.dot(xb, ca_w_q[l], preferred_element_type=jnp.float32) + ca_b_q[l]) * scale
        kv = jnp.dot(mem2, ca_w_kv[l], preferred_element_type=jnp.float32) + ca_b_kv[l]
        ca = _mha_core(q, kv[:, 0:D], kv[:, D:2 * D],
                       b, s_t, s_m, ca_w_o[l], ca_b_o[l], cross_bias, approx_recip)
        x = _layernorm(x + ca, lg[1:2, :], lb[1:2, :])

        # --- feedforward ---
        xb = x.astype(jnp.bfloat16)
        hdn = jnp.maximum(
            jnp.dot(xb, ff1_w[l], preferred_element_type=jnp.float32) + ff1_b[l], 0.0)
        ff = jnp.dot(hdn.astype(jnp.bfloat16), ff2_w[l],
                     preferred_element_type=jnp.float32) + ff2_b[l]
        x = _layernorm(x + ff, lg[2:3, :], lb[2:3, :])

    # value head: Linear(D,D) -> ReLU -> (elementwise mul + lane reduce) instead of an M=1 matmul
    h = jnp.maximum(jnp.dot(x.astype(jnp.bfloat16), hw1[...],
                            preferred_element_type=jnp.float32) + hb1[...], 0.0)
    vals = jnp.sum(h.reshape(b, s_t, D) * hw2[...], axis=-1) + hb2[...]
    # reset_pads(..., SENTINEL)
    return jnp.where(sel_mask[:, 0, :] > 0.0, SENTINEL, vals)


# ---------------------------------------------------------------------------
# Pallas kernel + wrapper
# ---------------------------------------------------------------------------

def _tsp_critic_kernel(*refs):
    # refs = (sel, mem, sel_mask, mem_mask, *weights, out)
    sel_ref, mem_ref, selmask_ref, memmask_ref = refs[:4]
    w_refs = refs[4:-1]         # weights stay as Refs; slabs are loaded at use sites
    out_ref = refs[-1]
    out_ref[...] = _forward_core(sel_ref[...], mem_ref[...],
                                 selmask_ref[...], memmask_ref[...],
                                 *w_refs, approx_recip=True)


def _prep_weights(params, s_t):
    """Host-side weight prep: fused lane-dense layouts, bf16 cast of MXU operands."""
    D = D_MODEL

    def bf(x):
        return x.astype(jnp.bfloat16)

    def f32(x):
        return x.astype(jnp.float32)

    rows = lax.broadcasted_iota(jnp.int32, (s_t, s_t), 0)
    cols = lax.broadcasted_iota(jnp.int32, (s_t, s_t), 1)
    causal = jnp.where(cols <= rows, 0.0, NEG).astype(jnp.float32)

    ca_in_w, ca_in_b = params["ca_in_w"], params["ca_in_b"]

    return (
        causal,
        f32(params["pe"][:s_t]),
        bf(params["emb_w"]), f32(params["emb_b"]),
        # self-attention: fused (L, D, 3D) QKV projection, (L, D, D) output projection
        bf(params["sa_in_w"]), f32(params["sa_in_b"]),
        bf(params["sa_out_w"]), f32(params["sa_out_b"]),
        # cross-attention: (L, D, D) Q projection + fused (L, D, 2D) KV projection
        bf(ca_in_w[:, :, 0:D]), f32(ca_in_b[:, :, 0:D]),
        bf(ca_in_w[:, :, D:3 * D]), f32(ca_in_b[:, :, D:3 * D]),
        bf(params["ca_out_w"]), f32(params["ca_out_b"]),
        f32(params["ln_g"]), f32(params["ln_b"]),
        bf(params["ff1_w"]), f32(params["ff1_b"]),
        bf(params["ff2_w"]), f32(params["ff2_b"]),
        bf(params["hw1"]), f32(params["hb1"]),
        f32(params["hw2"]), f32(params["hb2"]),
    )


def tsp_critic_forward(params, node_encodings, selections,
                       node_enc_padding_mask, select_padding_mask, block_b=32):
    n, s_m, _ = node_encodings.shape
    _, s_t, _ = selections.shape

    bb = int(max(1, min(block_b, n)))            # examples per grid step
    if bb < n:
        bb = max(8, (bb // 8) * 8)               # multi-block batch tiles stay sublane-dense
    n_blocks = -(-n // bb)
    n_pad = n_blocks * bb

    sel_p = jnp.concatenate(
        [selections.astype(jnp.float32),
         jnp.zeros((n, s_t, TSP_PAD - TSP_DIM), jnp.float32)], axis=-1)
    mem_p = node_encodings.astype(jnp.bfloat16)
    sel_mask = select_padding_mask.astype(jnp.float32)[:, None, :]
    mem_mask = node_enc_padding_mask.astype(jnp.float32)[:, None, :]
    if n_pad != n:                               # pad batch with unmasked zero examples
        pad = ((0, n_pad - n), (0, 0), (0, 0))
        sel_p = jnp.pad(sel_p, pad)
        mem_p = jnp.pad(mem_p, pad)
        sel_mask = jnp.pad(sel_mask, pad)
        mem_mask = jnp.pad(mem_mask, pad)

    weights = _prep_weights(params, s_t)

    def _rep(w):                                 # weight: constant index map, fetched once
        nd = w.ndim
        return pl.BlockSpec(w.shape, lambda i, _nd=nd: (0,) * _nd)

    in_specs = [
        pl.BlockSpec((bb, s_t, TSP_PAD), lambda i: (i, 0, 0)),
        pl.BlockSpec((bb, s_m, D_MODEL), lambda i: (i, 0, 0)),
        pl.BlockSpec((bb, 1, s_t), lambda i: (i, 0, 0)),
        pl.BlockSpec((bb, 1, s_m), lambda i: (i, 0, 0)),
    ] + [_rep(w) for w in weights]

    out = pl.pallas_call(
        _tsp_critic_kernel,
        out_shape=jax.ShapeDtypeStruct((n_pad, s_t), jnp.float32),
        grid=(n_blocks,),
        in_specs=in_specs,
        out_specs=pl.BlockSpec((bb, s_t), lambda i: (i, 0)),
        compiler_params=pltpu.CompilerParams(
            dimension_semantics=("parallel",),   # independent batch blocks (v7x: 2 TensorCores)
            vmem_limit_bytes=40 * 1024 * 1024,   # fits v7x's 64 MiB physical VMEM with headroom
        ),
    )(sel_p, mem_p, sel_mask, mem_mask, *weights)
    return out[:n]


def tsp_critic_reference(params, node_encodings, selections,
                         node_enc_padding_mask, select_padding_mask):
    """Pure-JAX reference (same math / same bf16 matmul operands, exact softmax divide)."""
    n, s_t, _ = selections.shape
    sel_p = jnp.concatenate(
        [selections.astype(jnp.float32),
         jnp.zeros((n, s_t, TSP_PAD - TSP_DIM), jnp.float32)], axis=-1)
    weights = _prep_weights(params, s_t)
    return _forward_core(
        sel_p, node_encodings.astype(jnp.bfloat16),
        select_padding_mask.astype(jnp.float32)[:, None, :],
        node_enc_padding_mask.astype(jnp.float32)[:, None, :],
        *weights, approx_recip=False)


# ---------------------------------------------------------------------------
# parameter construction (torch-equivalent layout)
# ---------------------------------------------------------------------------

def _positional_encoding(max_len, d):
    pos = np.arange(max_len, dtype=np.float32)[:, None]
    div = np.exp(np.arange(0, d, 2, dtype=np.float32) * (-math.log(10000.0) / d))
    pe = np.zeros((max_len, d), dtype=np.float32)
    pe[:, 0::2] = np.sin(pos * div)
    pe[:, 1::2] = np.cos(pos * div)
    return jnp.asarray(pe)


def init_params(key):
    keys = iter(jax.random.split(key, 32))

    def w(shape, scale=0.05):
        return jax.random.normal(next(keys), shape, dtype=jnp.float32) * scale

    L, D, F = N_LAYERS, D_MODEL, FF_DIM
    emb_w = w((TSP_PAD, D)).at[TSP_DIM:].set(0.0)   # only first TSP_DIM rows are real
    return {
        "pe": _positional_encoding(MAX_LEN, D),
        "emb_w": emb_w, "emb_b": w((1, D)),
        "sa_in_w": w((L, D, 3 * D)), "sa_in_b": w((L, 1, 3 * D)),
        "sa_out_w": w((L, D, D)), "sa_out_b": w((L, 1, D)),
        "ca_in_w": w((L, D, 3 * D)), "ca_in_b": w((L, 1, 3 * D)),
        "ca_out_w": w((L, D, D)), "ca_out_b": w((L, 1, D)),
        "ln_g": 1.0 + w((L, 3, D), 0.01), "ln_b": w((L, 3, D), 0.01),
        "ff1_w": w((L, D, F)), "ff1_b": w((L, 1, F)),
        "ff2_w": w((L, F, D)), "ff2_b": w((L, 1, D)),
        "hw1": w((D, D)), "hb1": w((1, D)),
        "hw2": w((1, D)), "hb2": w((1, 1)),
    }


if __name__ == "__main__":
    key = jax.random.PRNGKey(0)
    k_par, k_mem, k_sel = jax.random.split(key, 3)

    N, S_T, S_M = 2, 8, 8
    params = init_params(k_par)
    node_encodings = jax.random.normal(k_mem, (N, S_M, D_MODEL), dtype=jnp.float32)
    selections = jax.random.uniform(k_sel, (N, S_T, TSP_DIM), dtype=jnp.float32)
    # True == padded; keep position 0 unpadded so no attention row is fully masked
    select_padding_mask = jnp.array([[False] * 7 + [True], [False] * 8], dtype=jnp.bool_)
    node_enc_padding_mask = jnp.array([[False] * 8, [False] * 6 + [True] * 2], dtype=jnp.bool_)

    vals = tsp_critic_forward(params, node_encodings, selections,
                              node_enc_padding_mask, select_padding_mask)
    vals = jax.block_until_ready(vals)

    ref = tsp_critic_reference(params, node_encodings, selections,
                               node_enc_padding_mask, select_padding_mask)
    ref = jax.block_until_ready(ref)

    np.testing.assert_allclose(np.asarray(vals), np.asarray(ref), rtol=1e-2, atol=1e-2)
    print("KERNEL_OK")
</pallas_src>

<mosaic_0001>
module attributes {stable_mosaic.version = 11 : i64} {
  func.func @_tsp_critic_kernel(%arg0: i32, %arg1: memref<2x8x8xf32, #tpu.memory_space<vmem>>, %arg2: memref<2x8x128xbf16, #tpu.memory_space<vmem>>, %arg3: memref<2x1x8xf32, #tpu.memory_space<vmem>>, %arg4: memref<2x1x8xf32, #tpu.memory_space<vmem>>, %arg5: memref<8x8xf32, #tpu.memory_space<vmem>>, %arg6: memref<8x128xf32, #tpu.memory_space<vmem>>, %arg7: memref<8x128xbf16, #tpu.memory_space<vmem>>, %arg8: memref<1x128xf32, #tpu.memory_space<vmem>>, %arg9: memref<2x128x384xbf16, #tpu.memory_space<vmem>>, %arg10: memref<2x1x384xf32, #tpu.memory_space<vmem>>, %arg11: memref<2x128x128xbf16, #tpu.memory_space<vmem>>, %arg12: memref<2x1x128xf32, #tpu.memory_space<vmem>>, %arg13: memref<2x128x128xbf16, #tpu.memory_space<vmem>>, %arg14: memref<2x1x128xf32, #tpu.memory_space<vmem>>, %arg15: memref<2x128x256xbf16, #tpu.memory_space<vmem>>, %arg16: memref<2x1x256xf32, #tpu.memory_space<vmem>>, %arg17: memref<2x128x128xbf16, #tpu.memory_space<vmem>>, %arg18: memref<2x1x128xf32, #tpu.memory_space<vmem>>, %arg19: memref<2x3x128xf32, #tpu.memory_space<vmem>>, %arg20: memref<2x3x128xf32, #tpu.memory_space<vmem>>, %arg21: memref<2x128x512xbf16, #tpu.memory_space<vmem>>, %arg22: memref<2x1x512xf32, #tpu.memory_space<vmem>>, %arg23: memref<2x512x128xbf16, #tpu.memory_space<vmem>>, %arg24: memref<2x1x128xf32, #tpu.memory_space<vmem>>, %arg25: memref<128x128xbf16, #tpu.memory_space<vmem>>, %arg26: memref<1x128xf32, #tpu.memory_space<vmem>>, %arg27: memref<1x128xf32, #tpu.memory_space<vmem>>, %arg28: memref<1x1xf32, #tpu.memory_space<vmem>>, %arg29: memref<2x8xf32, #tpu.memory_space<vmem>>) attributes {dimension_semantics = [#tpu.dimension_semantics<parallel>], iteration_bounds = array<i64: 1>, scalar_prefetch = 0 : i64, scratch_operands = 0 : i64, tpu.core_type = #tpu.core_type<tc>, window_params = [{transform_indices = @transform_0, window_bounds = array<i64: 2, 8, 8>}, {transform_indices = @transform_1, window_bounds = array<i64: 2, 8, 128>}, {transform_indices = @transform_2, window_bounds = array<i64: 2, 1, 8>}, {transform_indices = @transform_3, window_bounds = array<i64: 2, 1, 8>}, {pipeline_mode = #tpu.pipeline_mode<synchronous>, transform_indices = @transform_4, window_bounds = array<i64: 8, 8>}, {pipeline_mode = #tpu.pipeline_mode<synchronous>, transform_indices = @transform_5, window_bounds = array<i64: 8, 128>}, {pipeline_mode = #tpu.pipeline_mode<synchronous>, transform_indices = @transform_6, window_bounds = array<i64: 8, 128>}, {pipeline_mode = #tpu.pipeline_mode<synchronous>, transform_indices = @transform_7, window_bounds = array<i64: 1, 128>}, {pipeline_mode = #tpu.pipeline_mode<synchronous>, transform_indices = @transform_8, window_bounds = array<i64: 2, 128, 384>}, {pipeline_mode = #tpu.pipeline_mode<synchronous>, transform_indices = @transform_9, window_bounds = array<i64: 2, 1, 384>}, {pipeline_mode = #tpu.pipeline_mode<synchronous>, transform_indices = @transform_10, window_bounds = array<i64: 2, 128, 128>}, {pipeline_mode = #tpu.pipeline_mode<synchronous>, transform_indices = @transform_11, window_bounds = array<i64: 2, 1, 128>}, {pipeline_mode = #tpu.pipeline_mode<synchronous>, transform_indices = @transform_12, window_bounds = array<i64: 2, 128, 128>}, {pipeline_mode = #tpu.pipeline_mode<synchronous>, transform_indices = @transform_13, window_bounds = array<i64: 2, 1, 128>}, {pipeline_mode = #tpu.pipeline_mode<synchronous>, transform_indices = @transform_14, window_bounds = array<i64: 2, 128, 256>}, {pipeline_mode = #tpu.pipeline_mode<synchronous>, transform_indices = @transform_15, window_bounds = array<i64: 2, 1, 256>}, {pipeline_mode = #tpu.pipeline_mode<synchronous>, transform_indices = @transform_16, window_bounds = array<i64: 2, 128, 128>}, {pipeline_mode = #tpu.pipeline_mode<synchronous>, transform_indices = @transform_17, window_bounds = array<i64: 2, 1, 128>}, {pipeline_mode = #tpu.pipeline_mode<synchronous>, transform_indices = @transform_18, window_bounds = array<i64: 2, 3, 128>}, {pipeline_mode = #tpu.pipeline_mode<synchronous>, transform_indices = @transform_19, window_bounds = array<i64: 2, 3, 128>}, {pipeline_mode = #tpu.pipeline_mode<synchronous>, transform_indices = @transform_20, window_bounds = array<i64: 2, 128, 512>}, {pipeline_mode = #tpu.pipeline_mode<synchronous>, transform_indices = @transform_21, window_bounds = array<i64: 2, 1, 512>}, {pipeline_mode = #tpu.pipeline_mode<synchronous>, transform_indices = @transform_22, window_bounds = array<i64: 2, 512, 128>}, {pipeline_mode = #tpu.pipeline_mode<synchronous>, transform_indices = @transform_23, window_bounds = array<i64: 2, 1, 128>}, {pipeline_mode = #tpu.pipeline_mode<synchronous>, transform_indices = @transform_24, window_bounds = array<i64: 128, 128>}, {pipeline_mode = #tpu.pipeline_mode<synchronous>, transform_indices = @transform_25, window_bounds = array<i64: 1, 128>}, {pipeline_mode = #tpu.pipeline_mode<synchronous>, transform_indices = @transform_26, window_bounds = array<i64: 1, 128>}, {pipeline_mode = #tpu.pipeline_mode<synchronous>, transform_indices = @transform_27, window_bounds = array<i64: 1, 1>}, {transform_indices = @transform_28, window_bounds = array<i64: 2, 8>}]} {
    %c0 = arith.constant 0 : index
    %c0_0 = arith.constant 0 : index
    %c0_1 = arith.constant 0 : index
    %0 = vector.load %arg1[%c0, %c0_0, %c0_1] : memref<2x8x8xf32, #tpu.memory_space<vmem>>, vector<2x8x8xf32>
    %c0_2 = arith.constant 0 : index
    %c0_3 = arith.constant 0 : index
    %c0_4 = arith.constant 0 : index
    %1 = vector.load %arg2[%c0_2, %c0_3, %c0_4] : memref<2x8x128xbf16, #tpu.memory_space<vmem>>, vector<2x8x128xbf16>
    %c0_5 = arith.constant 0 : index
    %c0_6 = arith.constant 0 : index
    %c0_7 = arith.constant 0 : index
    %2 = vector.load %arg3[%c0_5, %c0_6, %c0_7] : memref<2x1x8xf32, #tpu.memory_space<vmem>>, vector<2x1x8xf32>
    %c0_8 = arith.constant 0 : index
    %c0_9 = arith.constant 0 : index
    %c0_10 = arith.constant 0 : index
    %3 = vector.load %arg4[%c0_8, %c0_9, %c0_10] : memref<2x1x8xf32, #tpu.memory_space<vmem>>, vector<2x1x8xf32>
    %cst = arith.constant 2.000000e+00 : f32
    %4 = vector.broadcast %cst : f32 to vector<2x8x8xf32>
    %5 = arith.mulf %0, %4 : vector<2x8x8xf32>
    %cst_11 = arith.constant 1.000000e+00 : f32
    %6 = vector.broadcast %cst_11 : f32 to vector<2x8x8xf32>
    %7 = arith.subf %5, %6 : vector<2x8x8xf32>
    %8 = arith.truncf %7 : vector<2x8x8xf32> to vector<2x8x8xbf16>
    %9 = vector.shape_cast %8 : vector<2x8x8xbf16> to vector<16x8xbf16>
    %c0_12 = arith.constant 0 : index
    %c0_13 = arith.constant 0 : index
    %10 = vector.load %arg7[%c0_12, %c0_13] : memref<8x128xbf16, #tpu.memory_space<vmem>>, vector<8x128xbf16>
    %cst_14 = arith.constant dense<0.000000e+00> : vector<16x128xf32>
    %11 = tpu.matmul %9, %10, %cst_14 {dimension_numbers = #tpu.dot_dimension_numbers<[1], [0], [0], [1], [0, 0, 1, 1], [], []>} : vector<16x8xbf16>, vector<8x128xbf16>, vector<16x128xf32> -> vector<16x128xf32>
    %c0_15 = arith.constant 0 : index
    %c0_16 = arith.constant 0 : index
    %12 = vector.load %arg8[%c0_15, %c0_16] : memref<1x128xf32, #tpu.memory_space<vmem>>, vector<1x128xf32>
    %13 = vector.broadcast %12 : vector<1x128xf32> to vector<16x128xf32>
    %14 = arith.addf %11, %13 : vector<16x128xf32>
    %15 = vector.shape_cast %14 : vector<16x128xf32> to vector<2x8x128xf32>
    %c0_17 = arith.constant 0 : index
    %c0_18 = arith.constant 0 : index
    %16 = vector.load %arg6[%c0_17, %c0_18] : memref<8x128xf32, #tpu.memory_space<vmem>>, vector<8x128xf32>
    %17 = vector.shape_cast %16 : vector<8x128xf32> to vector<1x8x128xf32>
    %18 = vector.broadcast %17 : vector<1x8x128xf32> to vector<2x8x128xf32>
    %19 = arith.addf %15, %18 : vector<2x8x128xf32>
    %20 = vector.shape_cast %19 : vector<2x8x128xf32> to vector<16x128xf32>
    %c0_19 = arith.constant 0 : index
    %c0_20 = arith.constant 0 : index
    %21 = vector.load %arg5[%c0_19, %c0_20] : memref<8x8xf32, #tpu.memory_space<vmem>>, vector<8x8xf32>
    %22 = vector.shape_cast %21 : vector<8x8xf32> to vector<1x8x8xf32>
    %cst_21 = arith.constant -1.000000e+30 : f32
    %23 = vector.broadcast %cst_21 : f32 to vector<2x1x8xf32>
    %24 = arith.mulf %2, %23 : vector<2x1x8xf32>
    %25 = vector.broadcast %22 : vector<1x8x8xf32> to vector<2x8x8xf32>
    %26 = vector.broadcast %24 : vector<2x1x8xf32> to vector<2x8x8xf32>
    %27 = arith.addf %25, %26 : vector<2x8x8xf32>
    %cst_22 = arith.constant -1.000000e+30 : f32
    %28 = vector.broadcast %cst_22 : f32 to vector<2x1x8xf32>
    %29 = arith.mulf %3, %28 : vector<2x1x8xf32>
    %30 = vector.shape_cast %1 : vector<2x8x128xbf16> to vector<16x128xbf16>
    %c0_23 = arith.constant 0 : index
    %c0_24 = arith.constant 0 : index
    %c0_25 = arith.constant 0 : index
    %31 = vector.load %arg19[%c0_23, %c0_24, %c0_25] : memref<2x3x128xf32, #tpu.memory_space<vmem>>, vector<1x3x128xf32>
    %32 = vector.shape_cast %31 : vector<1x3x128xf32> to vector<3x128xf32>
    %c0_26 = arith.constant 0 : index
    %c0_27 = arith.constant 0 : index
    %c0_28 = arith.constant 0 : index
    %33 = vector.load %arg20[%c0_26, %c0_27, %c0_28] : memref<2x3x128xf32, #tpu.memory_space<vmem>>, vector<1x3x128xf32>
    %34 = vector.shape_cast %33 : vector<1x3x128xf32> to vector<3x128xf32>
    %35 = arith.truncf %20 : vector<16x128xf32> to vector<16x128xbf16>
    %c0_29 = arith.constant 0 : index
    %c0_30 = arith.constant 0 : index
    %c0_31 = arith.constant 0 : index
    %36 = vector.load %arg9[%c0_29, %c0_30, %c0_31] : memref<2x128x384xbf16, #tpu.memory_space<vmem>>, vector<1x128x384xbf16>
    %37 = vector.shape_cast %36 : vector<1x128x384xbf16> to vector<128x384xbf16>
    %cst_32 = arith.constant dense<0.000000e+00> : vector<16x384xf32>
    %38 = tpu.matmul %35, %37, %cst_32 {dimension_numbers = #tpu.dot_dimension_numbers<[1], [0], [0], [1], [0, 0, 1, 1], [], []>} : vector<16x128xbf16>, vector<128x384xbf16>, vector<16x384xf32> -> vector<16x384xf32>
    %c0_33 = arith.constant 0 : index
    %c0_34 = arith.constant 0 : index
    %c0_35 = arith.constant 0 : index
    %39 = vector.load %arg10[%c0_33, %c0_34, %c0_35] : memref<2x1x384xf32, #tpu.memory_space<vmem>>, vector<1x1x384xf32>
    %40 = vector.shape_cast %39 : vector<1x1x384xf32> to vector<1x384xf32>
    %41 = vector.broadcast %40 : vector<1x384xf32> to vector<16x384xf32>
    %42 = arith.addf %38, %41 : vector<16x384xf32>
    %43 = vector.extract_strided_slice %42 {offsets = [0, 0], sizes = [16, 128], strides = [1, 1]} : vector<16x384xf32> to vector<16x128xf32>
    %cst_36 = arith.constant 2.500000e-01 : f32
    %44 = vector.broadcast %cst_36 : f32 to vector<16x128xf32>
    %45 = arith.mulf %43, %44 : vector<16x128xf32>
    %46 = vector.extract_strided_slice %42 {offsets = [0, 128], sizes = [16, 128], strides = [1, 1]} : vector<16x384xf32> to vector<16x128xf32>
    %47 = vector.extract_strided_slice %42 {offsets = [0, 256], sizes = [16, 128], strides = [1, 1]} : vector<16x384xf32> to vector<16x128xf32>
    %c0_37 = arith.constant 0 : index
    %c0_38 = arith.constant 0 : index
    %c0_39 = arith.constant 0 : index
    %48 = vector.load %arg11[%c0_37, %c0_38, %c0_39] : memref<2x128x128xbf16, #tpu.memory_space<vmem>>, vector<1x128x128xbf16>
    %49 = vector.shape_cast %48 : vector<1x128x128xbf16> to vector<128x128xbf16>
    %c0_40 = arith.constant 0 : index
    %c0_41 = arith.constant 0 : index
    %c0_42 = arith.constant 0 : index
    %50 = vector.load %arg12[%c0_40, %c0_41, %c0_42] : memref<2x1x128xf32, #tpu.memory_space<vmem>>, vector<1x1x128xf32>
    %51 = vector.shape_cast %50 : vector<1x1x128xf32> to vector<1x128xf32>
    %52 = vector.shape_cast %45 : vector<16x128xf32> to vector<2x8x128xf32>
    %53 = arith.truncf %52 : vector<2x8x128xf32> to vector<2x8x128xbf16>
    %54 = vector.shape_cast %46 : vector<16x128xf32> to vector<2x8x128xf32>
    %55 = arith.truncf %54 : vector<2x8x128xf32> to vector<2x8x128xbf16>
    %56 = vector.shape_cast %47 : vector<16x128xf32> to vector<2x8x128xf32>
    %57 = arith.truncf %56 : vector<2x8x128xf32> to vector<2x8x128xbf16>
    %58 = vector.extract_strided_slice %53 {offsets = [0, 0, 0], sizes = [2, 8, 16], strides = [1, 1, 1]} : vector<2x8x128xbf16> to vector<2x8x16xbf16>
    %59 = vector.extract_strided_slice %55 {offsets = [0, 0, 0], sizes = [2, 8, 16], strides = [1, 1, 1]} : vector<2x8x128xbf16> to vector<2x8x16xbf16>
    "tpu.trace_start"() <{level = 10 : i32, message = "bqd,bkd->bqk"}> : () -> ()
    %cst_43 = arith.constant dense<0.000000e+00> : vector<2x8x8xf32>
    %60 = tpu.matmul %58, %59, %cst_43 {dimension_numbers = #tpu.dot_dimension_numbers<[2], [2], [1], [1], [0, 0, 0, 1, 1, 1], [0], [0]>} : vector<2x8x16xbf16>, vector<2x8x16xbf16>, vector<2x8x8xf32> -> vector<2x8x8xf32>
    "tpu.trace_stop"() : () -> ()
    %61 = arith.addf %60, %27 : vector<2x8x8xf32>
    %cst_44 = arith.constant dense<0xFF800000> : vector<2x8xf32>
    %62 = vector.multi_reduction <maximumf>, %61, %cst_44 [2] : vector<2x8x8xf32> to vector<2x8xf32>
    %63 = vector.shape_cast %62 : vector<2x8xf32> to vector<2x8x1xf32>
    %64 = vector.broadcast %63 : vector<2x8x1xf32> to vector<2x8x8xf32>
    %65 = arith.subf %61, %64 : vector<2x8x8xf32>
    %66 = math.exp %65 : vector<2x8x8xf32>
    %cst_45 = arith.constant dense<0.000000e+00> : vector<2x8xf32>
    %67 = vector.multi_reduction <add>, %66, %cst_45 [2] : vector<2x8x8xf32> to vector<2x8xf32>
    %68 = vector.shape_cast %67 : vector<2x8xf32> to vector<2x8x1xf32>
    %69 = tpu.reciprocal %68 {approx = true} : vector<2x8x1xf32> -> vector<2x8x1xf32>
    %70 = vector.broadcast %69 : vector<2x8x1xf32> to vector<2x8x8xf32>
    %71 = arith.mulf %66, %70 : vector<2x8x8xf32>
    %72 = arith.truncf %71 : vector<2x8x8xf32> to vector<2x8x8xbf16>
    %73 = vector.extract_strided_slice %57 {offsets = [0, 0, 0], sizes = [2, 8, 16], strides = [1, 1, 1]} : vector<2x8x128xbf16> to vector<2x8x16xbf16>
    "tpu.trace_start"() <{level = 10 : i32, message = "bqk,bkd->bqd"}> : () -> ()
    %cst_46 = arith.constant dense<0.000000e+00> : vector<2x8x16xf32>
    %74 = tpu.matmul %72, %73, %cst_46 {dimension_numbers = #tpu.dot_dimension_numbers<[2], [1], [1], [2], [0, 0, 0, 1, 1, 2], [0], [0]>} : vector<2x8x8xbf16>, vector<2x8x16xbf16>, vector<2x8x16xf32> -> vector<2x8x16xf32>
    "tpu.trace_stop"() : () -> ()
    %75 = vector.extract_strided_slice %53 {offsets = [0, 0, 16], sizes = [2, 8, 16], strides = [1, 1, 1]} : vector<2x8x128xbf16> to vector<2x8x16xbf16>
    %76 = vector.extract_strided_slice %55 {offsets = [0, 0, 16], sizes = [2, 8, 16], strides = [1, 1, 1]} : vector<2x8x128xbf16> to vector<2x8x16xbf16>
    "tpu.trace_start"() <{level = 10 : i32, message = "bqd,bkd->bqk"}> : () -> ()
    %cst_47 = arith.constant dense<0.000000e+00> : vector<2x8x8xf32>
    %77 = tpu.matmul %75, %76, %cst_47 {dimension_numbers = #tpu.dot_dimension_numbers<[2], [2], [1], [1], [0, 0, 0, 1, 1, 1], [0], [0]>} : vector<2x8x16xbf16>, vector<2x8x16xbf16>, vector<2x8x8xf32> -> vector<2x8x8xf32>
    "tpu.trace_stop"() : () -> ()
    %78 = arith.addf %77, %27 : vector<2x8x8xf32>
    %cst_48 = arith.constant dense<0xFF800000> : vector<2x8xf32>
    %79 = vector.multi_reduction <maximumf>, %78, %cst_48 [2] : vector<2x8x8xf32> to vector<2x8xf32>
    %80 = vector.shape_cast %79 : vector<2x8xf32> to vector<2x8x1xf32>
    %81 = vector.broadcast %80 : vector<2x8x1xf32> to vector<2x8x8xf32>
    %82 = arith.subf %78, %81 : vector<2x8x8xf32>
    %83 = math.exp %82 : vector<2x8x8xf32>
    %cst_49 = arith.constant dense<0.000000e+00> : vector<2x8xf32>
    %84 = vector.multi_reduction <add>, %83, %cst_49 [2] : vector<2x8x8xf32> to vector<2x8xf32>
    %85 = vector.shape_cast %84 : vector<2x8xf32> to vector<2x8x1xf32>
    %86 = tpu.reciprocal %85 {approx = true} : vector<2x8x1xf32> -> vector<2x8x1xf32>
    %87 = vector.broadcast %86 : vector<2x8x1xf32> to vector<2x8x8xf32>
    %88 = arith.mulf %83, %87 : vector<2x8x8xf32>
    %89 = arith.truncf %88 : vector<2x8x8xf32> to vector<2x8x8xbf16>
    %90 = vector.extract_strided_slice %57 {offsets = [0, 0, 16], sizes = [2, 8, 16], strides = [1, 1, 1]} : vector<2x8x128xbf16> to vector<2x8x16xbf16>
    "tpu.trace_start"() <{level = 10 : i32, message = "bqk,bkd->bqd"}> : () -> ()
    %cst_50 = arith.constant dense<0.000000e+00> : vector<2x8x16xf32>
    %91 = tpu.matmul %89, %90, %cst_50 {dimension_numbers = #tpu.dot_dimension_numbers<[2], [1], [1], [2], [0, 0, 0, 1, 1, 2], [0], [0]>} : vector<2x8x8xbf16>, vector<2x8x16xbf16>, vector<2x8x16xf32> -> vector<2x8x16xf32>
    "tpu.trace_stop"() : () -> ()
    %92 = vector.extract_strided_slice %53 {offsets = [0, 0, 32], sizes = [2, 8, 16], strides = [1, 1, 1]} : vector<2x8x128xbf16> to vector<2x8x16xbf16>
    %93 = vector.extract_strided_slice %55 {offsets = [0, 0, 32], sizes = [2, 8, 16], strides = [1, 1, 1]} : vector<2x8x128xbf16> to vector<2x8x16xbf16>
    "tpu.trace_start"() <{level = 10 : i32, message = "bqd,bkd->bqk"}> : () -> ()
    %cst_51 = arith.constant dense<0.000000e+00> : vector<2x8x8xf32>
    %94 = tpu.matmul %92, %93, %cst_51 {dimension_numbers = #tpu.dot_dimension_numbers<[2], [2], [1], [1], [0, 0, 0, 1, 1, 1], [0], [0]>} : vector<2x8x16xbf16>, vector<2x8x16xbf16>, vector<2x8x8xf32> -> vector<2x8x8xf32>
    "tpu.trace_stop"() : () -> ()
    %95 = arith.addf %94, %27 : vector<2x8x8xf32>
    %cst_52 = arith.constant dense<0xFF800000> : vector<2x8xf32>
    %96 = vector.multi_reduction <maximumf>, %95, %cst_52 [2] : vector<2x8x8xf32> to vector<2x8xf32>
    %97 = vector.shape_cast %96 : vector<2x8xf32> to vector<2x8x1xf32>
    %98 = vector.broadcast %97 : vector<2x8x1xf32> to vector<2x8x8xf32>
    %99 = arith.subf %95, %98 : vector<2x8x8xf32>
    %100 = math.exp %99 : vector<2x8x8xf32>
    %cst_53 = arith.constant dense<0.000000e+00> : vector<2x8xf32>
    %101 = vector.multi_reduction <add>, %100, %cst_53 [2] : vector<2x8x8xf32> to vector<2x8xf32>
    %102 = vector.shape_cast %101 : vector<2x8xf32> to vector<2x8x1xf32>
    %103 = tpu.reciprocal %102 {approx = true} : vector<2x8x1xf32> -> vector<2x8x1xf32>
    %104 = vector.broadcast %103 : vector<2x8x1xf32> to vector<2x8x8xf32>
    %105 = arith.mulf %100, %104 : vector<2x8x8xf32>
    %106 = arith.truncf %105 : vector<2x8x8xf32> to vector<2x8x8xbf16>
    %107 = vector.extract_strided_slice %57 {offsets = [0, 0, 32], sizes = [2, 8, 16], strides = [1, 1, 1]} : vector<2x8x128xbf16> to vector<2x8x16xbf16>
    "tpu.trace_start"() <{level = 10 : i32, message = "bqk,bkd->bqd"}> : () -> ()
    %cst_54 = arith.constant dense<0.000000e+00> : vector<2x8x16xf32>
    %108 = tpu.matmul %106, %107, %cst_54 {dimension_numbers = #tpu.dot_dimension_numbers<[2], [1], [1], [2], [0, 0, 0, 1, 1, 2], [0], [0]>} : vector<2x8x8xbf16>, vector<2x8x16xbf16>, vector<2x8x16xf32> -> vector<2x8x16xf32>
    "tpu.trace_stop"() : () -> ()
    %109 = vector.extract_strided_slice %53 {offsets = [0, 0, 48], sizes = [2, 8, 16], strides = [1, 1, 1]} : vector<2x8x128xbf16> to vector<2x8x16xbf16>
    %110 = vector.extract_strided_slice %55 {offsets = [0, 0, 48], sizes = [2, 8, 16], strides = [1, 1, 1]} : vector<2x8x128xbf16> to vector<2x8x16xbf16>
    "tpu.trace_start"() <{level = 10 : i32, message = "bqd,bkd->bqk"}> : () -> ()
    %cst_55 = arith.constant dense<0.000000e+00> : vector<2x8x8xf32>
    %111 = tpu.matmul %109, %110, %cst_55 {dimension_numbers = #tpu.dot_dimension_numbers<[2], [2], [1], [1], [0, 0, 0, 1, 1, 1], [0], [0]>} : vector<2x8x16xbf16>, vector<2x8x16xbf16>, vector<2x8x8xf32> -> vector<2x8x8xf32>
    "tpu.trace_stop"() : () -> ()
    %112 = arith.addf %111, %27 : vector<2x8x8xf32>
    %cst_56 = arith.constant dense<0xFF800000> : vector<2x8xf32>
    %113 = vector.multi_reduction <maximumf>, %112, %cst_56 [2] : vector<2x8x8xf32> to vector<2x8xf32>
    %114 = vector.shape_cast %113 : vector<2x8xf32> to vector<2x8x1xf32>
    %115 = vector.broadcast %114 : vector<2x8x1xf32> to vector<2x8x8xf32>
    %116 = arith.subf %112, %115 : vector<2x8x8xf32>
    %117 = math.exp %116 : vector<2x8x8xf32>
    %cst_57 = arith.constant dense<0.000000e+00> : vector<2x8xf32>
    %118 = vector.multi_reduction <add>, %117, %cst_57 [2] : vector<2x8x8xf32> to vector<2x8xf32>
    %119 = vector.shape_cast %118 : vector<2x8xf32> to vector<2x8x1xf32>
    %120 = tpu.reciprocal %119 {approx = true} : vector<2x8x1xf32> -> vector<2x8x1xf32>
    %121 = vector.broadcast %120 : vector<2x8x1xf32> to vector<2x8x8xf32>
    %122 = arith.mulf %117, %121 : vector<2x8x8xf32>
    %123 = arith.truncf %122 : vector<2x8x8xf32> to vector<2x8x8xbf16>
    %124 = vector.extract_strided_slice %57 {offsets = [0, 0, 48], sizes = [2, 8, 16], strides = [1, 1, 1]} : vector<2x8x128xbf16> to vector<2x8x16xbf16>
    "tpu.trace_start"() <{level = 10 : i32, message = "bqk,bkd->bqd"}> : () -> ()
    %cst_58 = arith.constant dense<0.000000e+00> : vector<2x8x16xf32>
    %125 = tpu.matmul %123, %124, %cst_58 {dimension_numbers = #tpu.dot_dimension_numbers<[2], [1], [1], [2], [0, 0, 0, 1, 1, 2], [0], [0]>} : vector<2x8x8xbf16>, vector<2x8x16xbf16>, vector<2x8x16xf32> -> vector<2x8x16xf32>
    "tpu.trace_stop"() : () -> ()
    %126 = vector.extract_strided_slice %53 {offsets = [0, 0, 64], sizes = [2, 8, 16], strides = [1, 1, 1]} : vector<2x8x128xbf16> to vector<2x8x16xbf16>
    %127 = vector.extract_strided_slice %55 {offsets = [0, 0, 64], sizes = [2, 8, 16], strides = [1, 1, 1]} : vector<2x8x128xbf16> to vector<2x8x16xbf16>
    "tpu.trace_start"() <{level = 10 : i32, message = "bqd,bkd->bqk"}> : () -> ()
    %cst_59 = arith.constant dense<0.000000e+00> : vector<2x8x8xf32>
    %128 = tpu.matmul %126, %127, %cst_59 {dimension_numbers = #tpu.dot_dimension_numbers<[2], [2], [1], [1], [0, 0, 0, 1, 1, 1], [0], [0]>} : vector<2x8x16xbf16>, vector<2x8x16xbf16>, vector<2x8x8xf32> -> vector<2x8x8xf32>
    "tpu.trace_stop"() : () -> ()
    %129 = arith.addf %128, %27 : vector<2x8x8xf32>
    %cst_60 = arith.constant dense<0xFF800000> : vector<2x8xf32>
    %130 = vector.multi_reduction <maximumf>, %129, %cst_60 [2] : vector<2x8x8xf32> to vector<2x8xf32>
    %131 = vector.shape_cast %130 : vector<2x8xf32> to vector<2x8x1xf32>
    %132 = vector.broadcast %131 : vector<2x8x1xf32> to vector<2x8x8xf32>
    %133 = arith.subf %129, %132 : vector<2x8x8xf32>
    %134 = math.exp %133 : vector<2x8x8xf32>
    %cst_61 = arith.constant dense<0.000000e+00> : vector<2x8xf32>
    %135 = vector.multi_reduction <add>, %134, %cst_61 [2] : vector<2x8x8xf32> to vector<2x8xf32>
    %136 = vector.shape_cast %135 : vector<2x8xf32> to vector<2x8x1xf32>
    %137 = tpu.reciprocal %136 {approx = true} : vector<2x8x1xf32> -> vector<2x8x1xf32>
    %138 = vector.broadcast %137 : vector<2x8x1xf32> to vector<2x8x8xf32>
    %139 = arith.mulf %134, %138 : vector<2x8x8xf32>
    %140 = arith.truncf %139 : vector<2x8x8xf32> to vector<2x8x8xbf16>
    %141 = vector.extract_strided_slice %57 {offsets = [0, 0, 64], sizes = [2, 8, 16], strides = [1, 1, 1]} : vector<2x8x128xbf16> to vector<2x8x16xbf16>
    "tpu.trace_start"() <{level = 10 : i32, message = "bqk,bkd->bqd"}> : () -> ()
    %cst_62 = arith.constant dense<0.000000e+00> : vector<2x8x16xf32>
    %142 = tpu.matmul %140, %141, %cst_62 {dimension_numbers = #tpu.dot_dimension_numbers<[2], [1], [1], [2], [0, 0, 0, 1, 1, 2], [0], [0]>} : vector<2x8x8xbf16>, vector<2x8x16xbf16>, vector<2x8x16xf32> -> vector<2x8x16xf32>
    "tpu.trace_stop"() : () -> ()
    %143 = vector.extract_strided_slice %53 {offsets = [0, 0, 80], sizes = [2, 8, 16], strides = [1, 1, 1]} : vector<2x8x128xbf16> to vector<2x8x16xbf16>
    %144 = vector.extract_strided_slice %55 {offsets = [0, 0, 80], sizes = [2, 8, 16], strides = [1, 1, 1]} : vector<2x8x128xbf16> to vector<2x8x16xbf16>
    "tpu.trace_start"() <{level = 10 : i32, message = "bqd,bkd->bqk"}> : () -> ()
    %cst_63 = arith.constant dense<0.000000e+00> : vector<2x8x8xf32>
    %145 = tpu.matmul %143, %144, %cst_63 {dimension_numbers = #tpu.dot_dimension_numbers<[2], [2], [1], [1], [0, 0, 0, 1, 1, 1], [0], [0]>} : vector<2x8x16xbf16>, vector<2x8x16xbf16>, vector<2x8x8xf32> -> vector<2x8x8xf32>
    "tpu.trace_stop"() : () -> ()
    %146 = arith.addf %145, %27 : vector<2x8x8xf32>
    %cst_64 = arith.constant dense<0xFF800000> : vector<2x8xf32>
    %147 = vector.multi_reduction <maximumf>, %146, %cst_64 [2] : vector<2x8x8xf32> to vector<2x8xf32>
    %148 = vector.shape_cast %147 : vector<2x8xf32> to vector<2x8x1xf32>
    %149 = vector.broadcast %148 : vector<2x8x1xf32> to vector<2x8x8xf32>
    %150 = arith.subf %146, %149 : vector<2x8x8xf32>
    %151 = math.exp %150 : vector<2x8x8xf32>
    %cst_65 = arith.constant dense<0.000000e+00> : vector<2x8xf32>
    %152 = vector.multi_reduction <add>, %151, %cst_65 [2] : vector<2x8x8xf32> to vector<2x8xf32>
    %153 = vector.shape_cast %152 : vector<2x8xf32> to vector<2x8x1xf32>
    %154 = tpu.reciprocal %153 {approx = true} : vector<2x8x1xf32> -> vector<2x8x1xf32>
    %155 = vector.broadcast %154 : vector<2x8x1xf32> to vector<2x8x8xf32>
    %156 = arith.mulf %151, %155 : vector<2x8x8xf32>
    %157 = arith.truncf %156 : vector<2x8x8xf32> to vector<2x8x8xbf16>
    %158 = vector.extract_strided_slice %57 {offsets = [0, 0, 80], sizes = [2, 8, 16], strides = [1, 1, 1]} : vector<2x8x128xbf16> to vector<2x8x16xbf16>
    "tpu.trace_start"() <{level = 10 : i32, message = "bqk,bkd->bqd"}> : () -> ()
    %cst_66 = arith.constant dense<0.000000e+00> : vector<2x8x16xf32>
    %159 = tpu.matmul %157, %158, %cst_66 {dimension_numbers = #tpu.dot_dimension_numbers<[2], [1], [1], [2], [0, 0, 0, 1, 1, 2], [0], [0]>} : vector<2x8x8xbf16>, vector<2x8x16xbf16>, vector<2x8x16xf32> -> vector<2x8x16xf32>
    "tpu.trace_stop"() : () -> ()
    %160 = vector.extract_strided_slice %53 {offsets = [0, 0, 96], sizes = [2, 8, 16], strides = [1, 1, 1]} : vector<2x8x128xbf16> to vector<2x8x16xbf16>
    %161 = vector.extract_strided_slice %55 {offsets = [0, 0, 96], sizes = [2, 8, 16], strides = [1, 1, 1]} : vector<2x8x128xbf16> to vector<2x8x16xbf16>
    "tpu.trace_start"() <{level = 10 : i32, message = "bqd,bkd->bqk"}> : () -> ()
    %cst_67 = arith.constant dense<0.000000e+00> : vector<2x8x8xf32>
    %162 = tpu.matmul %160, %161, %cst_67 {dimension_numbers = #tpu.dot_dimension_numbers<[2], [2], [1], [1], [0, 0, 0, 1, 1, 1], [0], [0]>} : vector<2x8x16xbf16>, vector<2x8x16xbf16>, vector<2x8x8xf32> -> vector<2x8x8xf32>
    "tpu.trace_stop"() : () -> ()
    %163 = arith.addf %162, %27 : vector<2x8x8xf32>
    %cst_68 = arith.constant dense<0xFF800000> : vector<2x8xf32>
    %164 = vector.multi_reduction <maximumf>, %163, %cst_68 [2] : vector<2x8x8xf32> to vector<2x8xf32>
    %165 = vector.shape_cast %164 : vector<2x8xf32> to vector<2x8x1xf32>
    %166 = vector.broadcast %165 : vector<2x8x1xf32> to vector<2x8x8xf32>
    %167 = arith.subf %163, %166 : vector<2x8x8xf32>
    %168 = math.exp %167 : vector<2x8x8xf32>
    %cst_69 = arith.constant dense<0.000000e+00> : vector<2x8xf32>
    %169 = vector.multi_reduction <add>, %168, %cst_69 [2] : vector<2x8x8xf32> to vector<2x8xf32>
    %170 = vector.shape_cast %169 : vector<2x8xf32> to vector<2x8x1xf32>
    %171 = tpu.reciprocal %170 {approx = true} : vector<2x8x1xf32> -> vector<2x8x1xf32>
    %172 = vector.broadcast %171 : vector<2x8x1xf32> to vector<2x8x8xf32>
    %173 = arith.mulf %168, %172 : vector<2x8x8xf32>
    %174 = arith.truncf %173 : vector<2x8x8xf32> to vector<2x8x8xbf16>
    %175 = vector.extract_strided_slice %57 {offsets = [0, 0, 96], sizes = [2, 8, 16], strides = [1, 1, 1]} : vector<2x8x128xbf16> to vector<2x8x16xbf16>
    "tpu.trace_start"() <{level = 10 : i32, message = "bqk,bkd->bqd"}> : () -> ()
    %cst_70 = arith.constant dense<0.000000e+00> : vector<2x8x16xf32>
    %176 = tpu.matmul %174, %175, %cst_70 {dimension_numbers = #tpu.dot_dimension_numbers<[2], [1], [1], [2], [0, 0, 0, 1, 1, 2], [0], [0]>} : vector<2x8x8xbf16>, vector<2x8x16xbf16>, vector<2x8x16xf32> -> vector<2x8x16xf32>
    "tpu.trace_stop"() : () -> ()
    %177 = vector.extract_strided_slice %53 {offsets = [0, 0, 112], sizes = [2, 8, 16], strides = [1, 1, 1]} : vector<2x8x128xbf16> to vector<2x8x16xbf16>
    %178 = vector.extract_strided_slice %55 {offsets = [0, 0, 112], sizes = [2, 8, 16], strides = [1, 1, 1]} : vector<2x8x128xbf16> to vector<2x8x16xbf16>
    "tpu.trace_start"() <{level = 10 : i32, message = "bqd,bkd->bqk"}> : () -> ()
    %cst_71 = arith.constant dense<0.000000e+00> : vector<2x8x8xf32>
    %179 = tpu.matmul %177, %178, %cst_71 {dimension_numbers = #tpu.dot_dimension_numbers<[2], [2], [1], [1], [0, 0, 0, 1, 1, 1], [0], [0]>} : vector<2x8x16xbf16>, vector<2x8x16xbf16>, vector<2x8x8xf32> -> vector<2x8x8xf32>
    "tpu.trace_stop"() : () -> ()
    %180 = arith.addf %179, %27 : vector<2x8x8xf32>
    %cst_72 = arith.constant dense<0xFF800000> : vector<2x8xf32>
    %181 = vector.multi_reduction <maximumf>, %180, %cst_72 [2] : vector<2x8x8xf32> to vector<2x8xf32>
    %182 = vector.shape_cast %181 : vector<2x8xf32> to vector<2x8x1xf32>
    %183 = vector.broadcast %182 : vector<2x8x1xf32> to vector<2x8x8xf32>
    %184 = arith.subf %180, %183 : vector<2x8x8xf32>
    %185 = math.exp %184 : vector<2x8x8xf32>
    %cst_73 = arith.constant dense<0.000000e+00> : vector<2x8xf32>
    %186 = vector.multi_reduction <add>, %185, %cst_73 [2] : vector<2x8x8xf32> to vector<2x8xf32>
    %187 = vector.shape_cast %186 : vector<2x8xf32> to vector<2x8x1xf32>
    %188 = tpu.reciprocal %187 {approx = true} : vector<2x8x1xf32> -> vector<2x8x1xf32>
    %189 = vector.broadcast %188 : vector<2x8x1xf32> to vector<2x8x8xf32>
    %190 = arith.mulf %185, %189 : vector<2x8x8xf32>
    %191 = arith.truncf %190 : vector<2x8x8xf32> to vector<2x8x8xbf16>
    %192 = vector.extract_strided_slice %57 {offsets = [0, 0, 112], sizes = [2, 8, 16], strides = [1, 1, 1]} : vector<2x8x128xbf16> to vector<2x8x16xbf16>
    "tpu.trace_start"() <{level = 10 : i32, message = "bqk,bkd->bqd"}> : () -> ()
    %cst_74 = arith.constant dense<0.000000e+00> : vector<2x8x16xf32>
    %193 = tpu.matmul %191, %192, %cst_74 {dimension_numbers = #tpu.dot_dimension_numbers<[2], [1], [1], [2], [0, 0, 0, 1, 1, 2], [0], [0]>} : vector<2x8x8xbf16>, vector<2x8x16xbf16>, vector<2x8x16xf32> -> vector<2x8x16xf32>
    "tpu.trace_stop"() : () -> ()
    %194 = tpu.concatenate %74, %91, %108, %125, %142, %159, %176, %193 in 2 : vector<2x8x16xf32>, vector<2x8x16xf32>, vector<2x8x16xf32>, vector<2x8x16xf32>, vector<2x8x16xf32>, vector<2x8x16xf32>, vector<2x8x16xf32>, vector<2x8x16xf32> -> vector<2x8x128xf32>
    %195 = vector.shape_cast %194 : vector<2x8x128xf32> to vector<16x128xf32>
    %196 = arith.truncf %195 : vector<16x128xf32> to vector<16x128xbf16>
    %cst_75 = arith.constant dense<0.000000e+00> : vector<16x128xf32>
    %197 = tpu.matmul %196, %49, %cst_75 {dimension_numbers = #tpu.dot_dimension_numbers<[1], [0], [0], [1], [0, 0, 1, 1], [], []>} : vector<16x128xbf16>, vector<128x128xbf16>, vector<16x128xf32> -> vector<16x128xf32>
    %198 = vector.broadcast %51 : vector<1x128xf32> to vector<16x128xf32>
    %199 = arith.addf %197, %198 : vector<16x128xf32>
    %200 = arith.addf %20, %199 : vector<16x128xf32>
    %201 = vector.extract_strided_slice %32 {offsets = [0, 0], sizes = [1, 128], strides = [1, 1]} : vector<3x128xf32> to vector<1x128xf32>
    %202 = vector.extract_strided_slice %34 {offsets = [0, 0], sizes = [1, 128], strides = [1, 1]} : vector<3x128xf32> to vector<1x128xf32>
    %cst_76 = arith.constant dense<0.000000e+00> : vector<16xf32>
    %203 = vector.multi_reduction <add>, %200, %cst_76 [1] : vector<16x128xf32> to vector<16xf32>
    %204 = vector.shape_cast %203 : vector<16xf32> to vector<16x1xf32>
    %cst_77 = arith.constant 1.280000e+02 : f32
    %205 = vector.broadcast %cst_77 : f32 to vector<16x1xf32>
    %206 = arith.divf %204, %205 : vector<16x1xf32>
    %207 = vector.broadcast %206 : vector<16x1xf32> to vector<16x128xf32>
    %208 = arith.subf %200, %207 : vector<16x128xf32>
    %209 = arith.mulf %208, %208 : vector<16x128xf32>
    %cst_78 = arith.constant dense<0.000000e+00> : vector<16xf32>
    %210 = vector.multi_reduction <add>, %209, %cst_78 [1] : vector<16x128xf32> to vector<16xf32>
    %211 = vector.shape_cast %210 : vector<16xf32> to vector<16x1xf32>
    %cst_79 = arith.constant 1.280000e+02 : f32
    %212 = vector.broadcast %cst_79 : f32 to vector<16x1xf32>
    %213 = arith.divf %211, %212 : vector<16x1xf32>
    %214 = vector.broadcast %206 : vector<16x1xf32> to vector<16x128xf32>
    %215 = arith.subf %200, %214 : vector<16x128xf32>
    %cst_80 = arith.constant 9.99999974E-6 : f32
    %216 = vector.broadcast %cst_80 : f32 to vector<16x1xf32>
    %217 = arith.addf %213, %216 : vector<16x1xf32>
    %218 = math.rsqrt %217 : vector<16x1xf32>
    %219 = vector.broadcast %218 : vector<16x1xf32> to vector<16x128xf32>
    %220 = arith.mulf %215, %219 : vector<16x128xf32>
    %221 = vector.broadcast %201 : vector<1x128xf32> to vector<16x128xf32>
    %222 = arith.mulf %220, %221 : vector<16x128xf32>
    %223 = vector.broadcast %202 : vector<1x128xf32> to vector<16x128xf32>
    %224 = arith.addf %222, %223 : vector<16x128xf32>
    %225 = arith.truncf %224 : vector<16x128xf32> to vector<16x128xbf16>
    %c0_81 = arith.constant 0 : index
    %c0_82 = arith.constant 0 : index
    %c0_83 = arith.constant 0 : index
    %226 = vector.load %arg13[%c0_81, %c0_82, %c0_83] : memref<2x128x128xbf16, #tpu.memory_space<vmem>>, vector<1x128x128xbf16>
    %227 = vector.shape_cast %226 : vector<1x128x128xbf16> to vector<128x128xbf16>
    %cst_84 = arith.constant dense<0.000000e+00> : vector<16x128xf32>
    %228 = tpu.matmul %225, %227, %cst_84 {dimension_numbers = #tpu.dot_dimension_numbers<[1], [0], [0], [1], [0, 0, 1, 1], [], []>} : vector<16x128xbf16>, vector<128x128xbf16>, vector<16x128xf32> -> vector<16x128xf32>
    %c0_85 = arith.constant 0 : index
    %c0_86 = arith.constant 0 : index
    %c0_87 = arith.constant 0 : index
    %229 = vector.load %arg14[%c0_85, %c0_86, %c0_87] : memref<2x1x128xf32, #tpu.memory_space<vmem>>, vector<1x1x128xf32>
    %230 = vector.shape_cast %229 : vector<1x1x128xf32> to vector<1x128xf32>
    %231 = vector.broadcast %230 : vector<1x128xf32> to vector<16x128xf32>
    %232 = arith.addf %228, %231 : vector<16x128xf32>
    %cst_88 = arith.constant 2.500000e-01 : f32
    %233 = vector.broadcast %cst_88 : f32 to vector<16x128xf32>
    %234 = arith.mulf %232, %233 : vector<16x128xf32>
    %c0_89 = arith.constant 0 : index
    %c0_90 = arith.constant 0 : index
    %c0_91 = arith.constant 0 : index
    %235 = vector.load %arg15[%c0_89, %c0_90, %c0_91] : memref<2x128x256xbf16, #tpu.memory_space<vmem>>, vector<1x128x256xbf16>
    %236 = vector.shape_cast %235 : vector<1x128x256xbf16> to vector<128x256xbf16>
    %cst_92 = arith.constant dense<0.000000e+00> : vector<16x256xf32>
    %237 = tpu.matmul %30, %236, %cst_92 {dimension_numbers = #tpu.dot_dimension_numbers<[1], [0], [0], [1], [0, 0, 1, 1], [], []>} : vector<16x128xbf16>, vector<128x256xbf16>, vector<16x256xf32> -> vector<16x256xf32>
    %c0_93 = arith.constant 0 : index
    %c0_94 = arith.constant 0 : index
    %c0_95 = arith.constant 0 : index
    %238 = vector.load %arg16[%c0_93, %c0_94, %c0_95] : memref<2x1x256xf32, #tpu.memory_space<vmem>>, vector<1x1x256xf32>
    %239 = vector.shape_cast %238 : vector<1x1x256xf32> to vector<1x256xf32>
    %240 = vector.broadcast %239 : vector<1x256xf32> to vector<16x256xf32>
    %241 = arith.addf %237, %240 : vector<16x256xf32>
    %242 = vector.extract_strided_slice %241 {offsets = [0, 0], sizes = [16, 128], strides = [1, 1]} : vector<16x256xf32> to vector<16x128xf32>
    %243 = vector.extract_strided_slice %241 {offsets = [0, 128], sizes = [16, 128], strides = [1, 1]} : vector<16x256xf32> to vector<16x128xf32>
    %c0_96 = arith.constant 0 : index
    %c0_97 = arith.constant 0 : index
    %c0_98 = arith.constant 0 : index
    %244 = vector.load %arg17[%c0_96, %c0_97, %c0_98] : memref<2x128x128xbf16, #tpu.memory_space<vmem>>, vector<1x128x128xbf16>
    %245 = vector.shape_cast %244 : vector<1x128x128xbf16> to vector<128x128xbf16>
    %c0_99 = arith.constant 0 : index
    %c0_100 = arith.constant 0 : index
    %c0_101 = arith.constant 0 : index
    %246 = vector.load %arg18[%c0_99, %c0_100, %c0_101] : memref<2x1x128xf32, #tpu.memory_space<vmem>>, vector<1x1x128xf32>
    %247 = vector.shape_cast %246 : vector<1x1x128xf32> to vector<1x128xf32>
    %248 = vector.shape_cast %234 : vector<16x128xf32> to vector<2x8x128xf32>
    %249 = arith.truncf %248 : vector<2x8x128xf32> to vector<2x8x128xbf16>
    %250 = vector.shape_cast %242 : vector<16x128xf32> to vector<2x8x128xf32>
    %251 = arith.truncf %250 : vector<2x8x128xf32> to vector<2x8x128xbf16>
    %252 = vector.shape_cast %243 : vector<16x128xf32> to vector<2x8x128xf32>
    %253 = arith.truncf %252 : vector<2x8x128xf32> to vector<2x8x128xbf16>
    %254 = vector.extract_strided_slice %249 {offsets = [0, 0, 0], sizes = [2, 8, 16], strides = [1, 1, 1]} : vector<2x8x128xbf16> to vector<2x8x16xbf16>
    %255 = vector.extract_strided_slice %251 {offsets = [0, 0, 0], sizes = [2, 8, 16], strides = [1, 1, 1]} : vector<2x8x128xbf16> to vector<2x8x16xbf16>
    "tpu.trace_start"() <{level = 10 : i32, message = "bqd,bkd->bqk"}> : () -> ()
    %cst_102 = arith.constant dense<0.000000e+00> : vector<2x8x8xf32>
    %256 = tpu.matmul %254, %255, %cst_102 {dimension_numbers = #tpu.dot_dimension_numbers<[2], [2], [1], [1], [0, 0, 0, 1, 1, 1], [0], [0]>} : vector<2x8x16xbf16>, vector<2x8x16xbf16>, vector<2x8x8xf32> -> vector<2x8x8xf32>
    "tpu.trace_stop"() : () -> ()
    %257 = vector.broadcast %29 : vector<2x1x8xf32> to vector<2x8x8xf32>
    %258 = arith.addf %256, %257 : vector<2x8x8xf32>
    %cst_103 = arith.constant dense<0xFF800000> : vector<2x8xf32>
    %259 = vector.multi_reduction <maximumf>, %258, %cst_103 [2] : vector<2x8x8xf32> to vector<2x8xf32>
    %260 = vector.shape_cast %259 : vector<2x8xf32> to vector<2x8x1xf32>
    %261 = vector.broadcast %260 : vector<2x8x1xf32> to vector<2x8x8xf32>
    %262 = arith.subf %258, %261 : vector<2x8x8xf32>
    %263 = math.exp %262 : vector<2x8x8xf32>
    %cst_104 = arith.constant dense<0.000000e+00> : vector<2x8xf32>
    %264 = vector.multi_reduction <add>, %263, %cst_104 [2] : vector<2x8x8xf32> to vector<2x8xf32>
    %265 = vector.shape_cast %264 : vector<2x8xf32> to vector<2x8x1xf32>
    %266 = tpu.reciprocal %265 {approx = true} : vector<2x8x1xf32> -> vector<2x8x1xf32>
    %267 = vector.broadcast %266 : vector<2x8x1xf32> to vector<2x8x8xf32>
    %268 = arith.mulf %263, %267 : vector<2x8x8xf32>
    %269 = arith.truncf %268 : vector<2x8x8xf32> to vector<2x8x8xbf16>
    %270 = vector.extract_strided_slice %253 {offsets = [0, 0, 0], sizes = [2, 8, 16], strides = [1, 1, 1]} : vector<2x8x128xbf16> to vector<2x8x16xbf16>
    "tpu.trace_start"() <{level = 10 : i32, message = "bqk,bkd->bqd"}> : () -> ()
    %cst_105 = arith.constant dense<0.000000e+00> : vector<2x8x16xf32>
    %271 = tpu.matmul %269, %270, %cst_105 {dimension_numbers = #tpu.dot_dimension_numbers<[2], [1], [1], [2], [0, 0, 0, 1, 1, 2], [0], [0]>} : vector<2x8x8xbf16>, vector<2x8x16xbf16>, vector<2x8x16xf32> -> vector<2x8x16xf32>
    "tpu.trace_stop"() : () -> ()
    %272 = vector.extract_strided_slice %249 {offsets = [0, 0, 16], sizes = [2, 8, 16], strides = [1, 1, 1]} : vector<2x8x128xbf16> to vector<2x8x16xbf16>
    %273 = vector.extract_strided_slice %251 {offsets = [0, 0, 16], sizes = [2, 8, 16], strides = [1, 1, 1]} : vector<2x8x128xbf16> to vector<2x8x16xbf16>
    "tpu.trace_start"() <{level = 10 : i32, message = "bqd,bkd->bqk"}> : () -> ()
    %cst_106 = arith.constant dense<0.000000e+00> : vector<2x8x8xf32>
    %274 = tpu.matmul %272, %273, %cst_106 {dimension_numbers = #tpu.dot_dimension_numbers<[2], [2], [1], [1], [0, 0, 0, 1, 1, 1], [0], [0]>} : vector<2x8x16xbf16>, vector<2x8x16xbf16>, vector<2x8x8xf32> -> vector<2x8x8xf32>
    "tpu.trace_stop"() : () -> ()
    %275 = vector.broadcast %29 : vector<2x1x8xf32> to vector<2x8x8xf32>
    %276 = arith.addf %274, %275 : vector<2x8x8xf32>
    %cst_107 = arith.constant dense<0xFF800000> : vector<2x8xf32>
    %277 = vector.multi_reduction <maximumf>, %276, %cst_107 [2] : vector<2x8x8xf32> to vector<2x8xf32>
    %278 = vector.shape_cast %277 : vector<2x8xf32> to vector<2x8x1xf32>
    %279 = vector.broadcast %278 : vector<2x8x1xf32> to vector<2x8x8xf32>
    %280 = arith.subf %276, %279 : vector<2x8x8xf32>
    %281 = math.exp %280 : vector<2x8x8xf32>
    %cst_108 = arith.constant dense<0.000000e+00> : vector<2x8xf32>
    %282 = vector.multi_reduction <add>, %281, %cst_108 [2] : vector<2x8x8xf32> to vector<2x8xf32>
    %283 = vector.shape_cast %282 : vector<2x8xf32> to vector<2x8x1xf32>
    %284 = tpu.reciprocal %283 {approx = true} : vector<2x8x1xf32> -> vector<2x8x1xf32>
    %285 = vector.broadcast %284 : vector<2x8x1xf32> to vector<2x8x8xf32>
    %286 = arith.mulf %281, %285 : vector<2x8x8xf32>
    %287 = arith.truncf %286 : vector<2x8x8xf32> to vector<2x8x8xbf16>
    %288 = vector.extract_strided_slice %253 {offsets = [0, 0, 16], sizes = [2, 8, 16], strides = [1, 1, 1]} : vector<2x8x128xbf16> to vector<2x8x16xbf16>
    "tpu.trace_start"() <{level = 10 : i32, message = "bqk,bkd->bqd"}> : () -> ()
    %cst_109 = arith.constant dense<0.000000e+00> : vector<2x8x16xf32>
    %289 = tpu.matmul %287, %288, %cst_109 {dimension_numbers = #tpu.dot_dimension_numbers<[2], [1], [1], [2], [0, 0, 0, 1, 1, 2], [0], [0]>} : vector<2x8x8xbf16>, vector<2x8x16xbf16>, vector<2x8x16xf32> -> vector<2x8x16xf32>
    "tpu.trace_stop"() : () -> ()
    %290 = vector.extract_strided_slice %249 {offsets = [0, 0, 32], sizes = [2, 8, 16], strides = [1, 1, 1]} : vector<2x8x128xbf16> to vector<2x8x16xbf16>
    %291 = vector.extract_strided_slice %251 {offsets = [0, 0, 32], sizes = [2, 8, 16], strides = [1, 1, 1]} : vector<2x8x128xbf16> to vector<2x8x16xbf16>
    "tpu.trace_start"() <{level = 10 : i32, message = "bqd,bkd->bqk"}> : () -> ()
    %cst_110 = arith.constant dense<0.000000e+00> : vector<2x8x8xf32>
    %292 = tpu.matmul %290, %291, %cst_110 {dimension_numbers = #tpu.dot_dimension_numbers<[2], [2], [1], [1], [0, 0, 0, 1, 1, 1], [0], [0]>} : vector<2x8x16xbf16>, vector<2x8x16xbf16>, vector<2x8x8xf32> -> vector<2x8x8xf32>
    "tpu.trace_stop"() : () -> ()
    %293 = vector.broadcast %29 : vector<2x1x8xf32> to vector<2x8x8xf32>
    %294 = arith.addf %292, %293 : vector<2x8x8xf32>
    %cst_111 = arith.constant dense<0xFF800000> : vector<2x8xf32>
    %295 = vector.multi_reduction <maximumf>, %294, %cst_111 [2] : vector<2x8x8xf32> to vector<2x8xf32>
    %296 = vector.shape_cast %295 : vector<2x8xf32> to vector<2x8x1xf32>
    %297 = vector.broadcast %296 : vector<2x8x1xf32> to vector<2x8x8xf32>
    %298 = arith.subf %294, %297 : vector<2x8x8xf32>
    %299 = math.exp %298 : vector<2x8x8xf32>
    %cst_112 = arith.constant dense<0.000000e+00> : vector<2x8xf32>
    %300 = vector.multi_reduction <add>, %299, %cst_112 [2] : vector<2x8x8xf32> to vector<2x8xf32>
    %301 = vector.shape_cast %300 : vector<2x8xf32> to vector<2x8x1xf32>
    %302 = tpu.reciprocal %301 {approx = true} : vector<2x8x1xf32> -> vector<2x8x1xf32>
    %303 = vector.broadcast %302 : vector<2x8x1xf32> to vector<2x8x8xf32>
    %304 = arith.mulf %299, %303 : vector<2x8x8xf32>
    %305 = arith.truncf %304 : vector<2x8x8xf32> to vector<2x8x8xbf16>
    %306 = vector.extract_strided_slice %253 {offsets = [0, 0, 32], sizes = [2, 8, 16], strides = [1, 1, 1]} : vector<2x8x128xbf16> to vector<2x8x16xbf16>
    "tpu.trace_start"() <{level = 10 : i32, message = "bqk,bkd->bqd"}> : () -> ()
    %cst_113 = arith.constant dense<0.000000e+00> : vector<2x8x16xf32>
    %307 = tpu.matmul %305, %306, %cst_113 {dimension_numbers = #tpu.dot_dimension_numbers<[2], [1], [1], [2], [0, 0, 0, 1, 1, 2], [0], [0]>} : vector<2x8x8xbf16>, vector<2x8x16xbf16>, vector<2x8x16xf32> -> vector<2x8x16xf32>
    "tpu.trace_stop"() : () -> ()
    %308 = vector.extract_strided_slice %249 {offsets = [0, 0, 48], sizes = [2, 8, 16], strides = [1, 1, 1]} : vector<2x8x128xbf16> to vector<2x8x16xbf16>
    %309 = vector.extract_strided_slice %251 {offsets = [0, 0, 48], sizes = [2, 8, 16], strides = [1, 1, 1]} : vector<2x8x128xbf16> to vector<2x8x16xbf16>
    "tpu.trace_start"() <{level = 10 : i32, message = "bqd,bkd->bqk"}> : () -> ()
    %cst_114 = arith.constant dense<0.000000e+00> : vector<2x8x8xf32>
    %310 = tpu.matmul %308, %309, %cst_114 {dimension_numbers = #tpu.dot_dimension_numbers<[2], [2], [1], [1], [0, 0, 0, 1, 1, 1], [0], [0]>} : vector<2x8x16xbf16>, vector<2x8x16xbf16>, vector<2x8x8xf32> -> vector<2x8x8xf32>
    "tpu.trace_stop"() : () -> ()
    %311 = vector.broadcast %29 : vector<2x1x8xf32> to vector<2x8x8xf32>
    %312 = arith.addf %310, %311 : vector<2x8x8xf32>
    %cst_115 = arith.constant dense<0xFF800000> : vector<2x8xf32>
    %313 = vector.multi_reduction <maximumf>, %312, %cst_115 [2] : vector<2x8x8xf32> to vector<2x8xf32>
    %314 = vector.shape_cast %313 : vector<2x8xf32> to vector<2x8x1xf32>
    %315 = vector.broadcast %314 : vector<2x8x1xf32> to vector<2x8x8xf32>
    %316 = arith.subf %312, %315 : vector<2x8x8xf32>
    %317 = math.exp %316 : vector<2x8x8xf32>
    %cst_116 = arith.constant dense<0.000000e+00> : vector<2x8xf32>
    %318 = vector.multi_reduction <add>, %317, %cst_116 [2] : vector<2x8x8xf32> to vector<2x8xf32>
    %319 = vector.shape_cast %318 : vector<2x8xf32> to vector<2x8x1xf32>
    %320 = tpu.reciprocal %319 {approx = true} : vector<2x8x1xf32> -> vector<2x8x1xf32>
    %321 = vector.broadcast %320 : vector<2x8x1xf32> to vector<2x8x8xf32>
    %322 = arith.mulf %317, %321 : vector<2x8x8xf32>
    %323 = arith.truncf %322 : vector<2x8x8xf32> to vector<2x8x8xbf16>
    %324 = vector.extract_strided_slice %253 {offsets = [0, 0, 48], sizes = [2, 8, 16], strides = [1, 1, 1]} : vector<2x8x128xbf16> to vector<2x8x16xbf16>
    "tpu.trace_start"() <{level = 10 : i32, message = "bqk,bkd->bqd"}> : () -> ()
    %cst_117 = arith.constant dense<0.000000e+00> : vector<2x8x16xf32>
    %325 = tpu.matmul %323, %324, %cst_117 {dimension_numbers = #tpu.dot_dimension_numbers<[2], [1], [1], [2], [0, 0, 0, 1, 1, 2], [0], [0]>} : vector<2x8x8xbf16>, vector<2x8x16xbf16>, vector<2x8x16xf32> -> vector<2x8x16xf32>
    "tpu.trace_stop"() : () -> ()
    %326 = vector.extract_strided_slice %249 {offsets = [0, 0, 64], sizes = [2, 8, 16], strides = [1, 1, 1]} : vector<2x8x128xbf16> to vector<2x8x16xbf16>
    %327 = vector.extract_strided_slice %251 {offsets = [0, 0, 64], sizes = [2, 8, 16], strides = [1, 1, 1]} : vector<2x8x128xbf16> to vector<2x8x16xbf16>
    "tpu.trace_start"() <{level = 10 : i32, message = "bqd,bkd->bqk"}> : () -> ()
    %cst_118 = arith.constant dense<0.000000e+00> : vector<2x8x8xf32>
    %328 = tpu.matmul %326, %327, %cst_118 {dimension_numbers = #tpu.dot_dimension_numbers<[2], [2], [1], [1], [0, 0, 0, 1, 1, 1], [0], [0]>} : vector<2x8x16xbf16>, vector<2x8x16xbf16>, vector<2x8x8xf32> -> vector<2x8x8xf32>
    "tpu.trace_stop"() : () -> ()
    %329 = vector.broadcast %29 : vector<2x1x8xf32> to vector<2x8x8xf32>
    %330 = arith.addf %328, %329 : vector<2x8x8xf32>
    %cst_119 = arith.constant dense<0xFF800000> : vector<2x8xf32>
    %331 = vector.multi_reduction <maximumf>, %330, %cst_119 [2] : vector<2x8x8xf32> to vector<2x8xf32>
    %332 = vector.shape_cast %331 : vector<2x8xf32> to vector<2x8x1xf32>
    %333 = vector.broadcast %332 : vector<2x8x1xf32> to vector<2x8x8xf32>
    %334 = arith.subf %330, %333 : vector<2x8x8xf32>
    %335 = math.exp %334 : vector<2x8x8xf32>
    %cst_120 = arith.constant dense<0.000000e+00> : vector<2x8xf32>
    %336 = vector.multi_reduction <add>, %335, %cst_120 [2] : vector<2x8x8xf32> to vector<2x8xf32>
    %337 = vector.shape_cast %336 : vector<2x8xf32> to vector<2x8x1xf32>
    %338 = tpu.reciprocal %337 {approx = true} : vector<2x8x1xf32> -> vector<2x8x1xf32>
    %339 = vector.broadcast %338 : vector<2x8x1xf32> to vector<2x8x8xf32>
    %340 = arith.mulf %335, %339 : vector<2x8x8xf32>
    %341 = arith.truncf %340 : vector<2x8x8xf32> to vector<2x8x8xbf16>
    %342 = vector.extract_strided_slice %253 {offsets = [0, 0, 64], sizes = [2, 8, 16], strides = [1, 1, 1]} : vector<2x8x128xbf16> to vector<2x8x16xbf16>
    "tpu.trace_start"() <{level = 10 : i32, message = "bqk,bkd->bqd"}> : () -> ()
    %cst_121 = arith.constant dense<0.000000e+00> : vector<2x8x16xf32>
    %343 = tpu.matmul %341, %342, %cst_121 {dimension_numbers = #tpu.dot_dimension_numbers<[2], [1], [1], [2], [0, 0, 0, 1, 1, 2], [0], [0]>} : vector<2x8x8xbf16>, vector<2x8x16xbf16>, vector<2x8x16xf32> -> vector<2x8x16xf32>
    "tpu.trace_stop"() : () -> ()
    %344 = vector.extract_strided_slice %249 {offsets = [0, 0, 80], sizes = [2, 8, 16], strides = [1, 1, 1]} : vector<2x8x128xbf16> to vector<2x8x16xbf16>
    %345 = vector.extract_strided_slice %251 {offsets = [0, 0, 80], sizes = [2, 8, 16], strides = [1, 1, 1]} : vector<2x8x128xbf16> to vector<2x8x16xbf16>
    "tpu.trace_start"() <{level = 10 : i32, message = "bqd,bkd->bqk"}> : () -> ()
    %cst_122 = arith.constant dense<0.000000e+00> : vector<2x8x8xf32>
    %346 = tpu.matmul %344, %345, %cst_122 {dimension_numbers = #tpu.dot_dimension_numbers<[2], [2], [1], [1], [0, 0, 0, 1, 1, 1], [0], [0]>} : vector<2x8x16xbf16>, vector<2x8x16xbf16>, vector<2x8x8xf32> -> vector<2x8x8xf32>
    "tpu.trace_stop"() : () -> ()
    %347 = vector.broadcast %29 : vector<2x1x8xf32> to vector<2x8x8xf32>
    %348 = arith.addf %346, %347 : vector<2x8x8xf32>
    %cst_123 = arith.constant dense<0xFF800000> : vector<2x8xf32>
    %349 = vector.multi_reduction <maximumf>, %348, %cst_123 [2] : vector<2x8x8xf32> to vector<2x8xf32>
    %350 = vector.shape_cast %349 : vector<2x8xf32> to vector<2x8x1xf32>
    %351 = vector.broadcast %350 : vector<2x8x1xf32> to vector<2x8x8xf32>
    %352 = arith.subf %348, %351 : vector<2x8x8xf32>
    %353 = math.exp %352 : vector<2x8x8xf32>
    %cst_124 = arith.constant dense<0.000000e+00> : vector<2x8xf32>
    %354 = vector.multi_reduction <add>, %353, %cst_124 [2] : vector<2x8x8xf32> to vector<2x8xf32>
    %355 = vector.shape_cast %354 : vector<2x8xf32> to vector<2x8x1xf32>
    %356 = tpu.reciprocal %355 {approx = true} : vector<2x8x1xf32> -> vector<2x8x1xf32>
    %357 = vector.broadcast %356 : vector<2x8x1xf32> to vector<2x8x8xf32>
    %358 = arith.mulf %353, %357 : vector<2x8x8xf32>
    %359 = arith.truncf %358 : vector<2x8x8xf32> to vector<2x8x8xbf16>
    %360 = vector.extract_strided_slice %253 {offsets = [0, 0, 80], sizes = [2, 8, 16], strides = [1, 1, 1]} : vector<2x8x128xbf16> to vector<2x8x16xbf16>
    "tpu.trace_start"() <{level = 10 : i32, message = "bqk,bkd->bqd"}> : () -> ()
    %cst_125 = arith.constant dense<0.000000e+00> : vector<2x8x16xf32>
    %361 = tpu.matmul %359, %360, %cst_125 {dimension_numbers = #tpu.dot_dimension_numbers<[2], [1], [1], [2], [0, 0, 0, 1, 1, 2], [0], [0]>} : vector<2x8x8xbf16>, vector<2x8x16xbf16>, vector<2x8x16xf32> -> vector<2x8x16xf32>
    "tpu.trace_stop"() : () -> ()
    %362 = vector.extract_strided_slice %249 {offsets = [0, 0, 96], sizes = [2, 8, 16], strides = [1, 1, 1]} : vector<2x8x128xbf16> to vector<2x8x16xbf16>
    %363 = vector.extract_strided_slice %251 {offsets = [0, 0, 96], sizes = [2, 8, 16], strides = [1, 1, 1]} : vector<2x8x128xbf16> to vector<2x8x16xbf16>
    "tpu.trace_start"() <{level = 10 : i32, message = "bqd,bkd->bqk"}> : () -> ()
    %cst_126 = arith.constant dense<0.000000e+00> : vector<2x8x8xf32>
    %364 = tpu.matmul %362, %363, %cst_126 {dimension_numbers = #tpu.dot_dimension_numbers<[2], [2], [1], [1], [0, 0, 0, 1, 1, 1], [0], [0]>} : vector<2x8x16xbf16>, vector<2x8x16xbf16>, vector<2x8x8xf32> -> vector<2x8x8xf32>
    "tpu.trace_stop"() : () -> ()
    %365 = vector.broadcast %29 : vector<2x1x8xf32> to vector<2x8x8xf32>
    %366 = arith.addf %364, %365 : vector<2x8x8xf32>
    %cst_127 = arith.constant dense<0xFF800000> : vector<2x8xf32>
    %367 = vector.multi_reduction <maximumf>, %366, %cst_127 [2] : vector<2x8x8xf32> to vector<2x8xf32>
    %368 = vector.shape_cast %367 : vector<2x8xf32> to vector<2x8x1xf32>
    %369 = vector.broadcast %368 : vector<2x8x1xf32> to vector<2x8x8xf32>
    %370 = arith.subf %366, %369 : vector<2x8x8xf32>
    %371 = math.exp %370 : vector<2x8x8xf32>
    %cst_128 = arith.constant dense<0.000000e+00> : vector<2x8xf32>
    %372 = vector.multi_reduction <add>, %371, %cst_128 [2] : vector<2x8x8xf32> to vector<2x8xf32>
    %373 = vector.shape_cast %372 : vector<2x8xf32> to vector<2x8x1xf32>
    %374 = tpu.reciprocal %373 {approx = true} : vector<2x8x1xf32> -> vector<2x8x1xf32>
    %375 = vector.broadcast %374 : vector<2x8x1xf32> to vector<2x8x8xf32>
    %376 = arith.mulf %371, %375 : vector<2x8x8xf32>
    %377 = arith.truncf %376 : vector<2x8x8xf32> to vector<2x8x8xbf16>
    %378 = vector.extract_strided_slice %253 {offsets = [0, 0, 96], sizes = [2, 8, 16], strides = [1, 1, 1]} : vector<2x8x128xbf16> to vector<2x8x16xbf16>
    "tpu.trace_start"() <{level = 10 : i32, message = "bqk,bkd->bqd"}> : () -> ()
    %cst_129 = arith.constant dense<0.000000e+00> : vector<2x8x16xf32>
    %379 = tpu.matmul %377, %378, %cst_129 {dimension_numbers = #tpu.dot_dimension_numbers<[2], [1], [1], [2], [0, 0, 0, 1, 1, 2], [0], [0]>} : vector<2x8x8xbf16>, vector<2x8x16xbf16>, vector<2x8x16xf32> -> vector<2x8x16xf32>
    "tpu.trace_stop"() : () -> ()
    %380 = vector.extract_strided_slice %249 {offsets = [0, 0, 112], sizes = [2, 8, 16], strides = [1, 1, 1]} : vector<2x8x128xbf16> to vector<2x8x16xbf16>
    %381 = vector.extract_strided_slice %251 {offsets = [0, 0, 112], sizes = [2, 8, 16], strides = [1, 1, 1]} : vector<2x8x128xbf16> to vector<2x8x16xbf16>
    "tpu.trace_start"() <{level = 10 : i32, message = "bqd,bkd->bqk"}> : () -> ()
    %cst_130 = arith.constant dense<0.000000e+00> : vector<2x8x8xf32>
    %382 = tpu.matmul %380, %381, %cst_130 {dimension_numbers = #tpu.dot_dimension_numbers<[2], [2], [1], [1], [0, 0, 0, 1, 1, 1], [0], [0]>} : vector<2x8x16xbf16>, vector<2x8x16xbf16>, vector<2x8x8xf32> -> vector<2x8x8xf32>
    "tpu.trace_stop"() : () -> ()
    %383 = vector.broadcast %29 : vector<2x1x8xf32> to vector<2x8x8xf32>
    %384 = arith.addf %382, %383 : vector<2x8x8xf32>
    %cst_131 = arith.constant dense<0xFF800000> : vector<2x8xf32>
    %385 = vector.multi_reduction <maximumf>, %384, %cst_131 [2] : vector<2x8x8xf32> to vector<2x8xf32>
    %386 = vector.shape_cast %385 : vector<2x8xf32> to vector<2x8x1xf32>
    %387 = vector.broadcast %386 : vector<2x8x1xf32> to vector<2x8x8xf32>
    %388 = arith.subf %384, %387 : vector<2x8x8xf32>
    %389 = math.exp %388 : vector<2x8x8xf32>
    %cst_132 = arith.constant dense<0.000000e+00> : vector<2x8xf32>
    %390 = vector.multi_reduction <add>, %389, %cst_132 [2] : vector<2x8x8xf32> to vector<2x8xf32>
    %391 = vector.shape_cast %390 : vector<2x8xf32> to vector<2x8x1xf32>
    %392 = tpu.reciprocal %391 {approx = true} : vector<2x8x1xf32> -> vector<2x8x1xf32>
    %393 = vector.broadcast %392 : vector<2x8x1xf32> to vector<2x8x8xf32>
    %394 = arith.mulf %389, %393 : vector<2x8x8xf32>
    %395 = arith.truncf %394 : vector<2x8x8xf32> to vector<2x8x8xbf16>
    %396 = vector.extract_strided_slice %253 {offsets = [0, 0, 112], sizes = [2, 8, 16], strides = [1, 1, 1]} : vector<2x8x128xbf16> to vector<2x8x16xbf16>
    "tpu.trace_start"() <{level = 10 : i32, message = "bqk,bkd->bqd"}> : () -> ()
    %cst_133 = arith.constant dense<0.000000e+00> : vector<2x8x16xf32>
    %397 = tpu.matmul %395, %396, %cst_133 {dimension_numbers = #tpu.dot_dimension_numbers<[2], [1], [1], [2], [0, 0, 0, 1, 1, 2], [0], [0]>} : vector<2x8x8xbf16>, vector<2x8x16xbf16>, vector<2x8x16xf32> -> vector<2x8x16xf32>
    "tpu.trace_stop"() : () -> ()
    %398 = tpu.concatenate %271, %289, %307, %325, %343, %361, %379, %397 in 2 : vector<2x8x16xf32>, vector<2x8x16xf32>, vector<2x8x16xf32>, vector<2x8x16xf32>, vector<2x8x16xf32>, vector<2x8x16xf32>, vector<2x8x16xf32>, vector<2x8x16xf32> -> vector<2x8x128xf32>
    %399 = vector.shape_cast %398 : vector<2x8x128xf32> to vector<16x128xf32>
    %400 = arith.truncf %399 : vector<16x128xf32> to vector<16x128xbf16>
    %cst_134 = arith.constant dense<0.000000e+00> : vector<16x128xf32>
    %401 = tpu.matmul %400, %245, %cst_134 {dimension_numbers = #tpu.dot_dimension_numbers<[1], [0], [0], [1], [0, 0, 1, 1], [], []>} : vector<16x128xbf16>, vector<128x128xbf16>, vector<16x128xf32> -> vector<16x128xf32>
    %402 = vector.broadcast %247 : vector<1x128xf32> to vector<16x128xf32>
    %403 = arith.addf %401, %402 : vector<16x128xf32>
    %404 = arith.addf %224, %403 : vector<16x128xf32>
    %405 = vector.extract_strided_slice %32 {offsets = [1, 0], sizes = [1, 128], strides = [1, 1]} : vector<3x128xf32> to vector<1x128xf32>
    %406 = vector.extract_strided_slice %34 {offsets = [1, 0], sizes = [1, 128], strides = [1, 1]} : vector<3x128xf32> to vector<1x128xf32>
    %cst_135 = arith.constant dense<0.000000e+00> : vector<16xf32>
    %407 = vector.multi_reduction <add>, %404, %cst_135 [1] : vector<16x128xf32> to vector<16xf32>
    %408 = vector.shape_cast %407 : vector<16xf32> to vector<16x1xf32>
    %cst_136 = arith.constant 1.280000e+02 : f32
    %409 = vector.broadcast %cst_136 : f32 to vector<16x1xf32>
    %410 = arith.divf %408, %409 : vector<16x1xf32>
    %411 = vector.broadcast %410 : vector<16x1xf32> to vector<16x128xf32>
    %412 = arith.subf %404, %411 : vector<16x128xf32>
    %413 = arith.mulf %412, %412 : vector<16x128xf32>
    %cst_137 = arith.constant dense<0.000000e+00> : vector<16xf32>
    %414 = vector.multi_reduction <add>, %413, %cst_137 [1] : vector<16x128xf32> to vector<16xf32>
    %415 = vector.shape_cast %414 : vector<16xf32> to vector<16x1xf32>
    %cst_138 = arith.constant 1.280000e+02 : f32
    %416 = vector.broadcast %cst_138 : f32 to vector<16x1xf32>
    %417 = arith.divf %415, %416 : vector<16x1xf32>
    %418 = vector.broadcast %410 : vector<16x1xf32> to vector<16x128xf32>
    %419 = arith.subf %404, %418 : vector<16x128xf32>
    %cst_139 = arith.constant 9.99999974E-6 : f32
    %420 = vector.broadcast %cst_139 : f32 to vector<16x1xf32>
    %421 = arith.addf %417, %420 : vector<16x1xf32>
    %422 = math.rsqrt %421 : vector<16x1xf32>
    %423 = vector.broadcast %422 : vector<16x1xf32> to vector<16x128xf32>
    %424 = arith.mulf %419, %423 : vector<16x128xf32>
    %425 = vector.broadcast %405 : vector<1x128xf32> to vector<16x128xf32>
    %426 = arith.mulf %424, %425 : vector<16x128xf32>
    %427 = vector.broadcast %406 : vector<1x128xf32> to vector<16x128xf32>
    %428 = arith.addf %426, %427 : vector<16x128xf32>
    %429 = arith.truncf %428 : vector<16x128xf32> to vector<16x128xbf16>
    %c0_140 = arith.constant 0 : index
    %c0_141 = arith.constant 0 : index
    %c0_142 = arith.constant 0 : index
    %430 = vector.load %arg21[%c0_140, %c0_141, %c0_142] : memref<2x128x512xbf16, #tpu.memory_space<vmem>>, vector<1x128x512xbf16>
    %431 = vector.shape_cast %430 : vector<1x128x512xbf16> to vector<128x512xbf16>
    %cst_143 = arith.constant dense<0.000000e+00> : vector<16x512xf32>
    %432 = tpu.matmul %429, %431, %cst_143 {dimension_numbers = #tpu.dot_dimension_numbers<[1], [0], [0], [1], [0, 0, 1, 1], [], []>} : vector<16x128xbf16>, vector<128x512xbf16>, vector<16x512xf32> -> vector<16x512xf32>
    %c0_144 = arith.constant 0 : index
    %c0_145 = arith.constant 0 : index
    %c0_146 = arith.constant 0 : index
    %433 = vector.load %arg22[%c0_144, %c0_145, %c0_146] : memref<2x1x512xf32, #tpu.memory_space<vmem>>, vector<1x1x512xf32>
    %434 = vector.shape_cast %433 : vector<1x1x512xf32> to vector<1x512xf32>
    %435 = vector.broadcast %434 : vector<1x512xf32> to vector<16x512xf32>
    %436 = arith.addf %432, %435 : vector<16x512xf32>
    %cst_147 = arith.constant 0.000000e+00 : f32
    %437 = vector.broadcast %cst_147 : f32 to vector<16x512xf32>
    %438 = arith.maximumf %436, %437 : vector<16x512xf32>
    %439 = arith.truncf %438 : vector<16x512xf32> to vector<16x512xbf16>
    %c0_148 = arith.constant 0 : index
    %c0_149 = arith.constant 0 : index
    %c0_150 = arith.constant 0 : index
    %440 = vector.load %arg23[%c0_148, %c0_149, %c0_150] : memref<2x512x128xbf16, #tpu.memory_space<vmem>>, vector<1x512x128xbf16>
    %441 = vector.shape_cast %440 : vector<1x512x128xbf16> to vector<512x128xbf16>
    %cst_151 = arith.constant dense<0.000000e+00> : vector<16x128xf32>
    %442 = tpu.matmul %439, %441, %cst_151 {dimension_numbers = #tpu.dot_dimension_numbers<[1], [0], [0], [1], [0, 0, 1, 1], [], []>} : vector<16x512xbf16>, vector<512x128xbf16>, vector<16x128xf32> -> vector<16x128xf32>
    %c0_152 = arith.constant 0 : index
    %c0_153 = arith.constant 0 : index
    %c0_154 = arith.constant 0 : index
    %443 = vector.load %arg24[%c0_152, %c0_153, %c0_154] : memref<2x1x128xf32, #tpu.memory_space<vmem>>, vector<1x1x128xf32>
    %444 = vector.shape_cast %443 : vector<1x1x128xf32> to vector<1x128xf32>
    %445 = vector.broadcast %444 : vector<1x128xf32> to vector<16x128xf32>
    %446 = arith.addf %442, %445 : vector<16x128xf32>
    %447 = arith.addf %428, %446 : vector<16x128xf32>
    %448 = vector.extract_strided_slice %32 {offsets = [2, 0], sizes = [1, 128], strides = [1, 1]} : vector<3x128xf32> to vector<1x128xf32>
    %449 = vector.extract_strided_slice %34 {offsets = [2, 0], sizes = [1, 128], strides = [1, 1]} : vector<3x128xf32> to vector<1x128xf32>
    %cst_155 = arith.constant dense<0.000000e+00> : vector<16xf32>
    %450 = vector.multi_reduction <add>, %447, %cst_155 [1] : vector<16x128xf32> to vector<16xf32>
    %451 = vector.shape_cast %450 : vector<16xf32> to vector<16x1xf32>
    %cst_156 = arith.constant 1.280000e+02 : f32
    %452 = vector.broadcast %cst_156 : f32 to vector<16x1xf32>
    %453 = arith.divf %451, %452 : vector<16x1xf32>
    %454 = vector.broadcast %453 : vector<16x1xf32> to vector<16x128xf32>
    %455 = arith.subf %447, %454 : vector<16x128xf32>
    %456 = arith.mulf %455, %455 : vector<16x128xf32>
    %cst_157 = arith.constant dense<0.000000e+00> : vector<16xf32>
    %457 = vector.multi_reduction <add>, %456, %cst_157 [1] : vector<16x128xf32> to vector<16xf32>
    %458 = vector.shape_cast %457 : vector<16xf32> to vector<16x1xf32>
    %cst_158 = arith.constant 1.280000e+02 : f32
    %459 = vector.broadcast %cst_158 : f32 to vector<16x1xf32>
    %460 = arith.divf %458, %459 : vector<16x1xf32>
    %461 = vector.broadcast %453 : vector<16x1xf32> to vector<16x128xf32>
    %462 = arith.subf %447, %461 : vector<16x128xf32>
    %cst_159 = arith.constant 9.99999974E-6 : f32
    %463 = vector.broadcast %cst_159 : f32 to vector<16x1xf32>
    %464 = arith.addf %460, %463 : vector<16x1xf32>
    %465 = math.rsqrt %464 : vector<16x1xf32>
    %466 = vector.broadcast %465 : vector<16x1xf32> to vector<16x128xf32>
    %467 = arith.mulf %462, %466 : vector<16x128xf32>
    %468 = vector.broadcast %448 : vector<1x128xf32> to vector<16x128xf32>
    %469 = arith.mulf %467, %468 : vector<16x128xf32>
    %470 = vector.broadcast %449 : vector<1x128xf32> to vector<16x128xf32>
    %471 = arith.addf %469, %470 : vector<16x128xf32>
    %c1 = arith.constant 1 : index
    %c0_160 = arith.constant 0 : index
    %c0_161 = arith.constant 0 : index
    %472 = vector.load %arg19[%c1, %c0_160, %c0_161] : memref<2x3x128xf32, #tpu.memory_space<vmem>>, vector<1x3x128xf32>
    %473 = vector.shape_cast %472 : vector<1x3x128xf32> to vector<3x128xf32>
    %c1_162 = arith.constant 1 : index
    %c0_163 = arith.constant 0 : index
    %c0_164 = arith.constant 0 : index
    %474 = vector.load %arg20[%c1_162, %c0_163, %c0_164] : memref<2x3x128xf32, #tpu.memory_space<vmem>>, vector<1x3x128xf32>
    %475 = vector.shape_cast %474 : vector<1x3x128xf32> to vector<3x128xf32>
    %476 = arith.truncf %471 : vector<16x128xf32> to vector<16x128xbf16>
    %c1_165 = arith.constant 1 : index
    %c0_166 = arith.constant 0 : index
    %c0_167 = arith.constant 0 : index
    %477 = vector.load %arg9[%c1_165, %c0_166, %c0_167] : memref<2x128x384xbf16, #tpu.memory_space<vmem>>, vector<1x128x384xbf16>
    %478 = vector.shape_cast %477 : vector<1x128x384xbf16> to vector<128x384xbf16>
    %cst_168 = arith.constant dense<0.000000e+00> : vector<16x384xf32>
    %479 = tpu.matmul %476, %478, %cst_168 {dimension_numbers = #tpu.dot_dimension_numbers<[1], [0], [0], [1], [0, 0, 1, 1], [], []>} : vector<16x128xbf16>, vector<128x384xbf16>, vector<16x384xf32> -> vector<16x384xf32>
    %c1_169 = arith.constant 1 : index
    %c0_170 = arith.constant 0 : index
    %c0_171 = arith.constant 0 : index
    %480 = vector.load %arg10[%c1_169, %c0_170, %c0_171] : memref<2x1x384xf32, #tpu.memory_space<vmem>>, vector<1x1x384xf32>
    %481 = vector.shape_cast %480 : vector<1x1x384xf32> to vector<1x384xf32>
    %482 = vector.broadcast %481 : vector<1x384xf32> to vector<16x384xf32>
    %483 = arith.addf %479, %482 : vector<16x384xf32>
    %484 = vector.extract_strided_slice %483 {offsets = [0, 0], sizes = [16, 128], strides = [1, 1]} : vector<16x384xf32> to vector<16x128xf32>
    %cst_172 = arith.constant 2.500000e-01 : f32
    %485 = vector.broadcast %cst_172 : f32 to vector<16x128xf32>
    %486 = arith.mulf %484, %485 : vector<16x128xf32>
    %487 = vector.extract_strided_slice %483 {offsets = [0, 128], sizes = [16, 128], strides = [1, 1]} : vector<16x384xf32> to vector<16x128xf32>
    %488 = vector.extract_strided_slice %483 {offsets = [0, 256], sizes = [16, 128], strides = [1, 1]} : vector<16x384xf32> to vector<16x128xf32>
    %c1_173 = arith.constant 1 : index
    %c0_174 = arith.constant 0 : index
    %c0_175 = arith.constant 0 : index
    %489 = vector.load %arg11[%c1_173, %c0_174, %c0_175] : memref<2x128x128xbf16, #tpu.memory_space<vmem>>, vector<1x128x128xbf16>
    %490 = vector.shape_cast %489 : vector<1x128x128xbf16> to vector<128x128xbf16>
    %c1_176 = arith.constant 1 : index
    %c0_177 = arith.constant 0 : index
    %c0_178 = arith.constant 0 : index
    %491 = vector.load %arg12[%c1_176, %c0_177, %c0_178] : memref<2x1x128xf32, #tpu.memory_space<vmem>>, vector<1x1x128xf32>
    %492 = vector.shape_cast %491 : vector<1x1x128xf32> to vector<1x128xf32>
    %493 = vector.shape_cast %486 : vector<16x128xf32> to vector<2x8x128xf32>
    %494 = arith.truncf %493 : vector<2x8x128xf32> to vector<2x8x128xbf16>
    %495 = vector.shape_cast %487 : vector<16x128xf32> to vector<2x8x128xf32>
    %496 = arith.truncf %495 : vector<2x8x128xf32> to vector<2x8x128xbf16>
    %497 = vector.shape_cast %488 : vector<16x128xf32> to vector<2x8x128xf32>
    %498 = arith.truncf %497 : vector<2x8x128xf32> to vector<2x8x128xbf16>
    %499 = vector.extract_strided_slice %494 {offsets = [0, 0, 0], sizes = [2, 8, 16], strides = [1, 1, 1]} : vector<2x8x128xbf16> to vector<2x8x16xbf16>
    %500 = vector.extract_strided_slice %496 {offsets = [0, 0, 0], sizes = [2, 8, 16], strides = [1, 1, 1]} : vector<2x8x128xbf16> to vector<2x8x16xbf16>
    "tpu.trace_start"() <{level = 10 : i32, message = "bqd,bkd->bqk"}> : () -> ()
    %cst_179 = arith.constant dense<0.000000e+00> : vector<2x8x8xf32>
    %501 = tpu.matmul %499, %500, %cst_179 {dimension_numbers = #tpu.dot_dimension_numbers<[2], [2], [1], [1], [0, 0, 0, 1, 1, 1], [0], [0]>} : vector<2x8x16xbf16>, vector<2x8x16xbf16>, vector<2x8x8xf32> -> vector<2x8x8xf32>
    "tpu.trace_stop"() : () -> ()
    %502 = arith.addf %501, %27 : vector<2x8x8xf32>
    %cst_180 = arith.constant dense<0xFF800000> : vector<2x8xf32>
    %503 = vector.multi_reduction <maximumf>, %502, %cst_180 [2] : vector<2x8x8xf32> to vector<2x8xf32>
    %504 = vector.shape_cast %503 : vector<2x8xf32> to vector<2x8x1xf32>
    %505 = vector.broadcast %504 : vector<2x8x1xf32> to vector<2x8x8xf32>
    %506 = arith.subf %502, %505 : vector<2x8x8xf32>
    %507 = math.exp %506 : vector<2x8x8xf32>
    %cst_181 = arith.constant dense<0.000000e+00> : vector<2x8xf32>
    %508 = vector.multi_reduction <add>, %507, %cst_181 [2] : vector<2x8x8xf32> to vector<2x8xf32>
    %509 = vector.shape_cast %508 : vector<2x8xf32> to vector<2x8x1xf32>
    %510 = tpu.reciprocal %509 {approx = true} : vector<2x8x1xf32> -> vector<2x8x1xf32>
    %511 = vector.broadcast %510 : vector<2x8x1xf32> to vector<2x8x8xf32>
    %512 = arith.mulf %507, %511 : vector<2x8x8xf32>
    %513 = arith.truncf %512 : vector<2x8x8xf32> to vector<2x8x8xbf16>
    %514 = vector.extract_strided_slice %498 {offsets = [0, 0, 0], sizes = [2, 8, 16], strides = [1, 1, 1]} : vector<2x8x128xbf16> to vector<2x8x16xbf16>
    "tpu.trace_start"() <{level = 10 : i32, message = "bqk,bkd->bqd"}> : () -> ()
    %cst_182 = arith.constant dense<0.000000e+00> : vector<2x8x16xf32>
    %515 = tpu.matmul %513, %514, %cst_182 {dimension_numbers = #tpu.dot_dimension_numbers<[2], [1], [1], [2], [0, 0, 0, 1, 1, 2], [0], [0]>} : vector<2x8x8xbf16>, vector<2x8x16xbf16>, vector<2x8x16xf32> -> vector<2x8x16xf32>
    "tpu.trace_stop"() : () -> ()
    %516 = vector.extract_strided_slice %494 {offsets = [0, 0, 16], sizes = [2, 8, 16], strides = [1, 1, 1]} : vector<2x8x128xbf16> to vector<2x8x16xbf16>
    %517 = vector.extract_strided_slice %496 {offsets = [0, 0, 16], sizes = [2, 8, 16], strides = [1, 1, 1]} : vector<2x8x128xbf16> to vector<2x8x16xbf16>
    "tpu.trace_start"() <{level = 10 : i32, message = "bqd,bkd->bqk"}> : () -> ()
    %cst_183 = arith.constant dense<0.000000e+00> : vector<2x8x8xf32>
    %518 = tpu.matmul %516, %517, %cst_183 {dimension_numbers = #tpu.dot_dimension_numbers<[2], [2], [1], [1], [0, 0, 0, 1, 1, 1], [0], [0]>} : vector<2x8x16xbf16>, vector<2x8x16xbf16>, vector<2x8x8xf32> -> vector<2x8x8xf32>
    "tpu.trace_stop"() : () -> ()
    %519 = arith.addf %518, %27 : vector<2x8x8xf32>
    %cst_184 = arith.constant dense<0xFF800000> : vector<2x8xf32>
    %520 = vector.multi_reduction <maximumf>, %519, %cst_184 [2] : vector<2x8x8xf32> to vector<2x8xf32>
    %521 = vector.shape_cast %520 : vector<2x8xf32> to vector<2x8x1xf32>
    %522 = vector.broadcast %521 : vector<2x8x1xf32> to vector<2x8x8xf32>
    %523 = arith.subf %519, %522 : vector<2x8x8xf32>
    %524 = math.exp %523 : vector<2x8x8xf32>
    %cst_185 = arith.constant dense<0.000000e+00> : vector<2x8xf32>
    %525 = vector.multi_reduction <add>, %524, %cst_185 [2] : vector<2x8x8xf32> to vector<2x8xf32>
    %526 = vector.shape_cast %525 : vector<2x8xf32> to vector<2x8x1xf32>
    %527 = tpu.reciprocal %526 {approx = true} : vector<2x8x1xf32> -> vector<2x8x1xf32>
    %528 = vector.broadcast %527 : vector<2x8x1xf32> to vector<2x8x8xf32>
    %529 = arith.mulf %524, %528 : vector<2x8x8xf32>
    %530 = arith.truncf %529 : vector<2x8x8xf32> to vector<2x8x8xbf16>
    %531 = vector.extract_strided_slice %498 {offsets = [0, 0, 16], sizes = [2, 8, 16], strides = [1, 1, 1]} : vector<2x8x128xbf16> to vector<2x8x16xbf16>
    "tpu.trace_start"() <{level = 10 : i32, message = "bqk,bkd->bqd"}> : () -> ()
    %cst_186 = arith.constant dense<0.000000e+00> : vector<2x8x16xf32>
    %532 = tpu.matmul %530, %531, %cst_186 {dimension_numbers = #tpu.dot_dimension_numbers<[2], [1], [1], [2], [0, 0, 0, 1, 1, 2], [0], [0]>} : vector<2x8x8xbf16>, vector<2x8x16xbf16>, vector<2x8x16xf32> -> vector<2x8x16xf32>
    "tpu.trace_stop"() : () -> ()
    %533 = vector.extract_strided_slice %494 {offsets = [0, 0, 32], sizes = [2, 8, 16], strides = [1, 1, 1]} : vector<2x8x128xbf16> to vector<2x8x16xbf16>
    %534 = vector.extract_strided_slice %496 {offsets = [0, 0, 32], sizes = [2, 8, 16], strides = [1, 1, 1]} : vector<2x8x128xbf16> to vector<2x8x16xbf16>
    "tpu.trace_start"() <{level = 10 : i32, message = "bqd,bkd->bqk"}> : () -> ()
    %cst_187 = arith.constant dense<0.000000e+00> : vector<2x8x8xf32>
    %535 = tpu.matmul %533, %534, %cst_187 {dimension_numbers = #tpu.dot_dimension_numbers<[2], [2], [1], [1], [0, 0, 0, 1, 1, 1], [0], [0]>} : vector<2x8x16xbf16>, vector<2x8x16xbf16>, vector<2x8x8xf32> -> vector<2x8x8xf32>
    "tpu.trace_stop"() : () -> ()
    %536 = arith.addf %535, %27 : vector<2x8x8xf32>
    %cst_188 = arith.constant dense<0xFF800000> : vector<2x8xf32>
    %537 = vector.multi_reduction <maximumf>, %536, %cst_188 [2] : vector<2x8x8xf32> to vector<2x8xf32>
    %538 = vector.shape_cast %537 : vector<2x8xf32> to vector<2x8x1xf32>
    %539 = vector.broadcast %538 : vector<2x8x1xf32> to vector<2x8x8xf32>
    %540 = arith.subf %536, %539 : vector<2x8x8xf32>
    %541 = math.exp %540 : vector<2x8x8xf32>
    %cst_189 = arith.constant dense<0.000000e+00> : vector<2x8xf32>
    %542 = vector.multi_reduction <add>, %541, %cst_189 [2] : vector<2x8x8xf32> to vector<2x8xf32>
    %543 = vector.shape_cast %542 : vector<2x8xf32> to vector<2x8x1xf32>
    %544 = tpu.reciprocal %543 {approx = true} : vector<2x8x1xf32> -> vector<2x8x1xf32>
    %545 = vector.broadcast %544 : vector<2x8x1xf32> to vector<2x8x8xf32>
    %546 = arith.mulf %541, %545 : vector<2x8x8xf32>
    %547 = arith.truncf %546 : vector<2x8x8xf32> to vector<2x8x8xbf16>
    %548 = vector.extract_strided_slice %498 {offsets = [0, 0, 32], sizes = [2, 8, 16], strides = [1, 1, 1]} : vector<2x8x128xbf16> to vector<2x8x16xbf16>
    "tpu.trace_start"() <{level = 10 : i32, message = "bqk,bkd->bqd"}> : () -> ()
    %cst_190 = arith.constant dense<0.000000e+00> : vector<2x8x16xf32>
    %549 = tpu.matmul %547, %548, %cst_190 {dimension_numbers = #tpu.dot_dimension_numbers<[2], [1], [1], [2], [0, 0, 0, 1, 1, 2], [0], [0]>} : vector<2x8x8xbf16>, vector<2x8x16xbf16>, vector<2x8x16xf32> -> vector<2x8x16xf32>
    "tpu.trace_stop"() : () -> ()
    %550 = vector.extract_strided_slice %494 {offsets = [0, 0, 48], sizes = [2, 8, 16], strides = [1, 1, 1]} : vector<2x8x128xbf16> to vector<2x8x16xbf16>
    %551 = vector.extract_strided_slice %496 {offsets = [0, 0, 48], sizes = [2, 8, 16], strides = [1, 1, 1]} : vector<2x8x128xbf16> to vector<2x8x16xbf16>
    "tpu.trace_start"() <{level = 10 : i32, message = "bqd,bkd->bqk"}> : () -> ()
    %cst_191 = arith.constant dense<0.000000e+00> : vector<2x8x8xf32>
    %552 = tpu.matmul %550, %551, %cst_191 {dimension_numbers = #tpu.dot_dimension_numbers<[2], [2], [1], [1], [0, 0, 0, 1, 1, 1], [0], [0]>} : vector<2x8x16xbf16>, vector<2x8x16xbf16>, vector<2x8x8xf32> -> vector<2x8x8xf32>
    "tpu.trace_stop"() : () -> ()
    %553 = arith.addf %552, %27 : vector<2x8x8xf32>
    %cst_192 = arith.constant dense<0xFF800000> : vector<2x8xf32>
    %554 = vector.multi_reduction <maximumf>, %553, %cst_192 [2] : vector<2x8x8xf32> to vector<2x8xf32>
    %555 = vector.shape_cast %554 : vector<2x8xf32> to vector<2x8x1xf32>
    %556 = vector.broadcast %555 : vector<2x8x1xf32> to vector<2x8x8xf32>
    %557 = arith.subf %553, %556 : vector<2x8x8xf32>
    %558 = math.exp %557 : vector<2x8x8xf32>
    %cst_193 = arith.constant dense<0.000000e+00> : vector<2x8xf32>
    %559 = vector.multi_reduction <add>, %558, %cst_193 [2] : vector<2x8x8xf32> to vector<2x8xf32>
    %560 = vector.shape_cast %559 : vector<2x8xf32> to vector<2x8x1xf32>
    %561 = tpu.reciprocal %560 {approx = true} : vector<2x8x1xf32> -> vector<2x8x1xf32>
    %562 = vector.broadcast %561 : vector<2x8x1xf32> to vector<2x8x8xf32>
    %563 = arith.mulf %558, %562 : vector<2x8x8xf32>
    %564 = arith.truncf %563 : vector<2x8x8xf32> to vector<2x8x8xbf16>
    %565 = vector.extract_strided_slice %498 {offsets = [0, 0, 48], sizes = [2, 8, 16], strides = [1, 1, 1]} : vector<2x8x128xbf16> to vector<2x8x16xbf16>
    "tpu.trace_start"() <{level = 10 : i32, message = "bqk,bkd->bqd"}> : () -> ()
    %cst_194 = arith.constant dense<0.000000e+00> : vector<2x8x16xf32>
    %566 = tpu.matmul %564, %565, %cst_194 {dimension_numbers = #tpu.dot_dimension_numbers<[2], [1], [1], [2], [0, 0, 0, 1, 1, 2], [0], [0]>} : vector<2x8x8xbf16>, vector<2x8x16xbf16>, vector<2x8x16xf32> -> vector<2x8x16xf32>
    "tpu.trace_stop"() : () -> ()
    %567 = vector.extract_strided_slice %494 {offsets = [0, 0, 64], sizes = [2, 8, 16], strides = [1, 1, 1]} : vector<2x8x128xbf16> to vector<2x8x16xbf16>
    %568 = vector.extract_strided_slice %496 {offsets = [0, 0, 64], sizes = [2, 8, 16], strides = [1, 1, 1]} : vector<2x8x128xbf16> to vector<2x8x16xbf16>
    "tpu.trace_start"() <{level = 10 : i32, message = "bqd,bkd->bqk"}> : () -> ()
    %cst_195 = arith.constant dense<0.000000e+00> : vector<2x8x8xf32>
    %569 = tpu.matmul %567, %568, %cst_195 {dimension_numbers = #tpu.dot_dimension_numbers<[2], [2], [1], [1], [0, 0, 0, 1, 1, 1], [0], [0]>} : vector<2x8x16xbf16>, vector<2x8x16xbf16>, vector<2x8x8xf32> -> vector<2x8x8xf32>
    "tpu.trace_stop"() : () -> ()
    %570 = arith.addf %569, %27 : vector<2x8x8xf32>
    %cst_196 = arith.constant dense<0xFF800000> : vector<2x8xf32>
    %571 = vector.multi_reduction <maximumf>, %570, %cst_196 [2] : vector<2x8x8xf32> to vector<2x8xf32>
    %572 = vector.shape_cast %571 : vector<2x8xf32> to vector<2x8x1xf32>
    %573 = vector.broadcast %572 : vector<2x8x1xf32> to vector<2x8x8xf32>
    %574 = arith.subf %570, %573 : vector<2x8x8xf32>
    %575 = math.exp %574 : vector<2x8x8xf32>
    %cst_197 = arith.constant dense<0.000000e+00> : vector<2x8xf32>
    %576 = vector.multi_reduction <add>, %575, %cst_197 [2] : vector<2x8x8xf32> to vector<2x8xf32>
    %577 = vector.shape_cast %576 : vector<2x8xf32> to vector<2x8x1xf32>
    %578 = tpu.reciprocal %577 {approx = true} : vector<2x8x1xf32> -> vector<2x8x1xf32>
    %579 = vector.broadcast %578 : vector<2x8x1xf32> to vector<2x8x8xf32>
    %580 = arith.mulf %575, %579 : vector<2x8x8xf32>
    %581 = arith.truncf %580 : vector<2x8x8xf32> to vector<2x8x8xbf16>
    %582 = vector.extract_strided_slice %498 {offsets = [0, 0, 64], sizes = [2, 8, 16], strides = [1, 1, 1]} : vector<2x8x128xbf16> to vector<2x8x16xbf16>
    "tpu.trace_start"() <{level = 10 : i32, message = "bqk,bkd->bqd"}> : () -> ()
    %cst_198 = arith.constant dense<0.000000e+00> : vector<2x8x16xf32>
    %583 = tpu.matmul %581, %582, %cst_198 {dimension_numbers = #tpu.dot_dimension_numbers<[2], [1], [1], [2], [0, 0, 0, 1, 1, 2], [0], [0]>} : vector<2x8x8xbf16>, vector<2x8x16xbf16>, vector<2x8x16xf32> -> vector<2x8x16xf32>
    "tpu.trace_stop"() : () -> ()
    %584 = vector.extract_strided_slice %494 {offsets = [0, 0, 80], sizes = [2, 8, 16], strides = [1, 1, 1]} : vector<2x8x128xbf16> to vector<2x8x16xbf16>
    %585 = vector.extract_strided_slice %496 {offsets = [0, 0, 80], sizes = [2, 8, 16], strides = [1, 1, 1]} : vector<2x8x128xbf16> to vector<2x8x16xbf16>
    "tpu.trace_start"() <{level = 10 : i32, message = "bqd,bkd->bqk"}> : () -> ()
    %cst_199 = arith.constant dense<0.000000e+00> : vector<2x8x8xf32>
    %586 = tpu.matmul %584, %585, %cst_199 {dimension_numbers = #tpu.dot_dimension_numbers<[2], [2], [1], [1], [0, 0, 0, 1, 1, 1], [0], [0]>} : vector<2x8x16xbf16>, vector<2x8x16xbf16>, vector<2x8x8xf32> -> vector<2x8x8xf32>
    "tpu.trace_stop"() : () -> ()
    %587 = arith.addf %586, %27 : vector<2x8x8xf32>
    %cst_200 = arith.constant dense<0xFF800000> : vector<2x8xf32>
    %588 = vector.multi_reduction <maximumf>, %587, %cst_200 [2] : vector<2x8x8xf32> to vector<2x8xf32>
    %589 = vector.shape_cast %588 : vector<2x8xf32> to vector<2x8x1xf32>
    %590 = vector.broadcast %589 : vector<2x8x1xf32> to vector<2x8x8xf32>
    %591 = arith.subf %587, %590 : vector<2x8x8xf32>
    %592 = math.exp %591 : vector<2x8x8xf32>
    %cst_201 = arith.constant dense<0.000000e+00> : vector<2x8xf32>
    %593 = vector.multi_reduction <add>, %592, %cst_201 [2] : vector<2x8x8xf32> to vector<2x8xf32>
    %594 = vector.shape_cast %593 : vector<2x8xf32> to vector<2x8x1xf32>
    %595 = tpu.reciprocal %594 {approx = true} : vector<2x8x1xf32> -> vector<2x8x1xf32>
    %596 = vector.broadcast %595 : vector<2x8x1xf32> to vector<2x8x8xf32>
    %597 = arith.mulf %592, %596 : vector<2x8x8xf32>
    %598 = arith.truncf %597 : vector<2x8x8xf32> to vector<2x8x8xbf16>
    %599 = vector.extract_strided_slice %498 {offsets = [0, 0, 80], sizes = [2, 8, 16], strides = [1, 1, 1]} : vector<2x8x128xbf16> to vector<2x8x16xbf16>
    "tpu.trace_start"() <{level = 10 : i32, message = "bqk,bkd->bqd"}> : () -> ()
    %cst_202 = arith.constant dense<0.000000e+00> : vector<2x8x16xf32>
    %600 = tpu.matmul %598, %599, %cst_202 {dimension_numbers = #tpu.dot_dimension_numbers<[2], [1], [1], [2], [0, 0, 0, 1, 1, 2], [0], [0]>} : vector<2x8x8xbf16>, vector<2x8x16xbf16>, vector<2x8x16xf32> -> vector<2x8x16xf32>
    "tpu.trace_stop"() : () -> ()
    %601 = vector.extract_strided_slice %494 {offsets = [0, 0, 96], sizes = [2, 8, 16], strides = [1, 1, 1]} : vector<2x8x128xbf16> to vector<2x8x16xbf16>
    %602 = vector.extract_strided_slice %496 {offsets = [0, 0, 96], sizes = [2, 8, 16], strides = [1, 1, 1]} : vector<2x8x128xbf16> to vector<2x8x16xbf16>
    "tpu.trace_start"() <{level = 10 : i32, message = "bqd,bkd->bqk"}> : () -> ()
    %cst_203 = arith.constant dense<0.000000e+00> : vector<2x8x8xf32>
    %603 = tpu.matmul %601, %602, %cst_203 {dimension_numbers = #tpu.dot_dimension_numbers<[2], [2], [1], [1], [0, 0, 0, 1, 1, 1], [0], [0]>} : vector<2x8x16xbf16>, vector<2x8x16xbf16>, vector<2x8x8xf32> -> vector<2x8x8xf32>
    "tpu.trace_stop"() : () -> ()
    %604 = arith.addf %603, %27 : vector<2x8x8xf32>
    %cst_204 = arith.constant dense<0xFF800000> : vector<2x8xf32>
    %605 = vector.multi_reduction <maximumf>, %604, %cst_204 [2] : vector<2x8x8xf32> to vector<2x8xf32>
    %606 = vector.shape_cast %605 : vector<2x8xf32> to vector<2x8x1xf32>
    %607 = vector.broadcast %606 : vector<2x8x1xf32> to vector<2x8x8xf32>
    %608 = arith.subf %604, %607 : vector<2x8x8xf32>
    %609 = math.exp %608 : vector<2x8x8xf32>
    %cst_205 = arith.constant dense<0.000000e+00> : vector<2x8xf32>
    %610 = vector.multi_reduction <add>, %609, %cst_205 [2] : vector<2x8x8xf32> to vector<2x8xf32>
    %611 = vector.shape_cast %610 : vector<2x8xf32> to vector<2x8x1xf32>
    %612 = tpu.reciprocal %611 {approx = true} : vector<2x8x1xf32> -> vector<2x8x1xf32>
    %613 = vector.broadcast %612 : vector<2x8x1xf32> to vector<2x8x8xf32>
    %614 = arith.mulf %609, %613 : vector<2x8x8xf32>
    %615 = arith.truncf %614 : vector<2x8x8xf32> to vector<2x8x8xbf16>
    %616 = vector.extract_strided_slice %498 {offsets = [0, 0, 96], sizes = [2, 8, 16], strides = [1, 1, 1]} : vector<2x8x128xbf16> to vector<2x8x16xbf16>
    "tpu.trace_start"() <{level = 10 : i32, message = "bqk,bkd->bqd"}> : () -> ()
    %cst_206 = arith.constant dense<0.000000e+00> : vector<2x8x16xf32>
    %617 = tpu.matmul %615, %616, %cst_206 {dimension_numbers = #tpu.dot_dimension_numbers<[2], [1], [1], [2], [0, 0, 0, 1, 1, 2], [0], [0]>} : vector<2x8x8xbf16>, vector<2x8x16xbf16>, vector<2x8x16xf32> -> vector<2x8x16xf32>
    "tpu.trace_stop"() : () -> ()
    %618 = vector.extract_strided_slice %494 {offsets = [0, 0, 112], sizes = [2, 8, 16], strides = [1, 1, 1]} : vector<2x8x128xbf16> to vector<2x8x16xbf16>
    %619 = vector.extract_strided_slice %496 {offsets = [0, 0, 112], sizes = [2, 8, 16], strides = [1, 1, 1]} : vector<2x8x128xbf16> to vector<2x8x16xbf16>
    "tpu.trace_start"() <{level = 10 : i32, message = "bqd,bkd->bqk"}> : () -> ()
    %cst_207 = arith.constant dense<0.000000e+00> : vector<2x8x8xf32>
    %620 = tpu.matmul %618, %619, %cst_207 {dimension_numbers = #tpu.dot_dimension_numbers<[2], [2], [1], [1], [0, 0, 0, 1, 1, 1], [0], [0]>} : vector<2x8x16xbf16>, vector<2x8x16xbf16>, vector<2x8x8xf32> -> vector<2x8x8xf32>
    "tpu.trace_stop"() : () -> ()
    %621 = arith.addf %620, %27 : vector<2x8x8xf32>
    %cst_208 = arith.constant dense<0xFF800000> : vector<2x8xf32>
    %622 = vector.multi_reduction <maximumf>, %621, %cst_208 [2] : vector<2x8x8xf32> to vector<2x8xf32>
    %623 = vector.shape_cast %622 : vector<2x8xf32> to vector<2x8x1xf32>
    %624 = vector.broadcast %623 : vector<2x8x1xf32> to vector<2x8x8xf32>
    %625 = arith.subf %621, %624 : vector<2x8x8xf32>
    %626 = math.exp %625 : vector<2x8x8xf32>
    %cst_209 = arith.constant dense<0.000000e+00> : vector<2x8xf32>
    %627 = vector.multi_reduction <add>, %626, %cst_209 [2] : vector<2x8x8xf32> to vector<2x8xf32>
    %628 = vector.shape_cast %627 : vector<2x8xf32> to vector<2x8x1xf32>
    %629 = tpu.reciprocal %628 {approx = true} : vector<2x8x1xf32> -> vector<2x8x1xf32>
    %630 = vector.broadcast %629 : vector<2x8x1xf32> to vector<2x8x8xf32>
    %631 = arith.mulf %626, %630 : vector<2x8x8xf32>
    %632 = arith.truncf %631 : vector<2x8x8xf32> to vector<2x8x8xbf16>
    %633 = vector.extract_strided_slice %498 {offsets = [0, 0, 112], sizes = [2, 8, 16], strides = [1, 1, 1]} : vector<2x8x128xbf16> to vector<2x8x16xbf16>
    "tpu.trace_start"() <{level = 10 : i32, message = "bqk,bkd->bqd"}> : () -> ()
    %cst_210 = arith.constant dense<0.000000e+00> : vector<2x8x16xf32>
    %634 = tpu.matmul %632, %633, %cst_210 {dimension_numbers = #tpu.dot_dimension_numbers<[2], [1], [1], [2], [0, 0, 0, 1, 1, 2], [0], [0]>} : vector<2x8x8xbf16>, vector<2x8x16xbf16>, vector<2x8x16xf32> -> vector<2x8x16xf32>
    "tpu.trace_stop"() : () -> ()
    %635 = tpu.concatenate %515, %532, %549, %566, %583, %600, %617, %634 in 2 : vector<2x8x16xf32>, vector<2x8x16xf32>, vector<2x8x16xf32>, vector<2x8x16xf32>, vector<2x8x16xf32>, vector<2x8x16xf32>, vector<2x8x16xf32>, vector<2x8x16xf32> -> vector<2x8x128xf32>
    %636 = vector.shape_cast %635 : vector<2x8x128xf32> to vector<16x128xf32>
    %637 = arith.truncf %636 : vector<16x128xf32> to vector<16x128xbf16>
    %cst_211 = arith.constant dense<0.000000e+00> : vector<16x128xf32>
    %638 = tpu.matmul %637, %490, %cst_211 {dimension_numbers = #tpu.dot_dimension_numbers<[1], [0], [0], [1], [0, 0, 1, 1], [], []>} : vector<16x128xbf16>, vector<128x128xbf16>, vector<16x128xf32> -> vector<16x128xf32>
    %639 = vector.broadcast %492 : vector<1x128xf32> to vector<16x128xf32>
    %640 = arith.addf %638, %639 : vector<16x128xf32>
    %641 = arith.addf %471, %640 : vector<16x128xf32>
    %642 = vector.extract_strided_slice %473 {offsets = [0, 0], sizes = [1, 128], strides = [1, 1]} : vector<3x128xf32> to vector<1x128xf32>
    %643 = vector.extract_strided_slice %475 {offsets = [0, 0], sizes = [1, 128], strides = [1, 1]} : vector<3x128xf32> to vector<1x128xf32>
    %cst_212 = arith.constant dense<0.000000e+00> : vector<16xf32>
    %644 = vector.multi_reduction <add>, %641, %cst_212 [1] : vector<16x128xf32> to vector<16xf32>
    %645 = vector.shape_cast %644 : vector<16xf32> to vector<16x1xf32>
    %cst_213 = arith.constant 1.280000e+02 : f32
    %646 = vector.broadcast %cst_213 : f32 to vector<16x1xf32>
    %647 = arith.divf %645, %646 : vector<16x1xf32>
    %648 = vector.broadcast %647 : vector<16x1xf32> to vector<16x128xf32>
    %649 = arith.subf %641, %648 : vector<16x128xf32>
    %650 = arith.mulf %649, %649 : vector<16x128xf32>
    %cst_214 = arith.constant dense<0.000000e+00> : vector<16xf32>
    %651 = vector.multi_reduction <add>, %650, %cst_214 [1] : vector<16x128xf32> to vector<16xf32>
    %652 = vector.shape_cast %651 : vector<16xf32> to vector<16x1xf32>
    %cst_215 = arith.constant 1.280000e+02 : f32
    %653 = vector.broadcast %cst_215 : f32 to vector<16x1xf32>
    %654 = arith.divf %652, %653 : vector<16x1xf32>
    %655 = vector.broadcast %647 : vector<16x1xf32> to vector<16x128xf32>
    %656 = arith.subf %641, %655 : vector<16x128xf32>
    %cst_216 = arith.constant 9.99999974E-6 : f32
    %657 = vector.broadcast %cst_216 : f32 to vector<16x1xf32>
    %658 = arith.addf %654, %657 : vector<16x1xf32>
    %659 = math.rsqrt %658 : vector<16x1xf32>
    %660 = vector.broadcast %659 : vector<16x1xf32> to vector<16x128xf32>
    %661 = arith.mulf %656, %660 : vector<16x128xf32>
    %662 = vector.broadcast %642 : vector<1x128xf32> to vector<16x128xf32>
    %663 = arith.mulf %661, %662 : vector<16x128xf32>
    %664 = vector.broadcast %643 : vector<1x128xf32> to vector<16x128xf32>
    %665 = arith.addf %663, %664 : vector<16x128xf32>
    %666 = arith.truncf %665 : vector<16x128xf32> to vector<16x128xbf16>
    %c1_217 = arith.constant 1 : index
    %c0_218 = arith.constant 0 : index
    %c0_219 = arith.constant 0 : index
    %667 = vector.load %arg13[%c1_217, %c0_218, %c0_219] : memref<2x128x128xbf16, #tpu.memory_space<vmem>>, vector<1x128x128xbf16>
    %668 = vector.shape_cast %667 : vector<1x128x128xbf16> to vector<128x128xbf16>
    %cst_220 = arith.constant dense<0.000000e+00> : vector<16x128xf32>
    %669 = tpu.matmul %666, %668, %cst_220 {dimension_numbers = #tpu.dot_dimension_numbers<[1], [0], [0], [1], [0, 0, 1, 1], [], []>} : vector<16x128xbf16>, vector<128x128xbf16>, vector<16x128xf32> -> vector<16x128xf32>
    %c1_221 = arith.constant 1 : index
    %c0_222 = arith.constant 0 : index
    %c0_223 = arith.constant 0 : index
    %670 = vector.load %arg14[%c1_221, %c0_222, %c0_223] : memref<2x1x128xf32, #tpu.memory_space<vmem>>, vector<1x1x128xf32>
    %671 = vector.shape_cast %670 : vector<1x1x128xf32> to vector<1x128xf32>
    %672 = vector.broadcast %671 : vector<1x128xf32> to vector<16x128xf32>
    %673 = arith.addf %669, %672 : vector<16x128xf32>
    %cst_224 = arith.constant 2.500000e-01 : f32
    %674 = vector.broadcast %cst_224 : f32 to vector<16x128xf32>
    %675 = arith.mulf %673, %674 : vector<16x128xf32>
    %c1_225 = arith.constant 1 : index
    %c0_226 = arith.constant 0 : index
    %c0_227 = arith.constant 0 : index
    %676 = vector.load %arg15[%c1_225, %c0_226, %c0_227] : memref<2x128x256xbf16, #tpu.memory_space<vmem>>, vector<1x128x256xbf16>
    %677 = vector.shape_cast %676 : vector<1x128x256xbf16> to vector<128x256xbf16>
    %cst_228 = arith.constant dense<0.000000e+00> : vector<16x256xf32>
    %678 = tpu.matmul %30, %677, %cst_228 {dimension_numbers = #tpu.dot_dimension_numbers<[1], [0], [0], [1], [0, 0, 1, 1], [], []>} : vector<16x128xbf16>, vector<128x256xbf16>, vector<16x256xf32> -> vector<16x256xf32>
    %c1_229 = arith.constant 1 : index
    %c0_230 = arith.constant 0 : index
    %c0_231 = arith.constant 0 : index
    %679 = vector.load %arg16[%c1_229, %c0_230, %c0_231] : memref<2x1x256xf32, #tpu.memory_space<vmem>>, vector<1x1x256xf32>
    %680 = vector.shape_cast %679 : vector<1x1x256xf32> to vector<1x256xf32>
    %681 = vector.broadcast %680 : vector<1x256xf32> to vector<16x256xf32>
    %682 = arith.addf %678, %681 : vector<16x256xf32>
    %683 = vector.extract_strided_slice %682 {offsets = [0, 0], sizes = [16, 128], strides = [1, 1]} : vector<16x256xf32> to vector<16x128xf32>
    %684 = vector.extract_strided_slice %682 {offsets = [0, 128], sizes = [16, 128], strides = [1, 1]} : vector<16x256xf32> to vector<16x128xf32>
    %c1_232 = arith.constant 1 : index
    %c0_233 = arith.constant 0 : index
    %c0_234 = arith.constant 0 : index
    %685 = vector.load %arg17[%c1_232, %c0_233, %c0_234] : memref<2x128x128xbf16, #tpu.memory_space<vmem>>, vector<1x128x128xbf16>
    %686 = vector.shape_cast %685 : vector<1x128x128xbf16> to vector<128x128xbf16>
    %c1_235 = arith.constant 1 : index
    %c0_236 = arith.constant 0 : index
    %c0_237 = arith.constant 0 : index
    %687 = vector.load %arg18[%c1_235, %c0_236, %c0_237] : memref<2x1x128xf32, #tpu.memory_space<vmem>>, vector<1x1x128xf32>
    %688 = vector.shape_cast %687 : vector<1x1x128xf32> to vector<1x128xf32>
    %689 = vector.shape_cast %675 : vector<16x128xf32> to vector<2x8x128xf32>
    %690 = arith.truncf %689 : vector<2x8x128xf32> to vector<2x8x128xbf16>
    %691 = vector.shape_cast %683 : vector<16x128xf32> to vector<2x8x128xf32>
    %692 = arith.truncf %691 : vector<2x8x128xf32> to vector<2x8x128xbf16>
    %693 = vector.shape_cast %684 : vector<16x128xf32> to vector<2x8x128xf32>
    %694 = arith.truncf %693 : vector<2x8x128xf32> to vector<2x8x128xbf16>
    %695 = vector.extract_strided_slice %690 {offsets = [0, 0, 0], sizes = [2, 8, 16], strides = [1, 1, 1]} : vector<2x8x128xbf16> to vector<2x8x16xbf16>
    %696 = vector.extract_strided_slice %692 {offsets = [0, 0, 0], sizes = [2, 8, 16], strides = [1, 1, 1]} : vector<2x8x128xbf16> to vector<2x8x16xbf16>
    "tpu.trace_start"() <{level = 10 : i32, message = "bqd,bkd->bqk"}> : () -> ()
    %cst_238 = arith.constant dense<0.000000e+00> : vector<2x8x8xf32>
    %697 = tpu.matmul %695, %696, %cst_238 {dimension_numbers = #tpu.dot_dimension_numbers<[2], [2], [1], [1], [0, 0, 0, 1, 1, 1], [0], [0]>} : vector<2x8x16xbf16>, vector<2x8x16xbf16>, vector<2x8x8xf32> -> vector<2x8x8xf32>
    "tpu.trace_stop"() : () -> ()
    %698 = vector.broadcast %29 : vector<2x1x8xf32> to vector<2x8x8xf32>
    %699 = arith.addf %697, %698 : vector<2x8x8xf32>
    %cst_239 = arith.constant dense<0xFF800000> : vector<2x8xf32>
    %700 = vector.multi_reduction <maximumf>, %699, %cst_239 [2] : vector<2x8x8xf32> to vector<2x8xf32>
    %701 = vector.shape_cast %700 : vector<2x8xf32> to vector<2x8x1xf32>
    %702 = vector.broadcast %701 : vector<2x8x1xf32> to vector<2x8x8xf32>
    %703 = arith.subf %699, %702 : vector<2x8x8xf32>
    %704 = math.exp %703 : vector<2x8x8xf32>
    %cst_240 = arith.constant dense<0.000000e+00> : vector<2x8xf32>
    %705 = vector.multi_reduction <add>, %704, %cst_240 [2] : vector<2x8x8xf32> to vector<2x8xf32>
    %706 = vector.shape_cast %705 : vector<2x8xf32> to vector<2x8x1xf32>
    %707 = tpu.reciprocal %706 {approx = true} : vector<2x8x1xf32> -> vector<2x8x1xf32>
    %708 = vector.broadcast %707 : vector<2x8x1xf32> to vector<2x8x8xf32>
    %709 = arith.mulf %704, %708 : vector<2x8x8xf32>
    %710 = arith.truncf %709 : vector<2x8x8xf32> to vector<2x8x8xbf16>
    %711 = vector.extract_strided_slice %694 {offsets = [0, 0, 0], sizes = [2, 8, 16], strides = [1, 1, 1]} : vector<2x8x128xbf16> to vector<2x8x16xbf16>
    "tpu.trace_start"() <{level = 10 : i32, message = "bqk,bkd->bqd"}> : () -> ()
    %cst_241 = arith.constant dense<0.000000e+00> : vector<2x8x16xf32>
    %712 = tpu.matmul %710, %711, %cst_241 {dimension_numbers = #tpu.dot_dimension_numbers<[2], [1], [1], [2], [0, 0, 0, 1, 1, 2], [0], [0]>} : vector<2x8x8xbf16>, vector<2x8x16xbf16>, vector<2x8x16xf32> -> vector<2x8x16xf32>
    "tpu.trace_stop"() : () -> ()
    %713 = vector.extract_strided_slice %690 {offsets = [0, 0, 16], sizes = [2, 8, 16], strides = [1, 1, 1]} : vector<2x8x128xbf16> to vector<2x8x16xbf16>
    %714 = vector.extract_strided_slice %692 {offsets = [0, 0, 16], sizes = [2, 8, 16], strides = [1, 1, 1]} : vector<2x8x128xbf16> to vector<2x8x16xbf16>
    "tpu.trace_start"() <{level = 10 : i32, message = "bqd,bkd->bqk"}> : () -> ()
    %cst_242 = arith.constant dense<0.000000e+00> : vector<2x8x8xf32>
    %715 = tpu.matmul %713, %714, %cst_242 {dimension_numbers = #tpu.dot_dimension_numbers<[2], [2], [1], [1], [0, 0, 0, 1, 1, 1], [0], [0]>} : vector<2x8x16xbf16>, vector<2x8x16xbf16>, vector<2x8x8xf32> -> vector<2x8x8xf32>
    "tpu.trace_stop"() : () -> ()
    %716 = vector.broadcast %29 : vector<2x1x8xf32> to vector<2x8x8xf32>
    %717 = arith.addf %715, %716 : vector<2x8x8xf32>
    %cst_243 = arith.constant dense<0xFF800000> : vector<2x8xf32>
    %718 = vector.multi_reduction <maximumf>, %717, %cst_243 [2] : vector<2x8x8xf32> to vector<2x8xf32>
    %719 = vector.shape_cast %718 : vector<2x8xf32> to vector<2x8x1xf32>
    %720 = vector.broadcast %719 : vector<2x8x1xf32> to vector<2x8x8xf32>
    %721 = arith.subf %717, %720 : vector<2x8x8xf32>
    %722 = math.exp %721 : vector<2x8x8xf32>
    %cst_244 = arith.constant dense<0.000000e+00> : vector<2x8xf32>
    %723 = vector.multi_reduction <add>, %722, %cst_244 [2] : vector<2x8x8xf32> to vector<2x8xf32>
    %724 = vector.shape_cast %723 : vector<2x8xf32> to vector<2x8x1xf32>
    %725 = tpu.reciprocal %724 {approx = true} : vector<2x8x1xf32> -> vector<2x8x1xf32>
    %726 = vector.broadcast %725 : vector<2x8x1xf32> to vector<2x8x8xf32>
    %727 = arith.mulf %722, %726 : vector<2x8x8xf32>
    %728 = arith.truncf %727 : vector<2x8x8xf32> to vector<2x8x8xbf16>
    %729 = vector.extract_strided_slice %694 {offsets = [0, 0, 16], sizes = [2, 8, 16], strides = [1, 1, 1]} : vector<2x8x128xbf16> to vector<2x8x16xbf16>
    "tpu.trace_start"() <{level = 10 : i32, message = "bqk,bkd->bqd"}> : () -> ()
    %cst_245 = arith.constant dense<0.000000e+00> : vector<2x8x16xf32>
    %730 = tpu.matmul %728, %729, %cst_245 {dimension_numbers = #tpu.dot_dimension_numbers<[2], [1], [1], [2], [0, 0, 0, 1, 1, 2], [0], [0]>} : vector<2x8x8xbf16>, vector<2x8x16xbf16>, vector<2x8x16xf32> -> vector<2x8x16xf32>
    "tpu.trace_stop"() : () -> ()
    %731 = vector.extract_strided_slice %690 {offsets = [0, 0, 32], sizes = [2, 8, 16], strides = [1, 1, 1]} : vector<2x8x128xbf16> to vector<2x8x16xbf16>
    %732 = vector.extract_strided_slice %692 {offsets = [0, 0, 32], sizes = [2, 8, 16], strides = [1, 1, 1]} : vector<2x8x128xbf16> to vector<2x8x16xbf16>
    "tpu.trace_start"() <{level = 10 : i32, message = "bqd,bkd->bqk"}> : () -> ()
    %cst_246 = arith.constant dense<0.000000e+00> : vector<2x8x8xf32>
    %733 = tpu.matmul %731, %732, %cst_246 {dimension_numbers = #tpu.dot_dimension_numbers<[2], [2], [1], [1], [0, 0, 0, 1, 1, 1], [0], [0]>} : vector<2x8x16xbf16>, vector<2x8x16xbf16>, vector<2x8x8xf32> -> vector<2x8x8xf32>
    "tpu.trace_stop"() : () -> ()
    %734 = vector.broadcast %29 : vector<2x1x8xf32> to vector<2x8x8xf32>
    %735 = arith.addf %733, %734 : vector<2x8x8xf32>
    %cst_247 = arith.constant dense<0xFF800000> : vector<2x8xf32>
    %736 = vector.multi_reduction <maximumf>, %735, %cst_247 [2] : vector<2x8x8xf32> to vector<2x8xf32>
    %737 = vector.shape_cast %736 : vector<2x8xf32> to vector<2x8x1xf32>
    %738 = vector.broadcast %737 : vector<2x8x1xf32> to vector<2x8x8xf32>
    %739 = arith.subf %735, %738 : vector<2x8x8xf32>
    %740 = math.exp %739 : vector<2x8x8xf32>
    %cst_248 = arith.constant dense<0.000000e+00> : vector<2x8xf32>
    %741 = vector.multi_reduction <add>, %740, %cst_248 [2] : vector<2x8x8xf32> to vector<2x8xf32>
    %742 = vector.shape_cast %741 : vector<2x8xf32> to vector<2x8x1xf32>
    %743 = tpu.reciprocal %742 {approx = true} : vector<2x8x1xf32> -> vector<2x8x1xf32>
    %744 = vector.broadcast %743 : vector<2x8x1xf32> to vector<2x8x8xf32>
    %745 = arith.mulf %740, %744 : vector<2x8x8xf32>
    %746 = arith.truncf %745 : vector<2x8x8xf32> to vector<2x8x8xbf16>
    %747 = vector.extract_strided_slice %694 {offsets = [0, 0, 32], sizes = [2, 8, 16], strides = [1, 1, 1]} : vector<2x8x128xbf16> to vector<2x8x16xbf16>
    "tpu.trace_start"() <{level = 10 : i32, message = "bqk,bkd->bqd"}> : () -> ()
    %cst_249 = arith.constant dense<0.000000e+00> : vector<2x8x16xf32>
    %748 = tpu.matmul %746, %747, %cst_249 {dimension_numbers = #tpu.dot_dimension_numbers<[2], [1], [1], [2], [0, 0, 0, 1, 1, 2], [0], [0]>} : vector<2x8x8xbf16>, vector<2x8x16xbf16>, vector<2x8x16xf32> -> vector<2x8x16xf32>
    "tpu.trace_stop"() : () -> ()
    %749 = vector.extract_strided_slice %690 {offsets = [0, 0, 48], sizes = [2, 8, 16], strides = [1, 1, 1]} : vector<2x8x128xbf16> to vector<2x8x16xbf16>
    %750 = vector.extract_strided_slice %692 {offsets = [0, 0, 48], sizes = [2, 8, 16], strides = [1, 1, 1]} : vector<2x8x128xbf16> to vector<2x8x16xbf16>
    "tpu.trace_start"() <{level = 10 : i32, message = "bqd,bkd->bqk"}> : () -> ()
    %cst_250 = arith.constant dense<0.000000e+00> : vector<2x8x8xf32>
    %751 = tpu.matmul %749, %750, %cst_250 {dimension_numbers = #tpu.dot_dimension_numbers<[2], [2], [1], [1], [0, 0, 0, 1, 1, 1], [0], [0]>} : vector<2x8x16xbf16>, vector<2x8x16xbf16>, vector<2x8x8xf32> -> vector<2x8x8xf32>
    "tpu.trace_stop"() : () -> ()
    %752 = vector.broadcast %29 : vector<2x1x8xf32> to vector<2x8x8xf32>
    %753 = arith.addf %751, %752 : vector<2x8x8xf32>
    %cst_251 = arith.constant dense<0xFF800000> : vector<2x8xf32>
    %754 = vector.multi_reduction <maximumf>, %753, %cst_251 [2] : vector<2x8x8xf32> to vector<2x8xf32>
    %755 = vector.shape_cast %754 : vector<2x8xf32> to vector<2x8x1xf32>
    %756 = vector.broadcast %755 : vector<2x8x1xf32> to vector<2x8x8xf32>
    %757 = arith.subf %753, %756 : vector<2x8x8xf32>
    %758 = math.exp %757 : vector<2x8x8xf32>
    %cst_252 = arith.constant dense<0.000000e+00> : vector<2x8xf32>
    %759 = vector.multi_reduction <add>, %758, %cst_252 [2] : vector<2x8x8xf32> to vector<2x8xf32>
    %760 = vector.shape_cast %759 : vector<2x8xf32> to vector<2x8x1xf32>
    %761 = tpu.reciprocal %760 {approx = true} : vector<2x8x1xf32> -> vector<2x8x1xf32>
    %762 = vector.broadcast %761 : vector<2x8x1xf32> to vector<2x8x8xf32>
    %763 = arith.mulf %758, %762 : vector<2x8x8xf32>
    %764 = arith.truncf %763 : vector<2x8x8xf32> to vector<2x8x8xbf16>
    %765 = vector.extract_strided_slice %694 {offsets = [0, 0, 48], sizes = [2, 8, 16], strides = [1, 1, 1]} : vector<2x8x128xbf16> to vector<2x8x16xbf16>
    "tpu.trace_start"() <{level = 10 : i32, message = "bqk,bkd->bqd"}> : () -> ()
    %cst_253 = arith.constant dense<0.000000e+00> : vector<2x8x16xf32>
    %766 = tpu.matmul %764, %765, %cst_253 {dimension_numbers = #tpu.dot_dimension_numbers<[2], [1], [1], [2], [0, 0, 0, 1, 1, 2], [0], [0]>} : vector<2x8x8xbf16>, vector<2x8x16xbf16>, vector<2x8x16xf32> -> vector<2x8x16xf32>
    "tpu.trace_stop"() : () -> ()
    %767 = vector.extract_strided_slice %690 {offsets = [0, 0, 64], sizes = [2, 8, 16], strides = [1, 1, 1]} : vector<2x8x128xbf16> to vector<2x8x16xbf16>
    %768 = vector.extract_strided_slice %692 {offsets = [0, 0, 64], sizes = [2, 8, 16], strides = [1, 1, 1]} : vector<2x8x128xbf16> to vector<2x8x16xbf16>
    "tpu.trace_start"() <{level = 10 : i32, message = "bqd,bkd->bqk"}> : () -> ()
    %cst_254 = arith.constant dense<0.000000e+00> : vector<2x8x8xf32>
    %769 = tpu.matmul %767, %768, %cst_254 {dimension_numbers = #tpu.dot_dimension_numbers<[2], [2], [1], [1], [0, 0, 0, 1, 1, 1], [0], [0]>} : vector<2x8x16xbf16>, vector<2x8x16xbf16>, vector<2x8x8xf32> -> vector<2x8x8xf32>
    "tpu.trace_stop"() : () -> ()
    %770 = vector.broadcast %29 : vector<2x1x8xf32> to vector<2x8x8xf32>
    %771 = arith.addf %769, %770 : vector<2x8x8xf32>
    %cst_255 = arith.constant dense<0xFF800000> : vector<2x8xf32>
    %772 = vector.multi_reduction <maximumf>, %771, %cst_255 [2] : vector<2x8x8xf32> to vector<2x8xf32>
    %773 = vector.shape_cast %772 : vector<2x8xf32> to vector<2x8x1xf32>
    %774 = vector.broadcast %773 : vector<2x8x1xf32> to vector<2x8x8xf32>
    %775 = arith.subf %771, %774 : vector<2x8x8xf32>
    %776 = math.exp %775 : vector<2x8x8xf32>
    %cst_256 = arith.constant dense<0.000000e+00> : vector<2x8xf32>
    %777 = vector.multi_reduction <add>, %776, %cst_256 [2] : vector<2x8x8xf32> to vector<2x8xf32>
    %778 = vector.shape_cast %777 : vector<2x8xf32> to vector<2x8x1xf32>
    %779 = tpu.reciprocal %778 {approx = true} : vector<2x8x1xf32> -> vector<2x8x1xf32>
    %780 = vector.broadcast %779 : vector<2x8x1xf32> to vector<2x8x8xf32>
    %781 = arith.mulf %776, %780 : vector<2x8x8xf32>
    %782 = arith.truncf %781 : vector<2x8x8xf32> to vector<2x8x8xbf16>
    %783 = vector.extract_strided_slice %694 {offsets = [0, 0, 64], sizes = [2, 8, 16], strides = [1, 1, 1]} : vector<2x8x128xbf16> to vector<2x8x16xbf16>
    "tpu.trace_start"() <{level = 10 : i32, message = "bqk,bkd->bqd"}> : () -> ()
    %cst_257 = arith.constant dense<0.000000e+00> : vector<2x8x16xf32>
    %784 = tpu.matmul %782, %783, %cst_257 {dimension_numbers = #tpu.dot_dimension_numbers<[2], [1], [1], [2], [0, 0, 0, 1, 1, 2], [0], [0]>} : vector<2x8x8xbf16>, vector<2x8x16xbf16>, vector<2x8x16xf32> -> vector<2x8x16xf32>
    "tpu.trace_stop"() : () -> ()
    %785 = vector.extract_strided_slice %690 {offsets = [0, 0, 80], sizes = [2, 8, 16], strides = [1, 1, 1]} : vector<2x8x128xbf16> to vector<2x8x16xbf16>
    %786 = vector.extract_strided_slice %692 {offsets = [0, 0, 80], sizes = [2, 8, 16], strides = [1, 1, 1]} : vector<2x8x128xbf16> to vector<2x8x16xbf16>
    "tpu.trace_start"() <{level = 10 : i32, message = "bqd,bkd->bqk"}> : () -> ()
    %cst_258 = arith.constant dense<0.000000e+00> : vector<2x8x8xf32>
    %787 = tpu.matmul %785, %786, %cst_258 {dimension_numbers = #tpu.dot_dimension_numbers<[2], [2], [1], [1], [0, 0, 0, 1, 1, 1], [0], [0]>} : vector<2x8x16xbf16>, vector<2x8x16xbf16>, vector<2x8x8xf32> -> vector<2x8x8xf32>
    "tpu.trace_stop"() : () -> ()
    %788 = vector.broadcast %29 : vector<2x1x8xf32> to vector<2x8x8xf32>
    %789 = arith.addf %787, %788 : vector<2x8x8xf32>
    %cst_259 = arith.constant dense<0xFF800000> : vector<2x8xf32>
    %790 = vector.multi_reduction <maximumf>, %789, %cst_259 [2] : vector<2x8x8xf32> to vector<2x8xf32>
    %791 = vector.shape_cast %790 : vector<2x8xf32> to vector<2x8x1xf32>
    %792 = vector.broadcast %791 : vector<2x8x1xf32> to vector<2x8x8xf32>
    %793 = arith.subf %789, %792 : vector<2x8x8xf32>
    %794 = math.exp %793 : vector<2x8x8xf32>
    %cst_260 = arith.constant dense<0.000000e+00> : vector<2x8xf32>
    %795 = vector.multi_reduction <add>, %794, %cst_260 [2] : vector<2x8x8xf32> to vector<2x8xf32>
    %796 = vector.shape_cast %795 : vector<2x8xf32> to vector<2x8x1xf32>
    %797 = tpu.reciprocal %796 {approx = true} : vector<2x8x1xf32> -> vector<2x8x1xf32>
    %798 = vector.broadcast %797 : vector<2x8x1xf32> to vector<2x8x8xf32>
    %799 = arith.mulf %794, %798 : vector<2x8x8xf32>
    %800 = arith.truncf %799 : vector<2x8x8xf32> to vector<2x8x8xbf16>
    %801 = vector.extract_strided_slice %694 {offsets = [0, 0, 80], sizes = [2, 8, 16], strides = [1, 1, 1]} : vector<2x8x128xbf16> to vector<2x8x16xbf16>
    "tpu.trace_start"() <{level = 10 : i32, message = "bqk,bkd->bqd"}> : () -> ()
    %cst_261 = arith.constant dense<0.000000e+00> : vector<2x8x16xf32>
    %802 = tpu.matmul %800, %801, %cst_261 {dimension_numbers = #tpu.dot_dimension_numbers<[2], [1], [1], [2], [0, 0, 0, 1, 1, 2], [0], [0]>} : vector<2x8x8xbf16>, vector<2x8x16xbf16>, vector<2x8x16xf32> -> vector<2x8x16xf32>
    "tpu.trace_stop"() : () -> ()
    %803 = vector.extract_strided_slice %690 {offsets = [0, 0, 96], sizes = [2, 8, 16], strides = [1, 1, 1]} : vector<2x8x128xbf16> to vector<2x8x16xbf16>
    %804 = vector.extract_strided_slice %692 {offsets = [0, 0, 96], sizes = [2, 8, 16], strides = [1, 1, 1]} : vector<2x8x128xbf16> to vector<2x8x16xbf16>
    "tpu.trace_start"() <{level = 10 : i32, message = "bqd,bkd->bqk"}> : () -> ()
    %cst_262 = arith.constant dense<0.000000e+00> : vector<2x8x8xf32>
    %805 = tpu.matmul %803, %804, %cst_262 {dimension_numbers = #tpu.dot_dimension_numbers<[2], [2], [1], [1], [0, 0, 0, 1, 1, 1], [0], [0]>} : vector<2x8x16xbf16>, vector<2x8x16xbf16>, vector<2x8x8xf32> -> vector<2x8x8xf32>
    "tpu.trace_stop"() : () -> ()
    %806 = vector.broadcast %29 : vector<2x1x8xf32> to vector<2x8x8xf32>
    %807 = arith.addf %805, %806 : vector<2x8x8xf32>
    %cst_263 = arith.constant dense<0xFF800000> : vector<2x8xf32>
    %808 = vector.multi_reduction <maximumf>, %807, %cst_263 [2] : vector<2x8x8xf32> to vector<2x8xf32>
    %809 = vector.shape_cast %808 : vector<2x8xf32> to vector<2x8x1xf32>
    %810 = vector.broadcast %809 : vector<2x8x1xf32> to vector<2x8x8xf32>
    %811 = arith.subf %807, %810 : vector<2x8x8xf32>
    %812 = math.exp %811 : vector<2x8x8xf32>
    %cst_264 = arith.constant dense<0.000000e+00> : vector<2x8xf32>
    %813 = vector.multi_reduction <add>, %812, %cst_264 [2] : vector<2x8x8xf32> to vector<2x8xf32>
    %814 = vector.shape_cast %813 : vector<2x8xf32> to vector<2x8x1xf32>
    %815 = tpu.reciprocal %814 {approx = true} : vector<2x8x1xf32> -> vector<2x8x1xf32>
    %816 = vector.broadcast %815 : vector<2x8x1xf32> to vector<2x8x8xf32>
    %817 = arith.mulf %812, %816 : vector<2x8x8xf32>
    %818 = arith.truncf %817 : vector<2x8x8xf32> to vector<2x8x8xbf16>
    %819 = vector.extract_strided_slice %694 {offsets = [0, 0, 96], sizes = [2, 8, 16], strides = [1, 1, 1]} : vector<2x8x128xbf16> to vector<2x8x16xbf16>
    "tpu.trace_start"() <{level = 10 : i32, message = "bqk,bkd->bqd"}> : () -> ()
    %cst_265 = arith.constant dense<0.000000e+00> : vector<2x8x16xf32>
    %820 = tpu.matmul %818, %819, %cst_265 {dimension_numbers = #tpu.dot_dimension_numbers<[2], [1], [1], [2], [0, 0, 0, 1, 1, 2], [0], [0]>} : vector<2x8x8xbf16>, vector<2x8x16xbf16>, vector<2x8x16xf32> -> vector<2x8x16xf32>
    "tpu.trace_stop"() : () -> ()
    %821 = vector.extract_strided_slice %690 {offsets = [0, 0, 112], sizes = [2, 8, 16], strides = [1, 1, 1]} : vector<2x8x128xbf16> to vector<2x8x16xbf16>
    %822 = vector.extract_strided_slice %692 {offsets = [0, 0, 112], sizes = [2, 8, 16], strides = [1, 1, 1]} : vector<2x8x128xbf16> to vector<2x8x16xbf16>
    "tpu.trace_start"() <{level = 10 : i32, message = "bqd,bkd->bqk"}> : () -> ()
    %cst_266 = arith.constant dense<0.000000e+00> : vector<2x8x8xf32>
    %823 = tpu.matmul %821, %822, %cst_266 {dimension_numbers = #tpu.dot_dimension_numbers<[2], [2], [1], [1], [0, 0, 0, 1, 1, 1], [0], [0]>} : vector<2x8x16xbf16>, vector<2x8x16xbf16>, vector<2x8x8xf32> -> vector<2x8x8xf32>
    "tpu.trace_stop"() : () -> ()
    %824 = vector.broadcast %29 : vector<2x1x8xf32> to vector<2x8x8xf32>
    %825 = arith.addf %823, %824 : vector<2x8x8xf32>
    %cst_267 = arith.constant dense<0xFF800000> : vector<2x8xf32>
    %826 = vector.multi_reduction <maximumf>, %825, %cst_267 [2] : vector<2x8x8xf32> to vector<2x8xf32>
    %827 = vector.shape_cast %826 : vector<2x8xf32> to vector<2x8x1xf32>
    %828 = vector.broadcast %827 : vector<2x8x1xf32> to vector<2x8x8xf32>
    %829 = arith.subf %825, %828 : vector<2x8x8xf32>
    %830 = math.exp %829 : vector<2x8x8xf32>
    %cst_268 = arith.constant dense<0.000000e+00> : vector<2x8xf32>
    %831 = vector.multi_reduction <add>, %830, %cst_268 [2] : vector<2x8x8xf32> to vector<2x8xf32>
    %832 = vector.shape_cast %831 : vector<2x8xf32> to vector<2x8x1xf32>
    %833 = tpu.reciprocal %832 {approx = true} : vector<2x8x1xf32> -> vector<2x8x1xf32>
    %834 = vector.broadcast %833 : vector<2x8x1xf32> to vector<2x8x8xf32>
    %835 = arith.mulf %830, %834 : vector<2x8x8xf32>
    %836 = arith.truncf %835 : vector<2x8x8xf32> to vector<2x8x8xbf16>
    %837 = vector.extract_strided_slice %694 {offsets = [0, 0, 112], sizes = [2, 8, 16], strides = [1, 1, 1]} : vector<2x8x128xbf16> to vector<2x8x16xbf16>
    "tpu.trace_start"() <{level = 10 : i32, message = "bqk,bkd->bqd"}> : () -> ()
    %cst_269 = arith.constant dense<0.000000e+00> : vector<2x8x16xf32>
    %838 = tpu.matmul %836, %837, %cst_269 {dimension_numbers = #tpu.dot_dimension_numbers<[2], [1], [1], [2], [0, 0, 0, 1, 1, 2], [0], [0]>} : vector<2x8x8xbf16>, vector<2x8x16xbf16>, vector<2x8x16xf32> -> vector<2x8x16xf32>
    "tpu.trace_stop"() : () -> ()
    %839 = tpu.concatenate %712, %730, %748, %766, %784, %802, %820, %838 in 2 : vector<2x8x16xf32>, vector<2x8x16xf32>, vector<2x8x16xf32>, vector<2x8x16xf32>, vector<2x8x16xf32>, vector<2x8x16xf32>, vector<2x8x16xf32>, vector<2x8x16xf32> -> vector<2x8x128xf32>
    %840 = vector.shape_cast %839 : vector<2x8x128xf32> to vector<16x128xf32>
    %841 = arith.truncf %840 : vector<16x128xf32> to vector<16x128xbf16>
    %cst_270 = arith.constant dense<0.000000e+00> : vector<16x128xf32>
    %842 = tpu.matmul %841, %686, %cst_270 {dimension_numbers = #tpu.dot_dimension_numbers<[1], [0], [0], [1], [0, 0, 1, 1], [], []>} : vector<16x128xbf16>, vector<128x128xbf16>, vector<16x128xf32> -> vector<16x128xf32>
    %843 = vector.broadcast %688 : vector<1x128xf32> to vector<16x128xf32>
    %844 = arith.addf %842, %843 : vector<16x128xf32>
    %845 = arith.addf %665, %844 : vector<16x128xf32>
    %846 = vector.extract_strided_slice %473 {offsets = [1, 0], sizes = [1, 128], strides = [1, 1]} : vector<3x128xf32> to vector<1x128xf32>
    %847 = vector.extract_strided_slice %475 {offsets = [1, 0], sizes = [1, 128], strides = [1, 1]} : vector<3x128xf32> to vector<1x128xf32>
    %cst_271 = arith.constant dense<0.000000e+00> : vector<16xf32>
    %848 = vector.multi_reduction <add>, %845, %cst_271 [1] : vector<16x128xf32> to vector<16xf32>
    %849 = vector.shape_cast %848 : vector<16xf32> to vector<16x1xf32>
    %cst_272 = arith.constant 1.280000e+02 : f32
    %850 = vector.broadcast %cst_272 : f32 to vector<16x1xf32>
    %851 = arith.divf %849, %850 : vector<16x1xf32>
    %852 = vector.broadcast %851 : vector<16x1xf32> to vector<16x128xf32>
    %853 = arith.subf %845, %852 : vector<16x128xf32>
    %854 = arith.mulf %853, %853 : vector<16x128xf32>
    %cst_273 = arith.constant dense<0.000000e+00> : vector<16xf32>
    %855 = vector.multi_reduction <add>, %854, %cst_273 [1] : vector<16x128xf32> to vector<16xf32>
    %856 = vector.shape_cast %855 : vector<16xf32> to vector<16x1xf32>
    %cst_274 = arith.constant 1.280000e+02 : f32
    %857 = vector.broadcast %cst_274 : f32 to vector<16x1xf32>
    %858 = arith.divf %856, %857 : vector<16x1xf32>
    %859 = vector.broadcast %851 : vector<16x1xf32> to vector<16x128xf32>
    %860 = arith.subf %845, %859 : vector<16x128xf32>
    %cst_275 = arith.constant 9.99999974E-6 : f32
    %861 = vector.broadcast %cst_275 : f32 to vector<16x1xf32>
    %862 = arith.addf %858, %861 : vector<16x1xf32>
    %863 = math.rsqrt %862 : vector<16x1xf32>
    %864 = vector.broadcast %863 : vector<16x1xf32> to vector<16x128xf32>
    %865 = arith.mulf %860, %864 : vector<16x128xf32>
    %866 = vector.broadcast %846 : vector<1x128xf32> to vector<16x128xf32>
    %867 = arith.mulf %865, %866 : vector<16x128xf32>
    %868 = vector.broadcast %847 : vector<1x128xf32> to vector<16x128xf32>
    %869 = arith.addf %867, %868 : vector<16x128xf32>
    %870 = arith.truncf %869 : vector<16x128xf32> to vector<16x128xbf16>
    %c1_276 = arith.constant 1 : index
    %c0_277 = arith.constant 0 : index
    %c0_278 = arith.constant 0 : index
    %871 = vector.load %arg21[%c1_276, %c0_277, %c0_278] : memref<2x128x512xbf16, #tpu.memory_space<vmem>>, vector<1x128x512xbf16>
    %872 = vector.shape_cast %871 : vector<1x128x512xbf16> to vector<128x512xbf16>
    %cst_279 = arith.constant dense<0.000000e+00> : vector<16x512xf32>
    %873 = tpu.matmul %870, %872, %cst_279 {dimension_numbers = #tpu.dot_dimension_numbers<[1], [0], [0], [1], [0, 0, 1, 1], [], []>} : vector<16x128xbf16>, vector<128x512xbf16>, vector<16x512xf32> -> vector<16x512xf32>
    %c1_280 = arith.constant 1 : index
    %c0_281 = arith.constant 0 : index
    %c0_282 = arith.constant 0 : index
    %874 = vector.load %arg22[%c1_280, %c0_281, %c0_282] : memref<2x1x512xf32, #tpu.memory_space<vmem>>, vector<1x1x512xf32>
    %875 = vector.shape_cast %874 : vector<1x1x512xf32> to vector<1x512xf32>
    %876 = vector.broadcast %875 : vector<1x512xf32> to vector<16x512xf32>
    %877 = arith.addf %873, %876 : vector<16x512xf32>
    %cst_283 = arith.constant 0.000000e+00 : f32
    %878 = vector.broadcast %cst_283 : f32 to vector<16x512xf32>
    %879 = arith.maximumf %877, %878 : vector<16x512xf32>
    %880 = arith.truncf %879 : vector<16x512xf32> to vector<16x512xbf16>
    %c1_284 = arith.constant 1 : index
    %c0_285 = arith.constant 0 : index
    %c0_286 = arith.constant 0 : index
    %881 = vector.load %arg23[%c1_284, %c0_285, %c0_286] : memref<2x512x128xbf16, #tpu.memory_space<vmem>>, vector<1x512x128xbf16>
    %882 = vector.shape_cast %881 : vector<1x512x128xbf16> to vector<512x128xbf16>
    %cst_287 = arith.constant dense<0.000000e+00> : vector<16x128xf32>
    %883 = tpu.matmul %880, %882, %cst_287 {dimension_numbers = #tpu.dot_dimension_numbers<[1], [0], [0], [1], [0, 0, 1, 1], [], []>} : vector<16x512xbf16>, vector<512x128xbf16>, vector<16x128xf32> -> vector<16x128xf32>
    %c1_288 = arith.constant 1 : index
    %c0_289 = arith.constant 0 : index
    %c0_290 = arith.constant 0 : index
    %884 = vector.load %arg24[%c1_288, %c0_289, %c0_290] : memref<2x1x128xf32, #tpu.memory_space<vmem>>, vector<1x1x128xf32>
    %885 = vector.shape_cast %884 : vector<1x1x128xf32> to vector<1x128xf32>
    %886 = vector.broadcast %885 : vector<1x128xf32> to vector<16x128xf32>
    %887 = arith.addf %883, %886 : vector<16x128xf32>
    %888 = arith.addf %869, %887 : vector<16x128xf32>
    %889 = vector.extract_strided_slice %473 {offsets = [2, 0], sizes = [1, 128], strides = [1, 1]} : vector<3x128xf32> to vector<1x128xf32>
    %890 = vector.extract_strided_slice %475 {offsets = [2, 0], sizes = [1, 128], strides = [1, 1]} : vector<3x128xf32> to vector<1x128xf32>
    %cst_291 = arith.constant dense<0.000000e+00> : vector<16xf32>
    %891 = vector.multi_reduction <add>, %888, %cst_291 [1] : vector<16x128xf32> to vector<16xf32>
    %892 = vector.shape_cast %891 : vector<16xf32> to vector<16x1xf32>
    %cst_292 = arith.constant 1.280000e+02 : f32
    %893 = vector.broadcast %cst_292 : f32 to vector<16x1xf32>
    %894 = arith.divf %892, %893 : vector<16x1xf32>
    %895 = vector.broadcast %894 : vector<16x1xf32> to vector<16x128xf32>
    %896 = arith.subf %888, %895 : vector<16x128xf32>
    %897 = arith.mulf %896, %896 : vector<16x128xf32>
    %cst_293 = arith.constant dense<0.000000e+00> : vector<16xf32>
    %898 = vector.multi_reduction <add>, %897, %cst_293 [1] : vector<16x128xf32> to vector<16xf32>
    %899 = vector.shape_cast %898 : vector<16xf32> to vector<16x1xf32>
    %cst_294 = arith.constant 1.280000e+02 : f32
    %900 = vector.broadcast %cst_294 : f32 to vector<16x1xf32>
    %901 = arith.divf %899, %900 : vector<16x1xf32>
    %902 = vector.broadcast %894 : vector<16x1xf32> to vector<16x128xf32>
    %903 = arith.subf %888, %902 : vector<16x128xf32>
    %cst_295 = arith.constant 9.99999974E-6 : f32
    %904 = vector.broadcast %cst_295 : f32 to vector<16x1xf32>
    %905 = arith.addf %901, %904 : vector<16x1xf32>
    %906 = math.rsqrt %905 : vector<16x1xf32>
    %907 = vector.broadcast %906 : vector<16x1xf32> to vector<16x128xf32>
    %908 = arith.mulf %903, %907 : vector<16x128xf32>
    %909 = vector.broadcast %889 : vector<1x128xf32> to vector<16x128xf32>
    %910 = arith.mulf %908, %909 : vector<16x128xf32>
    %911 = vector.broadcast %890 : vector<1x128xf32> to vector<16x128xf32>
    %912 = arith.addf %910, %911 : vector<16x128xf32>
    %913 = arith.truncf %912 : vector<16x128xf32> to vector<16x128xbf16>
    %c0_296 = arith.constant 0 : index
    %c0_297 = arith.constant 0 : index
    %914 = vector.load %arg25[%c0_296, %c0_297] : memref<128x128xbf16, #tpu.memory_space<vmem>>, vector<128x128xbf16>
    %cst_298 = arith.constant dense<0.000000e+00> : vector<16x128xf32>
    %915 = tpu.matmul %913, %914, %cst_298 {dimension_numbers = #tpu.dot_dimension_numbers<[1], [0], [0], [1], [0, 0, 1, 1], [], []>} : vector<16x128xbf16>, vector<128x128xbf16>, vector<16x128xf32> -> vector<16x128xf32>
    %c0_299 = arith.constant 0 : index
    %c0_300 = arith.constant 0 : index
    %916 = vector.load %arg26[%c0_299, %c0_300] : memref<1x128xf32, #tpu.memory_space<vmem>>, vector<1x128xf32>
    %917 = vector.broadcast %916 : vector<1x128xf32> to vector<16x128xf32>
    %918 = arith.addf %915, %917 : vector<16x128xf32>
    %cst_301 = arith.constant 0.000000e+00 : f32
    %919 = vector.broadcast %cst_301 : f32 to vector<16x128xf32>
    %920 = arith.maximumf %918, %919 : vector<16x128xf32>
    %921 = vector.shape_cast %920 : vector<16x128xf32> to vector<2x8x128xf32>
    %c0_302 = arith.constant 0 : index
    %c0_303 = arith.constant 0 : index
    %922 = vector.load %arg27[%c0_302, %c0_303] : memref<1x128xf32, #tpu.memory_space<vmem>>, vector<1x128xf32>
    %923 = vector.shape_cast %922 : vector<1x128xf32> to vector<1x1x128xf32>
    %924 = vector.broadcast %923 : vector<1x1x128xf32> to vector<2x8x128xf32>
    %925 = arith.mulf %921, %924 : vector<2x8x128xf32>
    %cst_304 = arith.constant dense<0.000000e+00> : vector<2x8xf32>
    %926 = vector.multi_reduction <add>, %925, %cst_304 [2] : vector<2x8x128xf32> to vector<2x8xf32>
    %c0_305 = arith.constant 0 : index
    %c0_306 = arith.constant 0 : index
    %927 = vector.load %arg28[%c0_305, %c0_306] : memref<1x1xf32, #tpu.memory_space<vmem>>, vector<1x1xf32>
    %928 = vector.broadcast %927 : vector<1x1xf32> to vector<2x8xf32>
    %929 = arith.addf %926, %928 : vector<2x8xf32>
    %930 = vector.shape_cast %2 : vector<2x1x8xf32> to vector<2x8xf32>
    %cst_307 = arith.constant 0.000000e+00 : f32
    %931 = vector.broadcast %cst_307 : f32 to vector<2x8xf32>
    %932 = arith.cmpf ogt, %930, %931 : vector<2x8xf32>
    %cst_308 = arith.constant -1.000000e+00 : f32
    %933 = vector.broadcast %cst_308 : f32 to vector<2x8xf32>
    %934 = arith.select %932, %933, %929 : vector<2x8xi1>, vector<2x8xf32>
    %c0_309 = arith.constant 0 : index
    %c0_310 = arith.constant 0 : index
    %935 = vector.load %arg29[%c0_309, %c0_310] : memref<2x8xf32, #tpu.memory_space<vmem>>, vector<2x8xf32>
    tpu.vector_store %arg29[%c0_309, %c0_310], %934 {strides = array<i32>} : memref<2x8xf32, #tpu.memory_space<vmem>>, vector<2x8xf32>,
    return
  }
  func.func @transform_0(%arg0: i32) -> (i32, i32, i32) {
    %c0_i32 = arith.constant 0 : i32
    %c0_i32_0 = arith.constant 0 : i32
    %c0_i32_1 = arith.constant 0 : i32
    return %arg0, %c0_i32, %c0_i32_0 : i32, i32, i32
  }
  func.func @transform_1(%arg0: i32) -> (i32, i32, i32) {
    %c0_i32 = arith.constant 0 : i32
    %c0_i32_0 = arith.constant 0 : i32
    %c0_i32_1 = arith.constant 0 : i32
    return %arg0, %c0_i32, %c0_i32_0 : i32, i32, i32
  }
  func.func @transform_2(%arg0: i32) -> (i32, i32, i32) {
    %c0_i32 = arith.constant 0 : i32
    %c0_i32_0 = arith.constant 0 : i32
    %c0_i32_1 = arith.constant 0 : i32
    return %arg0, %c0_i32, %c0_i32_0 : i32, i32, i32
  }
  func.func @transform_3(%arg0: i32) -> (i32, i32, i32) {
    %c0_i32 = arith.constant 0 : i32
    %c0_i32_0 = arith.constant 0 : i32
    %c0_i32_1 = arith.constant 0 : i32
    return %arg0, %c0_i32, %c0_i32_0 : i32, i32, i32
  }
  func.func @transform_4(%arg0: i32) -> (i32, i32) {
    %c0_i32 = arith.constant 0 : i32
    %c0_i32_0 = arith.constant 0 : i32
    %c0_i32_1 = arith.constant 0 : i32
    return %c0_i32, %c0_i32_0 : i32, i32
  }
  func.func @transform_5(%arg0: i32) -> (i32, i32) {
    %c0_i32 = arith.constant 0 : i32
    %c0_i32_0 = arith.constant 0 : i32
    %c0_i32_1 = arith.constant 0 : i32
    return %c0_i32, %c0_i32_0 : i32, i32
  }
  func.func @transform_6(%arg0: i32) -> (i32, i32) {
    %c0_i32 = arith.constant 0 : i32
    %c0_i32_0 = arith.constant 0 : i32
    %c0_i32_1 = arith.constant 0 : i32
    return %c0_i32, %c0_i32_0 : i32, i32
  }
  func.func @transform_7(%arg0: i32) -> (i32, i32) {
    %c0_i32 = arith.constant 0 : i32
    %c0_i32_0 = arith.constant 0 : i32
    %c0_i32_1 = arith.constant 0 : i32
    return %c0_i32, %c0_i32_0 : i32, i32
  }
  func.func @transform_8(%arg0: i32) -> (i32, i32, i32) {
    %c0_i32 = arith.constant 0 : i32
    %c0_i32_0 = arith.constant 0 : i32
    %c0_i32_1 = arith.constant 0 : i32
    %c0_i32_2 = arith.constant 0 : i32
    return %c0_i32, %c0_i32_0, %c0_i32_1 : i32, i32, i32
  }
  func.func @transform_9(%arg0: i32) -> (i32, i32, i32) {
    %c0_i32 = arith.constant 0 : i32
    %c0_i32_0 = arith.constant 0 : i32
    %c0_i32_1 = arith.constant 0 : i32
    %c0_i32_2 = arith.constant 0 : i32
    return %c0_i32, %c0_i32_0, %c0_i32_1 : i32, i32, i32
  }
  func.func @transform_10(%arg0: i32) -> (i32, i32, i32) {
    %c0_i32 = arith.constant 0 : i32
    %c0_i32_0 = arith.constant 0 : i32
    %c0_i32_1 = arith.constant 0 : i32
    %c0_i32_2 = arith.constant 0 : i32
    return %c0_i32, %c0_i32_0, %c0_i32_1 : i32, i32, i32
  }
  func.func @transform_11(%arg0: i32) -> (i32, i32, i32) {
    %c0_i32 = arith.constant 0 : i32
    %c0_i32_0 = arith.constant 0 : i32
    %c0_i32_1 = arith.constant 0 : i32
    %c0_i32_2 = arith.constant 0 : i32
    return %c0_i32, %c0_i32_0, %c0_i32_1 : i32, i32, i32
  }
  func.func @transform_12(%arg0: i32) -> (i32, i32, i32) {
    %c0_i32 = arith.constant 0 : i32
    %c0_i32_0 = arith.constant 0 : i32
    %c0_i32_1 = arith.constant 0 : i32
    %c0_i32_2 = arith.constant 0 : i32
    return %c0_i32, %c0_i32_0, %c0_i32_1 : i32, i32, i32
  }
  func.func @transform_13(%arg0: i32) -> (i32, i32, i32) {
    %c0_i32 = arith.constant 0 : i32
    %c0_i32_0 = arith.constant 0 : i32
    %c0_i32_1 = arith.constant 0 : i32
    %c0_i32_2 = arith.constant 0 : i32
    return %c0_i32, %c0_i32_0, %c0_i32_1 : i32, i32, i32
  }
  func.func @transform_14(%arg0: i32) -> (i32, i32, i32) {
    %c0_i32 = arith.constant 0 : i32
    %c0_i32_0 = arith.constant 0 : i32
    %c0_i32_1 = arith.constant 0 : i32
    %c0_i32_2 = arith.constant 0 : i32
    return %c0_i32, %c0_i32_0, %c0_i32_1 : i32, i32, i32
  }
  func.func @transform_15(%arg0: i32) -> (i32, i32, i32) {
    %c0_i32 = arith.constant 0 : i32
    %c0_i32_0 = arith.constant 0 : i32
    %c0_i32_1 = arith.constant 0 : i32
    %c0_i32_2 = arith.constant 0 : i32
    return %c0_i32, %c0_i32_0, %c0_i32_1 : i32, i32, i32
  }
  func.func @transform_16(%arg0: i32) -> (i32, i32, i32) {
    %c0_i32 = arith.constant 0 : i32
    %c0_i32_0 = arith.constant 0 : i32
    %c0_i32_1 = arith.constant 0 : i32
    %c0_i32_2 = arith.constant 0 : i32
    return %c0_i32, %c0_i32_0, %c0_i32_1 : i32, i32, i32
  }
  func.func @transform_17(%arg0: i32) -> (i32, i32, i32) {
    %c0_i32 = arith.constant 0 : i32
    %c0_i32_0 = arith.constant 0 : i32
    %c0_i32_1 = arith.constant 0 : i32
    %c0_i32_2 = arith.constant 0 : i32
    return %c0_i32, %c0_i32_0, %c0_i32_1 : i32, i32, i32
  }
  func.func @transform_18(%arg0: i32) -> (i32, i32, i32) {
    %c0_i32 = arith.constant 0 : i32
    %c0_i32_0 = arith.constant 0 : i32
    %c0_i32_1 = arith.constant 0 : i32
    %c0_i32_2 = arith.constant 0 : i32
    return %c0_i32, %c0_i32_0, %c0_i32_1 : i32, i32, i32
  }
  func.func @transform_19(%arg0: i32) -> (i32, i32, i32) {
    %c0_i32 = arith.constant 0 : i32
    %c0_i32_0 = arith.constant 0 : i32
    %c0_i32_1 = arith.constant 0 : i32
    %c0_i32_2 = arith.constant 0 : i32
    return %c0_i32, %c0_i32_0, %c0_i32_1 : i32, i32, i32
  }
  func.func @transform_20(%arg0: i32) -> (i32, i32, i32) {
    %c0_i32 = arith.constant 0 : i32
    %c0_i32_0 = arith.constant 0 : i32
    %c0_i32_1 = arith.constant 0 : i32
    %c0_i32_2 = arith.constant 0 : i32
    return %c0_i32, %c0_i32_0, %c0_i32_1 : i32, i32, i32
  }
  func.func @transform_21(%arg0: i32) -> (i32, i32, i32) {
    %c0_i32 = arith.constant 0 : i32
    %c0_i32_0 = arith.constant 0 : i32
    %c0_i32_1 = arith.constant 0 : i32
    %c0_i32_2 = arith.constant 0 : i32
    return %c0_i32, %c0_i32_0, %c0_i32_1 : i32, i32, i32
  }
  func.func @transform_22(%arg0: i32) -> (i32, i32, i32) {
    %c0_i32 = arith.constant 0 : i32
    %c0_i32_0 = arith.constant 0 : i32
    %c0_i32_1 = arith.constant 0 : i32
    %c0_i32_2 = arith.constant 0 : i32
    return %c0_i32, %c0_i32_0, %c0_i32_1 : i32, i32, i32
  }
  func.func @transform_23(%arg0: i32) -> (i32, i32, i32) {
    %c0_i32 = arith.constant 0 : i32
    %c0_i32_0 = arith.constant 0 : i32
    %c0_i32_1 = arith.constant 0 : i32
    %c0_i32_2 = arith.constant 0 : i32
    return %c0_i32, %c0_i32_0, %c0_i32_1 : i32, i32, i32
  }
  func.func @transform_24(%arg0: i32) -> (i32, i32) {
    %c0_i32 = arith.constant 0 : i32
    %c0_i32_0 = arith.constant 0 : i32
    %c0_i32_1 = arith.constant 0 : i32
    return %c0_i32, %c0_i32_0 : i32, i32
  }
  func.func @transform_25(%arg0: i32) -> (i32, i32) {
    %c0_i32 = arith.constant 0 : i32
    %c0_i32_0 = arith.constant 0 : i32
    %c0_i32_1 = arith.constant 0 : i32
    return %c0_i32, %c0_i32_0 : i32, i32
  }
  func.func @transform_26(%arg0: i32) -> (i32, i32) {
    %c0_i32 = arith.constant 0 : i32
    %c0_i32_0 = arith.constant 0 : i32
    %c0_i32_1 = arith.constant 0 : i32
    return %c0_i32, %c0_i32_0 : i32, i32
  }
  func.func @transform_27(%arg0: i32) -> (i32, i32) {
    %c0_i32 = arith.constant 0 : i32
    %c0_i32_0 = arith.constant 0 : i32
    %c0_i32_1 = arith.constant 0 : i32
    return %c0_i32, %c0_i32_0 : i32, i32
  }
  func.func @transform_28(%arg0: i32) -> (i32, i32) {
    %c0_i32 = arith.constant 0 : i32
    %c0_i32_0 = arith.constant 0 : i32
    return %arg0, %c0_i32 : i32, i32
  }
}

</mosaic_0001>

<bundles_post_ra>
// kernel: tpu_custom_call.1
= control target key start
LH: loop header
LB: loop body
LE: loop exit
PB: predicated region body
PF: predicated region fallthrough
CT: control target
= control target key end

     0   :  { %s16535_s0 = inlined_call_operand.vmem [shape: f32[2,8,8], index: 0, kind: input, shape index: {}]   ;;  %s16536_s1 = inlined_call_operand.vmem [shape: bf16[2,8,128], index: 1, kind: input, shape index: {}]   ;;  %s16537_s2 = inlined_call_operand.hbm [shape: f32[2,1,8], index: 2, kind: input, shape index: {}]   ;;  %s16538_s3 = inlined_call_operand.hbm [shape: f32[2,1,8], index: 3, kind: input, shape index: {}]   ;;  %s16539_s4 = inlined_call_operand.vmem [shape: f32[8,8], index: 4, kind: input, shape index: {}]   ;;  %s16540_s5 = inlined_call_operand.vmem [shape: f32[8,128], index: 5, kind: input, shape index: {}]   ;;  %s16541_s6 = inlined_call_operand.hbm [shape: bf16[8,128], index: 6, kind: input, shape index: {}]   ;;  %s16542_s7 = inlined_call_operand.hbm [shape: f32[1,128], index: 7, kind: input, shape index: {}]   ;;  %s16543_s8 = inlined_call_operand.hbm [shape: bf16[2,128,384], index: 8, kind: input, shape index: {}]   ;;  %s16544_s9 = inlined_call_operand.hbm [shape: f32[2,1,384], index: 9, kind: input, shape index: {}]   ;;  %s16545_s10 = inlined_call_operand.hbm [shape: bf16[2,128,128], index: 10, kind: input, shape index: {}]   ;;  %s16546_s11 = inlined_call_operand.hbm [shape: f32[2,1,128], index: 11, kind: input, shape index: {}]   ;;  %s16547_s12 = inlined_call_operand.hbm [shape: bf16[2,128,128], index: 12, kind: input, shape index: {}]   ;;  %s16548_s13 = inlined_call_operand.hbm [shape: f32[2,1,128], index: 13, kind: input, shape index: {}]   ;;  %s16549_s14 = inlined_call_operand.hbm [shape: bf16[2,128,256], index: 14, kind: input, shape index: {}]   ;;  %s16550_s15 = inlined_call_operand.vmem [shape: f32[2,1,256], index: 15, kind: input, shape index: {}]   ;;  %s16551_s16 = inlined_call_operand.hbm [shape: bf16[2,128,128], index: 16, kind: input, shape index: {}]   ;;  %s16552_s17 = inlined_call_operand.hbm [shape: f32[2,1,128], index: 17, kind: input, shape index: {}]   ;;  %s16553_s18 = inlined_call_operand.vmem [shape: f32[2,3,128], index: 18, kind: input, shape index: {}]   ;;  %s16554_s19 = inlined_call_operand.vmem [shape: f32[2,3,128], index: 19, kind: input, shape index: {}]   ;;  %s16555_s20 = inlined_call_operand.hbm [shape: bf16[2,128,512], index: 20, kind: input, shape index: {}]   ;;  %s16556_s21 = inlined_call_operand.vmem [shape: f32[2,1,512], index: 21, kind: input, shape index: {}]   ;;  %s16557_s22 = inlined_call_operand.hbm [shape: bf16[2,512,128], index: 22, kind: input, shape index: {}]   ;;  %s16558_s23 = inlined_call_operand.hbm [shape: f32[2,1,128], index: 23, kind: input, shape index: {}]   ;;  %s16559_s24 = inlined_call_operand.vmem [shape: bf16[128,128], index: 24, kind: input, shape index: {}]   ;;  %s16560_s25 = inlined_call_operand.vmem [shape: f32[1,128], index: 25, kind: input, shape index: {}]   ;;  %s16561_s26 = inlined_call_operand.vmem [shape: f32[1,128], index: 26, kind: input, shape index: {}]   ;;  %s16562_s27 = inlined_call_operand.<no memory space> [shape: f32[1,1], index: 27, kind: input, shape index: {}]   ;;  %s16563_s28 = inlined_call_operand.hbm [shape: f32[2,8], index: 28, kind: output, shape index: {}]  }
   0x1   :  { %16584 = sst [smem:[#allocation40_spill]] %s16535_s0  ;;  %v33_v0 = vstv %s16562_s27 }
   0x2   :  { %16585 = sst [smem:[#allocation41_spill]] %s16536_s1  ;;  %34 = vst [vmem:[#allocation2] sm:$0x1] %v33_v0 }
   0x3   :  { %16586 = sst [smem:[#allocation42_spill]] %s16537_s2 }
   0x4   :  { %16587 = sst [smem:[#allocation43_spill]] %s16538_s3 }
   0x5   :  { %16588 = sst [smem:[#allocation44_spill]] %s16539_s4 }
   0x6   :  { %16589 = sst [smem:[#allocation45_spill]] %s16540_s5 }
   0x7   :  { %16590 = sst [smem:[#allocation46_spill]] %s16541_s6 }
   0x8   :  { %16591 = sst [smem:[#allocation47_spill]] %s16542_s7 }
   0x9   :  { %16592 = sst [smem:[#allocation48_spill]] %s16543_s8 }
   0xa   :  { %16593 = sst [smem:[#allocation49_spill]] %s16544_s9 }
   0xb   :  { %16594 = sst [smem:[#allocation50_spill]] %s16545_s10 }
   0xc   :  { %16595 = sst [smem:[#allocation51_spill]] %s16546_s11 }
   0xd   :  { %16596 = sst [smem:[#allocation52_spill]] %s16547_s12 }
   0xe   :  { %16597 = sst [smem:[#allocation53_spill]] %s16561_s26 }
   0xf   :  { %16598 = sst [smem:[#allocation54_spill]] %s16563_s28 }
  0x10   :  { %35 = vsyncpa [#allocation4], 0 }
  0x11   :  { %36 = vsyncpa [#allocation7], 0 }
  0x12   :  { %37 = vsyncpa [#allocation10], 0 }
  0x13   :  { %38 = vsyncpa [#allocation13], 0 }
  0x14   :  { %39 = vsyncpa [#allocation16], 0 }
  0x15   :  { %40 = vsyncpa [#allocation19], 0 }
  0x16   :  { %41 = vsyncpa [#allocation22], 0 }
  0x17   :  { %42 = vsyncpa [#allocation25], 0 }
  0x18   :  { %43 = vsyncpa [#allocation28], 0 }
  0x19   :  { %44 = vsyncpa [#allocation5], 0  ;;  %s14194_s9 = smov [#allocation6]   ;;  %s14195_s3 = smov [#allocation9]  }
  0x1a   :  { %s66_s30 = sshll.u32 %s14194_s9, 4  ;;  %s93_s6 = sshll.u32 %s14195_s3, 4  ;;  %s67_s30 = int_to_ptr.vmem [resolvable:$true] %s66_s30  ;;  %s14378_s6 = int_to_ptr.vmem [resolvable:$true] %s93_s6 }
  0x1b   :  { %s16599_s0 = sld [smem:[#allocation43_spill]] }
  0x21   :  { %s13800_s11 = scalar_lea.hbm %s16599_s0, 32 }
  0x22   :  { %p13801_p0 = scmp.ne.s32.totalorder %s16599_s0, %s13800_s11  ;;  %p13804_p1 = scmp.lt.u32.totalorder %s13800_s11, %s16599_s0 }
  0x24   :  { %p13806_p2 = pnand %p13804_p1, %p13801_p0 }
  0x26   :  { %13809 = shalt.err (!%p13806_p2)
}
  0x27   :  { %s13810_s1 = scalar_lea.vmem %s67_s30, 32  ;;  %p13815_p4 = scmp.lt.s32.totalorder %s67_s30, %s67_s30 }
  0x28   :  { %p13811_p3 = scmp.ne.s32.totalorder %s67_s30, %s13810_s1  ;;  %p13816_p5 = scmp.lt.s32.totalorder %s13810_s1, %s13810_s1 }
  0x2a   :  { %p13817_p6 = por %p13816_p5, %p13815_p4 }
  0x2c   :  { %p13818_p7 = pnand %p13817_p6, %p13811_p3 }
  0x2e   :  { %13821 = shalt.err (!%p13818_p7)
}
  0x2f   :  { %s16575_s4 = smov 16   ;;  %s16577_s8 = smov 1  }
  0x30   :  { %72 = dma.hbm_to_vmem [thread:$0]  %s16599_s0, 32, %s67_s30, [#allocation7], %s16575_s4, %s16575_s4, %s16577_s8  }
  0x31   :  { %s16600_s27 = sld [smem:[#allocation47_spill]] }
  0x37   :  { %s13822_s11 = scalar_lea.hbm %s16600_s27, 16 }
  0x38   :  { %p13823_p8 = scmp.ne.s32.totalorder %s16600_s27, %s13822_s11  ;;  %p13826_p9 = scmp.lt.u32.totalorder %s13822_s11, %s16600_s27 }
  0x3a   :  { %p13828_p10 = pnand %p13826_p9, %p13823_p8 }
  0x3c   :  { %13831 = shalt.err (!%p13828_p10)
}
  0x3d   :  { %s13832_s1 = scalar_lea.vmem %s14378_s6, 16  ;;  %s13836_s30 = scalar_lea.vmem %s14378_s6, 32 }
  0x3e   :  { %p13833_p11 = scmp.ne.s32.totalorder %s14378_s6, %s13832_s1  ;;  %p13837_p12 = scmp.lt.s32.totalorder %s14378_s6, %s14378_s6 }
  0x3f   :  { %p13838_p13 = scmp.lt.s32.totalorder %s13836_s30, %s13832_s1 }
  0x41   :  { %p13839_p0 = por %p13838_p13, %p13837_p12 }
  0x43   :  { %p13840_p1 = pnand %p13839_p0, %p13833_p11 }
  0x45   :  { %13843 = shalt.err (!%p13840_p1)
}
  0x46   :  { %96 = dma.hbm_to_vmem [thread:$0]  %s16600_s27, 16, %s14378_s6, [#allocation10]  }
  0x47   :  { %s14198_s9 = smov [#allocation12]   ;;  %s16601_s29 = sld [smem:[#allocation49_spill]] }
  0x48   :  { %s114_s3 = sshll.u32 %s14198_s9, 4  ;;  %s115_s3 = int_to_ptr.vmem [resolvable:$true] %s114_s3 }
  0x4d   :  { %s13844_s2 = scalar_lea.hbm %s16601_s29, 96 }
  0x4e   :  { %p13845_p2 = scmp.ne.s32.totalorder %s16601_s29, %s13844_s2  ;;  %p13848_p3 = scmp.lt.u32.totalorder %s13844_s2, %s16601_s29 }
  0x50   :  { %p13850_p4 = pnand %p13848_p3, %p13845_p2 }
  0x52   :  { %13853 = shalt.err (!%p13850_p4)
}
  0x53   :  { %s13854_s4 = scalar_lea.vmem %s115_s3, 96  ;;  %p13859_p6 = scmp.lt.s32.totalorder %s115_s3, %s115_s3 }
  0x54   :  { %p13855_p5 = scmp.ne.s32.totalorder %s115_s3, %s13854_s4  ;;  %p13860_p7 = scmp.lt.s32.totalorder %s13854_s4, %s13854_s4 }
  0x56   :  { %p13861_p8 = por %p13860_p7, %p13859_p6 }
  0x58   :  { %p13862_p9 = pnand %p13861_p8, %p13855_p5 }
  0x5a   :  { %13865 = shalt.err (!%p13862_p9)
}
  0x5b   :  { %s16580_s6 = smov 48   ;;  %s14200_s27 = smov 3  }
  0x5c   :  { %120 = dma.hbm_to_vmem [thread:$0]  %s16601_s29, 96, %s115_s3, [#allocation13], %s16580_s6, %s16580_s6, %s14200_s27  }
  0x5d   :  { %s14201_s9 = smov [#allocation15]   ;;  %s14202_s11 = smov [#allocation18]  }
  0x5e   :  { %s138_s10 = sshll.u32 %s14201_s9, 4  ;;  %s162_s2 = sshll.u32 %s14202_s11, 4  ;;  %s139_s10 = int_to_ptr.vmem [resolvable:$true] %s138_s10  ;;  %s163_s2 = int_to_ptr.vmem [resolvable:$true] %s162_s2 }
  0x5f   :  { %s16602_s1 = sld [smem:[#allocation51_spill]] }
  0x65   :  { %s13866_s4 = scalar_lea.hbm %s16602_s1, 32 }
  0x66   :  { %p13867_p10 = scmp.ne.s32.totalorder %s16602_s1, %s13866_s4  ;;  %p13870_p11 = scmp.lt.u32.totalorder %s13866_s4, %s16602_s1 }
  0x68   :  { %p13872_p12 = pnand %p13870_p11, %p13867_p10 }
  0x6a   :  { %13875 = shalt.err (!%p13872_p12)
}
  0x6b   :  { %s13876_s3 = scalar_lea.vmem %s139_s10, 32  ;;  %p13881_p0 = scmp.lt.s32.totalorder %s139_s10, %s139_s10 }
  0x6c   :  { %p13877_p13 = scmp.ne.s32.totalorder %s139_s10, %s13876_s3  ;;  %p13882_p1 = scmp.lt.s32.totalorder %s13876_s3, %s13876_s3 }
  0x6e   :  { %p13883_p2 = por %p13882_p1, %p13881_p0 }
  0x70   :  { %p13884_p3 = pnand %p13883_p2, %p13877_p13 }
  0x72   :  { %13887 = shalt.err (!%p13884_p3)
}
  0x73   :  { %s16603_s29 = smov 1   ;;  %s16604_s27 = smov 16  }
  0x74   :  { %144 = dma.hbm_to_vmem [thread:$0]  %s16602_s1, 32, %s139_s10, [#allocation16], %s16604_s27, %s16604_s27, %s16603_s29  }
  0x75   :  { %s13888_s28 = scalar_lea.hbm %s16548_s13, 32 }
  0x76   :  { %p13889_p4 = scmp.ne.s32.totalorder %s16548_s13, %s13888_s28  ;;  %p13892_p5 = scmp.lt.u32.totalorder %s13888_s28, %s16548_s13 }
  0x78   :  { %p13894_p6 = pnand %p13892_p5, %p13889_p4 }
  0x7a   :  { %13897 = shalt.err (!%p13894_p6)
}
  0x7b   :  { %s13898_s4 = scalar_lea.vmem %s163_s2, 32  ;;  %p13903_p8 = scmp.lt.s32.totalorder %s163_s2, %s163_s2 }
  0x7c   :  { %p13899_p7 = scmp.ne.s32.totalorder %s163_s2, %s13898_s4  ;;  %p13904_p9 = scmp.lt.s32.totalorder %s13898_s4, %s13898_s4 }
  0x7e   :  { %p13905_p10 = por %p13904_p9, %p13903_p8 }
  0x80   :  { %p13906_p11 = pnand %p13905_p10, %p13899_p7 }
  0x82   :  { %13909 = shalt.err (!%p13906_p11)
}
  0x83   :  { %168 = dma.hbm_to_vmem [thread:$0]  %s16548_s13, 32, %s163_s2, [#allocation19], %s16604_s27, %s16604_s27, %s16603_s29  }
  0x84   :  { %s14203_s30 = smov [#allocation21]   ;;  %s14204_s0 = smov [#allocation24]  }
  0x85   :  { %s188_s3 = sshll.u32 %s14203_s30, 4  ;;  %s216_s5 = sshll.u32 %s14204_s0, 4  ;;  %s189_s3 = int_to_ptr.vmem [resolvable:$true] %s188_s3  ;;  %s217_s5 = int_to_ptr.vmem [resolvable:$true] %s216_s5 }
  0x86   :  { %s13910_s28 = scalar_lea.hbm %s16551_s16, 2048 }
  0x87   :  { %p13911_p12 = scmp.ne.s32.totalorder %s16551_s16, %s13910_s28  ;;  %p13914_p13 = scmp.lt.u32.totalorder %s13910_s28, %s16551_s16 }
  0x89   :  { %p13916_p0 = pnand %p13914_p13, %p13911_p12 }
  0x8b   :  { %13919 = shalt.err (!%p13916_p0)
}
  0x8c   :  { %s13920_s13 = scalar_lea.vmem %s189_s3, 2048  ;;  %p13925_p2 = scmp.lt.s32.totalorder %s189_s3, %s189_s3 }
  0x8d   :  { %p13921_p1 = scmp.ne.s32.totalorder %s189_s3, %s13920_s13  ;;  %p13926_p3 = scmp.lt.s32.totalorder %s13920_s13, %s13920_s13 }
  0x8f   :  { %p13927_p4 = por %p13926_p3, %p13925_p2 }
  0x91   :  { %p13928_p5 = pnand %p13927_p4, %p13921_p1 }
  0x93   :  { %13931 = shalt.err (!%p13928_p5)
}
  0x94   :  { %s16582_s2 = smov 64   ;;  %s14206_s4 = smov 4  }
  0x95   :  { %194 = dma.hbm_to_vmem [thread:$0]  %s16551_s16, 2048, %s189_s3, [#allocation22], %s16582_s2, %s16582_s2, %s14206_s4  }
  0x96   :  { %s13932_s8 = scalar_lea.hbm %s16555_s20, 8192 }
  0x97   :  { %p13933_p6 = scmp.ne.s32.totalorder %s16555_s20, %s13932_s8  ;;  %p13936_p7 = scmp.lt.u32.totalorder %s13932_s8, %s16555_s20 }
  0x99   :  { %p13938_p8 = pnand %p13936_p7, %p13933_p6 }
  0x9b   :  { %13941 = shalt.err (!%p13938_p8)
}
  0x9c   :  { %s13942_s7 = scalar_lea.vmem %s217_s5, 8192  ;;  %p13947_p10 = scmp.lt.s32.totalorder %s217_s5, %s217_s5 }
  0x9d   :  { %p13943_p9 = scmp.ne.s32.totalorder %s217_s5, %s13942_s7  ;;  %p13948_p11 = scmp.lt.s32.totalorder %s13942_s7, %s13942_s7 }
  0x9f   :  { %p13949_p12 = por %p13948_p11, %p13947_p10 }
  0xa1   :  { %p13950_p13 = pnand %p13949_p12, %p13943_p9 }
  0xa3   :  { %13953 = shalt.err (!%p13950_p13)
}
  0xa4   :  { %s14207_s16 = smov 256   ;;  %s14208_s13 = smov [#allocation3]  }
  0xa5   :  { %222 = dma.hbm_to_vmem [thread:$0]  %s16555_s20, 8192, %s217_s5, [#allocation25], %s14207_s16, %s14207_s16, %s16604_s27  }
  0xa6   :  { %s54_s10 = sshll.u32 %s14208_s13, 4  ;;  %s14209_s1 = smov [#allocation8]   ;;  %s55_s10 = int_to_ptr.vmem [resolvable:$true] %s54_s10 }
  0xa7   :  { %s83_s30 = sshll.u32 %s14209_s1, 4  ;;  %s16605_s26 = sld [smem:[#allocation42_spill]]  ;;  %s84_s30 = int_to_ptr.vmem [resolvable:$true] %s83_s30 }
  0xad   :  { %s13954_s28 = scalar_lea.hbm %s16605_s26, 32 }
  0xae   :  { %p13955_p0 = scmp.ne.s32.totalorder %s16605_s26, %s13954_s28  ;;  %p13958_p1 = scmp.lt.u32.totalorder %s13954_s28, %s16605_s26 }
  0xb0   :  { %p13960_p2 = pnand %p13958_p1, %p13955_p0 }
  0xb2   :  { %13963 = shalt.err (!%p13960_p2)
}
  0xb3   :  { %s13964_s20 = scalar_lea.vmem %s55_s10, 32  ;;  %p13969_p4 = scmp.lt.s32.totalorder %s55_s10, %s55_s10 }
  0xb4   :  { %p13965_p3 = scmp.ne.s32.totalorder %s55_s10, %s13964_s20  ;;  %p13970_p5 = scmp.lt.s32.totalorder %s13964_s20, %s13964_s20 }
  0xb6   :  { %p13971_p6 = por %p13970_p5, %p13969_p4 }
  0xb8   :  { %p13972_p7 = pnand %p13971_p6, %p13965_p3 }
  0xba   :  { %13975 = shalt.err (!%p13972_p7)
}
  0xbb   :  { %60 = dma.hbm_to_vmem [thread:$0]  %s16605_s26, 32, %s55_s10, [#allocation4], %s16604_s27, %s16604_s27, %s16603_s29  }
  0xbc   :  { %s16606_s6 = sld [smem:[#allocation46_spill]] }
  0xc2   :  { %s13976_s13 = scalar_lea.hbm %s16606_s6, 64 }
  0xc3   :  { %p13977_p8 = scmp.ne.s32.totalorder %s16606_s6, %s13976_s13  ;;  %p13980_p9 = scmp.lt.u32.totalorder %s13976_s13, %s16606_s6 }
  0xc5   :  { %p13982_p10 = pnand %p13980_p9, %p13977_p8 }
  0xc7   :  { %13985 = shalt.err (!%p13982_p10)
}
  0xc8   :  { %s13986_s9 = scalar_lea.vmem %s84_s30, 64  ;;  %p13991_p12 = scmp.lt.s32.totalorder %s84_s30, %s84_s30 }
  0xc9   :  { %p13987_p11 = scmp.ne.s32.totalorder %s84_s30, %s13986_s9  ;;  %p13992_p13 = scmp.lt.s32.totalorder %s13986_s9, %s13986_s9 }
  0xcb   :  { %p13993_p0 = por %p13992_p13, %p13991_p12 }
  0xcd   :  { %p13994_p1 = pnand %p13993_p0, %p13987_p11 }
  0xcf   :  { %13997 = shalt.err (!%p13994_p1)
}
  0xd0   :  { %86 = dma.hbm_to_vmem [thread:$0]  %s16606_s6, 64, %s84_s30, [#allocation7]  }
  0xd1   :  { %s14210_s11 = smov [#allocation11]   ;;  %s16607_s16 = sld [smem:[#allocation48_spill]] }
  0xd2   :  { %s102_s7 = sshll.u32 %s14210_s11, 4  ;;  %s103_s7 = int_to_ptr.vmem [resolvable:$true] %s102_s7 }
  0xd7   :  { %s13998_s3 = scalar_lea.hbm %s16607_s16, 6144 }
  0xd8   :  { %p13999_p2 = scmp.ne.s32.totalorder %s16607_s16, %s13998_s3  ;;  %p14002_p3 = scmp.lt.u32.totalorder %s13998_s3, %s16607_s16 }
  0xda   :  { %p14004_p4 = pnand %p14002_p3, %p13999_p2 }
  0xdc   :  { %14007 = shalt.err (!%p14004_p4)
}
  0xdd   :  { %s14008_s8 = scalar_lea.vmem %s103_s7, 6144  ;;  %p14013_p6 = scmp.lt.s32.totalorder %s103_s7, %s103_s7 }
  0xde   :  { %p14009_p5 = scmp.ne.s32.totalorder %s103_s7, %s14008_s8  ;;  %p14014_p7 = scmp.lt.s32.totalorder %s14008_s8, %s14008_s8 }
  0xe0   :  { %p14015_p8 = por %p14014_p7, %p14013_p6 }
  0xe2   :  { %p14016_p9 = pnand %p14015_p8, %p14009_p5 }
  0xe4   :  { %14019 = shalt.err (!%p14016_p9)
}
  0xe5   :  { %s14211_s30 = smov 192   ;;  %s14212_s6 = smov 12  }
  0xe6   :  { %108 = dma.hbm_to_vmem [thread:$0]  %s16607_s16, 6144, %s103_s7, [#allocation10], %s14211_s30, %s14211_s30, %s14212_s6  }
  0xe7   :  { %s14213_s10 = smov [#allocation14]   ;;  %s14214_s11 = smov [#allocation17]  }
  0xe8   :  { %s126_s26 = sshll.u32 %s14213_s10, 4  ;;  %s150_s20 = sshll.u32 %s14214_s11, 4  ;;  %s127_s26 = int_to_ptr.vmem [resolvable:$true] %s126_s26  ;;  %s151_s20 = int_to_ptr.vmem [resolvable:$true] %s150_s20 }
  0xe9   :  { %s16608_s12 = sld [smem:[#allocation50_spill]] }
  0xef   :  { %s14020_s13 = scalar_lea.hbm %s16608_s12, 2048 }
  0xf0   :  { %p14021_p10 = scmp.ne.s32.totalorder %s16608_s12, %s14020_s13  ;;  %p14024_p11 = scmp.lt.u32.totalorder %s14020_s13, %s16608_s12 }
  0xf2   :  { %p14026_p12 = pnand %p14024_p11, %p14021_p10 }
  0xf4   :  { %14029 = shalt.err (!%p14026_p12)
}
  0xf5   :  { %s14030_s7 = scalar_lea.vmem %s127_s26, 2048  ;;  %p14035_p0 = scmp.lt.s32.totalorder %s127_s26, %s127_s26 }
  0xf6   :  { %p14031_p13 = scmp.ne.s32.totalorder %s127_s26, %s14030_s7  ;;  %p14036_p1 = scmp.lt.s32.totalorder %s14030_s7, %s14030_s7 }
  0xf8   :  { %p14037_p2 = por %p14036_p1, %p14035_p0 }
  0xfa   :  { %p14038_p3 = pnand %p14037_p2, %p14031_p13 }
  0xfc   :  { %14041 = shalt.err (!%p14038_p3)
}
  0xfd   :  { %s16609_s16 = smov 64   ;;  %s16610_s9 = sld [smem:[#allocation52_spill]] }
  0xfe   :  { %132 = dma.hbm_to_vmem [thread:$0]  %s16608_s12, 2048, %s127_s26, [#allocation13], %s16609_s16, %s16609_s16, %s14206_s4  }
 0x103   :  { %s14042_s10 = scalar_lea.hbm %s16610_s9, 2048 }
 0x104   :  { %p14043_p4 = scmp.ne.s32.totalorder %s16610_s9, %s14042_s10  ;;  %p14046_p5 = scmp.lt.u32.totalorder %s14042_s10, %s16610_s9 }
 0x106   :  { %p14048_p6 = pnand %p14046_p5, %p14043_p4 }
 0x108   :  { %14051 = shalt.err (!%p14048_p6)
}
 0x109   :  { %s14052_s1 = scalar_lea.vmem %s151_s20, 2048  ;;  %p14057_p8 = scmp.lt.s32.totalorder %s151_s20, %s151_s20 }
 0x10a   :  { %p14053_p7 = scmp.ne.s32.totalorder %s151_s20, %s14052_s1  ;;  %p14058_p9 = scmp.lt.s32.totalorder %s14052_s1, %s14052_s1 }
 0x10c   :  { %p14059_p10 = por %p14058_p9, %p14057_p8 }
 0x10e   :  { %p14060_p11 = pnand %p14059_p10, %p14053_p7 }
 0x110   :  { %14063 = shalt.err (!%p14060_p11)
}
 0x111   :  { %156 = dma.hbm_to_vmem [thread:$0]  %s16610_s9, 2048, %s151_s20, [#allocation16], %s16609_s16, %s16609_s16, %s14206_s4  }
 0x112   :  { %s14215_s0 = smov [#allocation20]   ;;  %s14064_s6 = scalar_lea.hbm %s16549_s14, 4096 }
 0x113   :  { %s174_s8 = sshll.u32 %s14215_s0, 4  ;;  %p14065_p12 = scmp.ne.s32.totalorder %s16549_s14, %s14064_s6  ;;  %s175_s8 = int_to_ptr.vmem [resolvable:$true] %s174_s8 }
 0x114   :  { %p14068_p13 = scmp.lt.u32.totalorder %s14064_s6, %s16549_s14 }
 0x116   :  { %p14070_p0 = pnand %p14068_p13, %p14065_p12 }
 0x118   :  { %14073 = shalt.err (!%p14070_p0)
}
 0x119   :  { %s14074_s5 = scalar_lea.vmem %s175_s8, 4096  ;;  %p14079_p2 = scmp.lt.s32.totalorder %s175_s8, %s175_s8 }
 0x11a   :  { %p14075_p1 = scmp.ne.s32.totalorder %s175_s8, %s14074_s5  ;;  %p14080_p3 = scmp.lt.s32.totalorder %s14074_s5, %s14074_s5 }
 0x11c   :  { %p14081_p4 = por %p14080_p3, %p14079_p2 }
 0x11e   :  { %p14082_p5 = pnand %p14081_p4, %p14075_p1 }
 0x120   :  { %14085 = shalt.err (!%p14082_p5)
}
 0x121   :  { %s14216_s20 = smov 128   ;;  %s14217_s9 = smov 8  }
 0x122   :  { %180 = dma.hbm_to_vmem [thread:$0]  %s16549_s14, 4096, %s175_s8, [#allocation19], %s14216_s20, %s14216_s20, %s14217_s9  }
 0x123   :  { %s14218_s1 = smov [#allocation23]   ;;  %s14219_s12 = smov [#allocation26]  }
 0x124   :  { %s200_s26 = sshll.u32 %s14218_s1, 4  ;;  %s230_s0 = sshll.u32 %s14219_s12, 4  ;;  %s201_s26 = int_to_ptr.vmem [resolvable:$true] %s200_s26  ;;  %s14566_s0 = int_to_ptr.vmem [resolvable:$true] %s230_s0 }
 0x125   :  { %s14086_s6 = scalar_lea.hbm %s16552_s17, 32 }
 0x126   :  { %p14087_p6 = scmp.ne.s32.totalorder %s16552_s17, %s14086_s6  ;;  %p14090_p7 = scmp.lt.u32.totalorder %s14086_s6, %s16552_s17 }
 0x128   :  { %p14092_p8 = pnand %p14090_p7, %p14087_p6 }
 0x12a   :  { %14095 = shalt.err (!%p14092_p8)
}
 0x12b   :  { %s14096_s14 = scalar_lea.vmem %s201_s26, 32  ;;  %p14101_p10 = scmp.lt.s32.totalorder %s201_s26, %s201_s26 }
 0x12c   :  { %p14097_p9 = scmp.ne.s32.totalorder %s201_s26, %s14096_s14  ;;  %p14102_p11 = scmp.lt.s32.totalorder %s14096_s14, %s14096_s14 }
 0x12e   :  { %p14103_p12 = por %p14102_p11, %p14101_p10 }
 0x130   :  { %p14104_p13 = pnand %p14103_p12, %p14097_p9 }
 0x132   :  { %14107 = shalt.err (!%p14104_p13)
}
 0x133   :  { %206 = dma.hbm_to_vmem [thread:$0]  %s16552_s17, 32, %s201_s26, [#allocation22], %s16604_s27, %s16604_s27, %s16603_s29  }
 0x134   :  { %s14108_s3 = scalar_lea.hbm %s16557_s22, 8192 }
 0x135   :  { %p14109_p0 = scmp.ne.s32.totalorder %s16557_s22, %s14108_s3  ;;  %p14112_p1 = scmp.lt.u32.totalorder %s14108_s3, %s16557_s22 }
 0x137   :  { %p14114_p2 = pnand %p14112_p1, %p14109_p0 }
 0x139   :  { %14117 = shalt.err (!%p14114_p2)
}
 0x13a   :  { %s14118_s30 = scalar_lea.vmem %s14566_s0, 8192  ;;  %p14123_p4 = scmp.lt.s32.totalorder %s14566_s0, %s14566_s0 }
 0x13b   :  { %p14119_p3 = scmp.ne.s32.totalorder %s14566_s0, %s14118_s30  ;;  %p14124_p5 = scmp.lt.s32.totalorder %s14118_s30, %s14118_s30 }
 0x13d   :  { %p14125_p6 = por %p14124_p5, %p14123_p4 }
 0x13f   :  { %p14126_p7 = pnand %p14125_p6, %p14119_p3 }
 0x141   :  { %14129 = shalt.err (!%p14126_p7)
}
 0x142   :  { %236 = dma.hbm_to_vmem [thread:$0]  %s16557_s22, 8192, %s14566_s0, [#allocation25], %s16609_s16, %s16609_s16, %s14206_s4  }
 0x143   :  { %s14220_s6 = smov [#allocation27]   ;;  %s14130_s11 = scalar_lea.hbm %s16558_s23, 32 }
 0x144   :  { %s242_s28 = sshll.u32 %s14220_s6, 4  ;;  %p14131_p8 = scmp.ne.s32.totalorder %s16558_s23, %s14130_s11  ;;  %s243_s28 = int_to_ptr.vmem [resolvable:$true] %s242_s28 }
 0x145   :  { %p14134_p9 = scmp.lt.u32.totalorder %s14130_s11, %s16558_s23 }
 0x147   :  { %p14136_p10 = pnand %p14134_p9, %p14131_p8 }
 0x149   :  { %14139 = shalt.err (!%p14136_p10)
}
 0x14a   :  { %s14140_s9 = scalar_lea.vmem %s243_s28, 32  ;;  %p14145_p12 = scmp.lt.s32.totalorder %s243_s28, %s243_s28 }
 0x14b   :  { %p14141_p11 = scmp.ne.s32.totalorder %s243_s28, %s14140_s9  ;;  %p14146_p13 = scmp.lt.s32.totalorder %s14140_s9, %s14140_s9 }
 0x14d   :  { %p14147_p0 = por %p14146_p13, %p14145_p12 }
 0x14f   :  { %p14148_p1 = pnand %p14147_p0, %p14141_p11 }
 0x151   :  { %14151 = shalt.err (!%p14148_p1)
}
 0x152   :  { %248 = dma.hbm_to_vmem [thread:$0]  %s16558_s23, 32, %s243_s28, [#allocation28], %s16604_s27, %s16604_s27, %s16603_s29  }
 0x153   :  { %14174 = dma.done.wait [#allocation4], 32  }
 0x154   :  { %14175 = vsyncadd [#allocation4], 4294967264 }
 0x155   :  { %14176 = dma.done.wait [#allocation7], 96  }
 0x156   :  { %14177 = vsyncadd [#allocation7], 4294967200 }
 0x157   :  { %14178 = dma.done.wait [#allocation10], 6160  }
 0x158   :  { %14179 = vsyncadd [#allocation10], 4294961136 }
 0x159   :  { %14180 = dma.done.wait [#allocation13], 2144  }
 0x15a   :  { %14181 = vsyncadd [#allocation13], 4294965152 }
 0x15b   :  { %14182 = dma.done.wait [#allocation16], 2080  }
 0x15c   :  { %14183 = vsyncadd [#allocation16], 4294965216 }
 0x15d   :  { %14184 = dma.done.wait [#allocation19], 4128  }
 0x15e   :  { %14185 = vsyncadd [#allocation19], 4294963168 }
 0x15f   :  { %14186 = dma.done.wait [#allocation22], 2080  }
 0x160   :  { %14187 = vsyncadd [#allocation22], 4294965216 }
 0x161   :  { %14188 = dma.done.wait [#allocation25], 16384  }
 0x162   :  { %14189 = vsyncadd [#allocation25], 4294950912 }
 0x163   :  { %14190 = dma.done.wait [#allocation28], 32  }
 0x164   :  { %14191 = vsyncadd [#allocation28], 4294967264  ;;  %v14221_v1 = vmov 0.0   ;;  %vm14222_vm0 = vmmov 0   ;;  %vm337_vm1 = vcmask 1043456   ;;  %s16611_s0 = sld [smem:[#allocation40_spill]]  ;;  %v390_v47 = vlaneseq }
 0x165   :  { %12052 = vmatprep.subr.bf16.mxu0 %v14221_v1  ;;  %12054 = vmatprep.mubr.msk.bf16.mxu0 %vm14222_vm0, %v14221_v1  ;;  %v320_v2 = vld [vmem:[#allocation8] sm:$0xf]  ;;  %v13184_v8 = vld [vmem:[#allocation11 + $0x4] ss:$12 sps:$4 sm:$0xff]   ;;  %v13186_v9 = vld [vmem:[#allocation11] ss:$12 sps:$4 sm:$0xff]  }
 0x166   :  { %v339_v5 = vsel %vm337_vm1, %v320_v2, 0  ;;  %vm333_vm2 = vcmask 64512   ;;  %584 = vmatprep.subr.bf16.mxu1 %v13184_v8  ;;  %v13187_v12 = vld [vmem:[#allocation11 + $0x8] ss:$12 sps:$4 sm:$0xff]   ;;  %v13190_v15 = vld [vmem:[#allocation11 + $0x18] ss:$12 sps:$4 sm:$0xff]  }
 0x167   :  { %12053 = vmatpush3.bf16.msra.mxu0 %v339_v5  ;;  %v13188_v13 = vld [vmem:[#allocation11 + $0x1c] ss:$12 sps:$4 sm:$0xff]   ;;  %585 = vmatpush1.bf16.msra.mxu1 %v13186_v9  ;;  %v13192_v16 = vld [vmem:[#allocation11 + $0x34] ss:$12 sps:$4 sm:$0xff]   ;;  %v13196_v19 = vld [vmem:[#allocation11 + $0x4c] ss:$12 sps:$4 sm:$0xff]  }
 0x168   :  { %12058 = vmatprep.subr.bf16.mxu0 %v14221_v1  ;;  %586 = vmatprep.subr.bf16.mxu1 %v13188_v13  ;;  %v13191_v17 = vld [vmem:[#allocation11 + $0x20] ss:$12 sps:$4 sm:$0xff]   ;;  %v13194_v18 = vld [vmem:[#allocation11 + $0x30] ss:$12 sps:$4 sm:$0xff]   ;;  %v13195_v20 = vld [vmem:[#allocation11 + $0x38] ss:$12 sps:$4 sm:$0xff]  }
 0x169   :  { %v13198_v21 = vld [vmem:[#allocation11 + $0x48] ss:$12 sps:$4 sm:$0xff]   ;;  %v13200_v22 = vld [vmem:[#allocation11 + $0x64] ss:$12 sps:$4 sm:$0xff]   ;;  %v13202_v24 = vld [vmem:[#allocation11 + $0x60] ss:$12 sps:$4 sm:$0xff]  }
 0x16a   :  { %v306_v3 = vld [vmem:[%s16611_s0] sm:$0xff]  ;;  %v307_v4 = vld [vmem:[%s16611_s0 + $0x8] sm:$0xff]  ;;  %v14223_v35 = vmov 0   ;;  %s16612_s7 = sld [smem:[#allocation45_spill]]  ;;  %v14658_v48 = vshrl.u32 %v390_v47, 7  ;;  %vm693_vm3 = vcmask 130048  }
 0x16b   :  { %v314_v6 = vmul.f32 2.0, %v306_v3  ;;  %v315_v7 = vmul.f32 2.0, %v307_v4  ;;  %587 = vmatpush1.bf16.msra.mxu1 %v13190_v15  ;;  %v13199_v23 = vld [vmem:[#allocation11 + $0x50] ss:$12 sps:$4 sm:$0xff]   ;;  %v13203_v26 = vld [vmem:[#allocation11 + $0x68] ss:$12 sps:$4 sm:$0xff]   ;;  %616 = vmatprep.mubr.bf16.mxu1 %v14223_v35 }
 0x16c   :  { %588 = vmatprep.subr.bf16.mxu1 %v13192_v16  ;;  %v13204_v25 = vld [vmem:[#allocation11 + $0x7c] ss:$12 sps:$4 sm:$0xff]   ;;  %v13206_v27 = vld [vmem:[#allocation11 + $0x78] ss:$12 sps:$4 sm:$0xff]   ;;  %v13207_v28 = vld [vmem:[#allocation11 + $0x80] ss:$12 sps:$4 sm:$0xff]   ;;  %13182 = vset.pattern.permute.xlu0 %v14223_v35 }
 0x16d   :  { %v11211_v10 = vadd.f32 -1.0, %v314_v6  ;;  %v11212_v11 = vadd.f32 -1.0, %v315_v7  ;;  %v13208_v29 = vld [vmem:[#allocation11 + $0x94] ss:$12 sps:$4 sm:$0xff]   ;;  %v13210_v30 = vld [vmem:[#allocation11 + $0x90] ss:$12 sps:$4 sm:$0xff]   ;;  %13183 = vset.pattern.permute.xlu1 %v14223_v35 }
 0x16e   :  { %v13211_v31 = vld [vmem:[#allocation11 + $0x98] ss:$12 sps:$4 sm:$0xff]   ;;  %v13214_v33 = vld [vmem:[#allocation11 + $0xa8] ss:$12 sps:$4 sm:$0xff]   ;;  %v13215_v34 = vld [vmem:[#allocation11 + $0xb0] ss:$12 sps:$4 sm:$0xff]  }
 0x16f   :  { %v11624_v14 = vpack.c.bf16 %v11212_v11, %v11211_v10  ;;  %589 = vmatpush1.bf16.msra.mxu1 %v13194_v18  ;;  %v13212_v32 = vld [vmem:[#allocation11 + $0xac] ss:$12 sps:$4 sm:$0xff]   ;;  %v11213_v36 = vld [vmem:[#allocation9] ss:$0 sm:$0xff]  ;;  %v14661_v49 = vsub.s32 1, %v14658_v48  ;;  %v14664_v51 = vsub.s32 0, %v14658_v48 }
 0x170   :  { %590 = vmatprep.subr.bf16.mxu1 %v13196_v19  ;;  %v382_v40 = vld [vmem:[%s16612_s7] sm:$0xff]  ;;  %v439_v50 = vld [vmem:[#allocation12] sm:$0x7]  ;;  %v14667_v52 = vsub.s32 2, %v14658_v48  ;;  %s14224_s30 = smov 112   ;;  %s16613_s6 = sld [smem:[#allocation44_spill]] }
 0x171   :  { %12055 = vmatmul.mubr.msk.bf16.vlgmr.msra.gmra.mrb[0].mxu0 %vm333_vm2, %v11624_v14  ;;  %v448_v53 = vrot.slane %v439_v50, %v14661_v49  ;;  %v444_v54 = vrot.slane %v439_v50, %v14664_v51  ;;  %v310_v19 = vld [vmem:[#allocation3] sm:$0x1]  ;;  %s14225_s28 = smov 96   ;;  %s14226_s2 = smov 80   ;;  %vm2506_vm4 = vcmask 261120   ;;  %vm2509_vm5 = vcmask 392192  }
 0x172   :  { %12059 = vmatpush3.bf16.msra.mxu0 %v13187_v12  ;;  %12074 = vmatprep.mubr.msk.bf16.mxu0 %vm14222_vm0, %v14221_v1  ;;  %v452_v59 = vrot.slane %v439_v50, %v14667_v52  ;;  %s16614_s10 = smov 48   ;;  %s14227_s11 = smov 32   ;;  %vm2512_vm6 = vcmask 523264   ;;  %vm2515_vm7 = vcmask 654336   ;;  %vm2518_vm8 = vcmask 785408  }
 0x173   :  { %12060 = vmatprep.subr.bf16.mxu0 %v14221_v1  ;;  %591 = vmatpush1.bf16.msra.mxu1 %v13198_v21  ;;  %v386_v21 = vmul.f32 -1e+30, %v310_v19  ;;  %vm2521_vm9 = vcmask 916480   ;;  %s16615_s5 = sld [smem:[#allocation41_spill]]  ;;  %s16616_s8 = sld [smem:[#allocation53_spill]]  ;;  %vm11186_vm12 = vcmask 58368  }
 0x174   :  { %592 = vmatprep.subr.bf16.mxu1 %v13200_v22 }
 0x176   :  { %12061 = vmatpush3.bf16.msra.mxu0 %v13191_v17 }
 0x177   :  { %12062 = vmatprep.subr.bf16.mxu0 %v14221_v1  ;;  %593 = vmatpush1.bf16.msra.mxu1 %v13202_v24  ;;  %v385_v24 = vld [vmem:[%s16613_s6] sm:$0xff] }
 0x178   :  { %594 = vmatprep.subr.bf16.mxu1 %v13204_v25 }
 0x17a   :  { %12063 = vmatpush3.bf16.msra.mxu0 %v13195_v20  ;;  %v311_v20 = vld [vmem:[#allocation3 + $0x1] sm:$0x1] }
 0x17b   :  { %12064 = vmatprep.subr.bf16.mxu0 %v14221_v1  ;;  %595 = vmatpush1.bf16.msra.mxu1 %v13206_v27  ;;  %v387_v22 = vmul.f32 -1e+30, %v311_v20 }
 0x17c   :  { %596 = vmatprep.subr.bf16.mxu1 %v13208_v29 }
 0x17d   :  { %v397_v25 = vrot.slane %v387_v22, %v14664_v51 }
 0x17e   :  { %12065 = vmatpush3.bf16.msra.mxu0 %v13199_v23  ;;  %v393_v23 = vrot.slane %v386_v21, %v14664_v51 }
 0x17f   :  { %12066 = vmatprep.subr.bf16.mxu0 %v14221_v1  ;;  %597 = vmatpush1.bf16.msra.mxu1 %v13210_v30  ;;  %v14713_v27 = vadd.f32 %v397_v25, %v385_v24 }
 0x180   :  { %598 = vmatprep.subr.bf16.mxu1 %v13212_v32 }
 0x182   :  { %12067 = vmatpush3.bf16.msra.mxu0 %v13203_v26  ;;  %v14711_v26 = vadd.f32 %v393_v23, %v385_v24 }
 0x183   :  { %12068 = vmatprep.subr.bf16.mxu0 %v14221_v1  ;;  %599 = vmatpush1.bf16.msra.mxu1 %v13214_v33 }
 0x184   :  { %12078 = vmatprep.subr.bf16.mxu1 %v14221_v1 }
 0x186   :  { %12069 = vmatpush3.bf16.msra.mxu0 %v13207_v28 }
 0x187   :  { %12070 = vmatprep.subr.bf16.mxu0 %v14221_v1 }
 0x18a   :  { %12071 = vmatpush3.bf16.msra.mxu0 %v13211_v31 }
 0x18b   :  { %12072 = vmatprep.subr.bf16.mxu0 %v14221_v1 }
 0x18e   :  { %12073 = vmatpush3.bf16.msra.mxu0 %v13215_v34 }
 0x18f   :  { %12084 = vmatprep.subr.bf16.mxu0 %v14221_v1 }
 0x244   :  { %v375_v37 = vpop.f32.mrb[0].mxu0 }
 0x245   :  { %v376_v38 = vadd.f32 %v11213_v36, %v375_v37  ;;  %v12056_v39 = vpop.f32.mrb[1].mxu0 }
 0x246   :  { %v378_v41 = vpop.f32.mrb[2].mxu0 }
 0x247   :  { %v379_v42 = vadd.f32 %v11213_v36, %v378_v41  ;;  %v12057_v43 = vpop.f32.mrb[3].mxu0  ;;  %v14647_v44 = vadd.f32 %v382_v40, %v376_v38 }
 0x249   :  { %v14649_v45 = vadd.f32 %v382_v40, %v379_v42 }
 0x24b   :  { %v406_v46 = vpack.c.bf16 %v14649_v45, %v14647_v44 }
 0x24d   :  { %617 = vmatmul.mubr.bf16.vlgmr.msra.gmra.mrb[0].mxu1 %v406_v46  ;;  %12075 = vmatmul.mubr.bf16.vlgmr.msra.gmra.mrb[4].mxu0 %v406_v46 }
 0x24e   :  { %12080 = vmatprep.mubr.msk.bf16.mxu1 %vm14222_vm0, %v14221_v1  ;;  %12086 = vmatprep.mubr.msk.bf16.mxu0 %vm14222_vm0, %v14221_v1 }
 0x320   :  { %v618_v55 = vpop.f32.mrb[0].mxu1  ;;  %v661_v56 = vpop.f32.mrb[4].mxu0 }
 0x321   :  { %v620_v57 = vpop.f32.mrb[1].mxu1  ;;  %v12076_v58 = vpop.f32.mrb[5].mxu0  ;;  %v619_v2 = vadd.f32 %v618_v55, %v444_v54  ;;  %v662_v5 = vadd.f32 %v661_v56, %v452_v59 }
 0x322   :  { %v621_v60 = vadd.f32 %v620_v57, %v448_v53  ;;  %v622_v61 = vpop.f32.mrb[2].mxu1  ;;  %v664_v62 = vpop.f32.mrb[6].mxu0 }
 0x323   :  { %v624_v63 = vpop.f32.mrb[3].mxu1  ;;  %v12077_v0 = vpop.f32.mrb[7].mxu0  ;;  %v623_v6 = vadd.f32 %v622_v61, %v444_v54  ;;  %v668_v9 = vmul.f32 0.25, %v619_v2  ;;  %v665_v10 = vadd.f32 %v664_v62, %v452_v59  ;;  %v14683_v12 = vpack.c.bf16 %v662_v5, %v662_v5 }
 0x324   :  { %v14672_v3 = vpack.c.bf16 %v621_v60, %v621_v60  ;;  %v625_v4 = vadd.f32 %v624_v63, %v448_v53 }
 0x325   :  { %v669_v13 = vmul.f32 0.25, %v623_v6  ;;  %v14686_v14 = vpack.c.bf16 %v668_v9, %v668_v9  ;;  %v14688_v15 = vpack.c.bf16 %v665_v10, %v665_v10  ;;  %v814_v17 = vsel %vm337_vm1, %v14683_v12, 0 }
 0x326   :  { %v14674_v7 = vpack.c.bf16 %v625_v4, %v625_v4  ;;  %v698_v8 = vsel %vm693_vm3, %v14672_v3, 0 }
 0x327   :  { %12079 = vmatpush3.bf16.xpose.msra.mxu1 %v698_v8  ;;  %v14690_v16 = vpack.c.bf16 %v669_v13, %v669_v13  ;;  %v860_v18 = vsel %vm337_vm1, %v14688_v15, 0 }
 0x328   :  { %958 = vrot.lane.b32.xlu1 %v14674_v7, %s14224_s30  ;;  %v744_v11 = vsel %vm693_vm3, %v14674_v7, 0  ;;  %12090 = vmatprep.subr.bf16.mxu1 %v14221_v1 }
 0x329   :  { %12085 = vmatpush3.bf16.xpose.msra.mxu0 %v744_v11 }
 0x32a   :  { %12096 = vmatprep.subr.bf16.mxu0 %v14221_v1 }
 0x32e   :  { %12081 = vmatmul.mubr.msk.bf16.vlgmr.msra.gmra.mrb[4].mxu1 %vm693_vm3, %v14686_v14 }
 0x32f   :  { %12091 = vmatpush3.bf16.msra.mxu1 %v814_v17  ;;  %12092 = vmatprep.mubr.msk.bf16.mxu1 %vm14222_vm0, %v14221_v1 }
 0x330   :  { %12087 = vmatmul.mubr.msk.bf16.vlgmr.msra.gmra.mrb[8].mxu0 %vm693_vm3, %v14690_v16  ;;  %12102 = vmatprep.subr.bf16.mxu1 %v14221_v1 }
 0x331   :  { %12097 = vmatpush3.bf16.msra.mxu0 %v860_v18  ;;  %12098 = vmatprep.mubr.msk.bf16.mxu0 %vm14222_vm0, %v14221_v1 }
 0x332   :  { %12108 = vmatprep.subr.bf16.mxu0 %v14221_v1 }
 0x39a   :  { %v959_v58 = vpop.permute.xlu1 %958 }
 0x39b   :  { %v964_v8 = vsel %vm693_vm3, %v959_v58, 0 }
 0x401   :  { %v734_v28 = vpop.f32.mrb[4].mxu1 }
 0x402   :  { %v12082_v29 = vpop.f32.mrb[5].mxu1  ;;  %v735_v30 = vadd.f32 %v734_v28, %v14711_v26 }
 0x403   :  { %v737_v31 = vpop.f32.mrb[6].mxu1  ;;  %v780_v32 = vpop.f32.mrb[8].mxu0 }
 0x404   :  { %v12083_v33 = vpop.f32.mrb[7].mxu1  ;;  %v12088_v34 = vpop.f32.mrb[9].mxu0  ;;  %v786_v36 = vsel %vm333_vm2, %v735_v30, -inf  ;;  %v781_v37 = vadd.f32 %v780_v32, %v14713_v27 }
 0x405   :  { %787 = vmax.xlane.f32.xlu0 %v786_v36  ;;  %v783_v38 = vpop.f32.mrb[10].mxu0 }
 0x406   :  { %v12089_v39 = vpop.f32.mrb[11].mxu0  ;;  %v789_v40 = vsel %vm333_vm2, %v781_v37, -inf }
 0x409   :  { %790 = vmax.xlane.f32.xlu0 %v789_v40 }
 0x41f   :  { %906 = vrot.lane.b32.xlu0 %v14672_v3, %s14224_s30 }
 0x492   :  { %v788_v41 = vpop.xlane.xlu0 %787 }
 0x493   :  { %v792_v42 = vsub.f32 %v735_v30, %v788_v41 }
 0x495   :  { %v794_v43 = vmul.f32 1.442695, %v792_v42 }
 0x496   :  { %v791_v46 = vpop.xlane.xlu0 %790 }
 0x497   :  { %13513 = vpow2.f32 %v794_v43  ;;  %v793_v50 = vsub.f32 %v781_v37, %v791_v46 }
 0x499   :  { %v796_v53 = vmul.f32 1.442695, %v793_v50 }
 0x49a   :  { %v907_v63 = vpop.permute.xlu0 %906 }
 0x49b   :  { %13515 = vpow2.f32 %v796_v53  ;;  %v912_v4 = vsel %vm693_vm3, %v907_v63, 0 }
 0x4a1   :  { %v13514_v54 = vpop.eup %13513 }
 0x4a2   :  { %v798_v55 = vsel %vm333_vm2, %v13514_v54, 0.0 }
 0x4a3   :  { %799 = vadd.xlane.f32.xlu1 %v798_v55 }
 0x4a5   :  { %v13516_v56 = vpop.eup %13515 }
 0x4a6   :  { %v801_v57 = vsel %vm333_vm2, %v13516_v56, 0.0 }
 0x4a7   :  { %802 = vadd.xlane.f32.xlu1 %v801_v57 }
 0x4b8   :  { %903 = vrot.lane.b32.xlu1 %v14686_v14, %s14224_s30 }
 0x4bc   :  { %955 = vrot.lane.b32.xlu1 %v14690_v16, %s14224_s30 }
 0x530   :  { %v800_v59 = vpop.xlane.xlu1 %799 }
 0x531   :  { %13517 = vrcp.f32 %v800_v59 }
 0x534   :  { %v803_v60 = vpop.xlane.xlu1 %802 }
 0x535   :  { %13519 = vrcp.f32 %v803_v60 }
 0x538   :  { %v904_v9 = vpop.permute.xlu1 %903 }
 0x53b   :  { %v13518_v61 = vpop.eup %13517 }
 0x53c   :  { %v806_v62 = vmul.f32 %v13518_v61, %v13514_v54  ;;  %v956_v10 = vpop.permute.xlu1 %955 }
 0x53e   :  { %v808_v0 = vpack.c.bf16 %v806_v62, %v806_v62 }
 0x53f   :  { %v13520_v2 = vpop.eup %13519 }
 0x540   :  { %12093 = vmatmul.mubr.msk.bf16.vlgmr.msra.gmra.mrb[8].mxu1 %vm333_vm2, %v808_v0  ;;  %v807_v5 = vmul.f32 %v13520_v2, %v13516_v56 }
 0x541   :  { %12103 = vmatpush3.bf16.xpose.msra.mxu1 %v912_v4  ;;  %12104 = vmatprep.mubr.msk.bf16.mxu1 %vm14222_vm0, %v14221_v1 }
 0x542   :  { %v809_v6 = vpack.c.bf16 %v807_v5, %v807_v5  ;;  %12114 = vmatprep.subr.bf16.mxu1 %v14221_v1 }
 0x544   :  { %12099 = vmatmul.mubr.msk.bf16.vlgmr.msra.gmra.mrb[12].mxu0 %vm333_vm2, %v809_v6 }
 0x545   :  { %12109 = vmatpush3.bf16.xpose.msra.mxu0 %v964_v8  ;;  %12110 = vmatprep.mubr.msk.bf16.mxu0 %vm14222_vm0, %v14221_v1 }
 0x546   :  { %12120 = vmatprep.subr.bf16.mxu0 %v14221_v1 }
 0x548   :  { %12105 = vmatmul.mubr.msk.bf16.vlgmr.msra.gmra.mrb[12].mxu1 %vm693_vm3, %v904_v9 }
 0x549   :  { %12116 = vmatprep.mubr.msk.bf16.mxu1 %vm14222_vm0, %v14221_v1 }
 0x54c   :  { %12111 = vmatmul.mubr.msk.bf16.vlgmr.msra.gmra.mrb[16].mxu0 %vm693_vm3, %v956_v10 }
 0x54d   :  { %12122 = vmatprep.mubr.msk.bf16.mxu0 %vm14222_vm0, %v14221_v1 }
 0x613   :  { %v14743_v11 = vpop.f32.mrb[8].mxu1 }
 0x614   :  { %v12094_v13 = vpop.f32.mrb[9].mxu1 }
 0x615   :  { %v853_v17 = vpop.f32.mrb[10].mxu1 }
 0x616   :  { %v12095_v18 = vpop.f32.mrb[11].mxu1 }
 0x617   :  { %v14745_v19 = vpop.f32.mrb[12].mxu0 }
 0x618   :  { %v12100_v20 = vpop.f32.mrb[13].mxu0 }
 0x619   :  { %v899_v21 = vpop.f32.mrb[14].mxu0 }
 0x61a   :  { %v12101_v22 = vpop.f32.mrb[15].mxu0 }
 0x61b   :  { %v948_v23 = vpop.f32.mrb[12].mxu1 }
 0x61c   :  { %v12106_v24 = vpop.f32.mrb[13].mxu1  ;;  %v949_v25 = vadd.f32 %v948_v23, %v14711_v26 }
 0x61d   :  { %v951_v28 = vpop.f32.mrb[14].mxu1 }
 0x61e   :  { %v12107_v29 = vpop.f32.mrb[15].mxu1  ;;  %v1006_v30 = vsel %vm333_vm2, %v949_v25, -inf }
 0x61f   :  { %1007 = vmax.xlane.f32.xlu0 %v1006_v30  ;;  %v1000_v31 = vpop.f32.mrb[16].mxu0 }
 0x620   :  { %v12112_v32 = vpop.f32.mrb[17].mxu0  ;;  %v1001_v33 = vadd.f32 %v1000_v31, %v14713_v27 }
 0x621   :  { %v1003_v34 = vpop.f32.mrb[18].mxu0 }
 0x622   :  { %v12113_v36 = vpop.f32.mrb[19].mxu0  ;;  %v1009_v37 = vsel %vm333_vm2, %v1001_v33, -inf }
 0x623   :  { %1010 = vmax.xlane.f32.xlu1 %v1009_v37 }
 0x634   :  { %1080 = vrot.lane.b32.xlu1 %v14688_v15, %s14224_s30 }
 0x638   :  { %1130 = vrot.lane.b32.xlu1 %v14672_v3, %s14225_s28 }
 0x63c   :  { %1180 = vrot.lane.b32.xlu1 %v14674_v7, %s14225_s28 }
 0x640   :  { %1178 = vrot.lane.b32.xlu1 %v14690_v16, %s14225_s28 }
 0x6ac   :  { %v1008_v38 = vpop.xlane.xlu0 %1007 }
 0x6ad   :  { %v1012_v39 = vsub.f32 %v949_v25, %v1008_v38 }
 0x6af   :  { %v1014_v40 = vmul.f32 1.442695, %v1012_v39 }
 0x6b0   :  { %v1011_v41 = vpop.xlane.xlu1 %1010 }
 0x6b1   :  { %13521 = vpow2.f32 %v1014_v40  ;;  %v1013_v42 = vsub.f32 %v1001_v33, %v1011_v41 }
 0x6b3   :  { %v1016_v43 = vmul.f32 1.442695, %v1013_v42 }
 0x6b4   :  { %v1081_v46 = vpop.permute.xlu1 %1080 }
 0x6b5   :  { %13523 = vpow2.f32 %v1016_v43  ;;  %v1086_v50 = vsel %vm337_vm1, %v1081_v46, 0 }
 0x6b6   :  { %12121 = vmatpush3.bf16.msra.mxu0 %v1086_v50 }
 0x6b7   :  { %12132 = vmatprep.subr.bf16.mxu0 %v14221_v1 }
 0x6b8   :  { %v1131_v62 = vpop.permute.xlu1 %1130 }
 0x6b9   :  { %v1136_v6 = vsel %vm693_vm3, %v1131_v62, 0 }
 0x6bb   :  { %v13522_v53 = vpop.eup %13521 }
 0x6bc   :  { %v1018_v54 = vsel %vm333_vm2, %v13522_v53, 0.0  ;;  %v1181_v5 = vpop.permute.xlu1 %1180 }
 0x6bd   :  { %1019 = vadd.xlane.f32.xlu0 %v1018_v54  ;;  %v1186_v9 = vsel %vm693_vm3, %v1181_v5, 0 }
 0x6bf   :  { %v13524_v55 = vpop.eup %13523 }
 0x6c0   :  { %v1021_v56 = vsel %vm333_vm2, %v13524_v55, 0.0  ;;  %v1179_v13 = vpop.permute.xlu1 %1178 }
 0x6c1   :  { %1022 = vadd.xlane.f32.xlu0 %v1021_v56 }
 0x6d7   :  { %1031 = vrot.lane.b32.xlu0 %v14683_v12, %s14224_s30 }
 0x6db   :  { %1128 = vrot.lane.b32.xlu0 %v14686_v14, %s14225_s28 }
 0x74a   :  { %v1020_v57 = vpop.xlane.xlu0 %1019 }
 0x74b   :  { %13525 = vrcp.f32 %v1020_v57 }
 0x74e   :  { %v1023_v58 = vpop.xlane.xlu0 %1022 }
 0x74f   :  { %13527 = vrcp.f32 %v1023_v58 }
 0x752   :  { %v1032_v59 = vpop.permute.xlu0 %1031 }
 0x753   :  { %v1037_v60 = vsel %vm337_vm1, %v1032_v59, 0 }
 0x754   :  { %12115 = vmatpush3.bf16.msra.mxu1 %v1037_v60 }
 0x755   :  { %v13526_v61 = vpop.eup %13525  ;;  %12126 = vmatprep.subr.bf16.mxu1 %v14221_v1 }
 0x756   :  { %v1026_v63 = vmul.f32 %v13526_v61, %v13522_v53  ;;  %v1129_v10 = vpop.permute.xlu0 %1128 }
 0x758   :  { %v1028_v0 = vpack.c.bf16 %v1026_v63, %v1026_v63 }
 0x759   :  { %v13528_v2 = vpop.eup %13527 }
 0x75a   :  { %12117 = vmatmul.mubr.msk.bf16.vlgmr.msra.gmra.mrb[16].mxu1 %vm333_vm2, %v1028_v0  ;;  %v1027_v4 = vmul.f32 %v13528_v2, %v13524_v55 }
 0x75b   :  { %12128 = vmatprep.mubr.msk.bf16.mxu1 %vm14222_vm0, %v14221_v1 }
 0x75c   :  { %v1029_v8 = vpack.c.bf16 %v1027_v4, %v1027_v4 }
 0x75d   :  { %12127 = vmatpush3.bf16.xpose.msra.mxu1 %v1136_v6 }
 0x75e   :  { %12123 = vmatmul.mubr.msk.bf16.vlgmr.msra.gmra.mrb[20].mxu0 %vm333_vm2, %v1029_v8  ;;  %12138 = vmatprep.subr.bf16.mxu1 %v14221_v1 }
 0x75f   :  { %12133 = vmatpush3.bf16.xpose.msra.mxu0 %v1186_v9  ;;  %12134 = vmatprep.mubr.msk.bf16.mxu0 %vm14222_vm0, %v14221_v1 }
 0x760   :  { %12144 = vmatprep.subr.bf16.mxu0 %v14221_v1 }
 0x764   :  { %12129 = vmatmul.mubr.msk.bf16.vlgmr.msra.gmra.mrb[20].mxu1 %vm693_vm3, %v1129_v10 }
 0x765   :  { %12140 = vmatprep.mubr.msk.bf16.mxu1 %vm14222_vm0, %v14221_v1 }
 0x766   :  { %12135 = vmatmul.mubr.msk.bf16.vlgmr.msra.gmra.mrb[24].mxu0 %vm693_vm3, %v1179_v13 }
 0x767   :  { %12146 = vmatprep.mubr.msk.bf16.mxu0 %vm14222_vm0, %v14221_v1 }
 0x82d   :  { %v14785_v17 = vpop.f32.mrb[16].mxu1 }
 0x82e   :  { %v12118_v18 = vpop.f32.mrb[17].mxu1 }
 0x82f   :  { %v1076_v20 = vpop.f32.mrb[18].mxu1 }
 0x830   :  { %v12119_v21 = vpop.f32.mrb[19].mxu1 }
 0x831   :  { %v14787_v22 = vpop.f32.mrb[20].mxu0 }
 0x832   :  { %v12124_v23 = vpop.f32.mrb[21].mxu0  ;;  %v13042_v24 = vpack.i.bf16 %v14787_v22, %v14785_v17 }
 0x833   :  { %v1125_v25 = vpop.f32.mrb[22].mxu0 }
 0x834   :  { %v12125_v28 = vpop.f32.mrb[23].mxu0 }
 0x837   :  { %v1172_v29 = vpop.f32.mrb[20].mxu1 }
 0x838   :  { %v12130_v30 = vpop.f32.mrb[21].mxu1  ;;  %v1173_v31 = vadd.f32 %v1172_v29, %v14711_v26 }
 0x839   :  { %v1175_v32 = vpop.f32.mrb[22].mxu1  ;;  %v1222_v33 = vpop.f32.mrb[24].mxu0 }
 0x83a   :  { %v12131_v34 = vpop.f32.mrb[23].mxu1  ;;  %v12136_v36 = vpop.f32.mrb[25].mxu0  ;;  %v1228_v37 = vsel %vm333_vm2, %v1173_v31, -inf  ;;  %v1223_v38 = vadd.f32 %v1222_v33, %v14713_v27 }
 0x83b   :  { %1229 = vmax.xlane.f32.xlu0 %v1228_v37  ;;  %v1225_v39 = vpop.f32.mrb[26].mxu0 }
 0x83c   :  { %v12137_v40 = vpop.f32.mrb[27].mxu0  ;;  %v1231_v41 = vsel %vm333_vm2, %v1223_v38, -inf }
 0x83d   :  { %1232 = vmax.xlane.f32.xlu1 %v1231_v41 }
 0x84e   :  { %1300 = vrot.lane.b32.xlu1 %v14688_v15, %s14225_s28 }
 0x852   :  { %1350 = vrot.lane.b32.xlu1 %v14672_v3, %s14226_s2 }
 0x856   :  { %1400 = vrot.lane.b32.xlu1 %v14674_v7, %s14226_s2 }
 0x85a   :  { %1398 = vrot.lane.b32.xlu1 %v14690_v16, %s14226_s2 }
 0x8c8   :  { %v1230_v42 = vpop.xlane.xlu0 %1229 }
 0x8c9   :  { %v1234_v43 = vsub.f32 %v1173_v31, %v1230_v42 }
 0x8ca   :  { %v1233_v46 = vpop.xlane.xlu1 %1232 }
 0x8cb   :  { %v1236_v50 = vmul.f32 1.442695, %v1234_v43  ;;  %v1235_v53 = vsub.f32 %v1223_v38, %v1233_v46 }
 0x8cd   :  { %13529 = vpow2.f32 %v1236_v50  ;;  %v1238_v54 = vmul.f32 1.442695, %v1235_v53 }
 0x8ce   :  { %v1301_v55 = vpop.permute.xlu1 %1300 }
 0x8cf   :  { %13531 = vpow2.f32 %v1238_v54  ;;  %v1306_v56 = vsel %vm337_vm1, %v1301_v55, 0 }
 0x8d0   :  { %12145 = vmatpush3.bf16.msra.mxu0 %v1306_v56 }
 0x8d1   :  { %12156 = vmatprep.subr.bf16.mxu0 %v14221_v1 }
 0x8d2   :  { %v1351_v4 = vpop.permute.xlu1 %1350 }
 0x8d3   :  { %v1356_v13 = vsel %vm693_vm3, %v1351_v4, 0 }
 0x8d6   :  { %v1401_v10 = vpop.permute.xlu1 %1400 }
 0x8d7   :  { %v13530_v57 = vpop.eup %13529  ;;  %v1406_v20 = vsel %vm693_vm3, %v1401_v10, 0 }
 0x8d8   :  { %v1240_v58 = vsel %vm333_vm2, %v13530_v57, 0.0 }
 0x8d9   :  { %v13532_v59 = vpop.eup %13531  ;;  %1241 = vadd.xlane.f32.xlu0 %v1240_v58 }
 0x8da   :  { %v1243_v60 = vsel %vm333_vm2, %v13532_v59, 0.0  ;;  %v1399_v23 = vpop.permute.xlu1 %1398 }
 0x8dd   :  { %1244 = vadd.xlane.f32.xlu0 %v1243_v60 }
 0x8f3   :  { %1252 = vrot.lane.b32.xlu0 %v14683_v12, %s14225_s28 }
 0x8f7   :  { %1348 = vrot.lane.b32.xlu0 %v14686_v14, %s14226_s2 }
 0x966   :  { %v1242_v61 = vpop.xlane.xlu0 %1241 }
 0x967   :  { %13533 = vrcp.f32 %v1242_v61 }
 0x96a   :  { %v1245_v62 = vpop.xlane.xlu0 %1244 }
 0x96b   :  { %13535 = vrcp.f32 %v1245_v62 }
 0x96e   :  { %v1253_v63 = vpop.permute.xlu0 %1252 }
 0x96f   :  { %v1258_v0 = vsel %vm337_vm1, %v1253_v63, 0 }
 0x970   :  { %12139 = vmatpush3.bf16.msra.mxu1 %v1258_v0 }
 0x971   :  { %v13534_v2 = vpop.eup %13533  ;;  %12150 = vmatprep.subr.bf16.mxu1 %v14221_v1 }
 0x972   :  { %v1248_v5 = vmul.f32 %v13534_v2, %v13530_v57  ;;  %v1349_v21 = vpop.permute.xlu0 %1348 }
 0x974   :  { %v1250_v6 = vpack.c.bf16 %v1248_v5, %v1248_v5 }
 0x975   :  { %v13536_v8 = vpop.eup %13535 }
 0x976   :  { %12141 = vmatmul.mubr.msk.bf16.vlgmr.msra.gmra.mrb[24].mxu1 %vm333_vm2, %v1250_v6  ;;  %v1249_v9 = vmul.f32 %v13536_v8, %v13532_v59 }
 0x977   :  { %12152 = vmatprep.mubr.msk.bf16.mxu1 %vm14222_vm0, %v14221_v1 }
 0x978   :  { %v1251_v18 = vpack.c.bf16 %v1249_v9, %v1249_v9 }
 0x979   :  { %12151 = vmatpush3.bf16.xpose.msra.mxu1 %v1356_v13 }
 0x97a   :  { %12147 = vmatmul.mubr.msk.bf16.vlgmr.msra.gmra.mrb[28].mxu0 %vm333_vm2, %v1251_v18  ;;  %12162 = vmatprep.subr.bf16.mxu1 %v14221_v1 }
 0x97b   :  { %12157 = vmatpush3.bf16.xpose.msra.mxu0 %v1406_v20  ;;  %12158 = vmatprep.mubr.msk.bf16.mxu0 %vm14222_vm0, %v14221_v1 }
 0x97c   :  { %12168 = vmatprep.subr.bf16.mxu0 %v14221_v1 }
 0x980   :  { %12153 = vmatmul.mubr.msk.bf16.vlgmr.msra.gmra.mrb[28].mxu1 %vm693_vm3, %v1349_v21 }
 0x981   :  { %12164 = vmatprep.mubr.msk.bf16.mxu1 %vm14222_vm0, %v14221_v1 }
 0x982   :  { %12159 = vmatmul.mubr.msk.bf16.vlgmr.msra.gmra.mrb[32].mxu0 %vm693_vm3, %v1399_v23 }
 0x983   :  { %12170 = vmatprep.mubr.msk.bf16.mxu0 %vm14222_vm0, %v14221_v1 }
 0xa49   :  { %v14829_v25 = vpop.f32.mrb[24].mxu1 }
 0xa4a   :  { %v12142_v28 = vpop.f32.mrb[25].mxu1 }
 0xa4b   :  { %v1297_v29 = vpop.f32.mrb[26].mxu1 }
 0xa4c   :  { %v12143_v30 = vpop.f32.mrb[27].mxu1 }
 0xa4d   :  { %v14831_v31 = vpop.f32.mrb[28].mxu0 }
 0xa4e   :  { %v13047_v32 = vpack.i.bf16 %v14831_v31, %v14829_v25  ;;  %v12148_v33 = vpop.f32.mrb[29].mxu0 }
 0xa4f   :  { %v1345_v34 = vpop.f32.mrb[30].mxu0 }
 0xa50   :  { %v12149_v36 = vpop.f32.mrb[31].mxu0 }
 0xa53   :  { %v1392_v37 = vpop.f32.mrb[28].mxu1 }
 0xa54   :  { %v1393_v38 = vadd.f32 %v1392_v37, %v14711_v26  ;;  %v12154_v39 = vpop.f32.mrb[29].mxu1 }
 0xa55   :  { %v1395_v40 = vpop.f32.mrb[30].mxu1  ;;  %v1442_v41 = vpop.f32.mrb[32].mxu0 }
 0xa56   :  { %v12155_v42 = vpop.f32.mrb[31].mxu1  ;;  %v12160_v43 = vpop.f32.mrb[33].mxu0  ;;  %v1448_v46 = vsel %vm333_vm2, %v1393_v38, -inf  ;;  %v1443_v50 = vadd.f32 %v1442_v41, %v14713_v27 }
 0xa57   :  { %1449 = vmax.xlane.f32.xlu0 %v1448_v46  ;;  %v1445_v53 = vpop.f32.mrb[34].mxu0 }
 0xa58   :  { %v12161_v54 = vpop.f32.mrb[35].mxu0  ;;  %v1451_v55 = vsel %vm333_vm2, %v1443_v50, -inf }
 0xa59   :  { %1452 = vmax.xlane.f32.xlu1 %v1451_v55 }
 0xa6a   :  { %1520 = vrot.lane.b32.xlu1 %v14688_v15, %s14226_s2 }
 0xa6e   :  { %1570 = vrot.lane.b32.xlu1 %v14672_v3, %s16609_s16 }
 0xa72   :  { %1620 = vrot.lane.b32.xlu1 %v14674_v7, %s16609_s16 }
 0xa76   :  { %1618 = vrot.lane.b32.xlu1 %v14690_v16, %s16609_s16 }
 0xae4   :  { %v1450_v56 = vpop.xlane.xlu0 %1449 }
 0xae5   :  { %v1454_v57 = vsub.f32 %v1393_v38, %v1450_v56 }
 0xae6   :  { %v1453_v58 = vpop.xlane.xlu1 %1452 }
 0xae7   :  { %v1456_v59 = vmul.f32 1.442695, %v1454_v57  ;;  %v1455_v60 = vsub.f32 %v1443_v50, %v1453_v58 }
 0xae9   :  { %13537 = vpow2.f32 %v1456_v59  ;;  %v1458_v61 = vmul.f32 1.442695, %v1455_v60 }
 0xaea   :  { %v1521_v62 = vpop.permute.xlu1 %1520 }
 0xaeb   :  { %13539 = vpow2.f32 %v1458_v61  ;;  %v1526_v63 = vsel %vm337_vm1, %v1521_v62, 0 }
 0xaec   :  { %12169 = vmatpush3.bf16.msra.mxu0 %v1526_v63 }
 0xaed   :  { %12180 = vmatprep.subr.bf16.mxu0 %v14221_v1 }
 0xaee   :  { %v1571_v18 = vpop.permute.xlu1 %1570 }
 0xaef   :  { %v1576_v30 = vsel %vm693_vm3, %v1571_v18, 0 }
 0xaf2   :  { %v1621_v29 = vpop.permute.xlu1 %1620 }
 0xaf3   :  { %v13538_v0 = vpop.eup %13537  ;;  %v1626_v34 = vsel %vm693_vm3, %v1621_v29, 0 }
 0xaf4   :  { %v1460_v2 = vsel %vm333_vm2, %v13538_v0, 0.0 }
 0xaf5   :  { %v13540_v4 = vpop.eup %13539  ;;  %1461 = vadd.xlane.f32.xlu0 %v1460_v2 }
 0xaf6   :  { %v1463_v5 = vsel %vm333_vm2, %v13540_v4, 0.0  ;;  %v1619_v37 = vpop.permute.xlu1 %1618 }
 0xaf9   :  { %1464 = vadd.xlane.f32.xlu0 %v1463_v5 }
 0xb0f   :  { %1472 = vrot.lane.b32.xlu0 %v14683_v12, %s14226_s2 }
 0xb13   :  { %1568 = vrot.lane.b32.xlu0 %v14686_v14, %s16609_s16 }
 0xb82   :  { %v1462_v6 = vpop.xlane.xlu0 %1461 }
 0xb83   :  { %13541 = vrcp.f32 %v1462_v6 }
 0xb86   :  { %v1465_v8 = vpop.xlane.xlu0 %1464 }
 0xb87   :  { %13543 = vrcp.f32 %v1465_v8 }
 0xb8a   :  { %v1473_v9 = vpop.permute.xlu0 %1472 }
 0xb8b   :  { %v1478_v10 = vsel %vm337_vm1, %v1473_v9, 0 }
 0xb8c   :  { %12163 = vmatpush3.bf16.msra.mxu1 %v1478_v10 }
 0xb8d   :  { %v13542_v13 = vpop.eup %13541  ;;  %12174 = vmatprep.subr.bf16.mxu1 %v14221_v1 }
 0xb8e   :  { %v1468_v20 = vmul.f32 %v13542_v13, %v13538_v0  ;;  %v1569_v36 = vpop.permute.xlu0 %1568 }
 0xb90   :  { %v1470_v21 = vpack.c.bf16 %v1468_v20, %v1468_v20 }
 0xb91   :  { %v13544_v23 = vpop.eup %13543 }
 0xb92   :  { %12165 = vmatmul.mubr.msk.bf16.vlgmr.msra.gmra.mrb[32].mxu1 %vm333_vm2, %v1470_v21  ;;  %v1469_v28 = vmul.f32 %v13544_v23, %v13540_v4 }
 0xb93   :  { %12176 = vmatprep.mubr.msk.bf16.mxu1 %vm14222_vm0, %v14221_v1 }
 0xb94   :  { %v1471_v33 = vpack.c.bf16 %v1469_v28, %v1469_v28 }
 0xb95   :  { %12175 = vmatpush3.bf16.xpose.msra.mxu1 %v1576_v30 }
 0xb96   :  { %12171 = vmatmul.mubr.msk.bf16.vlgmr.msra.gmra.mrb[36].mxu0 %vm333_vm2, %v1471_v33  ;;  %12186 = vmatprep.subr.bf16.mxu1 %v14221_v1 }
 0xb97   :  { %12181 = vmatpush3.bf16.xpose.msra.mxu0 %v1626_v34  ;;  %12182 = vmatprep.mubr.msk.bf16.mxu0 %vm14222_vm0, %v14221_v1 }
 0xb98   :  { %12192 = vmatprep.subr.bf16.mxu0 %v14221_v1 }
 0xb9c   :  { %12177 = vmatmul.mubr.msk.bf16.vlgmr.msra.gmra.mrb[36].mxu1 %vm693_vm3, %v1569_v36 }
 0xb9d   :  { %12188 = vmatprep.mubr.msk.bf16.mxu1 %vm14222_vm0, %v14221_v1 }
 0xb9e   :  { %12183 = vmatmul.mubr.msk.bf16.vlgmr.msra.gmra.mrb[40].mxu0 %vm693_vm3, %v1619_v37 }
 0xb9f   :  { %12194 = vmatprep.mubr.msk.bf16.mxu0 %vm14222_vm0, %v14221_v1 }
 0xc65   :  { %v14873_v38 = vpop.f32.mrb[32].mxu1 }
 0xc66   :  { %v12166_v39 = vpop.f32.mrb[33].mxu1 }
 0xc67   :  { %v1517_v40 = vpop.f32.mrb[34].mxu1 }
 0xc68   :  { %v12167_v41 = vpop.f32.mrb[35].mxu1 }
 0xc69   :  { %v14875_v42 = vpop.f32.mrb[36].mxu0 }
 0xc6a   :  { %v12172_v43 = vpop.f32.mrb[37].mxu0  ;;  %v13052_v46 = vpack.i.bf16 %v14875_v42, %v14873_v38 }
 0xc6b   :  { %v1565_v50 = vpop.f32.mrb[38].mxu0 }
 0xc6c   :  { %v12173_v53 = vpop.f32.mrb[39].mxu0 }
 0xc6f   :  { %v1612_v54 = vpop.f32.mrb[36].mxu1 }
 0xc70   :  { %v1613_v55 = vadd.f32 %v1612_v54, %v14711_v26  ;;  %v12178_v56 = vpop.f32.mrb[37].mxu1 }
 0xc71   :  { %v1615_v57 = vpop.f32.mrb[38].mxu1  ;;  %v1662_v58 = vpop.f32.mrb[40].mxu0 }
 0xc72   :  { %v12179_v59 = vpop.f32.mrb[39].mxu1  ;;  %v12184_v60 = vpop.f32.mrb[41].mxu0  ;;  %v1668_v61 = vsel %vm333_vm2, %v1613_v55, -inf  ;;  %v1663_v62 = vadd.f32 %v1662_v58, %v14713_v27 }
 0xc73   :  { %1669 = vmax.xlane.f32.xlu0 %v1668_v61  ;;  %v1665_v63 = vpop.f32.mrb[42].mxu0 }
 0xc74   :  { %v12185_v0 = vpop.f32.mrb[43].mxu0  ;;  %v1671_v2 = vsel %vm333_vm2, %v1663_v62, -inf }
 0xc75   :  { %1672 = vmax.xlane.f32.xlu1 %v1671_v2 }
 0xc86   :  { %1740 = vrot.lane.b32.xlu1 %v14688_v15, %s16609_s16 }
 0xc8a   :  { %1790 = vrot.lane.b32.xlu1 %v14672_v3, %s16614_s10 }
 0xc8e   :  { %1840 = vrot.lane.b32.xlu1 %v14674_v7, %s16614_s10 }
 0xc92   :  { %1838 = vrot.lane.b32.xlu1 %v14690_v16, %s16614_s10 }
 0xd00   :  { %v1670_v4 = vpop.xlane.xlu0 %1669 }
 0xd01   :  { %v1674_v5 = vsub.f32 %v1613_v55, %v1670_v4 }
 0xd02   :  { %v1673_v6 = vpop.xlane.xlu1 %1672 }
 0xd03   :  { %v1676_v8 = vmul.f32 1.442695, %v1674_v5  ;;  %v1675_v9 = vsub.f32 %v1663_v62, %v1673_v6 }
 0xd05   :  { %13545 = vpow2.f32 %v1676_v8  ;;  %v1678_v10 = vmul.f32 1.442695, %v1675_v9 }
 0xd06   :  { %v1741_v13 = vpop.permute.xlu1 %1740 }
 0xd07   :  { %13547 = vpow2.f32 %v1678_v10  ;;  %v1746_v18 = vsel %vm337_vm1, %v1741_v13, 0 }
 0xd08   :  { %12193 = vmatpush3.bf16.msra.mxu0 %v1746_v18 }
 0xd09   :  { %12204 = vmatprep.subr.bf16.mxu0 %v14221_v1 }
 0xd0a   :  { %v1791_v37 = vpop.permute.xlu1 %1790 }
 0xd0b   :  { %v1796_v53 = vsel %vm693_vm3, %v1791_v37, 0 }
 0xd0e   :  { %v1841_v50 = vpop.permute.xlu1 %1840 }
 0xd0f   :  { %v13546_v20 = vpop.eup %13545  ;;  %v1846_v55 = vsel %vm693_vm3, %v1841_v50, 0 }
 0xd10   :  { %v1680_v21 = vsel %vm333_vm2, %v13546_v20, 0.0 }
 0xd11   :  { %v13548_v23 = vpop.eup %13547  ;;  %1681 = vadd.xlane.f32.xlu0 %v1680_v21 }
 0xd12   :  { %v1683_v28 = vsel %vm333_vm2, %v13548_v23, 0.0  ;;  %v1839_v57 = vpop.permute.xlu1 %1838 }
 0xd15   :  { %1684 = vadd.xlane.f32.xlu0 %v1683_v28 }
 0xd2b   :  { %1692 = vrot.lane.b32.xlu0 %v14683_v12, %s16609_s16 }
 0xd2f   :  { %1788 = vrot.lane.b32.xlu0 %v14686_v14, %s16614_s10 }
 0xd9e   :  { %v1682_v29 = vpop.xlane.xlu0 %1681 }
 0xd9f   :  { %13549 = vrcp.f32 %v1682_v29 }
 0xda2   :  { %v1685_v30 = vpop.xlane.xlu0 %1684 }
 0xda3   :  { %13551 = vrcp.f32 %v1685_v30 }
 0xda6   :  { %v1693_v33 = vpop.permute.xlu0 %1692 }
 0xda7   :  { %v1698_v34 = vsel %vm337_vm1, %v1693_v33, 0 }
 0xda8   :  { %12187 = vmatpush3.bf16.msra.mxu1 %v1698_v34 }
 0xda9   :  { %v13550_v36 = vpop.eup %13549  ;;  %12198 = vmatprep.subr.bf16.mxu1 %v14221_v1 }
 0xdaa   :  { %v1688_v39 = vmul.f32 %v13550_v36, %v13546_v20  ;;  %v1789_v56 = vpop.permute.xlu0 %1788 }
 0xdac   :  { %v1690_v40 = vpack.c.bf16 %v1688_v39, %v1688_v39 }
 0xdad   :  { %v13552_v41 = vpop.eup %13551 }
 0xdae   :  { %12189 = vmatmul.mubr.msk.bf16.vlgmr.msra.gmra.mrb[40].mxu1 %vm333_vm2, %v1690_v40  ;;  %v1689_v43 = vmul.f32 %v13552_v41, %v13548_v23 }
 0xdaf   :  { %12200 = vmatprep.mubr.msk.bf16.mxu1 %vm14222_vm0, %v14221_v1 }
 0xdb0   :  { %v1691_v54 = vpack.c.bf16 %v1689_v43, %v1689_v43 }
 0xdb1   :  { %12199 = vmatpush3.bf16.xpose.msra.mxu1 %v1796_v53 }
 0xdb2   :  { %12195 = vmatmul.mubr.msk.bf16.vlgmr.msra.gmra.mrb[44].mxu0 %vm333_vm2, %v1691_v54  ;;  %12210 = vmatprep.subr.bf16.mxu1 %v14221_v1 }
 0xdb3   :  { %12205 = vmatpush3.bf16.xpose.msra.mxu0 %v1846_v55  ;;  %12206 = vmatprep.mubr.msk.bf16.mxu0 %vm14222_vm0, %v14221_v1 }
 0xdb4   :  { %12216 = vmatprep.subr.bf16.mxu0 %v14221_v1 }
 0xdb8   :  { %12201 = vmatmul.mubr.msk.bf16.vlgmr.msra.gmra.mrb[44].mxu1 %vm693_vm3, %v1789_v56 }
 0xdb9   :  { %12212 = vmatprep.mubr.msk.bf16.mxu1 %vm14222_vm0, %v14221_v1 }
 0xdba   :  { %12207 = vmatmul.mubr.msk.bf16.vlgmr.msra.gmra.mrb[48].mxu0 %vm693_vm3, %v1839_v57 }
 0xdbb   :  { %12218 = vmatprep.mubr.msk.bf16.mxu0 %vm14222_vm0, %v14221_v1 }
 0xe81   :  { %v14917_v58 = vpop.f32.mrb[40].mxu1 }
 0xe82   :  { %v12190_v59 = vpop.f32.mrb[41].mxu1 }
 0xe83   :  { %v1737_v60 = vpop.f32.mrb[42].mxu1 }
 0xe84   :  { %v12191_v61 = vpop.f32.mrb[43].mxu1 }
 0xe85   :  { %v14919_v62 = vpop.f32.mrb[44].mxu0 }
 0xe86   :  { %v12196_v63 = vpop.f32.mrb[45].mxu0  ;;  %v13057_v0 = vpack.i.bf16 %v14919_v62, %v14917_v58 }
 0xe87   :  { %v1785_v2 = vpop.f32.mrb[46].mxu0 }
 0xe88   :  { %v12197_v4 = vpop.f32.mrb[47].mxu0 }
 0xe8b   :  { %v1832_v5 = vpop.f32.mrb[44].mxu1 }
 0xe8c   :  { %v1833_v6 = vadd.f32 %v1832_v5, %v14711_v26  ;;  %v12202_v8 = vpop.f32.mrb[45].mxu1 }
 0xe8d   :  { %v1835_v9 = vpop.f32.mrb[46].mxu1  ;;  %v1882_v10 = vpop.f32.mrb[48].mxu0 }
 0xe8e   :  { %v12203_v13 = vpop.f32.mrb[47].mxu1  ;;  %v12208_v18 = vpop.f32.mrb[49].mxu0  ;;  %v1888_v20 = vsel %vm333_vm2, %v1833_v6, -inf  ;;  %v1883_v21 = vadd.f32 %v1882_v10, %v14713_v27 }
 0xe8f   :  { %1889 = vmax.xlane.f32.xlu0 %v1888_v20  ;;  %v1885_v23 = vpop.f32.mrb[50].mxu0 }
 0xe90   :  { %v12209_v28 = vpop.f32.mrb[51].mxu0  ;;  %v1891_v29 = vsel %vm333_vm2, %v1883_v21, -inf }
 0xe91   :  { %1892 = vmax.xlane.f32.xlu1 %v1891_v29 }
 0xea2   :  { %1960 = vrot.lane.b32.xlu1 %v14688_v15, %s16614_s10 }
 0xea6   :  { %2010 = vrot.lane.b32.xlu1 %v14672_v3, %s14227_s11 }
 0xeaa   :  { %2060 = vrot.lane.b32.xlu1 %v14674_v7, %s14227_s11 }
 0xeae   :  { %2058 = vrot.lane.b32.xlu1 %v14690_v16, %s14227_s11 }
 0xf1c   :  { %v1890_v30 = vpop.xlane.xlu0 %1889 }
 0xf1d   :  { %v1894_v33 = vsub.f32 %v1833_v6, %v1890_v30 }
 0xf1e   :  { %v1893_v34 = vpop.xlane.xlu1 %1892 }
 0xf1f   :  { %v1896_v36 = vmul.f32 1.442695, %v1894_v33  ;;  %v1895_v37 = vsub.f32 %v1883_v21, %v1893_v34 }
 0xf21   :  { %13553 = vpow2.f32 %v1896_v36  ;;  %v1898_v39 = vmul.f32 1.442695, %v1895_v37 }
 0xf22   :  { %v1961_v40 = vpop.permute.xlu1 %1960 }
 0xf23   :  { %13555 = vpow2.f32 %v1898_v39  ;;  %v1966_v41 = vsel %vm337_vm1, %v1961_v40, 0 }
 0xf24   :  { %12217 = vmatpush3.bf16.msra.mxu0 %v1966_v41 }
 0xf25   :  { %12228 = vmatprep.subr.bf16.mxu0 %v14221_v1 }
 0xf26   :  { %v2011_v61 = vpop.permute.xlu1 %2010 }
 0xf27   :  { %v2016_v8 = vsel %vm693_vm3, %v2011_v61, 0 }
 0xf2a   :  { %v2061_v6 = vpop.permute.xlu1 %2060 }
 0xf2b   :  { %v13554_v43 = vpop.eup %13553  ;;  %v2066_v10 = vsel %vm693_vm3, %v2061_v6, 0 }
 0xf2c   :  { %v1900_v50 = vsel %vm333_vm2, %v13554_v43, 0.0 }
 0xf2d   :  { %v13556_v53 = vpop.eup %13555  ;;  %1901 = vadd.xlane.f32.xlu0 %v1900_v50 }
 0xf2e   :  { %v1903_v54 = vsel %vm333_vm2, %v13556_v53, 0.0  ;;  %v2059_v18 = vpop.permute.xlu1 %2058 }
 0xf31   :  { %1904 = vadd.xlane.f32.xlu0 %v1903_v54 }
 0xf47   :  { %1912 = vrot.lane.b32.xlu0 %v14683_v12, %s16614_s10 }
 0xf4b   :  { %2008 = vrot.lane.b32.xlu0 %v14686_v14, %s14227_s11 }
 0xfba   :  { %v1902_v55 = vpop.xlane.xlu0 %1901 }
 0xfbb   :  { %13557 = vrcp.f32 %v1902_v55 }
 0xfbe   :  { %v1905_v56 = vpop.xlane.xlu0 %1904 }
 0xfbf   :  { %13559 = vrcp.f32 %v1905_v56 }
 0xfc2   :  { %v1913_v57 = vpop.permute.xlu0 %1912 }
 0xfc3   :  { %v1918_v59 = vsel %vm337_vm1, %v1913_v57, 0 }
 0xfc4   :  { %12211 = vmatpush3.bf16.msra.mxu1 %v1918_v59 }
 0xfc5   :  { %v13558_v60 = vpop.eup %13557  ;;  %12222 = vmatprep.subr.bf16.mxu1 %v14221_v1 }
 0xfc6   :  { %v1908_v63 = vmul.f32 %v13558_v60, %v13554_v43  ;;  %v2009_v13 = vpop.permute.xlu0 %2008 }
 0xfc8   :  { %v1910_v2 = vpack.c.bf16 %v1908_v63, %v1908_v63 }
 0xfc9   :  { %v13560_v4 = vpop.eup %13559 }
 0xfca   :  { %12213 = vmatmul.mubr.msk.bf16.vlgmr.msra.gmra.mrb[48].mxu1 %vm333_vm2, %v1910_v2  ;;  %v1909_v5 = vmul.f32 %v13560_v4, %v13556_v53 }
 0xfcb   :  { %12224 = vmatprep.mubr.msk.bf16.mxu1 %vm14222_vm0, %v14221_v1 }
 0xfcc   :  { %v1911_v9 = vpack.c.bf16 %v1909_v5, %v1909_v5 }
 0xfcd   :  { %12223 = vmatpush3.bf16.xpose.msra.mxu1 %v2016_v8 }
 0xfce   :  { %12219 = vmatmul.mubr.msk.bf16.vlgmr.msra.gmra.mrb[52].mxu0 %vm333_vm2, %v1911_v9  ;;  %12234 = vmatprep.subr.bf16.mxu1 %v14221_v1 }
 0xfcf   :  { %12229 = vmatpush3.bf16.xpose.msra.mxu0 %v2066_v10  ;;  %12230 = vmatprep.mubr.msk.bf16.mxu0 %vm14222_vm0, %v14221_v1 }
 0xfd0   :  { %12240 = vmatprep.subr.bf16.mxu0 %v14221_v1 }
 0xfd4   :  { %12225 = vmatmul.mubr.msk.bf16.vlgmr.msra.gmra.mrb[52].mxu1 %vm693_vm3, %v2009_v13 }
 0xfd5   :  { %12236 = vmatprep.mubr.msk.bf16.mxu1 %vm14222_vm0, %v14221_v1 }
 0xfd6   :  { %12231 = vmatmul.mubr.msk.bf16.vlgmr.msra.gmra.mrb[56].mxu0 %vm693_vm3, %v2059_v18 }
 0xfd7   :  { %12242 = vmatprep.mubr.msk.bf16.mxu0 %vm14222_vm0, %v14221_v1 }
0x109d   :  { %v14961_v20 = vpop.f32.mrb[48].mxu1 }
0x109e   :  { %v12214_v21 = vpop.f32.mrb[49].mxu1 }
0x109f   :  { %v1957_v23 = vpop.f32.mrb[50].mxu1 }
0x10a0   :  { %v12215_v28 = vpop.f32.mrb[51].mxu1 }
0x10a1   :  { %v14963_v29 = vpop.f32.mrb[52].mxu0 }
0x10a2   :  { %v13062_v30 = vpack.i.bf16 %v14963_v29, %v14961_v20  ;;  %v12220_v33 = vpop.f32.mrb[53].mxu0  ;;  %v13216_v20 = vld [vmem:[#allocation14] sm:$0xff]   ;;  %v13217_v29 = vld [vmem:[#allocation14 + $0x8] sm:$0xff]  }
0x10a3   :  { %v2005_v34 = vpop.f32.mrb[54].mxu0 }
0x10a4   :  { %v12221_v36 = vpop.f32.mrb[55].mxu0 }
0x10a7   :  { %v2052_v37 = vpop.f32.mrb[52].mxu1 }
0x10a8   :  { %v2053_v39 = vadd.f32 %v2052_v37, %v14711_v26  ;;  %v12226_v40 = vpop.f32.mrb[53].mxu1 }
0x10a9   :  { %v2055_v41 = vpop.f32.mrb[54].mxu1  ;;  %v2102_v43 = vpop.f32.mrb[56].mxu0 }
0x10aa   :  { %v12227_v50 = vpop.f32.mrb[55].mxu1  ;;  %v12232_v53 = vpop.f32.mrb[57].mxu0  ;;  %v2108_v54 = vsel %vm333_vm2, %v2053_v39, -inf  ;;  %v2103_v55 = vadd.f32 %v2102_v43, %v14713_v27 }
0x10ab   :  { %2109 = vmax.xlane.f32.xlu0 %v2108_v54  ;;  %v2105_v56 = vpop.f32.mrb[58].mxu0 }
0x10ac   :  { %v12233_v57 = vpop.f32.mrb[59].mxu0  ;;  %v2111_v59 = vsel %vm333_vm2, %v2103_v55, -inf }
0x10ad   :  { %2112 = vmax.xlane.f32.xlu1 %v2111_v59 }
0x10be   :  { %2180 = vrot.lane.b32.xlu1 %v14688_v15, %s14227_s11 }
0x10c2   :  { %2230 = vrot.lane.b32.xlu1 %v14672_v3, %s16604_s27 }
0x10c6   :  { %2280 = vrot.lane.b32.xlu1 %v14674_v7, %s16604_s27 }
0x10ca   :  { %2278 = vrot.lane.b32.xlu1 %v14690_v16, %s16604_s27 }
0x1138   :  { %v2110_v60 = vpop.xlane.xlu0 %2109 }
0x1139   :  { %v2114_v61 = vsub.f32 %v2053_v39, %v2110_v60 }
0x113a   :  { %v2113_v63 = vpop.xlane.xlu1 %2112 }
0x113b   :  { %v2116_v2 = vmul.f32 1.442695, %v2114_v61  ;;  %v2115_v4 = vsub.f32 %v2103_v55, %v2113_v63 }
0x113d   :  { %13561 = vpow2.f32 %v2116_v2  ;;  %v2118_v5 = vmul.f32 1.442695, %v2115_v4 }
0x113e   :  { %v2181_v6 = vpop.permute.xlu1 %2180 }
0x113f   :  { %13563 = vpow2.f32 %v2118_v5  ;;  %v2186_v8 = vsel %vm337_vm1, %v2181_v6, 0 }
0x1140   :  { %12241 = vmatpush3.bf16.msra.mxu0 %v2186_v8 }
0x1141   :  { %12252 = vmatprep.subr.bf16.mxu0 %v14221_v1 }
0x1142   :  { %v2231_v28 = vpop.permute.xlu1 %2230 }
0x1146   :  { %v2281_v39 = vpop.permute.xlu1 %2280 }
0x1147   :  { %v13562_v3 = vpop.eup %13561  ;;  %v2286_v41 = vsel %vm693_vm3, %v2281_v39, 0 }
0x1148   :  { %v2120_v7 = vsel %vm333_vm2, %v13562_v3, 0.0 }
0x1149   :  { %v13564_v9 = vpop.eup %13563  ;;  %2121 = vadd.xlane.f32.xlu0 %v2120_v7 }
0x114a   :  { %v2123_v16 = vsel %vm333_vm2, %v13564_v9, 0.0  ;;  %v2279_v50 = vpop.permute.xlu1 %2278 }
0x114d   :  { %2124 = vadd.xlane.f32.xlu0 %v2123_v16 }
0x1163   :  { %2132 = vrot.lane.b32.xlu0 %v14683_v12, %s14227_s11 }
0x1167   :  { %2228 = vrot.lane.b32.xlu0 %v14686_v14, %s16604_s27  ;;  %v2236_v14 = vsel %vm693_vm3, %v2231_v28, 0 }
0x11d6   :  { %v2122_v10 = vpop.xlane.xlu0 %2121 }
0x11d7   :  { %13565 = vrcp.f32 %v2122_v10 }
0x11da   :  { %v2125_v13 = vpop.xlane.xlu0 %2124 }
0x11db   :  { %13567 = vrcp.f32 %v2125_v13 }
0x11de   :  { %v2133_v18 = vpop.permute.xlu0 %2132 }
0x11df   :  { %v2138_v21 = vsel %vm337_vm1, %v2133_v18, 0 }
0x11e0   :  { %12235 = vmatpush3.bf16.msra.mxu1 %v2138_v21 }
0x11e1   :  { %v13566_v23 = vpop.eup %13565  ;;  %12246 = vmatprep.subr.bf16.mxu1 %v14221_v1 }
0x11e2   :  { %v2128_v33 = vmul.f32 %v13566_v23, %v13562_v3  ;;  %v2229_v43 = vpop.permute.xlu0 %2228 }
0x11e4   :  { %v2130_v34 = vpack.c.bf16 %v2128_v33, %v2128_v33 }
0x11e5   :  { %v13568_v36 = vpop.eup %13567 }
0x11e6   :  { %12237 = vmatmul.mubr.msk.bf16.vlgmr.msra.gmra.mrb[56].mxu1 %vm333_vm2, %v2130_v34  ;;  %v2129_v37 = vmul.f32 %v13568_v36, %v13564_v9 }
0x11e7   :  { %12248 = vmatprep.mubr.msk.bf16.mxu1 %vm14222_vm0, %v14221_v1 }
0x11e8   :  { %v2131_v40 = vpack.c.bf16 %v2129_v37, %v2129_v37 }
0x11e9   :  { %12247 = vmatpush3.bf16.xpose.msra.mxu1 %v2236_v14  ;;  %v13219_v14 = vld [vmem:[#allocation14 + $0x18] sm:$0xff]  }
0x11ea   :  { %12243 = vmatmul.mubr.msk.bf16.vlgmr.msra.gmra.mrb[60].mxu0 %vm333_vm2, %v2131_v40  ;;  %12258 = vmatprep.subr.bf16.mxu1 %v14221_v1  ;;  %v13220_v40 = vld [vmem:[#allocation14 + $0x20] sm:$0xff]  }
0x11eb   :  { %12253 = vmatpush3.bf16.xpose.msra.mxu0 %v2286_v41  ;;  %12254 = vmatprep.mubr.msk.bf16.mxu0 %vm14222_vm0, %v14221_v1  ;;  %v13221_v41 = vld [vmem:[#allocation14 + $0x28] sm:$0xff]  }
0x11ec   :  { %12264 = vmatprep.subr.bf16.mxu0 %v14221_v1 }
0x11f0   :  { %12249 = vmatmul.mubr.msk.bf16.vlgmr.msra.gmra.mrb[60].mxu1 %vm693_vm3, %v2229_v43  ;;  %v13222_v43 = vld [vmem:[#allocation14 + $0x30] sm:$0xff]  }
0x11f1   :  { %12260 = vmatprep.mubr.msk.bf16.mxu1 %vm14222_vm0, %v14221_v1 }
0x11f2   :  { %12255 = vmatmul.mubr.msk.bf16.vlgmr.msra.gmra.mrb[64].mxu0 %vm693_vm3, %v2279_v50  ;;  %v13223_v50 = vld [vmem:[#allocation14 + $0x38] sm:$0xff]  }
0x11f3   :  { %12266 = vmatprep.mubr.msk.bf16.mxu0 %vm14222_vm0, %v14221_v1 }
0x12b9   :  { %v2174_v53 = vpop.f32.mrb[56].mxu1 }
0x12ba   :  { %v12238_v54 = vpop.f32.mrb[57].mxu1 }
0x12bb   :  { %v2177_v55 = vpop.f32.mrb[58].mxu1 }
0x12bc   :  { %v12239_v56 = vpop.f32.mrb[59].mxu1 }
0x12bd   :  { %v2222_v57 = vpop.f32.mrb[60].mxu0 }
0x12be   :  { %v13067_v59 = vpack.i.bf16 %v2222_v57, %v2174_v53  ;;  %v12244_v60 = vpop.f32.mrb[61].mxu0 }
0x12bf   :  { %v2225_v61 = vpop.f32.mrb[62].mxu0 }
0x12c0   :  { %v12245_v63 = vpop.f32.mrb[63].mxu0 }
0x12c3   :  { %v2272_v2 = vpop.f32.mrb[60].mxu1 }
0x12c4   :  { %v2273_v4 = vadd.f32 %v2272_v2, %v14711_v26  ;;  %v12250_v5 = vpop.f32.mrb[61].mxu1 }
0x12c5   :  { %v2275_v6 = vpop.f32.mrb[62].mxu1  ;;  %v2322_v8 = vpop.f32.mrb[64].mxu0 }
0x12c6   :  { %v2323_v3 = vadd.f32 %v2322_v8, %v14713_v27  ;;  %v12251_v7 = vpop.f32.mrb[63].mxu1  ;;  %v12256_v9 = vpop.f32.mrb[65].mxu0  ;;  %v2328_v16 = vsel %vm333_vm2, %v2273_v4, -inf }
0x12c7   :  { %2329 = vmax.xlane.f32.xlu0 %v2328_v16  ;;  %v2325_v10 = vpop.f32.mrb[66].mxu0 }
0x12c8   :  { %v12257_v13 = vpop.f32.mrb[67].mxu0  ;;  %v2331_v18 = vsel %vm333_vm2, %v2323_v3, -inf }
0x12c9   :  { %2332 = vmax.xlane.f32.xlu1 %v2331_v18 }
0x12da   :  { %2400 = vrot.lane.b32.xlu1 %v14688_v15, %s16604_s27 }
0x12de   :  { %13043 = vrot.lane.b32.xlu1 %v13042_v24, %s16604_s27 }
0x12e2   :  { %13048 = vrot.lane.b32.xlu1 %v13047_v32, %s14227_s11 }
0x12e6   :  { %13058 = vrot.lane.b32.xlu1 %v13057_v0, %s16609_s16 }
0x12ea   :  { %13068 = vrot.lane.b32.xlu1 %v13067_v59, %s14225_s28 }
0x1354   :  { %v2330_v21 = vpop.xlane.xlu0 %2329 }
0x1355   :  { %v2334_v23 = vsub.f32 %v2273_v4, %v2330_v21 }
0x1356   :  { %v2333_v15 = vpop.xlane.xlu1 %2332 }
0x1357   :  { %v2336_v28 = vmul.f32 1.442695, %v2334_v23  ;;  %v2335_v33 = vsub.f32 %v2323_v3, %v2333_v15 }
0x1359   :  { %13569 = vpow2.f32 %v2336_v28  ;;  %v2338_v17 = vmul.f32 1.442695, %v2335_v33 }
0x135a   :  { %v2401_v22 = vpop.permute.xlu1 %2400 }
0x135b   :  { %13571 = vpow2.f32 %v2338_v17  ;;  %v2406_v24 = vsel %vm337_vm1, %v2401_v22, 0 }
0x135c   :  { %12265 = vmatpush3.bf16.msra.mxu0 %v2406_v24 }
0x135d   :  { %12290 = vmatprep.subr.bf16.mxu0 %v14221_v1 }
0x135e   :  { %v13044_v2 = vpop.permute.xlu1 %13043 }
0x135f   :  { %v13046_v6 = vunpack.i.h.bf16 %v13044_v2  ;;  %v13045_v8 = vunpack.i.l.bf16 %v13044_v2 }
0x1361   :  { %v2505_v18 = vsel %vm693_vm3, %v14745_v19, %v13046_v6  ;;  %v2504_v21 = vsel %vm693_vm3, %v14743_v11, %v13045_v8 }
0x1362   :  { %v13049_v4 = vpop.permute.xlu1 %13048 }
0x1363   :  { %v13570_v25 = vpop.eup %13569  ;;  %v13051_v3 = vunpack.i.h.bf16 %v13049_v4  ;;  %v13050_v7 = vunpack.i.l.bf16 %v13049_v4 }
0x1364   :  { %v2340_v31 = vsel %vm333_vm2, %v13570_v25, 0.0 }
0x1365   :  { %v13572_v32 = vpop.eup %13571  ;;  %2341 = vadd.xlane.f32.xlu0 %v2340_v31  ;;  %v2507_v23 = vsel %vm2506_vm4, %v2504_v21, %v13050_v7  ;;  %v2508_v15 = vsel %vm2506_vm4, %v2505_v18, %v13051_v3  ;;  %v13244_v18 = vld [vmem:[#allocation20 + $0x54] ss:$8 sps:$4 sm:$0xff]   ;;  %v13242_v21 = vld [vmem:[#allocation20 + $0x50] ss:$8 sps:$4 sm:$0xff]  }
0x1366   :  { %v2343_v58 = vsel %vm333_vm2, %v13572_v32, 0.0  ;;  %v13059_v9 = vpop.permute.xlu1 %13058 }
0x1367   :  { %v13061_v24 = vunpack.i.h.bf16 %v13059_v9 }
0x1369   :  { %2344 = vadd.xlane.f32.xlu0 %v2343_v58 }
0x136a   :  { %v13069_v31 = vpop.permute.xlu1 %13068 }
0x137f   :  { %2352 = vrot.lane.b32.xlu0 %v14683_v12, %s16604_s27 }
0x1383   :  { %13053 = vrot.lane.b32.xlu0 %v13052_v46, %s16614_s10 }
0x1387   :  { %13063 = vrot.lane.b32.xlu0 %v13062_v30, %s14226_s2  ;;  %v13218_v30 = vld [vmem:[#allocation14 + $0x10] sm:$0xff]  }
0x13f2   :  { %v2342_v62 = vpop.xlane.xlu0 %2341 }
0x13f3   :  { %13573 = vrcp.f32 %v2342_v62  ;;  %v13071_v62 = vunpack.i.h.bf16 %v13069_v31 }
0x13f6   :  { %v2345_v0 = vpop.xlane.xlu0 %2344 }
0x13f7   :  { %13575 = vrcp.f32 %v2345_v0  ;;  %v13070_v0 = vunpack.i.l.bf16 %v13069_v31  ;;  %v13255_v31 = vld [vmem:[#allocation17 + $0x30] sm:$0xff]  }
0x13fa   :  { %v2353_v34 = vpop.permute.xlu0 %2352 }
0x13fb   :  { %v2358_v36 = vsel %vm337_vm1, %v2353_v34, 0 }
0x13fc   :  { %12259 = vmatpush3.bf16.msra.mxu1 %v2358_v36 }
0x13fd   :  { %v13574_v37 = vpop.eup %13573  ;;  %12270 = vmatprep.subr.bf16.mxu1 %v14221_v1 }
0x13fe   :  { %v2348_v12 = vmul.f32 %v13574_v37, %v13570_v25  ;;  %v13054_v5 = vpop.permute.xlu0 %13053  ;;  %v13060_v25 = vunpack.i.l.bf16 %v13059_v9  ;;  %v13237_v9 = vld [vmem:[#allocation17 + $0x8] sm:$0xff]  }
0x13ff   :  { %v13056_v16 = vunpack.i.h.bf16 %v13054_v5  ;;  %v13055_v10 = vunpack.i.l.bf16 %v13054_v5 }
0x1400   :  { %v2350_v39 = vpack.c.bf16 %v2348_v12, %v2348_v12 }
0x1401   :  { %v13576_v38 = vpop.eup %13575  ;;  %v2510_v28 = vsel %vm2509_vm5, %v2507_v23, %v13055_v10  ;;  %v2511_v33 = vsel %vm2509_vm5, %v2508_v15, %v13056_v16  ;;  %v13240_v16 = vld [vmem:[#allocation20 + $0x44] ss:$8 sps:$4 sm:$0xff]   ;;  %v13238_v10 = vld [vmem:[#allocation20 + $0x40] ss:$8 sps:$4 sm:$0xff]   ;;  %v13245_v23 = vld [vmem:[#allocation17 + $0x18] sm:$0xff]  }
0x1402   :  { %12261 = vmatmul.mubr.msk.bf16.vlgmr.msra.gmra.mrb[64].mxu1 %vm333_vm2, %v2350_v39  ;;  %v2349_v42 = vmul.f32 %v13576_v38, %v13572_v32  ;;  %v13064_v13 = vpop.permute.xlu0 %13063  ;;  %v2513_v19 = vsel %vm2512_vm6, %v2510_v28, %v13060_v25  ;;  %v2514_v32 = vsel %vm2512_vm6, %v2511_v33, %v13061_v24  ;;  %v13246_v15 = vld [vmem:[#allocation20 + $0x60] ss:$8 sps:$4 sm:$0xff]   ;;  %v13248_v28 = vld [vmem:[#allocation20 + $0x64] ss:$8 sps:$4 sm:$0xff]  }
0x1403   :  { %12286 = vmatprep.mubr.msk.bf16.mxu1 %vm14222_vm0, %v14221_v1  ;;  %12271 = vmatpush3.bf16.msra.mxu1 %v13216_v20  ;;  %v13066_v17 = vunpack.i.h.bf16 %v13064_v13  ;;  %v13065_v22 = vunpack.i.l.bf16 %v13064_v13  ;;  %v11272_v20 = vld [vmem:[#allocation15] ss:$0 sm:$0xff]  ;;  %v13241_v13 = vld [vmem:[#allocation17 + $0x10] sm:$0xff]   ;;  %v13249_v33 = vld [vmem:[#allocation17 + $0x20] sm:$0xff]  }
0x1404   :  { %v2351_v46 = vpack.c.bf16 %v2349_v42, %v2349_v42  ;;  %12272 = vmatprep.subr.bf16.mxu1 %v14221_v1  ;;  %v13253_v24 = vld [vmem:[#allocation17 + $0x28] sm:$0xff]  }
0x1405   :  { %v2516_v11 = vsel %vm2515_vm7, %v2513_v19, %v13065_v22  ;;  %v2517_v58 = vsel %vm2515_vm7, %v2514_v32, %v13066_v17  ;;  %v13252_v17 = vld [vmem:[#allocation20 + $0x74] ss:$8 sps:$4 sm:$0xff]   ;;  %v13250_v22 = vld [vmem:[#allocation20 + $0x70] ss:$8 sps:$4 sm:$0xff]  }
0x1406   :  { %12267 = vmatmul.mubr.msk.bf16.vlgmr.msra.gmra.mrb[68].mxu0 %vm333_vm2, %v2351_v46  ;;  %v2519_v12 = vsel %vm2518_vm8, %v2516_v11, %v13070_v0  ;;  %v2520_v39 = vsel %vm2518_vm8, %v2517_v58, %v13071_v62  ;;  %v13254_v25 = vld [vmem:[%s16615_s5] sm:$0xff]   ;;  %v13256_v19 = vld [vmem:[#allocation17 + $0x38] sm:$0xff]  }
0x1407   :  { %12306 = vmatprep.mubr.msk.bf16.mxu0 %vm14222_vm0, %v14221_v1  ;;  %12273 = vmatpush3.bf16.msra.mxu1 %v13217_v29 }
0x1408   :  { %12274 = vmatprep.subr.bf16.mxu1 %v14221_v1 }
0x140b   :  { %12275 = vmatpush3.bf16.msra.mxu1 %v13218_v30 }
0x140c   :  { %12276 = vmatprep.subr.bf16.mxu1 %v14221_v1 }
0x140f   :  { %12277 = vmatpush3.bf16.msra.mxu1 %v13219_v14 }
0x1410   :  { %12278 = vmatprep.subr.bf16.mxu1 %v14221_v1 }
0x1413   :  { %12279 = vmatpush3.bf16.msra.mxu1 %v13220_v40 }
0x1414   :  { %12280 = vmatprep.subr.bf16.mxu1 %v14221_v1 }
0x1417   :  { %12281 = vmatpush3.bf16.msra.mxu1 %v13221_v41 }
0x1418   :  { %12282 = vmatprep.subr.bf16.mxu1 %v14221_v1 }
0x141b   :  { %12283 = vmatpush3.bf16.msra.mxu1 %v13222_v43 }
0x141c   :  { %12284 = vmatprep.subr.bf16.mxu1 %v14221_v1 }
0x141f   :  { %12285 = vmatpush3.bf16.msra.mxu1 %v13223_v50 }
0x14d5   :  { %v2394_v53 = vpop.f32.mrb[64].mxu1 }
0x14d6   :  { %v12262_v54 = vpop.f32.mrb[65].mxu1 }
0x14d7   :  { %v2397_v55 = vpop.f32.mrb[66].mxu1  ;;  %v13224_v54 = vld [vmem:[#allocation20] ss:$8 sps:$4 sm:$0xff]  }
0x14d8   :  { %v12263_v56 = vpop.f32.mrb[67].mxu1  ;;  %v13226_v55 = vld [vmem:[#allocation20 + $0x4] ss:$8 sps:$4 sm:$0xff]  }
0x14d9   :  { %v2442_v57 = vpop.f32.mrb[68].mxu0  ;;  %v13229_v56 = vld [vmem:[#allocation20 + $0x14] ss:$8 sps:$4 sm:$0xff]   ;;  %2886 = vmatprep.subr.bf16.mxu1 %v13226_v55 }
0x14da   :  { %v13072_v59 = vpack.i.bf16 %v2442_v57, %v2394_v53  ;;  %v12268_v60 = vpop.f32.mrb[69].mxu0  ;;  %v13233_v57 = vld [vmem:[#allocation17] sm:$0xff]  }
0x14db   :  { %v2445_v61 = vpop.f32.mrb[70].mxu0  ;;  %v13232_v60 = vld [vmem:[#allocation20 + $0x24] ss:$8 sps:$4 sm:$0xff]   ;;  %12291 = vmatpush3.bf16.msra.mxu0 %v13233_v57 }
0x14dc   :  { %13073 = vrot.lane.b32.xlu0 %v13072_v59, %s14224_s30  ;;  %v12269_v63 = vpop.f32.mrb[71].mxu0  ;;  %v13227_v59 = vld [vmem:[#allocation20 + $0x10] ss:$8 sps:$4 sm:$0xff]   ;;  %12292 = vmatprep.subr.bf16.mxu0 %v14221_v1  ;;  %v13230_v61 = vld [vmem:[#allocation20 + $0x20] ss:$8 sps:$4 sm:$0xff]  }
0x14dd   :  { %v13234_v63 = vld [vmem:[#allocation20 + $0x30] ss:$8 sps:$4 sm:$0xff]  }
0x14df   :  { %12293 = vmatpush3.bf16.msra.mxu0 %v13237_v9 }
0x14e0   :  { %12294 = vmatprep.subr.bf16.mxu0 %v14221_v1 }
0x14e3   :  { %12295 = vmatpush3.bf16.msra.mxu0 %v13241_v13 }
0x14e4   :  { %12296 = vmatprep.subr.bf16.mxu0 %v14221_v1 }
0x14e7   :  { %12297 = vmatpush3.bf16.msra.mxu0 %v13245_v23 }
0x14e8   :  { %12298 = vmatprep.subr.bf16.mxu0 %v14221_v1 }
0x14eb   :  { %12299 = vmatpush3.bf16.msra.mxu0 %v13249_v33 }
0x14ec   :  { %12300 = vmatprep.subr.bf16.mxu0 %v14221_v1 }
0x14ef   :  { %12301 = vmatpush3.bf16.msra.mxu0 %v13253_v24 }
0x14f0   :  { %12302 = vmatprep.subr.bf16.mxu0 %v14221_v1 }
0x14f3   :  { %12303 = vmatpush3.bf16.msra.mxu0 %v13255_v31 }
0x14f4   :  { %12304 = vmatprep.subr.bf16.mxu0 %v14221_v1 }
0x14f7   :  { %12305 = vmatpush3.bf16.msra.mxu0 %v13256_v19 }
0x14f8   :  { %12310 = vmatprep.subr.bf16.mxu0 %v14221_v1 }
0x154e   :  { %v13074_v34 = vpop.permute.xlu0 %13073 }
0x154f   :  { %v13076_v36 = vunpack.i.h.bf16 %v13074_v34  ;;  %v13075_v37 = vunpack.i.l.bf16 %v13074_v34 }
0x1551   :  { %v2523_v38 = vsel %vm2521_vm9, %v2520_v39, %v13076_v36  ;;  %v2522_v42 = vsel %vm2521_vm9, %v2519_v12, %v13075_v37  ;;  %v404_v36 = vld [vmem:[%s16553_s18] sm:$0x7] }
0x1552   :  { %v2524_v46 = vpack.c.bf16 %v2523_v38, %v2522_v42  ;;  %v2648_v39 = vrot.slane %v404_v36, %v14664_v51  ;;  %v405_v38 = vld [vmem:[%s16554_s19] sm:$0x7] }
0x1554   :  { %12287 = vmatmul.mubr.bf16.vlgmr.msra.gmra.mrb[68].mxu1 %v2524_v46 }
0x1555   :  { %2918 = vmatprep.mubr.bf16.mxu1 %v14223_v35  ;;  %2887 = vmatpush1.bf16.msra.mxu1 %v13224_v54 }
0x1556   :  { %2888 = vmatprep.subr.bf16.mxu1 %v13229_v56 }
0x1559   :  { %2889 = vmatpush1.bf16.msra.mxu1 %v13227_v59 }
0x155a   :  { %2890 = vmatprep.subr.bf16.mxu1 %v13232_v60 }
0x155d   :  { %2891 = vmatpush1.bf16.msra.mxu1 %v13230_v61 }
0x1627   :  { %v2613_v29 = vpop.f32.mrb[68].mxu1 }
0x1628   :  { %v2614_v30 = vadd.f32 %v11272_v20, %v2613_v29  ;;  %v12288_v14 = vpop.f32.mrb[69].mxu1  ;;  %v2654_v29 = vrot.slane %v405_v38, %v14664_v51 }
0x1629   :  { %v2616_v40 = vpop.f32.mrb[70].mxu1 }
0x162a   :  { %v2617_v41 = vadd.f32 %v11272_v20, %v2616_v40  ;;  %v12289_v43 = vpop.f32.mrb[71].mxu1  ;;  %v2620_v50 = vadd.f32 %v2614_v30, %v14647_v44  ;;  %v13236_v44 = vld [vmem:[#allocation20 + $0x34] ss:$8 sps:$4 sm:$0xff]  }
0x162b   :  { %2892 = vmatprep.subr.bf16.mxu1 %v13236_v44  ;;  %v2788_v43 = vld [vmem:[%s16550_s15] sm:$0x3] }
0x162c   :  { %2622 = vadd.xlane.f32.xlu1 %v2620_v50  ;;  %v2621_v53 = vadd.f32 %v2617_v41, %v14649_v45  ;;  %2893 = vmatpush1.bf16.msra.mxu1 %v13234_v63  ;;  %v2797_v54 = vrot.slane %v2788_v43, %v14661_v49 }
0x162d   :  { %2894 = vmatprep.subr.bf16.mxu1 %v13240_v16 }
0x162e   :  { %2624 = vadd.xlane.f32.xlu0 %v2621_v53 }
0x1630   :  { %2895 = vmatpush1.bf16.msra.mxu1 %v13238_v10 }
0x1631   :  { %2896 = vmatprep.subr.bf16.mxu1 %v13244_v18 }
0x1634   :  { %2897 = vmatpush1.bf16.msra.mxu1 %v13242_v21 }
0x1635   :  { %2898 = vmatprep.subr.bf16.mxu1 %v13248_v28  ;;  %v312_v28 = vld [vmem:[#allocation6] sm:$0x1] }
0x1636   :  { %v402_v33 = vmul.f32 -1e+30, %v312_v28 }
0x1638   :  { %2899 = vmatpush1.bf16.msra.mxu1 %v13246_v15 }
0x1639   :  { %2900 = vmatprep.subr.bf16.mxu1 %v13252_v17  ;;  %v15138_v17 = vrot.slane %v402_v33, %v14664_v51 }
0x163c   :  { %2901 = vmatpush1.bf16.msra.mxu1 %v13250_v22  ;;  %v313_v22 = vld [vmem:[#allocation6 + $0x1] sm:$0x1] }
0x163d   :  { %12334 = vmatprep.subr.bf16.mxu1 %v14221_v1  ;;  %v403_v19 = vmul.f32 -1e+30, %v313_v22 }
0x163f   :  { %2919 = vmatmul.mubr.bf16.vlgmr.msra.gmra.mrb[72].mxu1 %v13254_v25 }
0x1640   :  { %12336 = vmatprep.mubr.msk.bf16.mxu1 %vm14222_vm0, %v14221_v1 }
0x16b9   :  { %v2623_v45 = vpop.xlane.xlu1 %2622 }
0x16ba   :  { %v2627_v2 = vmul.f32 0.0078125, %v2623_v45  ;;  %v11281_v45 = vld [vmem:[#allocation18] ss:$0 sm:$0xff] }
0x16bb   :  { %v2625_v4 = vpop.xlane.xlu0 %2624 }
0x16bc   :  { %v2628_v5 = vmul.f32 0.0078125, %v2625_v4  ;;  %v2629_v6 = vsub.f32 %v2620_v50, %v2627_v2  ;;  %v2793_v50 = vrot.slane %v2788_v43, %v14664_v51 }
0x16be   :  { %v2631_v8 = vmul.f32 %v2629_v6, %v2629_v6  ;;  %v2630_v3 = vsub.f32 %v2621_v53, %v2628_v5 }
0x16c0   :  { %2633 = vadd.xlane.f32.xlu0 %v2631_v8  ;;  %v2632_v7 = vmul.f32 %v2630_v3, %v2630_v3 }
0x16c4   :  { %2635 = vadd.xlane.f32.xlu0 %v2632_v7 }
0x1712   :  { %v2920_v53 = vpop.f32.mrb[72].mxu1 }
0x1713   :  { %v2921_v55 = vadd.f32 %v2920_v53, %v2793_v50  ;;  %v2922_v56 = vpop.f32.mrb[73].mxu1 }
0x1714   :  { %v2924_v57 = vpop.f32.mrb[74].mxu1  ;;  %v2923_v10 = vadd.f32 %v2922_v56, %v2797_v54 }
0x1715   :  { %v15108_v59 = vpack.c.bf16 %v2921_v55, %v2921_v55  ;;  %v2925_v60 = vadd.f32 %v2924_v57, %v2793_v50  ;;  %v2926_v61 = vpop.f32.mrb[75].mxu1 }
0x1716   :  { %v15110_v44 = vadd.f32 %v2926_v61, %v2797_v54  ;;  %v15126_v21 = vpack.c.bf16 %v2923_v10, %v2923_v10 }
0x1717   :  { %v2968_v63 = vsel %vm693_vm3, %v15108_v59, 0  ;;  %v15115_v8 = vpack.c.bf16 %v2925_v60, %v2925_v60 }
0x1718   :  { %v3084_v15 = vsel %vm337_vm1, %v15126_v21, 0  ;;  %v15161_v61 = vpack.c.bf16 %v15110_v44, %v15110_v44 }
0x1719   :  { %v3014_v13 = vsel %vm693_vm3, %v15115_v8, 0 }
0x174d   :  { %v2634_v32 = vpop.xlane.xlu0 %2633 }
0x174e   :  { %v2637_v11 = vmul.f32 0.0078125, %v2634_v32 }
0x1750   :  { %v2639_v58 = vadd.f32 1e-05, %v2637_v11 }
0x1751   :  { %v2636_v62 = vpop.xlane.xlu0 %2635 }
0x1752   :  { %13577 = vrsqrt.f32 %v2639_v58  ;;  %v2638_v0 = vmul.f32 0.0078125, %v2636_v62  ;;  %v15143_v62 = vrot.slane %v403_v19, %v14664_v51 }
0x1754   :  { %v2640_v34 = vadd.f32 1e-05, %v2638_v0 }
0x1756   :  { %13579 = vrsqrt.f32 %v2640_v34 }
0x175c   :  { %v13578_v37 = vpop.eup %13577 }
0x175d   :  { %v2643_v12 = vmul.f32 %v13578_v37, %v2629_v6 }
0x175f   :  { %v2649_v20 = vmul.f32 %v2648_v39, %v2643_v12 }
0x1760   :  { %v13580_v42 = vpop.eup %13579 }
0x1761   :  { %v2644_v46 = vmul.f32 %v13580_v42, %v2630_v3  ;;  %v15095_v14 = vadd.f32 %v2654_v29, %v2649_v20 }
0x1763   :  { %v2650_v30 = vmul.f32 %v2648_v39, %v2644_v46 }
0x1765   :  { %v15097_v40 = vadd.f32 %v2654_v29, %v2650_v30 }
0x1767   :  { %v2657_v41 = vpack.c.bf16 %v15097_v40, %v15095_v14 }
0x1769   :  { %12307 = vmatmul.mubr.bf16.vlgmr.msra.gmra.mrb[72].mxu0 %v2657_v41 }
0x176a   :  { %12312 = vmatprep.mubr.msk.bf16.mxu0 %vm14222_vm0, %v14221_v1  ;;  %12311 = vmatpush3.bf16.xpose.msra.mxu0 %v2968_v63 }
0x176b   :  { %12316 = vmatprep.subr.bf16.mxu0 %v14221_v1 }
0x183c   :  { %v2763_v2 = vpop.f32.mrb[72].mxu0 }
0x183d   :  { %v2764_v4 = vadd.f32 %v11281_v45, %v2763_v2  ;;  %v12308_v5 = vpop.f32.mrb[73].mxu0 }
0x183e   :  { %v2766_v6 = vpop.f32.mrb[74].mxu0 }
0x183f   :  { %v2770_v3 = vmul.f32 0.25, %v2764_v4  ;;  %v12309_v7 = vpop.f32.mrb[75].mxu0  ;;  %v2767_v16 = vadd.f32 %v11281_v45, %v2766_v6  ;;  %v3130_v4 = vsel %vm337_vm1, %v15161_v61, 0 }
0x1841   :  { %v15117_v9 = vpack.c.bf16 %v2770_v3, %v2770_v3  ;;  %v2771_v18 = vmul.f32 0.25, %v2767_v16 }
0x1843   :  { %12313 = vmatmul.mubr.msk.bf16.vlgmr.msra.gmra.mrb[76].mxu0 %vm693_vm3, %v15117_v9  ;;  %v15128_v23 = vpack.c.bf16 %v2771_v18, %v2771_v18 }
0x1844   :  { %12317 = vmatpush3.bf16.xpose.msra.mxu0 %v3014_v13  ;;  %12318 = vmatprep.mubr.msk.bf16.mxu0 %vm14222_vm0, %v14221_v1 }
0x1845   :  { %12322 = vmatprep.subr.bf16.mxu0 %v14221_v1 }
0x184b   :  { %12319 = vmatmul.mubr.msk.bf16.vlgmr.msra.gmra.mrb[80].mxu0 %vm693_vm3, %v15128_v23 }
0x184c   :  { %12323 = vmatpush3.bf16.msra.mxu0 %v3084_v15  ;;  %12324 = vmatprep.mubr.msk.bf16.mxu0 %vm14222_vm0, %v14221_v1 }
0x184d   :  { %12328 = vmatprep.subr.bf16.mxu0 %v14221_v1 }
0x1916   :  { %v3004_v24 = vpop.f32.mrb[76].mxu0 }
0x1917   :  { %v3005_v25 = vadd.f32 %v3004_v24, %v15138_v17  ;;  %v12314_v31 = vpop.f32.mrb[77].mxu0 }
0x1918   :  { %v3007_v32 = vpop.f32.mrb[78].mxu0 }
0x1919   :  { %v12315_v11 = vpop.f32.mrb[79].mxu0  ;;  %v3056_v58 = vsel %vm333_vm2, %v3005_v25, -inf }
0x191a   :  { %3057 = vmax.xlane.f32.xlu1 %v3056_v58 }
0x191e   :  { %v3050_v0 = vpop.f32.mrb[80].mxu0 }
0x191f   :  { %v3051_v34 = vadd.f32 %v3050_v0, %v15143_v62  ;;  %v12320_v36 = vpop.f32.mrb[81].mxu0 }
0x1920   :  { %v3053_v37 = vpop.f32.mrb[82].mxu0 }
0x1921   :  { %v12321_v12 = vpop.f32.mrb[83].mxu0  ;;  %v3059_v39 = vsel %vm333_vm2, %v3051_v34, -inf }
0x1922   :  { %3060 = vmax.xlane.f32.xlu0 %v3059_v39 }
0x19a7   :  { %v3058_v38 = vpop.xlane.xlu1 %3057 }
0x19a8   :  { %v3062_v42 = vsub.f32 %v3005_v25, %v3058_v38 }
0x19aa   :  { %v3064_v46 = vmul.f32 1.442695, %v3062_v42 }
0x19ac   :  { %13581 = vpow2.f32 %v3064_v46 }
0x19af   :  { %v3061_v20 = vpop.xlane.xlu0 %3060 }
0x19b0   :  { %v3063_v29 = vsub.f32 %v3051_v34, %v3061_v20 }
0x19b2   :  { %v3066_v30 = vmul.f32 1.442695, %v3063_v29 }
0x19b4   :  { %13583 = vpow2.f32 %v3066_v30 }
0x19b6   :  { %v13582_v41 = vpop.eup %13581 }
0x19b7   :  { %v3068_v43 = vsel %vm333_vm2, %v13582_v41, 0.0 }
0x19b8   :  { %3069 = vadd.xlane.f32.xlu1 %v3068_v43 }
0x19be   :  { %v13584_v50 = vpop.eup %13583 }
0x19bf   :  { %v3071_v53 = vsel %vm333_vm2, %v13584_v50, 0.0 }
0x19c0   :  { %3072 = vadd.xlane.f32.xlu0 %v3071_v53 }
0x19c9   :  { %3176 = vrot.lane.b32.xlu1 %v15108_v59, %s14224_s30 }
0x19cd   :  { %3173 = vrot.lane.b32.xlu1 %v15117_v9, %s14224_s30 }
0x19d1   :  { %3225 = vrot.lane.b32.xlu1 %v15128_v23, %s14224_s30 }
0x19d6   :  { %3228 = vrot.lane.b32.xlu0 %v15115_v8, %s14224_s30 }
0x1a45   :  { %v3070_v54 = vpop.xlane.xlu1 %3069 }
0x1a46   :  { %13585 = vrcp.f32 %v3070_v54 }
0x1a49   :  { %v3177_v55 = vpop.permute.xlu1 %3176 }
0x1a4a   :  { %v3182_v56 = vsel %vm693_vm3, %v3177_v55, 0 }
0x1a4b   :  { %12335 = vmatpush3.bf16.xpose.msra.mxu1 %v3182_v56 }
0x1a4c   :  { %12346 = vmatprep.subr.bf16.mxu1 %v14221_v1 }
0x1a4d   :  { %v3073_v57 = vpop.xlane.xlu0 %3072  ;;  %v3174_v63 = vpop.permute.xlu1 %3173 }
0x1a4e   :  { %13587 = vrcp.f32 %v3073_v57 }
0x1a50   :  { %v13586_v60 = vpop.eup %13585 }
0x1a51   :  { %v3076_v45 = vmul.f32 %v13586_v60, %v13582_v41  ;;  %v3229_v6 = vpop.permute.xlu0 %3228  ;;  %v3226_v16 = vpop.permute.xlu1 %3225 }
0x1a52   :  { %12337 = vmatmul.mubr.msk.bf16.vlgmr.msra.gmra.mrb[76].mxu1 %vm693_vm3, %v3174_v63  ;;  %v3234_v7 = vsel %vm693_vm3, %v3229_v6, 0 }
0x1a53   :  { %v3078_v2 = vpack.c.bf16 %v3076_v45, %v3076_v45  ;;  %12348 = vmatprep.mubr.msk.bf16.mxu1 %vm14222_vm0, %v14221_v1 }
0x1a55   :  { %12325 = vmatmul.mubr.msk.bf16.vlgmr.msra.gmra.mrb[84].mxu0 %vm333_vm2, %v3078_v2 }
0x1a56   :  { %12329 = vmatpush3.bf16.msra.mxu0 %v3130_v4  ;;  %12330 = vmatprep.mubr.msk.bf16.mxu0 %vm14222_vm0, %v14221_v1 }
0x1a57   :  { %12340 = vmatprep.subr.bf16.mxu0 %v14221_v1 }
0x1a58   :  { %v13588_v44 = vpop.eup %13587 }
0x1a59   :  { %v3077_v5 = vmul.f32 %v13588_v44, %v13584_v50 }
0x1a5b   :  { %v3079_v3 = vpack.c.bf16 %v3077_v5, %v3077_v5 }
0x1a5d   :  { %12331 = vmatmul.mubr.msk.bf16.vlgmr.msra.gmra.mrb[88].mxu0 %vm333_vm2, %v3079_v3 }
0x1a5e   :  { %12342 = vmatprep.mubr.msk.bf16.mxu0 %vm14222_vm0, %v14221_v1 }
0x1a5f   :  { %12341 = vmatpush3.bf16.xpose.msra.mxu0 %v3234_v7 }
0x1a60   :  { %12352 = vmatprep.subr.bf16.mxu0 %v14221_v1 }
0x1a66   :  { %12343 = vmatmul.mubr.msk.bf16.vlgmr.msra.gmra.mrb[92].mxu0 %vm693_vm3, %v3226_v16 }
0x1a67   :  { %12354 = vmatprep.mubr.msk.bf16.mxu0 %vm14222_vm0, %v14221_v1 }
0x1b25   :  { %v3218_v10 = vpop.f32.mrb[76].mxu1 }
0x1b26   :  { %v3219_v13 = vadd.f32 %v3218_v10, %v15138_v17  ;;  %v12338_v18 = vpop.f32.mrb[77].mxu1 }
0x1b27   :  { %v3221_v15 = vpop.f32.mrb[78].mxu1 }
0x1b28   :  { %v15181_v28 = vpop.f32.mrb[84].mxu0  ;;  %v12339_v33 = vpop.f32.mrb[79].mxu1  ;;  %v3276_v22 = vsel %vm333_vm2, %v3219_v13, -inf }
0x1b29   :  { %3277 = vmax.xlane.f32.xlu1 %v3276_v22  ;;  %v12326_v24 = vpop.f32.mrb[85].mxu0 }
0x1b2a   :  { %v3123_v25 = vpop.f32.mrb[86].mxu0 }
0x1b2b   :  { %v12327_v31 = vpop.f32.mrb[87].mxu0 }
0x1b30   :  { %v15184_v19 = vpop.f32.mrb[88].mxu0 }
0x1b31   :  { %v12332_v32 = vpop.f32.mrb[89].mxu0 }
0x1b32   :  { %v3169_v11 = vpop.f32.mrb[90].mxu0 }
0x1b33   :  { %v12333_v58 = vpop.f32.mrb[91].mxu0 }
0x1b39   :  { %v3270_v0 = vpop.f32.mrb[92].mxu0 }
0x1b3a   :  { %v3271_v34 = vadd.f32 %v3270_v0, %v15143_v62  ;;  %v12344_v36 = vpop.f32.mrb[93].mxu0  ;;  %3301 = vrot.lane.b32.xlu1 %v15126_v21, %s14224_s30 }
0x1b3b   :  { %v3273_v37 = vpop.f32.mrb[94].mxu0 }
0x1b3c   :  { %v12345_v12 = vpop.f32.mrb[95].mxu0  ;;  %v3279_v39 = vsel %vm333_vm2, %v3271_v34, -inf }
0x1b3d   :  { %3280 = vmax.xlane.f32.xlu0 %v3279_v39 }
0x1b3e   :  { %3400 = vrot.lane.b32.xlu1 %v15108_v59, %s14225_s28 }
0x1b42   :  { %3450 = vrot.lane.b32.xlu1 %v15115_v8, %s14225_s28 }
0x1b46   :  { %3398 = vrot.lane.b32.xlu1 %v15117_v9, %s14225_s28 }
0x1bb6   :  { %v3278_v38 = vpop.xlane.xlu1 %3277 }
0x1bb7   :  { %v3282_v42 = vsub.f32 %v3219_v13, %v3278_v38 }
0x1bb9   :  { %v3284_v46 = vmul.f32 1.442695, %v3282_v42 }
0x1bba   :  { %v3302_v20 = vpop.permute.xlu1 %3301 }
0x1bbb   :  { %13589 = vpow2.f32 %v3284_v46  ;;  %v3307_v29 = vsel %vm337_vm1, %v3302_v20, 0 }
0x1bbc   :  { %12347 = vmatpush3.bf16.msra.mxu1 %v3307_v29 }
0x1bbd   :  { %12358 = vmatprep.subr.bf16.mxu1 %v14221_v1 }
0x1bbe   :  { %v3401_v60 = vpop.permute.xlu1 %3400 }
0x1bbf   :  { %v3406_v2 = vsel %vm693_vm3, %v3401_v60, 0 }
0x1bc2   :  { %v3451_v4 = vpop.permute.xlu1 %3450 }
0x1bc3   :  { %v3456_v13 = vsel %vm693_vm3, %v3451_v4, 0 }
0x1bc5   :  { %v13590_v30 = vpop.eup %13589 }
0x1bc6   :  { %v3288_v41 = vsel %vm333_vm2, %v13590_v30, 0.0  ;;  %v3399_v5 = vpop.permute.xlu1 %3398 }
0x1bc7   :  { %3289 = vadd.xlane.f32.xlu0 %v3288_v41 }
0x1bca   :  { %v3281_v43 = vpop.xlane.xlu0 %3280 }
0x1bcb   :  { %v3283_v50 = vsub.f32 %v3271_v34, %v3281_v43 }
0x1bcd   :  { %v3286_v53 = vmul.f32 1.442695, %v3283_v50 }
0x1bcf   :  { %13591 = vpow2.f32 %v3286_v53 }
0x1bd9   :  { %v13592_v54 = vpop.eup %13591 }
0x1bda   :  { %v3291_v55 = vsel %vm333_vm2, %v13592_v54, 0.0 }
0x1bdb   :  { %3292 = vadd.xlane.f32.xlu0 %v3291_v55 }
0x1bf1   :  { %3350 = vrot.lane.b32.xlu0 %v15161_v61, %s14224_s30 }
0x1bf5   :  { %3448 = vrot.lane.b32.xlu0 %v15128_v23, %s14225_s28 }
0x1c54   :  { %v3290_v56 = vpop.xlane.xlu0 %3289 }
0x1c55   :  { %13593 = vrcp.f32 %v3290_v56 }
0x1c5f   :  { %v13594_v57 = vpop.eup %13593 }
0x1c60   :  { %v3296_v63 = vmul.f32 %v13594_v57, %v13590_v30 }
0x1c62   :  { %v3298_v45 = vpack.c.bf16 %v3296_v63, %v3296_v63 }
0x1c64   :  { %12349 = vmatmul.mubr.msk.bf16.vlgmr.msra.gmra.mrb[80].mxu1 %vm333_vm2, %v3298_v45 }
0x1c65   :  { %12359 = vmatpush3.bf16.xpose.msra.mxu1 %v3406_v2  ;;  %12360 = vmatprep.mubr.msk.bf16.mxu1 %vm14222_vm0, %v14221_v1 }
0x1c66   :  { %12370 = vmatprep.subr.bf16.mxu1 %v14221_v1 }
0x1c68   :  { %v3293_v44 = vpop.xlane.xlu0 %3292 }
0x1c69   :  { %13595 = vrcp.f32 %v3293_v44 }
0x1c6c   :  { %v3351_v6 = vpop.permute.xlu0 %3350  ;;  %12361 = vmatmul.mubr.msk.bf16.vlgmr.msra.gmra.mrb[84].mxu1 %vm693_vm3, %v3399_v5 }
0x1c6d   :  { %v3356_v3 = vsel %vm337_vm1, %v3351_v6, 0  ;;  %12372 = vmatprep.mubr.msk.bf16.mxu1 %vm14222_vm0, %v14221_v1 }
0x1c6e   :  { %12353 = vmatpush3.bf16.msra.mxu0 %v3356_v3 }
0x1c6f   :  { %12364 = vmatprep.subr.bf16.mxu0 %v14221_v1 }
0x1c70   :  { %v3449_v18 = vpop.permute.xlu0 %3448 }
0x1c73   :  { %v13596_v7 = vpop.eup %13595 }
0x1c74   :  { %v3297_v16 = vmul.f32 %v13596_v7, %v13592_v54 }
0x1c76   :  { %v3299_v10 = vpack.c.bf16 %v3297_v16, %v3297_v16 }
0x1c78   :  { %12355 = vmatmul.mubr.msk.bf16.vlgmr.msra.gmra.mrb[96].mxu0 %vm333_vm2, %v3299_v10 }
0x1c79   :  { %12365 = vmatpush3.bf16.xpose.msra.mxu0 %v3456_v13  ;;  %12366 = vmatprep.mubr.msk.bf16.mxu0 %vm14222_vm0, %v14221_v1 }
0x1c7a   :  { %12376 = vmatprep.subr.bf16.mxu0 %v14221_v1 }
0x1c80   :  { %12367 = vmatmul.mubr.msk.bf16.vlgmr.msra.gmra.mrb[100].mxu0 %vm693_vm3, %v3449_v18 }
0x1c81   :  { %12378 = vmatprep.mubr.msk.bf16.mxu0 %vm14222_vm0, %v14221_v1 }
0x1d37   :  { %v15222_v15 = vpop.f32.mrb[80].mxu1 }
0x1d38   :  { %v12350_v33 = vpop.f32.mrb[81].mxu1 }
0x1d39   :  { %v3346_v22 = vpop.f32.mrb[82].mxu1 }
0x1d3a   :  { %v12351_v24 = vpop.f32.mrb[83].mxu1 }
0x1d3f   :  { %v3442_v25 = vpop.f32.mrb[84].mxu1 }
0x1d40   :  { %v3443_v31 = vadd.f32 %v3442_v25, %v15138_v17  ;;  %v12362_v32 = vpop.f32.mrb[85].mxu1 }
0x1d41   :  { %v3445_v11 = vpop.f32.mrb[86].mxu1 }
0x1d42   :  { %v12363_v58 = vpop.f32.mrb[87].mxu1  ;;  %v3498_v0 = vsel %vm333_vm2, %v3443_v31, -inf }
0x1d43   :  { %3499 = vmax.xlane.f32.xlu1 %v3498_v0 }
0x1d4b   :  { %v15226_v34 = vpop.f32.mrb[96].mxu0 }
0x1d4c   :  { %v13077_v36 = vpack.i.bf16 %v15226_v34, %v15222_v15  ;;  %v12356_v37 = vpop.f32.mrb[97].mxu0 }
0x1d4d   :  { %v3395_v12 = vpop.f32.mrb[98].mxu0 }
0x1d4e   :  { %v12357_v39 = vpop.f32.mrb[99].mxu0 }
0x1d53   :  { %v3492_v38 = vpop.f32.mrb[100].mxu0 }
0x1d54   :  { %v3493_v42 = vadd.f32 %v3492_v38, %v15143_v62  ;;  %v12368_v46 = vpop.f32.mrb[101].mxu0  ;;  %3522 = vrot.lane.b32.xlu1 %v15126_v21, %s14225_s28 }
0x1d55   :  { %v3495_v20 = vpop.f32.mrb[102].mxu0 }
0x1d56   :  { %v12369_v29 = vpop.f32.mrb[103].mxu0  ;;  %v3501_v30 = vsel %vm333_vm2, %v3493_v42, -inf }
0x1d57   :  { %3502 = vmax.xlane.f32.xlu0 %v3501_v30 }
0x1d58   :  { %3620 = vrot.lane.b32.xlu1 %v15108_v59, %s14226_s2 }
0x1d5c   :  { %3670 = vrot.lane.b32.xlu1 %v15115_v8, %s14226_s2 }
0x1d60   :  { %3618 = vrot.lane.b32.xlu1 %v15117_v9, %s14226_s2 }
0x1dd0   :  { %v3500_v41 = vpop.xlane.xlu1 %3499 }
0x1dd1   :  { %v3504_v43 = vsub.f32 %v3443_v31, %v3500_v41 }
0x1dd3   :  { %v3506_v50 = vmul.f32 1.442695, %v3504_v43 }
0x1dd4   :  { %v3523_v53 = vpop.permute.xlu1 %3522 }
0x1dd5   :  { %13597 = vpow2.f32 %v3506_v50  ;;  %v3528_v54 = vsel %vm337_vm1, %v3523_v53, 0 }
0x1dd6   :  { %12371 = vmatpush3.bf16.msra.mxu1 %v3528_v54 }
0x1dd7   :  { %12382 = vmatprep.subr.bf16.mxu1 %v14221_v1 }
0x1dd8   :  { %v3621_v5 = vpop.permute.xlu1 %3620 }
0x1dd9   :  { %v3626_v7 = vsel %vm693_vm3, %v3621_v5, 0 }
0x1ddc   :  { %v3671_v16 = vpop.permute.xlu1 %3670 }
0x1ddd   :  { %v3676_v31 = vsel %vm693_vm3, %v3671_v16, 0 }
0x1ddf   :  { %v13598_v55 = vpop.eup %13597 }
0x1de0   :  { %v3510_v56 = vsel %vm333_vm2, %v13598_v55, 0.0  ;;  %v3619_v13 = vpop.permute.xlu1 %3618 }
0x1de1   :  { %3511 = vadd.xlane.f32.xlu0 %v3510_v56 }
0x1de4   :  { %v3503_v57 = vpop.xlane.xlu0 %3502 }
0x1de5   :  { %v3505_v60 = vsub.f32 %v3493_v42, %v3503_v57 }
0x1de7   :  { %v3508_v63 = vmul.f32 1.442695, %v3505_v60 }
0x1de9   :  { %13599 = vpow2.f32 %v3508_v63 }
0x1df3   :  { %v13600_v45 = vpop.eup %13599 }
0x1df4   :  { %v3513_v2 = vsel %vm333_vm2, %v13600_v45, 0.0 }
0x1df5   :  { %3514 = vadd.xlane.f32.xlu0 %v3513_v2 }
0x1e0b   :  { %3570 = vrot.lane.b32.xlu0 %v15161_v61, %s14225_s28 }
0x1e0f   :  { %3668 = vrot.lane.b32.xlu0 %v15128_v23, %s14226_s2 }
0x1e6e   :  { %v3512_v4 = vpop.xlane.xlu0 %3511 }
0x1e6f   :  { %13601 = vrcp.f32 %v3512_v4 }
0x1e79   :  { %v13602_v44 = vpop.eup %13601 }
0x1e7a   :  { %v3518_v6 = vmul.f32 %v13602_v44, %v13598_v55 }
0x1e7c   :  { %v3520_v3 = vpack.c.bf16 %v3518_v6, %v3518_v6 }
0x1e7e   :  { %12373 = vmatmul.mubr.msk.bf16.vlgmr.msra.gmra.mrb[88].mxu1 %vm333_vm2, %v3520_v3 }
0x1e7f   :  { %12383 = vmatpush3.bf16.xpose.msra.mxu1 %v3626_v7  ;;  %12384 = vmatprep.mubr.msk.bf16.mxu1 %vm14222_vm0, %v14221_v1 }
0x1e80   :  { %12394 = vmatprep.subr.bf16.mxu1 %v14221_v1 }
0x1e82   :  { %v3515_v10 = vpop.xlane.xlu0 %3514 }
0x1e83   :  { %13603 = vrcp.f32 %v3515_v10 }
0x1e86   :  { %v3571_v18 = vpop.permute.xlu0 %3570  ;;  %12385 = vmatmul.mubr.msk.bf16.vlgmr.msra.gmra.mrb[92].mxu1 %vm693_vm3, %v3619_v13 }
0x1e87   :  { %v3576_v33 = vsel %vm337_vm1, %v3571_v18, 0  ;;  %12396 = vmatprep.mubr.msk.bf16.mxu1 %vm14222_vm0, %v14221_v1 }
0x1e88   :  { %12377 = vmatpush3.bf16.msra.mxu0 %v3576_v33 }
0x1e89   :  { %12388 = vmatprep.subr.bf16.mxu0 %v14221_v1 }
0x1e8a   :  { %v3669_v32 = vpop.permute.xlu0 %3668 }
0x1e8d   :  { %v13604_v22 = vpop.eup %13603 }
0x1e8e   :  { %v3519_v24 = vmul.f32 %v13604_v22, %v13600_v45 }
0x1e90   :  { %v3521_v25 = vpack.c.bf16 %v3519_v24, %v3519_v24 }
0x1e92   :  { %12379 = vmatmul.mubr.msk.bf16.vlgmr.msra.gmra.mrb[104].mxu0 %vm333_vm2, %v3521_v25 }
0x1e93   :  { %12389 = vmatpush3.bf16.xpose.msra.mxu0 %v3676_v31  ;;  %12390 = vmatprep.mubr.msk.bf16.mxu0 %vm14222_vm0, %v14221_v1 }
0x1e94   :  { %12400 = vmatprep.subr.bf16.mxu0 %v14221_v1 }
0x1e9a   :  { %12391 = vmatmul.mubr.msk.bf16.vlgmr.msra.gmra.mrb[108].mxu0 %vm693_vm3, %v3669_v32 }
0x1e9b   :  { %12402 = vmatprep.mubr.msk.bf16.mxu0 %vm14222_vm0, %v14221_v1 }
0x1f51   :  { %v15266_v11 = vpop.f32.mrb[88].mxu1 }
0x1f52   :  { %v12374_v58 = vpop.f32.mrb[89].mxu1 }
0x1f53   :  { %v3567_v0 = vpop.f32.mrb[90].mxu1 }
0x1f54   :  { %v12375_v37 = vpop.f32.mrb[91].mxu1 }
0x1f59   :  { %v3662_v12 = vpop.f32.mrb[92].mxu1 }
0x1f5a   :  { %v3663_v39 = vadd.f32 %v3662_v12, %v15138_v17  ;;  %v12386_v38 = vpop.f32.mrb[93].mxu1 }
0x1f5b   :  { %v3665_v42 = vpop.f32.mrb[94].mxu1 }
0x1f5c   :  { %v12387_v46 = vpop.f32.mrb[95].mxu1  ;;  %v3718_v20 = vsel %vm333_vm2, %v3663_v39, -inf }
0x1f5d   :  { %3719 = vmax.xlane.f32.xlu1 %v3718_v20 }
0x1f65   :  { %v15270_v29 = vpop.f32.mrb[104].mxu0 }
0x1f66   :  { %v13082_v30 = vpack.i.bf16 %v15270_v29, %v15266_v11  ;;  %v12380_v41 = vpop.f32.mrb[105].mxu0 }
0x1f67   :  { %v3615_v43 = vpop.f32.mrb[106].mxu0 }
0x1f68   :  { %v12381_v50 = vpop.f32.mrb[107].mxu0 }
0x1f6d   :  { %v3712_v53 = vpop.f32.mrb[108].mxu0 }
0x1f6e   :  { %v3713_v54 = vadd.f32 %v3712_v53, %v15143_v62  ;;  %v12392_v55 = vpop.f32.mrb[109].mxu0  ;;  %3742 = vrot.lane.b32.xlu1 %v15126_v21, %s14226_s2 }
0x1f6f   :  { %v3715_v56 = vpop.f32.mrb[110].mxu0 }
0x1f70   :  { %v12393_v57 = vpop.f32.mrb[111].mxu0  ;;  %v3721_v60 = vsel %vm333_vm2, %v3713_v54, -inf }
0x1f71   :  { %3722 = vmax.xlane.f32.xlu0 %v3721_v60 }
0x1f72   :  { %3840 = vrot.lane.b32.xlu1 %v15108_v59, %s16609_s16 }
0x1f76   :  { %3890 = vrot.lane.b32.xlu1 %v15115_v8, %s16609_s16 }
0x1f7a   :  { %3838 = vrot.lane.b32.xlu1 %v15117_v9, %s16609_s16 }
0x1fea   :  { %v3720_v63 = vpop.xlane.xlu1 %3719 }
0x1feb   :  { %v3724_v45 = vsub.f32 %v3663_v39, %v3720_v63 }
0x1fed   :  { %v3726_v2 = vmul.f32 1.442695, %v3724_v45 }
0x1fee   :  { %v3743_v4 = vpop.permute.xlu1 %3742 }
0x1fef   :  { %13605 = vpow2.f32 %v3726_v2  ;;  %v3748_v44 = vsel %vm337_vm1, %v3743_v4, 0 }
0x1ff0   :  { %12395 = vmatpush3.bf16.msra.mxu1 %v3748_v44 }
0x1ff1   :  { %12406 = vmatprep.subr.bf16.mxu1 %v14221_v1 }
0x1ff2   :  { %v3841_v22 = vpop.permute.xlu1 %3840 }
0x1ff3   :  { %v3846_v31 = vsel %vm693_vm3, %v3841_v22, 0 }
0x1ff6   :  { %v3891_v32 = vpop.permute.xlu1 %3890 }
0x1ff7   :  { %v3896_v46 = vsel %vm693_vm3, %v3891_v32, 0 }
0x1ff9   :  { %v13606_v5 = vpop.eup %13605 }
0x1ffa   :  { %v3730_v6 = vsel %vm333_vm2, %v13606_v5, 0.0  ;;  %v3839_v0 = vpop.permute.xlu1 %3838 }
0x1ffb   :  { %3731 = vadd.xlane.f32.xlu0 %v3730_v6 }
0x1ffe   :  { %v3723_v3 = vpop.xlane.xlu0 %3722 }
0x1fff   :  { %v3725_v7 = vsub.f32 %v3713_v54, %v3723_v3 }
0x2001   :  { %v3728_v16 = vmul.f32 1.442695, %v3725_v7 }
0x2003   :  { %13607 = vpow2.f32 %v3728_v16 }
0x200d   :  { %v13608_v10 = vpop.eup %13607 }
0x200e   :  { %v3733_v13 = vsel %vm333_vm2, %v13608_v10, 0.0 }
0x200f   :  { %3734 = vadd.xlane.f32.xlu0 %v3733_v13 }
0x2025   :  { %3790 = vrot.lane.b32.xlu0 %v15161_v61, %s14226_s2 }
0x2029   :  { %3888 = vrot.lane.b32.xlu0 %v15128_v23, %s16609_s16 }
0x2088   :  { %v3732_v18 = vpop.xlane.xlu0 %3731 }
0x2089   :  { %13609 = vrcp.f32 %v3732_v18 }
0x2093   :  { %v13610_v33 = vpop.eup %13609 }
0x2094   :  { %v3738_v24 = vmul.f32 %v13610_v33, %v13606_v5 }
0x2096   :  { %v3740_v25 = vpack.c.bf16 %v3738_v24, %v3738_v24 }
0x2098   :  { %12397 = vmatmul.mubr.msk.bf16.vlgmr.msra.gmra.mrb[96].mxu1 %vm333_vm2, %v3740_v25 }
0x2099   :  { %12407 = vmatpush3.bf16.xpose.msra.mxu1 %v3846_v31  ;;  %12408 = vmatprep.mubr.msk.bf16.mxu1 %vm14222_vm0, %v14221_v1 }
0x209a   :  { %12418 = vmatprep.subr.bf16.mxu1 %v14221_v1 }
0x209c   :  { %v3735_v58 = vpop.xlane.xlu0 %3734 }
0x209d   :  { %13611 = vrcp.f32 %v3735_v58 }
0x20a0   :  { %v3791_v37 = vpop.permute.xlu0 %3790  ;;  %12409 = vmatmul.mubr.msk.bf16.vlgmr.msra.gmra.mrb[100].mxu1 %vm693_vm3, %v3839_v0 }
0x20a1   :  { %v3796_v12 = vsel %vm337_vm1, %v3791_v37, 0  ;;  %12420 = vmatprep.mubr.msk.bf16.mxu1 %vm14222_vm0, %v14221_v1 }
0x20a2   :  { %12401 = vmatpush3.bf16.msra.mxu0 %v3796_v12 }
0x20a3   :  { %12412 = vmatprep.subr.bf16.mxu0 %v14221_v1 }
0x20a4   :  { %v3889_v20 = vpop.permute.xlu0 %3888 }
0x20a7   :  { %v13612_v39 = vpop.eup %13611 }
0x20a8   :  { %v3739_v38 = vmul.f32 %v13612_v39, %v13608_v10 }
0x20aa   :  { %v3741_v42 = vpack.c.bf16 %v3739_v38, %v3739_v38 }
0x20ac   :  { %12403 = vmatmul.mubr.msk.bf16.vlgmr.msra.gmra.mrb[112].mxu0 %vm333_vm2, %v3741_v42 }
0x20ad   :  { %12413 = vmatpush3.bf16.xpose.msra.mxu0 %v3896_v46  ;;  %12414 = vmatprep.mubr.msk.bf16.mxu0 %vm14222_vm0, %v14221_v1 }
0x20ae   :  { %12424 = vmatprep.subr.bf16.mxu0 %v14221_v1 }
0x20b4   :  { %12415 = vmatmul.mubr.msk.bf16.vlgmr.msra.gmra.mrb[116].mxu0 %vm693_vm3, %v3889_v20 }
0x20b5   :  { %12426 = vmatprep.mubr.msk.bf16.mxu0 %vm14222_vm0, %v14221_v1 }
0x216b   :  { %v15310_v41 = vpop.f32.mrb[96].mxu1 }
0x216c   :  { %v12398_v43 = vpop.f32.mrb[97].mxu1 }
0x216d   :  { %v3787_v50 = vpop.f32.mrb[98].mxu1 }
0x216e   :  { %v12399_v53 = vpop.f32.mrb[99].mxu1 }
0x2173   :  { %v3882_v54 = vpop.f32.mrb[100].mxu1 }
0x2174   :  { %v3883_v55 = vadd.f32 %v3882_v54, %v15138_v17  ;;  %v12410_v56 = vpop.f32.mrb[101].mxu1 }
0x2175   :  { %v3885_v57 = vpop.f32.mrb[102].mxu1 }
0x2176   :  { %v12411_v60 = vpop.f32.mrb[103].mxu1  ;;  %v3938_v63 = vsel %vm333_vm2, %v3883_v55, -inf }
0x2177   :  { %3939 = vmax.xlane.f32.xlu1 %v3938_v63 }
0x217f   :  { %v15314_v45 = vpop.f32.mrb[112].mxu0 }
0x2180   :  { %v13087_v2 = vpack.i.bf16 %v15314_v45, %v15310_v41  ;;  %v12404_v4 = vpop.f32.mrb[113].mxu0 }
0x2181   :  { %v3835_v44 = vpop.f32.mrb[114].mxu0 }
0x2182   :  { %v12405_v5 = vpop.f32.mrb[115].mxu0 }
0x2187   :  { %v3932_v6 = vpop.f32.mrb[116].mxu0 }
0x2188   :  { %v3933_v3 = vadd.f32 %v3932_v6, %v15143_v62  ;;  %v12416_v7 = vpop.f32.mrb[117].mxu0  ;;  %3962 = vrot.lane.b32.xlu1 %v15126_v21, %s16609_s16 }
0x2189   :  { %v3935_v16 = vpop.f32.mrb[118].mxu0 }
0x218a   :  { %v12417_v10 = vpop.f32.mrb[119].mxu0  ;;  %v3941_v13 = vsel %vm333_vm2, %v3933_v3, -inf }
0x218b   :  { %3942 = vmax.xlane.f32.xlu0 %v3941_v13 }
0x218c   :  { %4060 = vrot.lane.b32.xlu1 %v15108_v59, %s16614_s10 }
0x2190   :  { %4110 = vrot.lane.b32.xlu1 %v15115_v8, %s16614_s10 }
0x2194   :  { %4058 = vrot.lane.b32.xlu1 %v15117_v9, %s16614_s10 }
0x2204   :  { %v3940_v18 = vpop.xlane.xlu1 %3939 }
0x2205   :  { %v3944_v33 = vsub.f32 %v3883_v55, %v3940_v18 }
0x2207   :  { %v3946_v22 = vmul.f32 1.442695, %v3944_v33 }
0x2208   :  { %v3963_v24 = vpop.permute.xlu1 %3962 }
0x2209   :  { %13613 = vpow2.f32 %v3946_v22  ;;  %v3968_v25 = vsel %vm337_vm1, %v3963_v24, 0 }
0x220a   :  { %12419 = vmatpush3.bf16.msra.mxu1 %v3968_v25 }
0x220b   :  { %12430 = vmatprep.subr.bf16.mxu1 %v14221_v1 }
0x220c   :  { %v4061_v46 = vpop.permute.xlu1 %4060 }
0x220d   :  { %v4066_v50 = vsel %vm693_vm3, %v4061_v46, 0 }
0x2210   :  { %v4111_v53 = vpop.permute.xlu1 %4110 }
0x2211   :  { %v4116_v44 = vsel %vm693_vm3, %v4111_v53, 0 }
0x2213   :  { %v13614_v31 = vpop.eup %13613 }
0x2214   :  { %v3950_v32 = vsel %vm333_vm2, %v13614_v31, 0.0  ;;  %v4059_v55 = vpop.permute.xlu1 %4058 }
0x2215   :  { %3951 = vadd.xlane.f32.xlu0 %v3950_v32 }
0x2218   :  { %v3943_v58 = vpop.xlane.xlu0 %3942 }
0x2219   :  { %v3945_v0 = vsub.f32 %v3933_v3, %v3943_v58 }
0x221b   :  { %v3948_v37 = vmul.f32 1.442695, %v3945_v0 }
0x221d   :  { %13615 = vpow2.f32 %v3948_v37 }
0x2227   :  { %v13616_v12 = vpop.eup %13615 }
0x2228   :  { %v3953_v39 = vsel %vm333_vm2, %v13616_v12, 0.0 }
0x2229   :  { %3954 = vadd.xlane.f32.xlu0 %v3953_v39 }
0x223f   :  { %4010 = vrot.lane.b32.xlu0 %v15161_v61, %s16609_s16 }
0x2243   :  { %4108 = vrot.lane.b32.xlu0 %v15128_v23, %s16614_s10 }
0x22a2   :  { %v3952_v38 = vpop.xlane.xlu0 %3951 }
0x22a3   :  { %13617 = vrcp.f32 %v3952_v38 }
0x22ad   :  { %v13618_v42 = vpop.eup %13617 }
0x22ae   :  { %v3958_v20 = vmul.f32 %v13618_v42, %v13614_v31 }
0x22b0   :  { %v3960_v43 = vpack.c.bf16 %v3958_v20, %v3958_v20 }
0x22b2   :  { %12421 = vmatmul.mubr.msk.bf16.vlgmr.msra.gmra.mrb[104].mxu1 %vm333_vm2, %v3960_v43 }
0x22b3   :  { %12431 = vmatpush3.bf16.xpose.msra.mxu1 %v4066_v50  ;;  %12432 = vmatprep.mubr.msk.bf16.mxu1 %vm14222_vm0, %v14221_v1 }
0x22b4   :  { %12442 = vmatprep.subr.bf16.mxu1 %v14221_v1 }
0x22b6   :  { %v3955_v54 = vpop.xlane.xlu0 %3954 }
0x22b7   :  { %13619 = vrcp.f32 %v3955_v54 }
0x22ba   :  { %v4011_v56 = vpop.permute.xlu0 %4010  ;;  %12433 = vmatmul.mubr.msk.bf16.vlgmr.msra.gmra.mrb[108].mxu1 %vm693_vm3, %v4059_v55 }
0x22bb   :  { %v4016_v57 = vsel %vm337_vm1, %v4011_v56, 0  ;;  %12444 = vmatprep.mubr.msk.bf16.mxu1 %vm14222_vm0, %v14221_v1 }
0x22bc   :  { %12425 = vmatpush3.bf16.msra.mxu0 %v4016_v57 }
0x22bd   :  { %12436 = vmatprep.subr.bf16.mxu0 %v14221_v1 }
0x22be   :  { %v4109_v5 = vpop.permute.xlu0 %4108 }
0x22c1   :  { %v13620_v60 = vpop.eup %13619 }
0x22c2   :  { %v3959_v63 = vmul.f32 %v13620_v60, %v13616_v12 }
0x22c4   :  { %v3961_v4 = vpack.c.bf16 %v3959_v63, %v3959_v63 }
0x22c6   :  { %12427 = vmatmul.mubr.msk.bf16.vlgmr.msra.gmra.mrb[120].mxu0 %vm333_vm2, %v3961_v4 }
0x22c7   :  { %12437 = vmatpush3.bf16.xpose.msra.mxu0 %v4116_v44  ;;  %12438 = vmatprep.mubr.msk.bf16.mxu0 %vm14222_vm0, %v14221_v1 }
0x22c8   :  { %12448 = vmatprep.subr.bf16.mxu0 %v14221_v1 }
0x22ce   :  { %12439 = vmatmul.mubr.msk.bf16.vlgmr.msra.gmra.mrb[124].mxu0 %vm693_vm3, %v4109_v5 }
0x22cf   :  { %12450 = vmatprep.mubr.msk.bf16.mxu0 %vm14222_vm0, %v14221_v1 }
0x2385   :  { %v15354_v6 = vpop.f32.mrb[104].mxu1 }
0x2386   :  { %v12422_v3 = vpop.f32.mrb[105].mxu1 }
0x2387   :  { %v4007_v7 = vpop.f32.mrb[106].mxu1 }
0x2388   :  { %v12423_v16 = vpop.f32.mrb[107].mxu1 }
0x238d   :  { %v4102_v10 = vpop.f32.mrb[108].mxu1 }
0x238e   :  { %v4103_v13 = vadd.f32 %v4102_v10, %v15138_v17  ;;  %v12434_v18 = vpop.f32.mrb[109].mxu1 }
0x238f   :  { %v4105_v33 = vpop.f32.mrb[110].mxu1 }
0x2390   :  { %v12435_v22 = vpop.f32.mrb[111].mxu1  ;;  %v4158_v24 = vsel %vm333_vm2, %v4103_v13, -inf }
0x2391   :  { %4159 = vmax.xlane.f32.xlu1 %v4158_v24 }
0x2399   :  { %v15358_v25 = vpop.f32.mrb[120].mxu0 }
0x239a   :  { %v13092_v31 = vpack.i.bf16 %v15358_v25, %v15354_v6  ;;  %v12428_v32 = vpop.f32.mrb[121].mxu0 }
0x239b   :  { %v4055_v58 = vpop.f32.mrb[122].mxu0 }
0x239c   :  { %v12429_v0 = vpop.f32.mrb[123].mxu0 }
0x23a1   :  { %v4152_v37 = vpop.f32.mrb[124].mxu0 }
0x23a2   :  { %v4153_v12 = vadd.f32 %v4152_v37, %v15143_v62  ;;  %v12440_v39 = vpop.f32.mrb[125].mxu0  ;;  %4182 = vrot.lane.b32.xlu1 %v15126_v21, %s16614_s10 }
0x23a3   :  { %v4155_v38 = vpop.f32.mrb[126].mxu0 }
0x23a4   :  { %v12441_v42 = vpop.f32.mrb[127].mxu0  ;;  %v4161_v46 = vsel %vm333_vm2, %v4153_v12, -inf }
0x23a5   :  { %4162 = vmax.xlane.f32.xlu0 %v4161_v46 }
0x23a6   :  { %4280 = vrot.lane.b32.xlu1 %v15108_v59, %s14227_s11 }
0x23aa   :  { %4330 = vrot.lane.b32.xlu1 %v15115_v8, %s14227_s11 }
0x23ae   :  { %4278 = vrot.lane.b32.xlu1 %v15117_v9, %s14227_s11 }
0x241e   :  { %v4160_v20 = vpop.xlane.xlu1 %4159 }
0x241f   :  { %v4164_v43 = vsub.f32 %v4103_v13, %v4160_v20 }
0x2421   :  { %v4166_v50 = vmul.f32 1.442695, %v4164_v43 }
0x2422   :  { %v4183_v53 = vpop.permute.xlu1 %4182 }
0x2423   :  { %13621 = vpow2.f32 %v4166_v50  ;;  %v4188_v54 = vsel %vm337_vm1, %v4183_v53, 0 }
0x2424   :  { %12443 = vmatpush3.bf16.msra.mxu1 %v4188_v54 }
0x2425   :  { %12454 = vmatprep.subr.bf16.mxu1 %v14221_v1 }
0x2426   :  { %v4281_v7 = vpop.permute.xlu1 %4280 }
0x2427   :  { %v4286_v13 = vsel %vm693_vm3, %v4281_v7, 0 }
0x242a   :  { %v4331_v18 = vpop.permute.xlu1 %4330 }
0x242d   :  { %v13622_v55 = vpop.eup %13621 }
0x242e   :  { %v4170_v56 = vsel %vm333_vm2, %v13622_v55, 0.0  ;;  %v4279_v22 = vpop.permute.xlu1 %4278 }
0x242f   :  { %4171 = vadd.xlane.f32.xlu0 %v4170_v56 }
0x2432   :  { %v4163_v57 = vpop.xlane.xlu0 %4162 }
0x2433   :  { %v4165_v60 = vsub.f32 %v4153_v12, %v4163_v57  ;;  %v4336_v12 = vsel %vm693_vm3, %v4331_v18, 0 }
0x2435   :  { %v4168_v63 = vmul.f32 1.442695, %v4165_v60 }
0x2437   :  { %13623 = vpow2.f32 %v4168_v63 }
0x2441   :  { %v13624_v4 = vpop.eup %13623 }
0x2442   :  { %v4173_v44 = vsel %vm333_vm2, %v13624_v4, 0.0 }
0x2443   :  { %4174 = vadd.xlane.f32.xlu0 %v4173_v44 }
0x2459   :  { %4230 = vrot.lane.b32.xlu0 %v15161_v61, %s16614_s10 }
0x245d   :  { %4328 = vrot.lane.b32.xlu0 %v15128_v23, %s14227_s11 }
0x24bc   :  { %v4172_v5 = vpop.xlane.xlu0 %4171 }
0x24bd   :  { %13625 = vrcp.f32 %v4172_v5 }
0x24c7   :  { %v13626_v3 = vpop.eup %13625 }
0x24c8   :  { %v4178_v16 = vmul.f32 %v13626_v3, %v13622_v55 }
0x24ca   :  { %v4180_v10 = vpack.c.bf16 %v4178_v16, %v4178_v16 }
0x24cc   :  { %12445 = vmatmul.mubr.msk.bf16.vlgmr.msra.gmra.mrb[112].mxu1 %vm333_vm2, %v4180_v10 }
0x24cd   :  { %12455 = vmatpush3.bf16.xpose.msra.mxu1 %v4286_v13  ;;  %12456 = vmatprep.mubr.msk.bf16.mxu1 %vm14222_vm0, %v14221_v1 }
0x24ce   :  { %12466 = vmatprep.subr.bf16.mxu1 %v14221_v1 }
0x24d0   :  { %v4175_v33 = vpop.xlane.xlu0 %4174 }
0x24d1   :  { %13627 = vrcp.f32 %v4175_v33 }
0x24d4   :  { %v4231_v24 = vpop.permute.xlu0 %4230  ;;  %12457 = vmatmul.mubr.msk.bf16.vlgmr.msra.gmra.mrb[116].mxu1 %vm693_vm3, %v4279_v22 }
0x24d5   :  { %v4236_v32 = vsel %vm337_vm1, %v4231_v24, 0  ;;  %12468 = vmatprep.mubr.msk.bf16.mxu1 %vm14222_vm0, %v14221_v1 }
0x24d6   :  { %12449 = vmatpush3.bf16.msra.mxu0 %v4236_v32 }
0x24d7   :  { %12460 = vmatprep.subr.bf16.mxu0 %v14221_v1 }
0x24d8   :  { %v4329_v39 = vpop.permute.xlu0 %4328 }
0x24db   :  { %v13628_v58 = vpop.eup %13627 }
0x24dc   :  { %v4179_v0 = vmul.f32 %v13628_v58, %v13624_v4 }
0x24de   :  { %v4181_v37 = vpack.c.bf16 %v4179_v0, %v4179_v0 }
0x24e0   :  { %12451 = vmatmul.mubr.msk.bf16.vlgmr.msra.gmra.mrb[128].mxu0 %vm333_vm2, %v4181_v37 }
0x24e1   :  { %12461 = vmatpush3.bf16.xpose.msra.mxu0 %v4336_v12  ;;  %12462 = vmatprep.mubr.msk.bf16.mxu0 %vm14222_vm0, %v14221_v1 }
0x24e2   :  { %12472 = vmatprep.subr.bf16.mxu0 %v14221_v1 }
0x24e8   :  { %12463 = vmatmul.mubr.msk.bf16.vlgmr.msra.gmra.mrb[132].mxu0 %vm693_vm3, %v4329_v39 }
0x24e9   :  { %12474 = vmatprep.mubr.msk.bf16.mxu0 %vm14222_vm0, %v14221_v1 }
0x259f   :  { %v15398_v38 = vpop.f32.mrb[112].mxu1 }
0x25a0   :  { %v12446_v42 = vpop.f32.mrb[113].mxu1 }
0x25a1   :  { %v4227_v46 = vpop.f32.mrb[114].mxu1 }
0x25a2   :  { %v12447_v20 = vpop.f32.mrb[115].mxu1 }
0x25a7   :  { %v4322_v43 = vpop.f32.mrb[116].mxu1 }
0x25a8   :  { %v4323_v50 = vadd.f32 %v4322_v43, %v15138_v17  ;;  %v12458_v53 = vpop.f32.mrb[117].mxu1 }
0x25a9   :  { %v4325_v54 = vpop.f32.mrb[118].mxu1 }
0x25aa   :  { %v12459_v55 = vpop.f32.mrb[119].mxu1  ;;  %v4378_v56 = vsel %vm333_vm2, %v4323_v50, -inf }
0x25ab   :  { %4379 = vmax.xlane.f32.xlu1 %v4378_v56 }
0x25b3   :  { %v15402_v57 = vpop.f32.mrb[128].mxu0 }
0x25b4   :  { %v13097_v60 = vpack.i.bf16 %v15402_v57, %v15398_v38  ;;  %v12452_v63 = vpop.f32.mrb[129].mxu0 }
0x25b5   :  { %v4275_v4 = vpop.f32.mrb[130].mxu0 }
0x25b6   :  { %v12453_v44 = vpop.f32.mrb[131].mxu0 }
0x25bb   :  { %v4372_v5 = vpop.f32.mrb[132].mxu0 }
0x25bc   :  { %v4373_v3 = vadd.f32 %v4372_v5, %v15143_v62  ;;  %v12464_v7 = vpop.f32.mrb[133].mxu0  ;;  %4402 = vrot.lane.b32.xlu1 %v15126_v21, %s14227_s11 }
0x25bd   :  { %v4375_v16 = vpop.f32.mrb[134].mxu0 }
0x25be   :  { %v12465_v10 = vpop.f32.mrb[135].mxu0  ;;  %v4381_v13 = vsel %vm333_vm2, %v4373_v3, -inf }
0x25bf   :  { %4382 = vmax.xlane.f32.xlu0 %v4381_v13 }
0x25c0   :  { %4500 = vrot.lane.b32.xlu1 %v15108_v59, %s16604_s27 }
0x25c4   :  { %4550 = vrot.lane.b32.xlu1 %v15115_v8, %s16604_s27 }
0x25c8   :  { %4498 = vrot.lane.b32.xlu1 %v15117_v9, %s16604_s27 }
0x2638   :  { %v4380_v18 = vpop.xlane.xlu1 %4379 }
0x2639   :  { %v4384_v33 = vsub.f32 %v4323_v50, %v4380_v18 }
0x263b   :  { %v4386_v22 = vmul.f32 1.442695, %v4384_v33 }
0x263c   :  { %v4403_v24 = vpop.permute.xlu1 %4402 }
0x263d   :  { %13629 = vpow2.f32 %v4386_v22  ;;  %v4408_v32 = vsel %vm337_vm1, %v4403_v24, 0 }
0x263e   :  { %12467 = vmatpush3.bf16.msra.mxu1 %v4408_v32 }
0x263f   :  { %12478 = vmatprep.subr.bf16.mxu1 %v14221_v1 }
0x2640   :  { %v4501_v46 = vpop.permute.xlu1 %4500 }
0x2641   :  { %v4506_v50 = vsel %vm693_vm3, %v4501_v46, 0 }
0x2644   :  { %v4551_v53 = vpop.permute.xlu1 %4550 }
0x2645   :  { %v4556_v5 = vsel %vm693_vm3, %v4551_v53, 0 }
0x2647   :  { %v13630_v58 = vpop.eup %13629 }
0x2648   :  { %v4390_v0 = vsel %vm333_vm2, %v13630_v58, 0.0 }
0x2649   :  { %4391 = vadd.xlane.f32.xlu0 %v4390_v0 }
0x264c   :  { %v4383_v59 = vpop.xlane.xlu0 %4382 }
0x264d   :  { %v4385_v37 = vsub.f32 %v4373_v3, %v4383_v59 }
0x264f   :  { %v4388_v8 = vmul.f32 1.442695, %v4385_v37 }
0x2651   :  { %13631 = vpow2.f32 %v4388_v8 }
0x265b   :  { %v13632_v12 = vpop.eup %13631 }
0x265c   :  { %v4393_v9 = vsel %vm333_vm2, %v13632_v12, 0.0 }
0x265d   :  { %4394 = vadd.xlane.f32.xlu0 %v4393_v9 }
0x2673   :  { %4450 = vrot.lane.b32.xlu0 %v15161_v61, %s14227_s11 }
0x2677   :  { %4548 = vrot.lane.b32.xlu0 %v15128_v23, %s16604_s27  ;;  %v4499_v23 = vpop.permute.xlu1 %4498 }
0x26d6   :  { %v4392_v39 = vpop.xlane.xlu0 %4391 }
0x26d7   :  { %13633 = vrcp.f32 %v4392_v39 }
0x26e1   :  { %v13634_v42 = vpop.eup %13633 }
0x26e2   :  { %v4398_v20 = vmul.f32 %v13634_v42, %v13630_v58 }
0x26e4   :  { %v4400_v43 = vpack.c.bf16 %v4398_v20, %v4398_v20 }
0x26e6   :  { %12469 = vmatmul.mubr.msk.bf16.vlgmr.msra.gmra.mrb[120].mxu1 %vm333_vm2, %v4400_v43 }
0x26e7   :  { %12479 = vmatpush3.bf16.xpose.msra.mxu1 %v4506_v50  ;;  %12480 = vmatprep.mubr.msk.bf16.mxu1 %vm14222_vm0, %v14221_v1 }
0x26e8   :  { %12490 = vmatprep.subr.bf16.mxu1 %v14221_v1 }
0x26ea   :  { %v4395_v54 = vpop.xlane.xlu0 %4394 }
0x26eb   :  { %13635 = vrcp.f32 %v4395_v54 }
0x26ee   :  { %v4451_v55 = vpop.permute.xlu0 %4450  ;;  %12481 = vmatmul.mubr.msk.bf16.vlgmr.msra.gmra.mrb[124].mxu1 %vm693_vm3, %v4499_v23 }
0x26ef   :  { %v4456_v56 = vsel %vm337_vm1, %v4451_v55, 0  ;;  %12492 = vmatprep.mubr.msk.bf16.mxu1 %vm14222_vm0, %v14221_v1 }
0x26f0   :  { %12473 = vmatpush3.bf16.msra.mxu0 %v4456_v56  ;;  %v13257_v56 = vld [vmem:[#allocation21] sm:$0xff]  }
0x26f1   :  { %12484 = vmatprep.subr.bf16.mxu0 %v14221_v1 }
0x26f2   :  { %v4549_v3 = vpop.permute.xlu0 %4548 }
0x26f5   :  { %v13636_v63 = vpop.eup %13635 }
0x26f6   :  { %v4399_v4 = vmul.f32 %v13636_v63, %v13632_v12  ;;  %v13258_v63 = vld [vmem:[#allocation21 + $0x8] sm:$0xff]  }
0x26f8   :  { %v4401_v44 = vpack.c.bf16 %v4399_v4, %v4399_v4  ;;  %v13259_v4 = vld [vmem:[#allocation21 + $0x10] sm:$0xff]  }
0x26fa   :  { %12475 = vmatmul.mubr.msk.bf16.vlgmr.msra.gmra.mrb[136].mxu0 %vm333_vm2, %v4401_v44  ;;  %v13260_v44 = vld [vmem:[#allocation21 + $0x18] sm:$0xff]  }
0x26fb   :  { %12485 = vmatpush3.bf16.xpose.msra.mxu0 %v4556_v5  ;;  %12486 = vmatprep.mubr.msk.bf16.mxu0 %vm14222_vm0, %v14221_v1  ;;  %v13261_v5 = vld [vmem:[#allocation21 + $0x20] sm:$0xff]  }
0x26fc   :  { %12496 = vmatprep.subr.bf16.mxu0 %v14221_v1 }
0x2702   :  { %12487 = vmatmul.mubr.msk.bf16.vlgmr.msra.gmra.mrb[140].mxu0 %vm693_vm3, %v4549_v3  ;;  %v13262_v3 = vld [vmem:[#allocation21 + $0x28] sm:$0xff]  }
0x2703   :  { %12498 = vmatprep.mubr.msk.bf16.mxu0 %vm14222_vm0, %v14221_v1 }
0x27b9   :  { %v4444_v7 = vpop.f32.mrb[120].mxu1 }
0x27ba   :  { %v12470_v16 = vpop.f32.mrb[121].mxu1 }
0x27bb   :  { %v4447_v10 = vpop.f32.mrb[122].mxu1 }
0x27bc   :  { %v12471_v13 = vpop.f32.mrb[123].mxu1 }
0x27c1   :  { %v4542_v18 = vpop.f32.mrb[124].mxu1 }
0x27c2   :  { %v4543_v33 = vadd.f32 %v4542_v18, %v15138_v17  ;;  %v12482_v22 = vpop.f32.mrb[125].mxu1 }
0x27c3   :  { %v4545_v24 = vpop.f32.mrb[126].mxu1 }
0x27c4   :  { %v12483_v32 = vpop.f32.mrb[127].mxu1  ;;  %v4598_v58 = vsel %vm333_vm2, %v4543_v33, -inf }
0x27c5   :  { %4599 = vmax.xlane.f32.xlu1 %v4598_v58 }
0x27cd   :  { %v4492_v0 = vpop.f32.mrb[136].mxu0 }
0x27ce   :  { %v13102_v59 = vpack.i.bf16 %v4492_v0, %v4444_v7  ;;  %v12476_v37 = vpop.f32.mrb[137].mxu0  ;;  %v13263_v7 = vld [vmem:[#allocation21 + $0x30] sm:$0xff]  }
0x27cf   :  { %v4495_v8 = vpop.f32.mrb[138].mxu0 }
0x27d0   :  { %v12477_v12 = vpop.f32.mrb[139].mxu0 }
0x27d5   :  { %v4592_v9 = vpop.f32.mrb[140].mxu0 }
0x27d6   :  { %v4593_v39 = vadd.f32 %v4592_v9, %v15143_v62  ;;  %v12488_v42 = vpop.f32.mrb[141].mxu0  ;;  %4622 = vrot.lane.b32.xlu1 %v15126_v21, %s16604_s27 }
0x27d7   :  { %v4595_v46 = vpop.f32.mrb[142].mxu0 }
0x27d8   :  { %v12489_v20 = vpop.f32.mrb[143].mxu0  ;;  %v4601_v43 = vsel %vm333_vm2, %v4593_v39, -inf }
0x27d9   :  { %4602 = vmax.xlane.f32.xlu0 %v4601_v43 }
0x27da   :  { %13078 = vrot.lane.b32.xlu1 %v13077_v36, %s16604_s27 }
0x27de   :  { %13083 = vrot.lane.b32.xlu1 %v13082_v30, %s14227_s11 }
0x27e2   :  { %13088 = vrot.lane.b32.xlu1 %v13087_v2, %s16614_s10 }
0x27e6   :  { %13098 = vrot.lane.b32.xlu1 %v13097_v60, %s14226_s2 }
0x2852   :  { %v4600_v21 = vpop.xlane.xlu1 %4599 }
0x2853   :  { %v4604_v50 = vsub.f32 %v4543_v33, %v4600_v21  ;;  %v13264_v33 = vld [vmem:[#allocation21 + $0x38] sm:$0xff]  }
0x2855   :  { %v4606_v53 = vmul.f32 1.442695, %v4604_v50 }
0x2856   :  { %v4623_v15 = vpop.permute.xlu1 %4622 }
0x2857   :  { %13637 = vpow2.f32 %v4606_v53  ;;  %v4628_v34 = vsel %vm337_vm1, %v4623_v15, 0 }
0x2858   :  { %12491 = vmatpush3.bf16.msra.mxu1 %v4628_v34 }
0x2859   :  { %12502 = vmatprep.subr.bf16.mxu1 %v14221_v1 }
0x2861   :  { %v13638_v36 = vpop.eup %13637 }
0x2862   :  { %v4610_v11 = vsel %vm333_vm2, %v13638_v36, 0.0 }
0x2863   :  { %4611 = vadd.xlane.f32.xlu0 %v4610_v11 }
0x2866   :  { %v4603_v29 = vpop.xlane.xlu0 %4602 }
0x2867   :  { %v4605_v30 = vsub.f32 %v4593_v39, %v4603_v29 }
0x2869   :  { %v4608_v41 = vmul.f32 1.442695, %v4605_v30 }
0x286b   :  { %13639 = vpow2.f32 %v4608_v41 }
0x2875   :  { %v13640_v45 = vpop.eup %13639 }
0x2876   :  { %v4613_v2 = vsel %vm333_vm2, %v13640_v45, 0.0 }
0x2877   :  { %4614 = vadd.xlane.f32.xlu0 %v4613_v2 }
0x288d   :  { %4670 = vrot.lane.b32.xlu0 %v15161_v61, %s16604_s27 }
0x2891   :  { %13093 = vrot.lane.b32.xlu0 %v13092_v31, %s16609_s16 }
0x2895   :  { %13103 = vrot.lane.b32.xlu0 %v13102_v59, %s14225_s28  ;;  %v13079_v59 = vpop.permute.xlu1 %13078 }
0x2896   :  { %v13081_v9 = vunpack.i.h.bf16 %v13079_v59  ;;  %v13080_v39 = vunpack.i.l.bf16 %v13079_v59  ;;  %v13271_v59 = vld [vmem:[#allocation24 + $0x20] ss:$16 sps:$4 sm:$0xff]  }
0x2898   :  { %v4775_v53 = vsel %vm693_vm3, %v15184_v19, %v13081_v9  ;;  %v4774_v15 = vsel %vm693_vm3, %v15181_v28, %v13080_v39 }
0x2899   :  { %v13084_v37 = vpop.permute.xlu1 %13083 }
0x289a   :  { %v13086_v42 = vunpack.i.h.bf16 %v13084_v37  ;;  %v13085_v46 = vunpack.i.l.bf16 %v13084_v37  ;;  %v13274_v37 = vld [vmem:[#allocation24 + $0x28] ss:$16 sps:$4 sm:$0xff]  }
0x289c   :  { %v4777_v11 = vsel %vm2506_vm4, %v4775_v53, %v13086_v42  ;;  %v13285_v53 = vld [vmem:[#allocation24 + $0x64] ss:$16 sps:$4 sm:$0xff]  }
0x289d   :  { %v13089_v12 = vpop.permute.xlu1 %13088 }
0x289e   :  { %v13091_v20 = vunpack.i.h.bf16 %v13089_v12  ;;  %v13090_v43 = vunpack.i.l.bf16 %v13089_v12 }
0x28a0   :  { %v4779_v41 = vsel %vm2509_vm5, %v4777_v11, %v13091_v20  ;;  %v13279_v20 = vld [vmem:[#allocation24 + $0x44] ss:$16 sps:$4 sm:$0xff]  }
0x28a1   :  { %v13099_v29 = vpop.permute.xlu1 %13098  ;;  %v13291_v11 = vld [vmem:[#allocation24 + $0x84] ss:$16 sps:$4 sm:$0xff]  }
0x28a2   :  { %v13101_v19 = vunpack.i.h.bf16 %v13099_v29 }
0x28f0   :  { %v4612_v38 = vpop.xlane.xlu0 %4611 }
0x28f1   :  { %13641 = vrcp.f32 %v4612_v38 }
0x28fb   :  { %v13642_v57 = vpop.eup %13641 }
0x28fc   :  { %v4618_v60 = vmul.f32 %v13642_v57, %v13638_v36  ;;  %v4776_v36 = vsel %vm2506_vm4, %v4774_v15, %v13085_v46  ;;  %v13288_v15 = vld [vmem:[#allocation24 + $0x6c] ss:$16 sps:$4 sm:$0xff]  }
0x28fd   :  { %v4778_v30 = vsel %vm2509_vm5, %v4776_v36, %v13090_v43  ;;  %v13282_v43 = vld [vmem:[#allocation24 + $0x4c] ss:$16 sps:$4 sm:$0xff]   ;;  %v13286_v36 = vld [vmem:[#allocation24 + $0x68] ss:$16 sps:$4 sm:$0xff]  }
0x28fe   :  { %v4620_v54 = vpack.c.bf16 %v4618_v60, %v4618_v60  ;;  %v13100_v60 = vunpack.i.l.bf16 %v13099_v29  ;;  %v13289_v29 = vld [vmem:[#allocation24 + $0x80] ss:$16 sps:$4 sm:$0xff]  }
0x2900   :  { %12493 = vmatmul.mubr.msk.bf16.vlgmr.msra.gmra.mrb[128].mxu1 %vm333_vm2, %v4620_v54 }
0x2901   :  { %12518 = vmatprep.mubr.msk.bf16.mxu1 %vm14222_vm0, %v14221_v1  ;;  %12503 = vmatpush3.bf16.msra.mxu1 %v13257_v56 }
0x2902   :  { %12504 = vmatprep.subr.bf16.mxu1 %v14221_v1 }
0x2904   :  { %v4615_v23 = vpop.xlane.xlu0 %4614 }
0x2905   :  { %13643 = vrcp.f32 %v4615_v23  ;;  %12505 = vmatpush3.bf16.msra.mxu1 %v13258_v63 }
0x2906   :  { %12506 = vmatprep.subr.bf16.mxu1 %v14221_v1 }
0x2908   :  { %v4671_v61 = vpop.permute.xlu0 %4670 }
0x2909   :  { %v4676_v55 = vsel %vm337_vm1, %v4671_v61, 0  ;;  %12507 = vmatpush3.bf16.msra.mxu1 %v13259_v4  ;;  %v11339_v4 = vld [vmem:[#allocation23] ss:$0 sm:$0xff] }
0x290a   :  { %12497 = vmatpush3.bf16.msra.mxu0 %v4676_v55  ;;  %12508 = vmatprep.subr.bf16.mxu1 %v14221_v1 }
0x290c   :  { %v13094_v8 = vpop.permute.xlu0 %13093 }
0x290d   :  { %12509 = vmatpush3.bf16.msra.mxu1 %v13260_v44  ;;  %v13096_v21 = vunpack.i.h.bf16 %v13094_v8  ;;  %v13095_v50 = vunpack.i.l.bf16 %v13094_v8 }
0x290e   :  { %12510 = vmatprep.subr.bf16.mxu1 %v14221_v1 }
0x290f   :  { %v13644_v6 = vpop.eup %13643  ;;  %v4780_v2 = vsel %vm2512_vm6, %v4778_v30, %v13095_v50  ;;  %v13280_v50 = vld [vmem:[#allocation24 + $0x48] ss:$16 sps:$4 sm:$0xff]  }
0x2910   :  { %v4619_v25 = vmul.f32 %v13644_v6, %v13640_v45  ;;  %v13104_v34 = vpop.permute.xlu0 %13103  ;;  %v4781_v45 = vsel %vm2512_vm6, %v4779_v41, %v13096_v21  ;;  %v4782_v28 = vsel %vm2515_vm7, %v4780_v2, %v13100_v60  ;;  %v13277_v21 = vld [vmem:[#allocation24 + $0x40] ss:$16 sps:$4 sm:$0xff]   ;;  %v13292_v30 = vld [vmem:[#allocation24 + $0x88] ss:$16 sps:$4 sm:$0xff]   ;;  %v13294_v41 = vld [vmem:[#allocation24 + $0x8c] ss:$16 sps:$4 sm:$0xff]  }
0x2911   :  { %12511 = vmatpush3.bf16.msra.mxu1 %v13261_v5  ;;  %v13106_v38 = vunpack.i.h.bf16 %v13104_v34  ;;  %v13105_v57 = vunpack.i.l.bf16 %v13104_v34  ;;  %v4783_v23 = vsel %vm2515_vm7, %v4781_v45, %v13101_v19  ;;  %v13283_v34 = vld [vmem:[#allocation24 + $0x60] ss:$16 sps:$4 sm:$0xff]   ;;  %v13297_v45 = vld [vmem:[#allocation24 + $0xa4] ss:$16 sps:$4 sm:$0xff]   ;;  %v13300_v2 = vld [vmem:[#allocation24 + $0xac] ss:$16 sps:$4 sm:$0xff]  }
0x2912   :  { %v4621_v31 = vpack.c.bf16 %v4619_v25, %v4619_v25  ;;  %12512 = vmatprep.subr.bf16.mxu1 %v14221_v1  ;;  %v13303_v19 = vld [vmem:[#allocation24 + $0xc4] ss:$16 sps:$4 sm:$0xff]   ;;  %v13306_v60 = vld [vmem:[#allocation24 + $0xcc] ss:$16 sps:$4 sm:$0xff]  }
0x2913   :  { %v4784_v6 = vsel %vm2518_vm8, %v4782_v28, %v13105_v57  ;;  %v4785_v25 = vsel %vm2518_vm8, %v4783_v23, %v13106_v38  ;;  %v13295_v38 = vld [vmem:[#allocation24 + $0xa0] ss:$16 sps:$4 sm:$0xff]   ;;  %v13298_v57 = vld [vmem:[#allocation24 + $0xa8] ss:$16 sps:$4 sm:$0xff]   ;;  %v13309_v23 = vld [vmem:[#allocation24 + $0xe4] ss:$16 sps:$4 sm:$0xff]  }
0x2914   :  { %12499 = vmatmul.mubr.msk.bf16.vlgmr.msra.gmra.mrb[144].mxu0 %vm333_vm2, %v4621_v31  ;;  %v13304_v28 = vld [vmem:[#allocation24 + $0xc8] ss:$16 sps:$4 sm:$0xff]  }
0x2915   :  { %5167 = vmatprep.mubr.bf16.mxu0 %v14223_v35  ;;  %12513 = vmatpush3.bf16.msra.mxu1 %v13262_v3 }
0x2916   :  { %12514 = vmatprep.subr.bf16.mxu1 %v14221_v1 }
0x2919   :  { %12515 = vmatpush3.bf16.msra.mxu1 %v13263_v7 }
0x291a   :  { %12516 = vmatprep.subr.bf16.mxu1 %v14221_v1 }
0x291d   :  { %12517 = vmatpush3.bf16.msra.mxu1 %v13264_v33  ;;  %v13265_v33 = vld [vmem:[#allocation24] ss:$16 sps:$4 sm:$0xff]  }
0x29d3   :  { %v4664_v16 = vpop.f32.mrb[128].mxu1 }
0x29d4   :  { %v12494_v10 = vpop.f32.mrb[129].mxu1 }
0x29d5   :  { %v4667_v13 = vpop.f32.mrb[130].mxu1 }
0x29d6   :  { %v12495_v18 = vpop.f32.mrb[131].mxu1 }
0x29e7   :  { %v4712_v22 = vpop.f32.mrb[144].mxu0 }
0x29e8   :  { %v13107_v24 = vpack.i.bf16 %v4712_v22, %v4664_v16  ;;  %v12500_v32 = vpop.f32.mrb[145].mxu0  ;;  %v13267_v22 = vld [vmem:[#allocation24 + $0x4] ss:$16 sps:$4 sm:$0xff]  }
0x29e9   :  { %v4715_v58 = vpop.f32.mrb[146].mxu0  ;;  %v13270_v32 = vld [vmem:[#allocation24 + $0xc] ss:$16 sps:$4 sm:$0xff]   ;;  %5135 = vmatprep.subr.bf16.mxu0 %v13267_v22 }
0x29ea   :  { %13108 = vrot.lane.b32.xlu1 %v13107_v24, %s14224_s30  ;;  %v12501_v0 = vpop.f32.mrb[147].mxu0  ;;  %v13268_v24 = vld [vmem:[#allocation24 + $0x8] ss:$16 sps:$4 sm:$0xff]   ;;  %v13273_v58 = vld [vmem:[#allocation24 + $0x24] ss:$16 sps:$4 sm:$0xff]   ;;  %5178 = vmatprep.subr.bf16.mxu1 %v13270_v32 }
0x29eb   :  { %v13276_v0 = vld [vmem:[#allocation24 + $0x2c] ss:$16 sps:$4 sm:$0xff]   ;;  %5136 = vmatpush1.bf16.msra.mxu0 %v13265_v33 }
0x29ec   :  { %5137 = vmatprep.subr.bf16.mxu0 %v13273_v58 }
0x29ef   :  { %5138 = vmatpush1.bf16.msra.mxu0 %v13271_v59 }
0x29f0   :  { %5139 = vmatprep.subr.bf16.mxu0 %v13279_v20  ;;  %v13323_v20 = vld [vmem:[#allocation26 + $0x10] sm:$0xff]  }
0x29f3   :  { %5140 = vmatpush1.bf16.msra.mxu0 %v13277_v21  ;;  %v13325_v21 = vld [vmem:[#allocation26 + $0x58] sm:$0xff]  }
0x29f4   :  { %5141 = vmatprep.subr.bf16.mxu0 %v13285_v53  ;;  %v13327_v53 = vld [vmem:[#allocation26 + $0x18] sm:$0xff]  }
0x29f7   :  { %5142 = vmatpush1.bf16.msra.mxu0 %v13283_v34  ;;  %v13329_v34 = vld [vmem:[#allocation26 + $0x60] sm:$0xff]  }
0x29f8   :  { %5143 = vmatprep.subr.bf16.mxu0 %v13291_v11  ;;  %v13331_v11 = vld [vmem:[#allocation26 + $0x20] sm:$0xff]  }
0x29fb   :  { %5144 = vmatpush1.bf16.msra.mxu0 %v13289_v29  ;;  %v13332_v29 = vld [vmem:[#allocation26 + $0xa0] sm:$0xff]  }
0x29fc   :  { %5145 = vmatprep.subr.bf16.mxu0 %v13297_v45  ;;  %v13335_v45 = vld [vmem:[#allocation26 + $0x28] sm:$0xff]  }
0x29ff   :  { %5146 = vmatpush1.bf16.msra.mxu0 %v13295_v38  ;;  %v13337_v38 = vld [vmem:[#allocation26 + $0x70] sm:$0xff]  }
0x2a00   :  { %5147 = vmatprep.subr.bf16.mxu0 %v13303_v19  ;;  %v13339_v19 = vld [vmem:[#allocation26 + $0x30] sm:$0xff]  }
0x2a5c   :  { %v13109_v54 = vpop.permute.xlu1 %13108 }
0x2a5d   :  { %v13111_v61 = vunpack.i.h.bf16 %v13109_v54  ;;  %v13110_v55 = vunpack.i.l.bf16 %v13109_v54  ;;  %v13301_v54 = vld [vmem:[#allocation24 + $0xc0] ss:$16 sps:$4 sm:$0xff]  }
0x2a5e   :  { %5148 = vmatpush1.bf16.msra.mxu0 %v13301_v54  ;;  %v13341_v54 = vld [vmem:[#allocation26 + $0x78] sm:$0xff]  }
0x2a5f   :  { %v4787_v31 = vsel %vm2521_vm9, %v4785_v25, %v13111_v61  ;;  %v4786_v56 = vsel %vm2521_vm9, %v4784_v6, %v13110_v55  ;;  %v13312_v61 = vld [vmem:[#allocation24 + $0xec] ss:$16 sps:$4 sm:$0xff]   ;;  %v13307_v55 = vld [vmem:[#allocation24 + $0xe0] ss:$16 sps:$4 sm:$0xff]   ;;  %v13310_v6 = vld [vmem:[#allocation24 + $0xe8] ss:$16 sps:$4 sm:$0xff]   ;;  %5149 = vmatprep.subr.bf16.mxu0 %v13309_v23 }
0x2a60   :  { %v4788_v63 = vpack.c.bf16 %v4787_v31, %v4786_v56  ;;  %v13313_v25 = vld [vmem:[#allocation26 + $0x40] sm:$0xff]   ;;  %v13343_v23 = vld [vmem:[#allocation26 + $0x38] sm:$0xff]  }
0x2a61   :  { %v13314_v31 = vld [vmem:[#allocation26 + $0xc0] sm:$0xff]  }
0x2a62   :  { %12519 = vmatmul.mubr.bf16.vlgmr.msra.gmra.mrb[132].mxu1 %v4788_v63  ;;  %5150 = vmatpush1.bf16.msra.mxu0 %v13307_v55  ;;  %v4953_v55 = vld [vmem:[%s16556_s21] sm:$0xf] }
0x2a63   :  { %5210 = vmatprep.mubr.bf16.mxu1 %v14223_v35  ;;  %5179 = vmatpush1.bf16.msra.mxu1 %v13268_v24  ;;  %v15528_v24 = vld [vmem:[%s16554_s19] sm:$0x7] }
0x2a64   :  { %5180 = vmatprep.subr.bf16.mxu1 %v13276_v0  ;;  %11791 = vmatprep.subr.bf16.mxu0 %v13313_v25  ;;  %v4917_v32 = vrot.slane %v15528_v24, %v14661_v49  ;;  %v4958_v25 = vrot.slane %v4953_v55, %v14664_v51 }
0x2a67   :  { %5181 = vmatpush1.bf16.msra.mxu1 %v13274_v37  ;;  %v13315_v37 = vld [vmem:[#allocation26] sm:$0xff]  }
0x2a68   :  { %5182 = vmatprep.subr.bf16.mxu1 %v13282_v43  ;;  %v13324_v43 = vld [vmem:[#allocation26 + $0x90] sm:$0xff]  }
0x2a6b   :  { %5183 = vmatpush1.bf16.msra.mxu1 %v13280_v50  ;;  %v13326_v50 = vld [vmem:[#allocation26 + $0xd8] sm:$0xff]  }
0x2a6c   :  { %5184 = vmatprep.subr.bf16.mxu1 %v13288_v15  ;;  %v13328_v15 = vld [vmem:[#allocation26 + $0x98] sm:$0xff]  }
0x2a6f   :  { %5185 = vmatpush1.bf16.msra.mxu1 %v13286_v36  ;;  %v13330_v36 = vld [vmem:[#allocation26 + $0xe0] sm:$0xff]  }
0x2a70   :  { %5186 = vmatprep.subr.bf16.mxu1 %v13294_v41  ;;  %v13334_v41 = vld [vmem:[#allocation26 + $0xe8] sm:$0xff]  }
0x2a73   :  { %5187 = vmatpush1.bf16.msra.mxu1 %v13292_v30  ;;  %v13333_v30 = vld [vmem:[#allocation26 + $0x68] sm:$0xff]  }
0x2a74   :  { %5188 = vmatprep.subr.bf16.mxu1 %v13300_v2  ;;  %v13336_v2 = vld [vmem:[#allocation26 + $0xa8] sm:$0xff]  }
0x2a77   :  { %5189 = vmatpush1.bf16.msra.mxu1 %v13298_v57  ;;  %v13338_v57 = vld [vmem:[#allocation26 + $0xf0] sm:$0xff]  }
0x2a78   :  { %5190 = vmatprep.subr.bf16.mxu1 %v13306_v60  ;;  %v13340_v60 = vld [vmem:[#allocation26 + $0xb0] sm:$0xff]  }
0x2a7b   :  { %5191 = vmatpush1.bf16.msra.mxu1 %v13304_v28  ;;  %v13342_v28 = vld [vmem:[#allocation26 + $0xf8] sm:$0xff]  }
0x2a7c   :  { %5192 = vmatprep.subr.bf16.mxu1 %v13312_v61  ;;  %v13344_v61 = vld [vmem:[#allocation26 + $0xb8] sm:$0xff]  }
0x2a7f   :  { %5193 = vmatpush1.bf16.msra.mxu1 %v13310_v6  ;;  %v15543_v6 = vsub.s32 3, %v14658_v48 }
0x2a80   :  { %11813 = vmatprep.subr.bf16.mxu1 %v13314_v31  ;;  %v4966_v31 = vrot.slane %v4953_v55, %v14667_v52 }
0x2b35   :  { %v4877_v44 = vpop.f32.mrb[132].mxu1 }
0x2b36   :  { %v4878_v5 = vadd.f32 %v11339_v4, %v4877_v44  ;;  %v12520_v3 = vpop.f32.mrb[133].mxu1 }
0x2b37   :  { %v4880_v7 = vpop.f32.mrb[134].mxu1 }
0x2b38   :  { %v4884_v16 = vadd.f32 %v4878_v5, %v15095_v14  ;;  %v4881_v10 = vadd.f32 %v11339_v4, %v4880_v7  ;;  %v12521_v13 = vpop.f32.mrb[135].mxu1 }
0x2b3a   :  { %v4885_v18 = vadd.f32 %v4881_v10, %v15097_v40  ;;  %4886 = vadd.xlane.f32.xlu0 %v4884_v16  ;;  %v15520_v10 = vld [vmem:[%s16553_s18] sm:$0x7] }
0x2b3b   :  { %v4911_v13 = vrot.slane %v15520_v10, %v14661_v49 }
0x2b3c   :  { %4888 = vadd.xlane.f32.xlu1 %v4885_v18 }
0x2bc7   :  { %v4887_v14 = vpop.xlane.xlu0 %4886 }
0x2bc8   :  { %v4890_v40 = vmul.f32 0.0078125, %v4887_v14  ;;  %v13316_v14 = vld [vmem:[#allocation26 + $0x80] sm:$0xff]  }
0x2bc9   :  { %v4889_v8 = vpop.xlane.xlu1 %4888 }
0x2bca   :  { %v15508_v12 = vsub.f32 %v4884_v16, %v4890_v40  ;;  %v4891_v9 = vmul.f32 0.0078125, %v4889_v8  ;;  %v13317_v8 = vld [vmem:[#allocation26 + $0x48] sm:$0xff]  }
0x2bcc   :  { %v15510_v39 = vsub.f32 %v4885_v18, %v4891_v9  ;;  %v4894_v42 = vmul.f32 %v15508_v12, %v15508_v12  ;;  %v13319_v9 = vld [vmem:[#allocation26 + $0x8] sm:$0xff]  }
0x2bce   :  { %4896 = vadd.xlane.f32.xlu0 %v4894_v42  ;;  %v4895_v46 = vmul.f32 %v15510_v39, %v15510_v39  ;;  %v13321_v42 = vld [vmem:[#allocation26 + $0x50] sm:$0xff]  }
0x2bd2   :  { %4898 = vadd.xlane.f32.xlu0 %v4895_v46  ;;  %v13322_v46 = vld [vmem:[#allocation26 + $0xd0] sm:$0xff]  }
0x2c5b   :  { %v4897_v56 = vpop.xlane.xlu0 %4896 }
0x2c5c   :  { %v4900_v63 = vmul.f32 0.0078125, %v4897_v56  ;;  %v4962_v56 = vrot.slane %v4953_v55, %v14661_v49 }
0x2c5e   :  { %v4902_v4 = vadd.f32 1e-05, %v4900_v63  ;;  %v4970_v63 = vrot.slane %v4953_v55, %v15543_v6 }
0x2c5f   :  { %v4899_v44 = vpop.xlane.xlu0 %4898 }
0x2c60   :  { %13645 = vrsqrt.f32 %v4902_v4  ;;  %v4901_v5 = vmul.f32 0.0078125, %v4899_v44 }
0x2c62   :  { %v4903_v3 = vadd.f32 1e-05, %v4901_v5 }
0x2c64   :  { %13647 = vrsqrt.f32 %v4903_v3 }
0x2c6a   :  { %v13646_v7 = vpop.eup %13645 }
0x2c6b   :  { %v4906_v16 = vmul.f32 %v13646_v7, %v15508_v12  ;;  %v13318_v12 = vld [vmem:[#allocation26 + $0xc8] sm:$0xff]  }
0x2c6d   :  { %v4912_v22 = vmul.f32 %v4911_v13, %v4906_v16 }
0x2c6e   :  { %v13648_v18 = vpop.eup %13647 }
0x2c6f   :  { %v4907_v33 = vmul.f32 %v13648_v18, %v15510_v39  ;;  %v15532_v0 = vadd.f32 %v4917_v32, %v4912_v22  ;;  %v13320_v39 = vld [vmem:[#allocation26 + $0x88] sm:$0xff]  }
0x2c71   :  { %v4913_v58 = vmul.f32 %v4911_v13, %v4907_v33 }
0x2c73   :  { %v15534_v59 = vadd.f32 %v4917_v32, %v4913_v58 }
0x2c75   :  { %v4920_v40 = vpack.c.bf16 %v15534_v59, %v15532_v0 }
0x2c77   :  { %5168 = vmatmul.mubr.bf16.vlgmr.msra.gmra.mrb[148].mxu0 %v4920_v40  ;;  %5211 = vmatmul.mubr.bf16.vlgmr.msra.gmra.mrb[136].mxu1 %v4920_v40 }
0x2c78   :  { %11792 = vmatpush3.bf16.msra.mxu0 %v13315_v37  ;;  %11814 = vmatpush3.bf16.msra.mxu1 %v13316_v14 }
0x2c79   :  { %11793 = vmatprep.subr.bf16.mxu0 %v13317_v8  ;;  %11815 = vmatprep.subr.bf16.mxu1 %v13318_v12 }
0x2c7c   :  { %11794 = vmatpush3.bf16.msra.mxu0 %v13319_v9  ;;  %11816 = vmatpush3.bf16.msra.mxu1 %v13320_v39 }
0x2c7d   :  { %11795 = vmatprep.subr.bf16.mxu0 %v13321_v42  ;;  %11817 = vmatprep.subr.bf16.mxu1 %v13322_v46 }
0x2c80   :  { %11796 = vmatpush3.bf16.msra.mxu0 %v13323_v20  ;;  %11818 = vmatpush3.bf16.msra.mxu1 %v13324_v43 }
0x2c81   :  { %11797 = vmatprep.subr.bf16.mxu0 %v13325_v21  ;;  %11819 = vmatprep.subr.bf16.mxu1 %v13326_v50 }
0x2c84   :  { %11798 = vmatpush3.bf16.msra.mxu0 %v13327_v53  ;;  %11820 = vmatpush3.bf16.msra.mxu1 %v13328_v15 }
0x2c85   :  { %11799 = vmatprep.subr.bf16.mxu0 %v13329_v34  ;;  %11821 = vmatprep.subr.bf16.mxu1 %v13330_v36 }
0x2c88   :  { %11800 = vmatpush3.bf16.msra.mxu0 %v13331_v11  ;;  %11822 = vmatpush3.bf16.msra.mxu1 %v13332_v29  ;;  %v11380_v29 = vld [vmem:[#allocation27] ss:$0 sm:$0xff] }
0x2c89   :  { %11801 = vmatprep.subr.bf16.mxu0 %v13333_v30  ;;  %11823 = vmatprep.subr.bf16.mxu1 %v13334_v41 }
0x2c8c   :  { %11802 = vmatpush3.bf16.msra.mxu0 %v13335_v45  ;;  %11824 = vmatpush3.bf16.msra.mxu1 %v13336_v2 }
0x2c8d   :  { %11803 = vmatprep.subr.bf16.mxu0 %v13337_v38  ;;  %11825 = vmatprep.subr.bf16.mxu1 %v13338_v57 }
0x2c90   :  { %11804 = vmatpush3.bf16.msra.mxu0 %v13339_v19  ;;  %11826 = vmatpush3.bf16.msra.mxu1 %v13340_v60 }
0x2c91   :  { %11805 = vmatprep.subr.bf16.mxu0 %v13341_v54  ;;  %11827 = vmatprep.subr.bf16.mxu1 %v13342_v28 }
0x2c94   :  { %11806 = vmatpush3.bf16.msra.mxu0 %v13343_v23  ;;  %11828 = vmatpush3.bf16.msra.mxu1 %v13344_v61 }
0x2c95   :  { %12522 = vmatprep.subr.bf16.mxu1 %v14221_v1 }
0x2d4a   :  { %v5169_v4 = vpop.f32.mrb[148].mxu0  ;;  %v5212_v44 = vpop.f32.mrb[136].mxu1 }
0x2d4b   :  { %v5170_v5 = vadd.f32 %v5169_v4, %v4958_v25  ;;  %v5213_v3 = vadd.f32 %v5212_v44, %v4966_v31  ;;  %v5171_v7 = vpop.f32.mrb[149].mxu0  ;;  %v5214_v16 = vpop.f32.mrb[137].mxu1  ;;  %v13347_v4 = vld [vmem:[#allocation11 + $0xc4] ss:$12 sps:$4 sm:$0xff]   ;;  %v13348_v44 = vld [vmem:[#allocation11 + $0xc8] ss:$12 sps:$4 sm:$0xff]  }
0x2d4c   :  { %v5172_v13 = vadd.f32 %v5171_v7, %v4962_v56  ;;  %v5215_v18 = vadd.f32 %v5214_v16, %v4970_v63  ;;  %v5173_v33 = vpop.f32.mrb[150].mxu0  ;;  %v5216_v22 = vpop.f32.mrb[138].mxu1  ;;  %5798 = vmatprep.subr.bf16.mxu0 %v13347_v4  ;;  %v13349_v7 = vld [vmem:[#allocation11 + $0xd8] ss:$12 sps:$4 sm:$0xff]  }
0x2d4d   :  { %v5174_v32 = vadd.f32 %v5173_v33, %v4958_v25  ;;  %v5217_v58 = vadd.f32 %v5216_v22, %v4966_v31  ;;  %v5175_v37 = vpop.f32.mrb[151].mxu0  ;;  %v5218_v14 = vpop.f32.mrb[139].mxu1  ;;  %v5221_v12 = vmax.f32 %v5170_v5, 0.0  ;;  %v5223_v9 = vmax.f32 %v5213_v3, 0.0  ;;  %v13351_v5 = vld [vmem:[#allocation11 + $0xdc] ss:$12 sps:$4 sm:$0xff]  }
0x2d4e   :  { %v5176_v40 = vadd.f32 %v5175_v37, %v4962_v56  ;;  %v5219_v8 = vadd.f32 %v5218_v14, %v4970_v63  ;;  %v5222_v46 = vmax.f32 %v5172_v13, 0.0  ;;  %v5224_v20 = vmax.f32 %v5215_v18, 0.0  ;;  %v13345_v63 = vld [vmem:[#allocation11 + $0xc0] ss:$12 sps:$4 sm:$0xff]   ;;  %v13353_v37 = vld [vmem:[#allocation11 + $0xf0] ss:$12 sps:$4 sm:$0xff]  }
0x2d4f   :  { %v5225_v39 = vmax.f32 %v5174_v32, 0.0  ;;  %v5227_v42 = vmax.f32 %v5217_v58, 0.0  ;;  %v13352_v3 = vld [vmem:[#allocation11 + $0xe0] ss:$12 sps:$4 sm:$0xff]   ;;  %v13356_v14 = vld [vmem:[#allocation11 + $0xf8] ss:$12 sps:$4 sm:$0xff]  }
0x2d50   :  { %v5226_v43 = vmax.f32 %v5176_v40, 0.0  ;;  %v5228_v21 = vmax.f32 %v5219_v8, 0.0  ;;  %v13355_v58 = vld [vmem:[#allocation11 + $0xf4] ss:$12 sps:$4 sm:$0xff]   ;;  %v13359_v40 = vld [vmem:[#allocation11 + $0x10c] ss:$12 sps:$4 sm:$0xff]  }
0x2d51   :  { %v5229_v50 = vpack.c.bf16 %v5225_v39, %v5221_v12  ;;  %v5231_v53 = vpack.c.bf16 %v5227_v42, %v5223_v9  ;;  %v13357_v8 = vld [vmem:[#allocation11 + $0x108] ss:$12 sps:$4 sm:$0xff]   ;;  %v13360_v12 = vld [vmem:[#allocation11 + $0x110] ss:$12 sps:$4 sm:$0xff]   ;;  %v13361_v39 = vld [vmem:[#allocation11 + $0x120] ss:$12 sps:$4 sm:$0xff]  }
0x2d52   :  { %v5230_v15 = vpack.c.bf16 %v5226_v43, %v5222_v46  ;;  %v5232_v34 = vpack.c.bf16 %v5228_v21, %v5224_v20  ;;  %v13363_v9 = vld [vmem:[#allocation11 + $0x124] ss:$12 sps:$4 sm:$0xff]   ;;  %v13364_v42 = vld [vmem:[#allocation11 + $0x128] ss:$12 sps:$4 sm:$0xff]   ;;  %v13368_v43 = vld [vmem:[#allocation11 + $0x140] ss:$12 sps:$4 sm:$0xff]  }
0x2d53   :  { %v13367_v46 = vld [vmem:[#allocation11 + $0x13c] ss:$12 sps:$4 sm:$0xff]   ;;  %v13365_v20 = vld [vmem:[#allocation11 + $0x138] ss:$12 sps:$4 sm:$0xff]   ;;  %v13371_v21 = vld [vmem:[#allocation11 + $0x154] ss:$12 sps:$4 sm:$0xff]  }
0x2d54   :  { %5528 = vmatprep.mubr.bf16.mxu0 %v5230_v15  ;;  %5569 = vmatprep.mubr.bf16.mxu1 %v5232_v34  ;;  %v13375_v15 = vld [vmem:[#allocation11 + $0x16c] ss:$12 sps:$4 sm:$0xff]   ;;  %v13373_v34 = vld [vmem:[#allocation11 + $0x168] ss:$12 sps:$4 sm:$0xff]  }
0x2d55   :  { %5529 = vmatmul.mubr.bf16.vlgmr.msra.gmra.mrb[152].mxu0 %v5229_v50  ;;  %5570 = vmatmul.mubr.bf16.vlgmr.msra.gmra.mrb[140].mxu1 %v5231_v53  ;;  %v13369_v50 = vld [vmem:[#allocation11 + $0x150] ss:$12 sps:$4 sm:$0xff]   ;;  %v13372_v53 = vld [vmem:[#allocation11 + $0x158] ss:$12 sps:$4 sm:$0xff]  }
0x2d56   :  { %5830 = vmatprep.mubr.bf16.mxu0 %v14223_v35  ;;  %12538 = vmatprep.mubr.msk.bf16.mxu1 %vm14222_vm0, %v14221_v1 }
0x2d57   :  { %12523 = vmatpush3.bf16.msra.mxu1 %v13348_v44  ;;  %5799 = vmatpush1.bf16.msra.mxu0 %v13345_v63 }
0x2d58   :  { %12524 = vmatprep.subr.bf16.mxu1 %v14221_v1  ;;  %5800 = vmatprep.subr.bf16.mxu0 %v13351_v5 }
0x2d5b   :  { %12525 = vmatpush3.bf16.msra.mxu1 %v13352_v3  ;;  %5801 = vmatpush1.bf16.msra.mxu0 %v13349_v7 }
0x2d5c   :  { %12526 = vmatprep.subr.bf16.mxu1 %v14221_v1  ;;  %5802 = vmatprep.subr.bf16.mxu0 %v13355_v58 }
0x2d5f   :  { %5803 = vmatpush1.bf16.msra.mxu0 %v13353_v37  ;;  %12527 = vmatpush3.bf16.msra.mxu1 %v13356_v14 }
0x2d60   :  { %12528 = vmatprep.subr.bf16.mxu1 %v14221_v1  ;;  %5804 = vmatprep.subr.bf16.mxu0 %v13359_v40 }
0x2d63   :  { %5805 = vmatpush1.bf16.msra.mxu0 %v13357_v8  ;;  %12529 = vmatpush3.bf16.msra.mxu1 %v13360_v12 }
0x2d64   :  { %5806 = vmatprep.subr.bf16.mxu0 %v13363_v9  ;;  %12530 = vmatprep.subr.bf16.mxu1 %v14221_v1 }
0x2d67   :  { %5807 = vmatpush1.bf16.msra.mxu0 %v13361_v39  ;;  %12531 = vmatpush3.bf16.msra.mxu1 %v13364_v42 }
0x2d68   :  { %5808 = vmatprep.subr.bf16.mxu0 %v13367_v46  ;;  %12532 = vmatprep.subr.bf16.mxu1 %v14221_v1 }
0x2d6b   :  { %5809 = vmatpush1.bf16.msra.mxu0 %v13365_v20  ;;  %12533 = vmatpush3.bf16.msra.mxu1 %v13368_v43 }
0x2d6c   :  { %5810 = vmatprep.subr.bf16.mxu0 %v13371_v21  ;;  %12534 = vmatprep.subr.bf16.mxu1 %v14221_v1 }
0x2d6f   :  { %5811 = vmatpush1.bf16.msra.mxu0 %v13369_v50  ;;  %12535 = vmatpush3.bf16.msra.mxu1 %v13372_v53 }
0x2d70   :  { %5812 = vmatprep.subr.bf16.mxu0 %v13375_v15  ;;  %12536 = vmatprep.subr.bf16.mxu1 %v14221_v1 }
0x2d73   :  { %5813 = vmatpush1.bf16.msra.mxu0 %v13373_v34 }
0x2d74   :  { %12542 = vmatprep.subr.bf16.mxu0 %v14221_v1 }
0x2e28   :  { %v11807_v36 = vpop.f32.mrb[152].mxu0  ;;  %v11829_v11 = vpop.f32.mrb[140].mxu1 }
0x2e29   :  { %v11808_v30 = vpop.f32.mrb[153].mxu0  ;;  %v11830_v41 = vpop.f32.mrb[141].mxu1 }
0x2e2a   :  { %v11809_v45 = vadd.f32 %v11808_v30, %v11807_v36  ;;  %v11831_v2 = vadd.f32 %v11830_v41, %v11829_v11  ;;  %v11810_v38 = vpop.f32.mrb[154].mxu0  ;;  %v11832_v57 = vpop.f32.mrb[142].mxu1  ;;  %v13376_v36 = vld [vmem:[#allocation11 + $0x170] ss:$12 sps:$4 sm:$0xff]  }
0x2e2b   :  { %v11811_v19 = vpop.f32.mrb[155].mxu0  ;;  %v11833_v60 = vpop.f32.mrb[143].mxu1  ;;  %12537 = vmatpush3.bf16.msra.mxu1 %v13376_v36 }
0x2e2c   :  { %v5531_v54 = vadd.f32 %v11809_v45, %v11380_v29  ;;  %v11812_v28 = vadd.f32 %v11811_v19, %v11810_v38  ;;  %v11834_v23 = vadd.f32 %v11833_v60, %v11832_v57  ;;  %12566 = vmatprep.subr.bf16.mxu1 %v14221_v1  ;;  %v5605_v38 = vrot.slane %v15520_v10, %v14667_v52  ;;  %v5653_v10 = vld [vmem:[#allocation12 + $0x3] sm:$0x7] }
0x2e2d   :  { %v5666_v44 = vrot.slane %v5653_v10, %v14667_v52 }
0x2e2e   :  { %v5572_v61 = vadd.f32 %v11831_v2, %v5531_v54  ;;  %v5534_v55 = vadd.f32 %v11812_v28, %v11380_v29 }
0x2e30   :  { %v5575_v25 = vadd.f32 %v11834_v23, %v5534_v55  ;;  %v5578_v31 = vadd.f32 %v5572_v61, %v15532_v0  ;;  %v5611_v23 = vrot.slane %v15528_v24, %v14667_v52  ;;  %v5658_v24 = vrot.slane %v5653_v10, %v14664_v51 }
0x2e32   :  { %5580 = vadd.xlane.f32.xlu0 %v5578_v31  ;;  %v5579_v56 = vadd.f32 %v5575_v25, %v15534_v59 }
0x2e34   :  { %5582 = vadd.xlane.f32.xlu1 %v5579_v56 }
0x2ebf   :  { %v5581_v0 = vpop.xlane.xlu0 %5580 }
0x2ec0   :  { %v5584_v16 = vmul.f32 0.0078125, %v5581_v0 }
0x2ec1   :  { %v5583_v59 = vpop.xlane.xlu1 %5582 }
0x2ec2   :  { %v5586_v13 = vsub.f32 %v5578_v31, %v5584_v16  ;;  %v5585_v18 = vmul.f32 0.0078125, %v5583_v59 }
0x2ec4   :  { %v5587_v33 = vsub.f32 %v5579_v56, %v5585_v18  ;;  %v5588_v22 = vmul.f32 %v5586_v13, %v5586_v13  ;;  %v5662_v56 = vrot.slane %v5653_v10, %v14661_v49 }
0x2ec6   :  { %5590 = vadd.xlane.f32.xlu0 %v5588_v22  ;;  %v5589_v32 = vmul.f32 %v5587_v33, %v5587_v33 }
0x2ec8   :  { %5592 = vadd.xlane.f32.xlu1 %v5589_v32 }
0x2f53   :  { %v5591_v11 = vpop.xlane.xlu0 %5590 }
0x2f54   :  { %v5594_v29 = vmul.f32 0.0078125, %v5591_v11 }
0x2f55   :  { %v5593_v30 = vpop.xlane.xlu1 %5592 }
0x2f56   :  { %v5596_v41 = vadd.f32 1e-05, %v5594_v29  ;;  %v5595_v45 = vmul.f32 0.0078125, %v5593_v30 }
0x2f58   :  { %13649 = vrsqrt.f32 %v5596_v41  ;;  %v5597_v2 = vadd.f32 1e-05, %v5595_v45 }
0x2f5a   :  { %13651 = vrsqrt.f32 %v5597_v2 }
0x2f62   :  { %v13650_v57 = vpop.eup %13649 }
0x2f63   :  { %v5600_v19 = vmul.f32 %v13650_v57, %v5586_v13 }
0x2f64   :  { %v13652_v60 = vpop.eup %13651 }
0x2f65   :  { %v5601_v54 = vmul.f32 %v13652_v60, %v5587_v33  ;;  %v5606_v28 = vmul.f32 %v5605_v38, %v5600_v19 }
0x2f67   :  { %v5607_v61 = vmul.f32 %v5605_v38, %v5601_v54  ;;  %v15567_v55 = vadd.f32 %v5611_v23, %v5606_v28 }
0x2f69   :  { %v15569_v25 = vadd.f32 %v5611_v23, %v5607_v61 }
0x2f6b   :  { %v5618_v31 = vpack.c.bf16 %v15569_v25, %v15567_v55 }
0x2f6d   :  { %5831 = vmatmul.mubr.bf16.vlgmr.msra.gmra.mrb[156].mxu0 %v5618_v31  ;;  %12539 = vmatmul.mubr.bf16.vlgmr.msra.gmra.mrb[144].mxu1 %v5618_v31 }
0x2f6e   :  { %12544 = vmatprep.mubr.msk.bf16.mxu0 %vm14222_vm0, %v14221_v1  ;;  %12568 = vmatprep.mubr.msk.bf16.mxu1 %vm14222_vm0, %v14221_v1 }
0x3040   :  { %v5832_v63 = vpop.f32.mrb[156].mxu0  ;;  %v5875_v4 = vpop.f32.mrb[144].mxu1 }
0x3041   :  { %v5834_v5 = vpop.f32.mrb[157].mxu0  ;;  %v12540_v3 = vpop.f32.mrb[145].mxu1  ;;  %v5833_v33 = vadd.f32 %v5832_v63, %v5658_v24  ;;  %v5876_v12 = vadd.f32 %v5875_v4, %v5666_v44 }
0x3042   :  { %v5835_v7 = vadd.f32 %v5834_v5, %v5662_v56  ;;  %v5836_v0 = vpop.f32.mrb[158].mxu0  ;;  %v5878_v16 = vpop.f32.mrb[146].mxu1 }
0x3043   :  { %v15580_v59 = vadd.f32 %v5878_v16, %v5666_v44  ;;  %v5838_v13 = vpop.f32.mrb[159].mxu0  ;;  %v12541_v18 = vpop.f32.mrb[147].mxu1  ;;  %v5882_v37 = vmul.f32 0.25, %v5833_v33  ;;  %v5837_v8 = vadd.f32 %v5836_v0, %v5658_v24  ;;  %v15598_v42 = vpack.c.bf16 %v5876_v12, %v5876_v12 }
0x3044   :  { %v15582_v22 = vpack.c.bf16 %v5835_v7, %v5835_v7  ;;  %v5839_v32 = vadd.f32 %v5838_v13, %v5662_v56 }
0x3045   :  { %v15589_v40 = vpack.c.bf16 %v5882_v37, %v5882_v37  ;;  %v5883_v39 = vmul.f32 0.25, %v5837_v8  ;;  %v6029_v20 = vsel %vm337_vm1, %v15598_v42, 0  ;;  %v15627_v5 = vpack.c.bf16 %v15580_v59, %v15580_v59 }
0x3046   :  { %v5913_v58 = vsel %vm693_vm3, %v15582_v22, 0  ;;  %v15587_v14 = vpack.c.bf16 %v5839_v32, %v5839_v32 }
0x3047   :  { %12543 = vmatpush3.bf16.xpose.msra.mxu0 %v5913_v58  ;;  %v15600_v46 = vpack.c.bf16 %v5883_v39, %v5883_v39  ;;  %v6075_v16 = vsel %vm337_vm1, %v15627_v5, 0 }
0x3048   :  { %12548 = vmatprep.subr.bf16.mxu0 %v14221_v1  ;;  %v5959_v9 = vsel %vm693_vm3, %v15587_v14, 0 }
0x304e   :  { %12545 = vmatmul.mubr.msk.bf16.vlgmr.msra.gmra.mrb[160].mxu0 %vm693_vm3, %v15589_v40 }
0x304f   :  { %12549 = vmatpush3.bf16.xpose.msra.mxu0 %v5959_v9  ;;  %12550 = vmatprep.mubr.msk.bf16.mxu0 %vm14222_vm0, %v14221_v1 }
0x3050   :  { %12554 = vmatprep.subr.bf16.mxu0 %v14221_v1 }
0x3056   :  { %12551 = vmatmul.mubr.msk.bf16.vlgmr.msra.gmra.mrb[164].mxu0 %vm693_vm3, %v15600_v46 }
0x3057   :  { %12555 = vmatpush3.bf16.msra.mxu0 %v6029_v20  ;;  %12556 = vmatprep.mubr.msk.bf16.mxu0 %vm14222_vm0, %v14221_v1 }
0x3058   :  { %12560 = vmatprep.subr.bf16.mxu0 %v14221_v1 }
0x3121   :  { %v5949_v43 = vpop.f32.mrb[160].mxu0 }
0x3122   :  { %v5950_v21 = vadd.f32 %v5949_v43, %v14711_v26  ;;  %v12546_v50 = vpop.f32.mrb[161].mxu0 }
0x3123   :  { %v5952_v53 = vpop.f32.mrb[162].mxu0 }
0x3124   :  { %v12547_v15 = vpop.f32.mrb[163].mxu0  ;;  %v6001_v34 = vsel %vm333_vm2, %v5950_v21, -inf }
0x3125   :  { %6002 = vmax.xlane.f32.xlu0 %v6001_v34 }
0x3129   :  { %v5995_v36 = vpop.f32.mrb[164].mxu0 }
0x312a   :  { %v5996_v11 = vadd.f32 %v5995_v36, %v14713_v27  ;;  %v12552_v29 = vpop.f32.mrb[165].mxu0 }
0x312b   :  { %v5998_v30 = vpop.f32.mrb[166].mxu0 }
0x312c   :  { %v12553_v41 = vpop.f32.mrb[167].mxu0  ;;  %v6004_v45 = vsel %vm333_vm2, %v5996_v11, -inf }
0x312d   :  { %6005 = vmax.xlane.f32.xlu1 %v6004_v45 }
0x313e   :  { %6173 = vrot.lane.b32.xlu1 %v15587_v14, %s14224_s30 }
0x31b2   :  { %v6003_v2 = vpop.xlane.xlu0 %6002 }
0x31b3   :  { %v6007_v38 = vsub.f32 %v5950_v21, %v6003_v2 }
0x31b5   :  { %v6009_v57 = vmul.f32 1.442695, %v6007_v38 }
0x31b7   :  { %13653 = vpow2.f32 %v6009_v57 }
0x31ba   :  { %v6006_v19 = vpop.xlane.xlu1 %6005 }
0x31bb   :  { %v6008_v60 = vsub.f32 %v5996_v11, %v6006_v19 }
0x31bd   :  { %v6011_v54 = vmul.f32 1.442695, %v6008_v60 }
0x31be   :  { %v6174_v56 = vpop.permute.xlu1 %6173 }
0x31bf   :  { %13655 = vpow2.f32 %v6011_v54  ;;  %v6179_v33 = vsel %vm693_vm3, %v6174_v56, 0 }
0x31c1   :  { %v13654_v28 = vpop.eup %13653 }
0x31c2   :  { %v6013_v23 = vsel %vm333_vm2, %v13654_v28, 0.0 }
0x31c3   :  { %6014 = vadd.xlane.f32.xlu0 %v6013_v23 }
0x31c9   :  { %v13656_v61 = vpop.eup %13655 }
0x31ca   :  { %v6016_v31 = vsel %vm333_vm2, %v13656_v61, 0.0 }
0x31cb   :  { %6017 = vadd.xlane.f32.xlu1 %v6016_v31 }
0x31d9   :  { %6121 = vrot.lane.b32.xlu0 %v15582_v22, %s14224_s30 }
0x31dc   :  { %6118 = vrot.lane.b32.xlu1 %v15589_v40, %s14224_s30 }
0x31e0   :  { %6170 = vrot.lane.b32.xlu1 %v15600_v46, %s14224_s30 }
0x3250   :  { %v6015_v10 = vpop.xlane.xlu0 %6014 }
0x3251   :  { %13657 = vrcp.f32 %v6015_v10 }
0x3254   :  { %v6122_v24 = vpop.permute.xlu0 %6121 }
0x3255   :  { %v6127_v63 = vsel %vm693_vm3, %v6122_v24, 0 }
0x3256   :  { %12567 = vmatpush3.bf16.xpose.msra.mxu1 %v6127_v63 }
0x3257   :  { %12578 = vmatprep.subr.bf16.mxu1 %v14221_v1 }
0x3258   :  { %v6018_v4 = vpop.xlane.xlu1 %6017 }
0x3259   :  { %13659 = vrcp.f32 %v6018_v4 }
0x325b   :  { %v13658_v44 = vpop.eup %13657 }
0x325c   :  { %v6119_v3 = vpop.permute.xlu1 %6118  ;;  %v6021_v7 = vmul.f32 %v13658_v44, %v13654_v28 }
0x325d   :  { %12569 = vmatmul.mubr.msk.bf16.vlgmr.msra.gmra.mrb[148].mxu1 %vm693_vm3, %v6119_v3 }
0x325e   :  { %v6023_v0 = vpack.c.bf16 %v6021_v7, %v6021_v7  ;;  %12580 = vmatprep.mubr.msk.bf16.mxu1 %vm14222_vm0, %v14221_v1 }
0x3260   :  { %12557 = vmatmul.mubr.msk.bf16.vlgmr.msra.gmra.mrb[168].mxu0 %vm333_vm2, %v6023_v0  ;;  %v6171_v32 = vpop.permute.xlu1 %6170 }
0x3261   :  { %12561 = vmatpush3.bf16.msra.mxu0 %v6075_v16  ;;  %12562 = vmatprep.mubr.msk.bf16.mxu0 %vm14222_vm0, %v14221_v1 }
0x3262   :  { %12572 = vmatprep.subr.bf16.mxu0 %v14221_v1 }
0x3263   :  { %v13660_v59 = vpop.eup %13659 }
0x3264   :  { %v6022_v13 = vmul.f32 %v13660_v59, %v13656_v61 }
0x3266   :  { %v6024_v18 = vpack.c.bf16 %v6022_v13, %v6022_v13 }
0x3268   :  { %12563 = vmatmul.mubr.msk.bf16.vlgmr.msra.gmra.mrb[172].mxu0 %vm333_vm2, %v6024_v18 }
0x3269   :  { %12574 = vmatprep.mubr.msk.bf16.mxu0 %vm14222_vm0, %v14221_v1 }
0x326a   :  { %12573 = vmatpush3.bf16.xpose.msra.mxu0 %v6179_v33 }
0x326b   :  { %12584 = vmatprep.subr.bf16.mxu0 %v14221_v1 }
0x3271   :  { %12575 = vmatmul.mubr.msk.bf16.vlgmr.msra.gmra.mrb[176].mxu0 %vm693_vm3, %v6171_v32 }
0x3272   :  { %12586 = vmatprep.mubr.msk.bf16.mxu0 %vm14222_vm0, %v14221_v1 }
0x3330   :  { %v6163_v58 = vpop.f32.mrb[148].mxu1 }
0x3331   :  { %v6164_v37 = vadd.f32 %v6163_v58, %v14711_v26  ;;  %v12570_v8 = vpop.f32.mrb[149].mxu1 }
0x3332   :  { %v6166_v12 = vpop.f32.mrb[150].mxu1 }
0x3333   :  { %v15647_v9 = vpop.f32.mrb[168].mxu0  ;;  %v12571_v39 = vpop.f32.mrb[151].mxu1  ;;  %v6221_v20 = vsel %vm333_vm2, %v6164_v37, -inf }
0x3334   :  { %6222 = vmax.xlane.f32.xlu0 %v6221_v20  ;;  %v12558_v43 = vpop.f32.mrb[169].mxu0 }
0x3335   :  { %v6068_v21 = vpop.f32.mrb[170].mxu0 }
0x3336   :  { %v12559_v50 = vpop.f32.mrb[171].mxu0 }
0x333b   :  { %v15650_v53 = vpop.f32.mrb[172].mxu0 }
0x333c   :  { %v12564_v15 = vpop.f32.mrb[173].mxu0 }
0x333d   :  { %v6114_v34 = vpop.f32.mrb[174].mxu0 }
0x333e   :  { %v12565_v36 = vpop.f32.mrb[175].mxu0 }
0x3344   :  { %v6215_v11 = vpop.f32.mrb[176].mxu0 }
0x3345   :  { %v6216_v29 = vadd.f32 %v6215_v11, %v14713_v27  ;;  %v12576_v30 = vpop.f32.mrb[177].mxu0 }
0x3346   :  { %v6218_v41 = vpop.f32.mrb[178].mxu0 }
0x3347   :  { %v12577_v45 = vpop.f32.mrb[179].mxu0  ;;  %v6224_v2 = vsel %vm333_vm2, %v6216_v29, -inf }
0x3348   :  { %6225 = vmax.xlane.f32.xlu1 %v6224_v2 }
0x3359   :  { %6295 = vrot.lane.b32.xlu1 %v15627_v5, %s14224_s30 }
0x335d   :  { %6345 = vrot.lane.b32.xlu1 %v15582_v22, %s14225_s28 }
0x3361   :  { %6395 = vrot.lane.b32.xlu1 %v15587_v14, %s14225_s28 }
0x3365   :  { %6393 = vrot.lane.b32.xlu1 %v15600_v46, %s14225_s28 }
0x33c1   :  { %v6223_v38 = vpop.xlane.xlu0 %6222 }
0x33c2   :  { %v6227_v57 = vsub.f32 %v6164_v37, %v6223_v38 }
0x33c4   :  { %v6229_v19 = vmul.f32 1.442695, %v6227_v57 }
0x33c6   :  { %13661 = vpow2.f32 %v6229_v19 }
0x33d0   :  { %v13662_v60 = vpop.eup %13661 }
0x33d1   :  { %v6233_v54 = vsel %vm333_vm2, %v13662_v60, 0.0 }
0x33d2   :  { %6234 = vadd.xlane.f32.xlu0 %v6233_v54 }
0x33d5   :  { %v6226_v28 = vpop.xlane.xlu1 %6225 }
0x33d6   :  { %v6228_v23 = vsub.f32 %v6216_v29, %v6226_v28 }
0x33d8   :  { %v6231_v61 = vmul.f32 1.442695, %v6228_v23 }
0x33d9   :  { %v6296_v31 = vpop.permute.xlu1 %6295 }
0x33da   :  { %13663 = vpow2.f32 %v6231_v61  ;;  %v6301_v10 = vsel %vm337_vm1, %v6296_v31, 0 }
0x33db   :  { %12585 = vmatpush3.bf16.msra.mxu0 %v6301_v10 }
0x33dc   :  { %12596 = vmatprep.subr.bf16.mxu0 %v14221_v1 }
0x33dd   :  { %v6346_v16 = vpop.permute.xlu1 %6345 }
0x33de   :  { %v6351_v32 = vsel %vm693_vm3, %v6346_v16, 0 }
0x33e1   :  { %v6396_v33 = vpop.permute.xlu1 %6395 }
0x33e2   :  { %v6401_v37 = vsel %vm693_vm3, %v6396_v33, 0 }
0x33e4   :  { %v13664_v56 = vpop.eup %13663 }
0x33e5   :  { %v6236_v24 = vsel %vm333_vm2, %v13664_v56, 0.0  ;;  %v6394_v12 = vpop.permute.xlu1 %6393 }
0x33e6   :  { %6237 = vadd.xlane.f32.xlu0 %v6236_v24 }
0x33fc   :  { %6246 = vrot.lane.b32.xlu0 %v15598_v42, %s14224_s30 }
0x3400   :  { %6343 = vrot.lane.b32.xlu0 %v15589_v40, %s14225_s28 }
0x345f   :  { %v6235_v63 = vpop.xlane.xlu0 %6234 }
0x3460   :  { %13665 = vrcp.f32 %v6235_v63 }
0x346a   :  { %v13666_v4 = vpop.eup %13665 }
0x346b   :  { %v6241_v3 = vmul.f32 %v13666_v4, %v13662_v60 }
0x346d   :  { %v6243_v59 = vpack.c.bf16 %v6241_v3, %v6241_v3 }
0x3473   :  { %v6238_v44 = vpop.xlane.xlu0 %6237 }
0x3474   :  { %13667 = vrcp.f32 %v6238_v44 }
0x3477   :  { %v6247_v7 = vpop.permute.xlu0 %6246 }
0x3478   :  { %v6252_v0 = vsel %vm337_vm1, %v6247_v7, 0 }
0x3479   :  { %12579 = vmatpush3.bf16.msra.mxu1 %v6252_v0 }
0x347a   :  { %12590 = vmatprep.subr.bf16.mxu1 %v14221_v1 }
0x347b   :  { %v6344_v8 = vpop.permute.xlu0 %6343 }
0x347c   :  { %12581 = vmatmul.mubr.msk.bf16.vlgmr.msra.gmra.mrb[152].mxu1 %vm333_vm2, %v6243_v59 }
0x347d   :  { %12592 = vmatprep.mubr.msk.bf16.mxu1 %vm14222_vm0, %v14221_v1 }
0x347e   :  { %v13668_v13 = vpop.eup %13667 }
0x347f   :  { %v6242_v18 = vmul.f32 %v13668_v13, %v13664_v56 }
0x3481   :  { %v6244_v58 = vpack.c.bf16 %v6242_v18, %v6242_v18 }
0x3482   :  { %12591 = vmatpush3.bf16.xpose.msra.mxu1 %v6351_v32 }
0x3483   :  { %12587 = vmatmul.mubr.msk.bf16.vlgmr.msra.gmra.mrb[180].mxu0 %vm333_vm2, %v6244_v58  ;;  %12602 = vmatprep.subr.bf16.mxu1 %v14221_v1 }
0x3484   :  { %12597 = vmatpush3.bf16.xpose.msra.mxu0 %v6401_v37  ;;  %12598 = vmatprep.mubr.msk.bf16.mxu0 %vm14222_vm0, %v14221_v1 }
0x3485   :  { %12608 = vmatprep.subr.bf16.mxu0 %v14221_v1 }
0x3489   :  { %12593 = vmatmul.mubr.msk.bf16.vlgmr.msra.gmra.mrb[156].mxu1 %vm693_vm3, %v6344_v8 }
0x348a   :  { %12604 = vmatprep.mubr.msk.bf16.mxu1 %vm14222_vm0, %v14221_v1 }
0x348b   :  { %12599 = vmatmul.mubr.msk.bf16.vlgmr.msra.gmra.mrb[184].mxu0 %vm693_vm3, %v6394_v12 }
0x348c   :  { %12610 = vmatprep.mubr.msk.bf16.mxu0 %vm14222_vm0, %v14221_v1 }
0x354f   :  { %v15688_v39 = vpop.f32.mrb[152].mxu1 }
0x3550   :  { %v12582_v20 = vpop.f32.mrb[153].mxu1 }
0x3551   :  { %v6291_v43 = vpop.f32.mrb[154].mxu1 }
0x3552   :  { %v12583_v21 = vpop.f32.mrb[155].mxu1 }
0x3556   :  { %v15690_v50 = vpop.f32.mrb[180].mxu0 }
0x3557   :  { %v13112_v15 = vpack.i.bf16 %v15690_v50, %v15688_v39  ;;  %v12588_v34 = vpop.f32.mrb[181].mxu0 }
0x3558   :  { %v6340_v36 = vpop.f32.mrb[182].mxu0 }
0x3559   :  { %v12589_v11 = vpop.f32.mrb[183].mxu0 }
0x355c   :  { %v6387_v29 = vpop.f32.mrb[156].mxu1 }
0x355d   :  { %v6388_v30 = vadd.f32 %v6387_v29, %v14711_v26  ;;  %v12594_v41 = vpop.f32.mrb[157].mxu1 }
0x355e   :  { %v6390_v45 = vpop.f32.mrb[158].mxu1  ;;  %v6437_v2 = vpop.f32.mrb[184].mxu0 }
0x355f   :  { %v6438_v38 = vadd.f32 %v6437_v2, %v14713_v27  ;;  %v12595_v57 = vpop.f32.mrb[159].mxu1  ;;  %v12600_v19 = vpop.f32.mrb[185].mxu0  ;;  %v6443_v60 = vsel %vm333_vm2, %v6388_v30, -inf }
0x3560   :  { %6444 = vmax.xlane.f32.xlu0 %v6443_v60  ;;  %v6440_v54 = vpop.f32.mrb[186].mxu0 }
0x3561   :  { %v12601_v28 = vpop.f32.mrb[187].mxu0  ;;  %v6446_v23 = vsel %vm333_vm2, %v6438_v38, -inf }
0x3562   :  { %6447 = vmax.xlane.f32.xlu1 %v6446_v23 }
0x3573   :  { %6515 = vrot.lane.b32.xlu1 %v15627_v5, %s14225_s28 }
0x3577   :  { %6565 = vrot.lane.b32.xlu1 %v15582_v22, %s14226_s2 }
0x357b   :  { %6615 = vrot.lane.b32.xlu1 %v15587_v14, %s14226_s2 }
0x357f   :  { %6613 = vrot.lane.b32.xlu1 %v15600_v46, %s14226_s2 }
0x35ed   :  { %v6445_v61 = vpop.xlane.xlu0 %6444 }
0x35ee   :  { %v6449_v31 = vsub.f32 %v6388_v30, %v6445_v61 }
0x35ef   :  { %v6448_v10 = vpop.xlane.xlu1 %6447 }
0x35f0   :  { %v6451_v56 = vmul.f32 1.442695, %v6449_v31  ;;  %v6450_v24 = vsub.f32 %v6438_v38, %v6448_v10 }
0x35f2   :  { %13669 = vpow2.f32 %v6451_v56  ;;  %v6453_v63 = vmul.f32 1.442695, %v6450_v24 }
0x35f3   :  { %v6516_v4 = vpop.permute.xlu1 %6515 }
0x35f4   :  { %13671 = vpow2.f32 %v6453_v63  ;;  %v6521_v44 = vsel %vm337_vm1, %v6516_v4, 0 }
0x35f5   :  { %12609 = vmatpush3.bf16.msra.mxu0 %v6521_v44 }
0x35f6   :  { %12620 = vmatprep.subr.bf16.mxu0 %v14221_v1 }
0x35f7   :  { %v6566_v58 = vpop.permute.xlu1 %6565 }
0x35f8   :  { %v6571_v21 = vsel %vm693_vm3, %v6566_v58, 0 }
0x35fb   :  { %v6616_v43 = vpop.permute.xlu1 %6615 }
0x35fc   :  { %v13670_v3 = vpop.eup %13669  ;;  %v6621_v36 = vsel %vm693_vm3, %v6616_v43, 0 }
0x35fd   :  { %v6455_v7 = vsel %vm333_vm2, %v13670_v3, 0.0 }
0x35fe   :  { %v13672_v0 = vpop.eup %13671  ;;  %6456 = vadd.xlane.f32.xlu0 %v6455_v7 }
0x35ff   :  { %v6458_v16 = vsel %vm333_vm2, %v13672_v0, 0.0  ;;  %v6614_v29 = vpop.permute.xlu1 %6613 }
0x3602   :  { %6459 = vadd.xlane.f32.xlu0 %v6458_v16 }
0x3618   :  { %6467 = vrot.lane.b32.xlu0 %v15598_v42, %s14225_s28 }
0x361c   :  { %6563 = vrot.lane.b32.xlu0 %v15589_v40, %s14226_s2 }
0x368b   :  { %v6457_v59 = vpop.xlane.xlu0 %6456 }
0x368c   :  { %13673 = vrcp.f32 %v6457_v59 }
0x368f   :  { %v6460_v13 = vpop.xlane.xlu0 %6459 }
0x3690   :  { %13675 = vrcp.f32 %v6460_v13 }
0x3693   :  { %v6468_v18 = vpop.permute.xlu0 %6467 }
0x3694   :  { %v6473_v33 = vsel %vm337_vm1, %v6468_v18, 0 }
0x3695   :  { %12603 = vmatpush3.bf16.msra.mxu1 %v6473_v33 }
0x3696   :  { %v13674_v32 = vpop.eup %13673  ;;  %12614 = vmatprep.subr.bf16.mxu1 %v14221_v1 }
0x3697   :  { %v6463_v37 = vmul.f32 %v13674_v32, %v13670_v3  ;;  %v6564_v11 = vpop.permute.xlu0 %6563 }
0x3699   :  { %v6465_v8 = vpack.c.bf16 %v6463_v37, %v6463_v37 }
0x369a   :  { %v13676_v12 = vpop.eup %13675 }
0x369b   :  { %12605 = vmatmul.mubr.msk.bf16.vlgmr.msra.gmra.mrb[160].mxu1 %vm333_vm2, %v6465_v8  ;;  %v6464_v20 = vmul.f32 %v13676_v12, %v13672_v0 }
0x369c   :  { %12616 = vmatprep.mubr.msk.bf16.mxu1 %vm14222_vm0, %v14221_v1 }
0x369d   :  { %v6466_v34 = vpack.c.bf16 %v6464_v20, %v6464_v20 }
0x369e   :  { %12615 = vmatpush3.bf16.xpose.msra.mxu1 %v6571_v21 }
0x369f   :  { %12611 = vmatmul.mubr.msk.bf16.vlgmr.msra.gmra.mrb[188].mxu0 %vm333_vm2, %v6466_v34  ;;  %12626 = vmatprep.subr.bf16.mxu1 %v14221_v1 }
0x36a0   :  { %12621 = vmatpush3.bf16.xpose.msra.mxu0 %v6621_v36  ;;  %12622 = vmatprep.mubr.msk.bf16.mxu0 %vm14222_vm0, %v14221_v1 }
0x36a1   :  { %12632 = vmatprep.subr.bf16.mxu0 %v14221_v1 }
0x36a5   :  { %12617 = vmatmul.mubr.msk.bf16.vlgmr.msra.gmra.mrb[164].mxu1 %vm693_vm3, %v6564_v11 }
0x36a6   :  { %12628 = vmatprep.mubr.msk.bf16.mxu1 %vm14222_vm0, %v14221_v1 }
0x36a7   :  { %12623 = vmatmul.mubr.msk.bf16.vlgmr.msra.gmra.mrb[192].mxu0 %vm693_vm3, %v6614_v29 }
0x36a8   :  { %12634 = vmatprep.mubr.msk.bf16.mxu0 %vm14222_vm0, %v14221_v1 }
0x376e   :  { %v15732_v30 = vpop.f32.mrb[160].mxu1 }
0x376f   :  { %v12606_v41 = vpop.f32.mrb[161].mxu1 }
0x3770   :  { %v6512_v45 = vpop.f32.mrb[162].mxu1 }
0x3771   :  { %v12607_v2 = vpop.f32.mrb[163].mxu1 }
0x3772   :  { %v15734_v38 = vpop.f32.mrb[188].mxu0 }
0x3773   :  { %v13117_v57 = vpack.i.bf16 %v15734_v38, %v15732_v30  ;;  %v12612_v19 = vpop.f32.mrb[189].mxu0 }
0x3774   :  { %v6560_v60 = vpop.f32.mrb[190].mxu0 }
0x3775   :  { %v12613_v54 = vpop.f32.mrb[191].mxu0 }
0x3778   :  { %v6607_v28 = vpop.f32.mrb[164].mxu1 }
0x3779   :  { %v6608_v23 = vadd.f32 %v6607_v28, %v14711_v26  ;;  %v12618_v61 = vpop.f32.mrb[165].mxu1 }
0x377a   :  { %v6610_v31 = vpop.f32.mrb[166].mxu1  ;;  %v6657_v10 = vpop.f32.mrb[192].mxu0 }
0x377b   :  { %v6658_v56 = vadd.f32 %v6657_v10, %v14713_v27  ;;  %v12619_v24 = vpop.f32.mrb[167].mxu1  ;;  %v12624_v63 = vpop.f32.mrb[193].mxu0  ;;  %v6663_v4 = vsel %vm333_vm2, %v6608_v23, -inf }
0x377c   :  { %6664 = vmax.xlane.f32.xlu0 %v6663_v4  ;;  %v6660_v44 = vpop.f32.mrb[194].mxu0 }
0x377d   :  { %v12625_v3 = vpop.f32.mrb[195].mxu0  ;;  %v6666_v7 = vsel %vm333_vm2, %v6658_v56, -inf }
0x377e   :  { %6667 = vmax.xlane.f32.xlu1 %v6666_v7 }
0x378f   :  { %6735 = vrot.lane.b32.xlu1 %v15627_v5, %s14226_s2 }
0x3793   :  { %6785 = vrot.lane.b32.xlu1 %v15582_v22, %s16609_s16 }
0x3797   :  { %6835 = vrot.lane.b32.xlu1 %v15587_v14, %s16609_s16 }
0x379b   :  { %6833 = vrot.lane.b32.xlu1 %v15600_v46, %s16609_s16 }
0x3809   :  { %v6665_v0 = vpop.xlane.xlu0 %6664 }
0x380a   :  { %v6669_v16 = vsub.f32 %v6608_v23, %v6665_v0 }
0x380b   :  { %v6668_v59 = vpop.xlane.xlu1 %6667 }
0x380c   :  { %v6671_v13 = vmul.f32 1.442695, %v6669_v16  ;;  %v6670_v18 = vsub.f32 %v6658_v56, %v6668_v59 }
0x380e   :  { %13677 = vpow2.f32 %v6671_v13  ;;  %v6673_v33 = vmul.f32 1.442695, %v6670_v18 }
0x380f   :  { %v6736_v32 = vpop.permute.xlu1 %6735 }
0x3810   :  { %13679 = vpow2.f32 %v6673_v33  ;;  %v6741_v58 = vsel %vm337_vm1, %v6736_v32, 0 }
0x3811   :  { %12633 = vmatpush3.bf16.msra.mxu0 %v6741_v58 }
0x3812   :  { %12644 = vmatprep.subr.bf16.mxu0 %v14221_v1 }
0x3813   :  { %v6786_v29 = vpop.permute.xlu1 %6785 }
0x3814   :  { %v6791_v54 = vsel %vm693_vm3, %v6786_v29, 0 }
0x3817   :  { %v6836_v60 = vpop.permute.xlu1 %6835 }
0x3818   :  { %v13678_v37 = vpop.eup %13677  ;;  %v6841_v23 = vsel %vm693_vm3, %v6836_v60, 0 }
0x3819   :  { %v6675_v8 = vsel %vm333_vm2, %v13678_v37, 0.0 }
0x381a   :  { %v13680_v12 = vpop.eup %13679  ;;  %6676 = vadd.xlane.f32.xlu0 %v6675_v8 }
0x381b   :  { %v6678_v20 = vsel %vm333_vm2, %v13680_v12, 0.0  ;;  %v6834_v31 = vpop.permute.xlu1 %6833 }
0x381e   :  { %6679 = vadd.xlane.f32.xlu0 %v6678_v20 }
0x3834   :  { %6687 = vrot.lane.b32.xlu0 %v15598_v42, %s14226_s2 }
0x3838   :  { %6783 = vrot.lane.b32.xlu0 %v15589_v40, %s16609_s16 }
0x38a7   :  { %v6677_v43 = vpop.xlane.xlu0 %6676 }
0x38a8   :  { %13681 = vrcp.f32 %v6677_v43 }
0x38ab   :  { %v6680_v21 = vpop.xlane.xlu0 %6679 }
0x38ac   :  { %13683 = vrcp.f32 %v6680_v21 }
0x38af   :  { %v6688_v34 = vpop.permute.xlu0 %6687 }
0x38b0   :  { %v6693_v36 = vsel %vm337_vm1, %v6688_v34, 0 }
0x38b1   :  { %12627 = vmatpush3.bf16.msra.mxu1 %v6693_v36 }
0x38b2   :  { %v13682_v11 = vpop.eup %13681  ;;  %12638 = vmatprep.subr.bf16.mxu1 %v14221_v1 }
0x38b3   :  { %v6683_v41 = vmul.f32 %v13682_v11, %v13678_v37  ;;  %v6784_v61 = vpop.permute.xlu0 %6783 }
0x38b5   :  { %v6685_v45 = vpack.c.bf16 %v6683_v41, %v6683_v41 }
0x38b6   :  { %v13684_v2 = vpop.eup %13683 }
0x38b7   :  { %12629 = vmatmul.mubr.msk.bf16.vlgmr.msra.gmra.mrb[168].mxu1 %vm333_vm2, %v6685_v45  ;;  %v6684_v19 = vmul.f32 %v13684_v2, %v13680_v12 }
0x38b8   :  { %12640 = vmatprep.mubr.msk.bf16.mxu1 %vm14222_vm0, %v14221_v1 }
0x38b9   :  { %v6686_v28 = vpack.c.bf16 %v6684_v19, %v6684_v19 }
0x38ba   :  { %12639 = vmatpush3.bf16.xpose.msra.mxu1 %v6791_v54 }
0x38bb   :  { %12635 = vmatmul.mubr.msk.bf16.vlgmr.msra.gmra.mrb[196].mxu0 %vm333_vm2, %v6686_v28  ;;  %12650 = vmatprep.subr.bf16.mxu1 %v14221_v1 }
0x38bc   :  { %12645 = vmatpush3.bf16.xpose.msra.mxu0 %v6841_v23  ;;  %12646 = vmatprep.mubr.msk.bf16.mxu0 %vm14222_vm0, %v14221_v1 }
0x38bd   :  { %12656 = vmatprep.subr.bf16.mxu0 %v14221_v1 }
0x38c1   :  { %12641 = vmatmul.mubr.msk.bf16.vlgmr.msra.gmra.mrb[172].mxu1 %vm693_vm3, %v6784_v61 }
0x38c2   :  { %12652 = vmatprep.mubr.msk.bf16.mxu1 %vm14222_vm0, %v14221_v1 }
0x38c3   :  { %12647 = vmatmul.mubr.msk.bf16.vlgmr.msra.gmra.mrb[200].mxu0 %vm693_vm3, %v6834_v31 }
0x38c4   :  { %12658 = vmatprep.mubr.msk.bf16.mxu0 %vm14222_vm0, %v14221_v1 }
0x398a   :  { %v15776_v10 = vpop.f32.mrb[168].mxu1 }
0x398b   :  { %v12630_v56 = vpop.f32.mrb[169].mxu1 }
0x398c   :  { %v6732_v24 = vpop.f32.mrb[170].mxu1 }
0x398d   :  { %v12631_v63 = vpop.f32.mrb[171].mxu1 }
0x398e   :  { %v15778_v4 = vpop.f32.mrb[196].mxu0 }
0x398f   :  { %v13122_v44 = vpack.i.bf16 %v15778_v4, %v15776_v10  ;;  %v12636_v3 = vpop.f32.mrb[197].mxu0 }
0x3990   :  { %v6780_v7 = vpop.f32.mrb[198].mxu0 }
0x3991   :  { %v12637_v0 = vpop.f32.mrb[199].mxu0 }
0x3994   :  { %v6827_v16 = vpop.f32.mrb[172].mxu1 }
0x3995   :  { %v6828_v59 = vadd.f32 %v6827_v16, %v14711_v26  ;;  %v12642_v13 = vpop.f32.mrb[173].mxu1 }
0x3996   :  { %v6830_v18 = vpop.f32.mrb[174].mxu1  ;;  %v6877_v33 = vpop.f32.mrb[200].mxu0 }
0x3997   :  { %v6878_v32 = vadd.f32 %v6877_v33, %v14713_v27  ;;  %v12643_v58 = vpop.f32.mrb[175].mxu1  ;;  %v12648_v37 = vpop.f32.mrb[201].mxu0  ;;  %v6883_v8 = vsel %vm333_vm2, %v6828_v59, -inf }
0x3998   :  { %6884 = vmax.xlane.f32.xlu0 %v6883_v8  ;;  %v6880_v12 = vpop.f32.mrb[202].mxu0 }
0x3999   :  { %v12649_v20 = vpop.f32.mrb[203].mxu0  ;;  %v6886_v43 = vsel %vm333_vm2, %v6878_v32, -inf }
0x399a   :  { %6887 = vmax.xlane.f32.xlu1 %v6886_v43 }
0x39ab   :  { %6955 = vrot.lane.b32.xlu1 %v15627_v5, %s16609_s16 }
0x39af   :  { %7005 = vrot.lane.b32.xlu1 %v15582_v22, %s16614_s10 }
0x39b3   :  { %7055 = vrot.lane.b32.xlu1 %v15587_v14, %s16614_s10 }
0x39b7   :  { %7053 = vrot.lane.b32.xlu1 %v15600_v46, %s16614_s10 }
0x3a25   :  { %v6885_v21 = vpop.xlane.xlu0 %6884 }
0x3a26   :  { %v6889_v34 = vsub.f32 %v6828_v59, %v6885_v21 }
0x3a27   :  { %v6888_v36 = vpop.xlane.xlu1 %6887 }
0x3a28   :  { %v6891_v11 = vmul.f32 1.442695, %v6889_v34  ;;  %v6890_v29 = vsub.f32 %v6878_v32, %v6888_v36 }
0x3a2a   :  { %13685 = vpow2.f32 %v6891_v11  ;;  %v6893_v41 = vmul.f32 1.442695, %v6890_v29 }
0x3a2b   :  { %v6956_v45 = vpop.permute.xlu1 %6955 }
0x3a2c   :  { %13687 = vpow2.f32 %v6893_v41  ;;  %v6961_v2 = vsel %vm337_vm1, %v6956_v45, 0 }
0x3a2d   :  { %12657 = vmatpush3.bf16.msra.mxu0 %v6961_v2 }
0x3a2e   :  { %12668 = vmatprep.subr.bf16.mxu0 %v14221_v1 }
0x3a2f   :  { %v7006_v63 = vpop.permute.xlu1 %7005 }
0x3a30   :  { %v7011_v13 = vsel %vm693_vm3, %v7006_v63, 0 }
0x3a33   :  { %v7056_v59 = vpop.permute.xlu1 %7055 }
0x3a34   :  { %v13686_v19 = vpop.eup %13685  ;;  %v7061_v33 = vsel %vm693_vm3, %v7056_v59, 0 }
0x3a35   :  { %v6895_v60 = vsel %vm333_vm2, %v13686_v19, 0.0 }
0x3a36   :  { %v13688_v54 = vpop.eup %13687  ;;  %6896 = vadd.xlane.f32.xlu0 %v6895_v60 }
0x3a37   :  { %v6898_v28 = vsel %vm333_vm2, %v13688_v54, 0.0  ;;  %v7054_v58 = vpop.permute.xlu1 %7053 }
0x3a3a   :  { %6899 = vadd.xlane.f32.xlu0 %v6898_v28 }
0x3a50   :  { %6907 = vrot.lane.b32.xlu0 %v15598_v42, %s16609_s16 }
0x3a54   :  { %7003 = vrot.lane.b32.xlu0 %v15589_v40, %s16614_s10 }
0x3ac3   :  { %v6897_v23 = vpop.xlane.xlu0 %6896 }
0x3ac4   :  { %13689 = vrcp.f32 %v6897_v23 }
0x3ac7   :  { %v6900_v61 = vpop.xlane.xlu0 %6899 }
0x3ac8   :  { %13691 = vrcp.f32 %v6900_v61 }
0x3acb   :  { %v6908_v31 = vpop.permute.xlu0 %6907 }
0x3acc   :  { %v6913_v56 = vsel %vm337_vm1, %v6908_v31, 0 }
0x3acd   :  { %12651 = vmatpush3.bf16.msra.mxu1 %v6913_v56 }
0x3ace   :  { %v13690_v24 = vpop.eup %13689  ;;  %12662 = vmatprep.subr.bf16.mxu1 %v14221_v1 }
0x3acf   :  { %v6903_v3 = vmul.f32 %v13690_v24, %v13686_v19  ;;  %v7004_v32 = vpop.permute.xlu0 %7003 }
0x3ad1   :  { %v6905_v7 = vpack.c.bf16 %v6903_v3, %v6903_v3 }
0x3ad2   :  { %v13692_v0 = vpop.eup %13691 }
0x3ad3   :  { %12653 = vmatmul.mubr.msk.bf16.vlgmr.msra.gmra.mrb[176].mxu1 %vm333_vm2, %v6905_v7  ;;  %v6904_v16 = vmul.f32 %v13692_v0, %v13688_v54 }
0x3ad4   :  { %12664 = vmatprep.mubr.msk.bf16.mxu1 %vm14222_vm0, %v14221_v1 }
0x3ad5   :  { %v6906_v18 = vpack.c.bf16 %v6904_v16, %v6904_v16 }
0x3ad6   :  { %12663 = vmatpush3.bf16.xpose.msra.mxu1 %v7011_v13 }
0x3ad7   :  { %12659 = vmatmul.mubr.msk.bf16.vlgmr.msra.gmra.mrb[204].mxu0 %vm333_vm2, %v6906_v18  ;;  %12674 = vmatprep.subr.bf16.mxu1 %v14221_v1 }
0x3ad8   :  { %12669 = vmatpush3.bf16.xpose.msra.mxu0 %v7061_v33  ;;  %12670 = vmatprep.mubr.msk.bf16.mxu0 %vm14222_vm0, %v14221_v1 }
0x3ad9   :  { %12680 = vmatprep.subr.bf16.mxu0 %v14221_v1 }
0x3add   :  { %12665 = vmatmul.mubr.msk.bf16.vlgmr.msra.gmra.mrb[180].mxu1 %vm693_vm3, %v7004_v32 }
0x3ade   :  { %12676 = vmatprep.mubr.msk.bf16.mxu1 %vm14222_vm0, %v14221_v1 }
0x3adf   :  { %12671 = vmatmul.mubr.msk.bf16.vlgmr.msra.gmra.mrb[208].mxu0 %vm693_vm3, %v7054_v58 }
0x3ae0   :  { %12682 = vmatprep.mubr.msk.bf16.mxu0 %vm14222_vm0, %v14221_v1 }
0x3ba6   :  { %v15820_v37 = vpop.f32.mrb[176].mxu1 }
0x3ba7   :  { %v12654_v8 = vpop.f32.mrb[177].mxu1 }
0x3ba8   :  { %v6952_v12 = vpop.f32.mrb[178].mxu1 }
0x3ba9   :  { %v12655_v20 = vpop.f32.mrb[179].mxu1 }
0x3baa   :  { %v15822_v43 = vpop.f32.mrb[204].mxu0 }
0x3bab   :  { %v13127_v21 = vpack.i.bf16 %v15822_v43, %v15820_v37  ;;  %v12660_v34 = vpop.f32.mrb[205].mxu0 }
0x3bac   :  { %v7000_v36 = vpop.f32.mrb[206].mxu0 }
0x3bad   :  { %v12661_v11 = vpop.f32.mrb[207].mxu0 }
0x3bb0   :  { %v7047_v29 = vpop.f32.mrb[180].mxu1 }
0x3bb1   :  { %v7048_v41 = vadd.f32 %v7047_v29, %v14711_v26  ;;  %v12666_v45 = vpop.f32.mrb[181].mxu1 }
0x3bb2   :  { %v7050_v2 = vpop.f32.mrb[182].mxu1  ;;  %v7097_v19 = vpop.f32.mrb[208].mxu0 }
0x3bb3   :  { %v7098_v60 = vadd.f32 %v7097_v19, %v14713_v27  ;;  %v12667_v54 = vpop.f32.mrb[183].mxu1  ;;  %v12672_v28 = vpop.f32.mrb[209].mxu0  ;;  %v7103_v23 = vsel %vm333_vm2, %v7048_v41, -inf }
0x3bb4   :  { %7104 = vmax.xlane.f32.xlu0 %v7103_v23  ;;  %v7100_v61 = vpop.f32.mrb[210].mxu0 }
0x3bb5   :  { %v12673_v31 = vpop.f32.mrb[211].mxu0  ;;  %v7106_v56 = vsel %vm333_vm2, %v7098_v60, -inf }
0x3bb6   :  { %7107 = vmax.xlane.f32.xlu1 %v7106_v56 }
0x3bc7   :  { %7175 = vrot.lane.b32.xlu1 %v15627_v5, %s16614_s10 }
0x3bcb   :  { %7225 = vrot.lane.b32.xlu1 %v15582_v22, %s14227_s11 }
0x3bcf   :  { %7275 = vrot.lane.b32.xlu1 %v15587_v14, %s14227_s11 }
0x3bd3   :  { %7273 = vrot.lane.b32.xlu1 %v15600_v46, %s14227_s11 }
0x3c41   :  { %v7105_v24 = vpop.xlane.xlu0 %7104 }
0x3c42   :  { %v7109_v63 = vsub.f32 %v7048_v41, %v7105_v24 }
0x3c43   :  { %v7108_v3 = vpop.xlane.xlu1 %7107 }
0x3c44   :  { %v7111_v7 = vmul.f32 1.442695, %v7109_v63  ;;  %v7110_v0 = vsub.f32 %v7098_v60, %v7108_v3 }
0x3c46   :  { %13693 = vpow2.f32 %v7111_v7  ;;  %v7113_v16 = vmul.f32 1.442695, %v7110_v0 }
0x3c47   :  { %v7176_v59 = vpop.permute.xlu1 %7175 }
0x3c48   :  { %13695 = vpow2.f32 %v7113_v16  ;;  %v7181_v13 = vsel %vm337_vm1, %v7176_v59, 0 }
0x3c49   :  { %12681 = vmatpush3.bf16.msra.mxu0 %v7181_v13 }
0x3c4a   :  { %12692 = vmatprep.subr.bf16.mxu0 %v14221_v1 }
0x3c4b   :  { %v7226_v11 = vpop.permute.xlu1 %7225 }
0x3c4c   :  { %v7231_v60 = vsel %vm693_vm3, %v7226_v11, 0 }
0x3c4f   :  { %v7276_v19 = vpop.permute.xlu1 %7275 }
0x3c50   :  { %v13694_v18 = vpop.eup %13693  ;;  %v7281_v28 = vsel %vm693_vm3, %v7276_v19, 0 }
0x3c51   :  { %v7115_v33 = vsel %vm333_vm2, %v13694_v18, 0.0 }
0x3c52   :  { %v13696_v32 = vpop.eup %13695  ;;  %7116 = vadd.xlane.f32.xlu0 %v7115_v33 }
0x3c53   :  { %v7118_v58 = vsel %vm333_vm2, %v13696_v32, 0.0  ;;  %v7274_v61 = vpop.permute.xlu1 %7273 }
0x3c56   :  { %7119 = vadd.xlane.f32.xlu0 %v7118_v58 }
0x3c6c   :  { %7127 = vrot.lane.b32.xlu0 %v15598_v42, %s16614_s10 }
0x3c70   :  { %7223 = vrot.lane.b32.xlu0 %v15589_v40, %s14227_s11 }
0x3cdf   :  { %v7117_v8 = vpop.xlane.xlu0 %7116 }
0x3ce0   :  { %13697 = vrcp.f32 %v7117_v8 }
0x3ce3   :  { %v7120_v12 = vpop.xlane.xlu0 %7119 }
0x3ce4   :  { %13699 = vrcp.f32 %v7120_v12 }
0x3ce7   :  { %v7128_v20 = vpop.permute.xlu0 %7127 }
0x3ce8   :  { %v7133_v34 = vsel %vm337_vm1, %v7128_v20, 0 }
0x3ce9   :  { %12675 = vmatpush3.bf16.msra.mxu1 %v7133_v34 }
0x3cea   :  { %v13698_v36 = vpop.eup %13697  ;;  %12686 = vmatprep.subr.bf16.mxu1 %v14221_v1 }
0x3ceb   :  { %v7123_v29 = vmul.f32 %v13698_v36, %v13694_v18  ;;  %v7224_v23 = vpop.permute.xlu0 %7223 }
0x3ced   :  { %v7125_v41 = vpack.c.bf16 %v7123_v29, %v7123_v29 }
0x3cee   :  { %v13700_v45 = vpop.eup %13699 }
0x3cef   :  { %12677 = vmatmul.mubr.msk.bf16.vlgmr.msra.gmra.mrb[184].mxu1 %vm333_vm2, %v7125_v41  ;;  %v7124_v2 = vmul.f32 %v13700_v45, %v13696_v32 }
0x3cf0   :  { %12688 = vmatprep.mubr.msk.bf16.mxu1 %vm14222_vm0, %v14221_v1 }
0x3cf1   :  { %v7126_v54 = vpack.c.bf16 %v7124_v2, %v7124_v2 }
0x3cf2   :  { %12687 = vmatpush3.bf16.xpose.msra.mxu1 %v7231_v60 }
0x3cf3   :  { %12683 = vmatmul.mubr.msk.bf16.vlgmr.msra.gmra.mrb[212].mxu0 %vm333_vm2, %v7126_v54  ;;  %12698 = vmatprep.subr.bf16.mxu1 %v14221_v1 }
0x3cf4   :  { %12693 = vmatpush3.bf16.xpose.msra.mxu0 %v7281_v28  ;;  %12694 = vmatprep.mubr.msk.bf16.mxu0 %vm14222_vm0, %v14221_v1 }
0x3cf5   :  { %12704 = vmatprep.subr.bf16.mxu0 %v14221_v1 }
0x3cf9   :  { %12689 = vmatmul.mubr.msk.bf16.vlgmr.msra.gmra.mrb[188].mxu1 %vm693_vm3, %v7224_v23 }
0x3cfa   :  { %12700 = vmatprep.mubr.msk.bf16.mxu1 %vm14222_vm0, %v14221_v1 }
0x3cfb   :  { %12695 = vmatmul.mubr.msk.bf16.vlgmr.msra.gmra.mrb[216].mxu0 %vm693_vm3, %v7274_v61 }
0x3cfc   :  { %12706 = vmatprep.mubr.msk.bf16.mxu0 %vm14222_vm0, %v14221_v1 }
0x3dc2   :  { %v15864_v31 = vpop.f32.mrb[184].mxu1 }
0x3dc3   :  { %v12678_v56 = vpop.f32.mrb[185].mxu1 }
0x3dc4   :  { %v7172_v24 = vpop.f32.mrb[186].mxu1 }
0x3dc5   :  { %v12679_v63 = vpop.f32.mrb[187].mxu1 }
0x3dc6   :  { %v15866_v3 = vpop.f32.mrb[212].mxu0 }
0x3dc7   :  { %v13132_v7 = vpack.i.bf16 %v15866_v3, %v15864_v31  ;;  %v12684_v0 = vpop.f32.mrb[213].mxu0  ;;  %v13377_v31 = vld [vmem:[#allocation14 + $0x40] sm:$0xff]   ;;  %v13378_v3 = vld [vmem:[#allocation14 + $0x48] sm:$0xff]  }
0x3dc8   :  { %v7220_v16 = vpop.f32.mrb[214].mxu0 }
0x3dc9   :  { %v12685_v59 = vpop.f32.mrb[215].mxu0 }
0x3dcc   :  { %v7267_v13 = vpop.f32.mrb[188].mxu1 }
0x3dcd   :  { %v7268_v18 = vadd.f32 %v7267_v13, %v14711_v26  ;;  %v12690_v33 = vpop.f32.mrb[189].mxu1 }
0x3dce   :  { %v7270_v32 = vpop.f32.mrb[190].mxu1  ;;  %v7317_v58 = vpop.f32.mrb[216].mxu0 }
0x3dcf   :  { %v7318_v8 = vadd.f32 %v7317_v58, %v14713_v27  ;;  %v12691_v12 = vpop.f32.mrb[191].mxu1  ;;  %v12696_v20 = vpop.f32.mrb[217].mxu0  ;;  %v7323_v34 = vsel %vm333_vm2, %v7268_v18, -inf }
0x3dd0   :  { %7324 = vmax.xlane.f32.xlu0 %v7323_v34  ;;  %v7320_v36 = vpop.f32.mrb[218].mxu0 }
0x3dd1   :  { %v12697_v11 = vpop.f32.mrb[219].mxu0  ;;  %v7326_v29 = vsel %vm333_vm2, %v7318_v8, -inf }
0x3dd2   :  { %7327 = vmax.xlane.f32.xlu1 %v7326_v29 }
0x3de3   :  { %7395 = vrot.lane.b32.xlu1 %v15627_v5, %s14227_s11 }
0x3de7   :  { %7445 = vrot.lane.b32.xlu1 %v15582_v22, %s16604_s27 }
0x3deb   :  { %7495 = vrot.lane.b32.xlu1 %v15587_v14, %s16604_s27 }
0x3def   :  { %7493 = vrot.lane.b32.xlu1 %v15600_v46, %s16604_s27 }
0x3e5d   :  { %v7325_v41 = vpop.xlane.xlu0 %7324 }
0x3e5e   :  { %v7329_v45 = vsub.f32 %v7268_v18, %v7325_v41 }
0x3e5f   :  { %v7328_v2 = vpop.xlane.xlu1 %7327 }
0x3e60   :  { %v7331_v19 = vmul.f32 1.442695, %v7329_v45  ;;  %v7330_v60 = vsub.f32 %v7318_v8, %v7328_v2 }
0x3e62   :  { %13701 = vpow2.f32 %v7331_v19  ;;  %v7333_v54 = vmul.f32 1.442695, %v7330_v60 }
0x3e63   :  { %v7396_v28 = vpop.permute.xlu1 %7395 }
0x3e64   :  { %13703 = vpow2.f32 %v7333_v54  ;;  %v7401_v23 = vsel %vm337_vm1, %v7396_v28, 0 }
0x3e65   :  { %12705 = vmatpush3.bf16.msra.mxu0 %v7401_v23 }
0x3e66   :  { %12716 = vmatprep.subr.bf16.mxu0 %v14221_v1 }
0x3e67   :  { %v7446_v59 = vpop.permute.xlu1 %7445 }
0x3e6b   :  { %v7496_v58 = vpop.permute.xlu1 %7495 }
0x3e6c   :  { %v13702_v22 = vpop.eup %13701  ;;  %v7501_v12 = vsel %vm693_vm3, %v7496_v58, 0 }
0x3e6d   :  { %v7335_v14 = vsel %vm333_vm2, %v13702_v22, 0.0 }
0x3e6e   :  { %v13704_v61 = vpop.eup %13703  ;;  %7336 = vadd.xlane.f32.xlu0 %v7335_v14 }
0x3e6f   :  { %v7338_v46 = vsel %vm333_vm2, %v13704_v61, 0.0  ;;  %v7494_v34 = vpop.permute.xlu1 %7493 }
0x3e72   :  { %7339 = vadd.xlane.f32.xlu0 %v7338_v46 }
0x3e88   :  { %7347 = vrot.lane.b32.xlu0 %v15598_v42, %s14227_s11 }
0x3e8c   :  { %7443 = vrot.lane.b32.xlu0 %v15589_v40, %s16604_s27  ;;  %v7451_v40 = vsel %vm693_vm3, %v7446_v59, 0 }
0x3efb   :  { %v7337_v56 = vpop.xlane.xlu0 %7336 }
0x3efc   :  { %13705 = vrcp.f32 %v7337_v56 }
0x3eff   :  { %v7340_v24 = vpop.xlane.xlu0 %7339 }
0x3f00   :  { %13707 = vrcp.f32 %v7340_v24 }
0x3f03   :  { %v7348_v63 = vpop.permute.xlu0 %7347 }
0x3f04   :  { %v7353_v0 = vsel %vm337_vm1, %v7348_v63, 0 }
0x3f05   :  { %12699 = vmatpush3.bf16.msra.mxu1 %v7353_v0 }
0x3f06   :  { %v13706_v16 = vpop.eup %13705  ;;  %12710 = vmatprep.subr.bf16.mxu1 %v14221_v1 }
0x3f07   :  { %v7343_v13 = vmul.f32 %v13706_v16, %v13702_v22  ;;  %v7444_v20 = vpop.permute.xlu0 %7443 }
0x3f09   :  { %v7345_v18 = vpack.c.bf16 %v7343_v13, %v7343_v13 }
0x3f0a   :  { %v13708_v33 = vpop.eup %13707 }
0x3f0b   :  { %12701 = vmatmul.mubr.msk.bf16.vlgmr.msra.gmra.mrb[192].mxu1 %vm333_vm2, %v7345_v18  ;;  %v7344_v32 = vmul.f32 %v13708_v33, %v13704_v61 }
0x3f0c   :  { %12712 = vmatprep.mubr.msk.bf16.mxu1 %vm14222_vm0, %v14221_v1 }
0x3f0d   :  { %v7346_v8 = vpack.c.bf16 %v7344_v32, %v7344_v32 }
0x3f0e   :  { %12711 = vmatpush3.bf16.xpose.msra.mxu1 %v7451_v40 }
0x3f0f   :  { %12707 = vmatmul.mubr.msk.bf16.vlgmr.msra.gmra.mrb[220].mxu0 %vm333_vm2, %v7346_v8  ;;  %12722 = vmatprep.subr.bf16.mxu1 %v14221_v1  ;;  %v13380_v8 = vld [vmem:[#allocation14 + $0x58] sm:$0xff]  }
0x3f10   :  { %12717 = vmatpush3.bf16.xpose.msra.mxu0 %v7501_v12  ;;  %12718 = vmatprep.mubr.msk.bf16.mxu0 %vm14222_vm0, %v14221_v1  ;;  %v13381_v12 = vld [vmem:[#allocation14 + $0x60] sm:$0xff]  }
0x3f11   :  { %12728 = vmatprep.subr.bf16.mxu0 %v14221_v1 }
0x3f15   :  { %12713 = vmatmul.mubr.msk.bf16.vlgmr.msra.gmra.mrb[196].mxu1 %vm693_vm3, %v7444_v20  ;;  %v13382_v20 = vld [vmem:[#allocation14 + $0x68] sm:$0xff]  }
0x3f16   :  { %12724 = vmatprep.mubr.msk.bf16.mxu1 %vm14222_vm0, %v14221_v1 }
0x3f17   :  { %12719 = vmatmul.mubr.msk.bf16.vlgmr.msra.gmra.mrb[224].mxu0 %vm693_vm3, %v7494_v34  ;;  %v13383_v34 = vld [vmem:[#allocation14 + $0x70] sm:$0xff]  }
0x3f18   :  { %12730 = vmatprep.mubr.msk.bf16.mxu0 %vm14222_vm0, %v14221_v1 }
0x3fde   :  { %v7389_v36 = vpop.f32.mrb[192].mxu1 }
0x3fdf   :  { %v12702_v11 = vpop.f32.mrb[193].mxu1 }
0x3fe0   :  { %v7392_v29 = vpop.f32.mrb[194].mxu1 }
0x3fe1   :  { %v12703_v41 = vpop.f32.mrb[195].mxu1 }
0x3fe2   :  { %v7437_v45 = vpop.f32.mrb[220].mxu0 }
0x3fe3   :  { %v13137_v2 = vpack.i.bf16 %v7437_v45, %v7389_v36  ;;  %v12708_v19 = vpop.f32.mrb[221].mxu0  ;;  %v13384_v36 = vld [vmem:[#allocation14 + $0x78] sm:$0xff]  }
0x3fe4   :  { %v7440_v60 = vpop.f32.mrb[222].mxu0 }
0x3fe5   :  { %v12709_v54 = vpop.f32.mrb[223].mxu0 }
0x3fe8   :  { %v7487_v28 = vpop.f32.mrb[196].mxu1 }
0x3fe9   :  { %v7488_v23 = vadd.f32 %v7487_v28, %v14711_v26  ;;  %v12714_v22 = vpop.f32.mrb[197].mxu1 }
0x3fea   :  { %v7490_v14 = vpop.f32.mrb[198].mxu1  ;;  %v7537_v61 = vpop.f32.mrb[224].mxu0 }
0x3feb   :  { %v7538_v46 = vadd.f32 %v7537_v61, %v14713_v27  ;;  %v12715_v56 = vpop.f32.mrb[199].mxu1  ;;  %v12720_v24 = vpop.f32.mrb[225].mxu0  ;;  %v7543_v63 = vsel %vm333_vm2, %v7488_v23, -inf }
0x3fec   :  { %7544 = vmax.xlane.f32.xlu0 %v7543_v63  ;;  %v7540_v0 = vpop.f32.mrb[226].mxu0 }
0x3fed   :  { %v12721_v16 = vpop.f32.mrb[227].mxu0  ;;  %v7546_v59 = vsel %vm333_vm2, %v7538_v46, -inf }
0x3fee   :  { %7547 = vmax.xlane.f32.xlu1 %v7546_v59 }
0x3fff   :  { %7615 = vrot.lane.b32.xlu1 %v15627_v5, %s16604_s27 }
0x4003   :  { %13113 = vrot.lane.b32.xlu1 %v13112_v15, %s16604_s27 }
0x4007   :  { %13118 = vrot.lane.b32.xlu1 %v13117_v57, %s14227_s11 }
0x400b   :  { %13128 = vrot.lane.b32.xlu1 %v13127_v21, %s16609_s16 }
0x400f   :  { %13138 = vrot.lane.b32.xlu1 %v13137_v2, %s14225_s28 }
0x4079   :  { %v7545_v26 = vpop.xlane.xlu0 %7544 }
0x407a   :  { %v7549_v27 = vsub.f32 %v7488_v23, %v7545_v26 }
0x407b   :  { %v7548_v5 = vpop.xlane.xlu1 %7547 }
0x407c   :  { %v7551_v13 = vmul.f32 1.442695, %v7549_v27  ;;  %v7550_v18 = vsub.f32 %v7538_v46, %v7548_v5 }
0x407e   :  { %13709 = vpow2.f32 %v7551_v13  ;;  %v7553_v39 = vmul.f32 1.442695, %v7550_v18 }
0x407f   :  { %v7616_v50 = vpop.permute.xlu1 %7615 }
0x4080   :  { %13711 = vpow2.f32 %v7553_v39  ;;  %v7621_v15 = vsel %vm337_vm1, %v7616_v50, 0 }
0x4081   :  { %12729 = vmatpush3.bf16.msra.mxu0 %v7621_v15 }
0x4082   :  { %12754 = vmatprep.subr.bf16.mxu0 %v14221_v1 }
0x4083   :  { %v13114_v23 = vpop.permute.xlu1 %13113 }
0x4084   :  { %v13116_v61 = vunpack.i.h.bf16 %v13114_v23  ;;  %v13115_v46 = vunpack.i.l.bf16 %v13114_v23 }
0x4086   :  { %v7720_v26 = vsel %vm693_vm3, %v15650_v53, %v13116_v61  ;;  %v7719_v27 = vsel %vm693_vm3, %v15647_v9, %v13115_v46 }
0x4087   :  { %v13119_v22 = vpop.permute.xlu1 %13118 }
0x4088   :  { %v13710_v30 = vpop.eup %13709  ;;  %v13121_v56 = vunpack.i.h.bf16 %v13119_v22  ;;  %v13120_v24 = vunpack.i.l.bf16 %v13119_v22 }
0x4089   :  { %v7555_v38 = vsel %vm333_vm2, %v13710_v30, 0.0 }
0x408a   :  { %v13712_v57 = vpop.eup %13711  ;;  %7556 = vadd.xlane.f32.xlu0 %v7555_v38  ;;  %v7721_v5 = vsel %vm2506_vm4, %v7719_v27, %v13120_v24  ;;  %v7722_v13 = vsel %vm2506_vm4, %v7720_v26, %v13121_v56  ;;  %v13402_v26 = vld [vmem:[#allocation17 + $0x50] sm:$0xff]  }
0x408b   :  { %v7558_v37 = vsel %vm333_vm2, %v13712_v57, 0.0  ;;  %v13129_v63 = vpop.permute.xlu1 %13128  ;;  %v13405_v27 = vld [vmem:[#allocation20 + $0xd4] ss:$8 sps:$4 sm:$0xff]  }
0x408c   :  { %v13130_v38 = vunpack.i.l.bf16 %v13129_v63 }
0x408e   :  { %7559 = vadd.xlane.f32.xlu0 %v7558_v37 }
0x40a4   :  { %7567 = vrot.lane.b32.xlu0 %v15598_v42, %s16604_s27 }
0x40a8   :  { %13123 = vrot.lane.b32.xlu0 %v13122_v44, %s16614_s10 }
0x40ac   :  { %13133 = vrot.lane.b32.xlu0 %v13132_v7, %s14226_s2  ;;  %v13379_v7 = vld [vmem:[#allocation14 + $0x50] sm:$0xff]  }
0x4117   :  { %v7557_v43 = vpop.xlane.xlu0 %7556 }
0x4118   :  { %13713 = vrcp.f32 %v7557_v43 }
0x411b   :  { %v7560_v21 = vpop.xlane.xlu0 %7559 }
0x411c   :  { %13715 = vrcp.f32 %v7560_v21 }
0x411f   :  { %v7568_v33 = vpop.permute.xlu0 %7567 }
0x4120   :  { %v7573_v32 = vsel %vm337_vm1, %v7568_v33, 0 }
0x4121   :  { %12723 = vmatpush3.bf16.msra.mxu1 %v7573_v32 }
0x4122   :  { %v13714_v58 = vpop.eup %13713  ;;  %12734 = vmatprep.subr.bf16.mxu1 %v14221_v1 }
0x4123   :  { %v7563_v42 = vmul.f32 %v13714_v58, %v13710_v30  ;;  %v13124_v14 = vpop.permute.xlu0 %13123  ;;  %v13131_v30 = vunpack.i.h.bf16 %v13129_v63 }
0x4124   :  { %v13126_v0 = vunpack.i.h.bf16 %v13124_v14  ;;  %v13125_v16 = vunpack.i.l.bf16 %v13124_v14 }
0x4125   :  { %v7565_v40 = vpack.c.bf16 %v7563_v42, %v7563_v42 }
0x4126   :  { %v13716_v10 = vpop.eup %13715  ;;  %v7723_v18 = vsel %vm2509_vm5, %v7721_v5, %v13125_v16  ;;  %v7724_v39 = vsel %vm2509_vm5, %v7722_v13, %v13126_v0  ;;  %v13398_v0 = vld [vmem:[#allocation17 + $0x48] sm:$0xff]   ;;  %v13403_v5 = vld [vmem:[#allocation20 + $0xd0] ss:$8 sps:$4 sm:$0xff]  }
0x4127   :  { %12725 = vmatmul.mubr.msk.bf16.vlgmr.msra.gmra.mrb[200].mxu1 %vm333_vm2, %v7565_v40  ;;  %v7564_v4 = vmul.f32 %v13716_v10, %v13712_v57  ;;  %v13134_v59 = vpop.permute.xlu0 %13133  ;;  %v13139_v57 = vpop.permute.xlu1 %13138  ;;  %v7725_v37 = vsel %vm2512_vm6, %v7723_v18, %v13130_v38  ;;  %v7726_v53 = vsel %vm2512_vm6, %v7724_v39, %v13131_v30  ;;  %v13401_v16 = vld [vmem:[#allocation20 + $0xc4] ss:$8 sps:$4 sm:$0xff]   ;;  %v13406_v13 = vld [vmem:[#allocation17 + $0x58] sm:$0xff]   ;;  %v13407_v39 = vld [vmem:[#allocation20 + $0xe0] ss:$8 sps:$4 sm:$0xff]  }
0x4128   :  { %12750 = vmatprep.mubr.msk.bf16.mxu1 %vm14222_vm0, %v14221_v1  ;;  %12735 = vmatpush3.bf16.msra.mxu1 %v13377_v31  ;;  %v13136_v50 = vunpack.i.h.bf16 %v13134_v59  ;;  %v13135_v15 = vunpack.i.l.bf16 %v13134_v59  ;;  %v13141_v21 = vunpack.i.h.bf16 %v13139_v57  ;;  %v13140_v33 = vunpack.i.l.bf16 %v13139_v57  ;;  %v13399_v59 = vld [vmem:[#allocation20 + $0xc0] ss:$8 sps:$4 sm:$0xff]   ;;  %v13409_v18 = vld [vmem:[#allocation20 + $0xe4] ss:$8 sps:$4 sm:$0xff]   ;;  %v13411_v30 = vld [vmem:[#allocation20 + $0xf0] ss:$8 sps:$4 sm:$0xff]  }
0x4129   :  { %v7566_v44 = vpack.c.bf16 %v7564_v4, %v7564_v4  ;;  %12736 = vmatprep.subr.bf16.mxu1 %v14221_v1  ;;  %v13414_v38 = vld [vmem:[#allocation17 + $0x68] sm:$0xff]  }
0x412a   :  { %v7727_v43 = vsel %vm2515_vm7, %v7725_v37, %v13135_v15  ;;  %v7728_v9 = vsel %vm2515_vm7, %v7726_v53, %v13136_v50  ;;  %v13410_v50 = vld [vmem:[#allocation17 + $0x60] sm:$0xff]   ;;  %v13795_v57 = vld [vmem:[%s16615_s5] sm:$0xff]   ;;  %v13416_v53 = vld [vmem:[#allocation17 + $0x78] sm:$0xff]  }
0x412b   :  { %12731 = vmatmul.mubr.msk.bf16.vlgmr.msra.gmra.mrb[228].mxu0 %vm333_vm2, %v7566_v44  ;;  %v7729_v40 = vsel %vm2518_vm8, %v7727_v43, %v13140_v33  ;;  %v7730_v10 = vsel %vm2518_vm8, %v7728_v9, %v13141_v21  ;;  %v13413_v15 = vld [vmem:[#allocation20 + $0xf4] ss:$8 sps:$4 sm:$0xff]  }
0x412c   :  { %12770 = vmatprep.mubr.msk.bf16.mxu0 %vm14222_vm0, %v14221_v1  ;;  %12737 = vmatpush3.bf16.msra.mxu1 %v13378_v3  ;;  %v11471_v3 = vld [vmem:[#allocation15 + $0x1] ss:$0 sm:$0xff]  ;;  %v13415_v37 = vld [vmem:[#allocation17 + $0x70] sm:$0xff]  }
0x412d   :  { %12738 = vmatprep.subr.bf16.mxu1 %v14221_v1 }
0x4130   :  { %12739 = vmatpush3.bf16.msra.mxu1 %v13379_v7 }
0x4131   :  { %12740 = vmatprep.subr.bf16.mxu1 %v14221_v1 }
0x4134   :  { %12741 = vmatpush3.bf16.msra.mxu1 %v13380_v8 }
0x4135   :  { %12742 = vmatprep.subr.bf16.mxu1 %v14221_v1 }
0x4138   :  { %12743 = vmatpush3.bf16.msra.mxu1 %v13381_v12 }
0x4139   :  { %12744 = vmatprep.subr.bf16.mxu1 %v14221_v1 }
0x413c   :  { %12745 = vmatpush3.bf16.msra.mxu1 %v13382_v20 }
0x413d   :  { %12746 = vmatprep.subr.bf16.mxu1 %v14221_v1 }
0x4140   :  { %12747 = vmatpush3.bf16.msra.mxu1 %v13383_v34 }
0x4141   :  { %12748 = vmatprep.subr.bf16.mxu1 %v14221_v1 }
0x4144   :  { %12749 = vmatpush3.bf16.msra.mxu1 %v13384_v36 }
0x41fa   :  { %v7609_v11 = vpop.f32.mrb[200].mxu1 }
0x41fb   :  { %v12726_v29 = vpop.f32.mrb[201].mxu1 }
0x41fc   :  { %v7612_v41 = vpop.f32.mrb[202].mxu1 }
0x41fd   :  { %v12727_v45 = vpop.f32.mrb[203].mxu1  ;;  %v13385_v41 = vld [vmem:[#allocation20 + $0x80] ss:$8 sps:$4 sm:$0xff]  }
0x41fe   :  { %v7657_v2 = vpop.f32.mrb[228].mxu0  ;;  %v13387_v45 = vld [vmem:[#allocation20 + $0x84] ss:$8 sps:$4 sm:$0xff]  }
0x41ff   :  { %v13142_v19 = vpack.i.bf16 %v7657_v2, %v7609_v11  ;;  %v12732_v60 = vpop.f32.mrb[229].mxu0  ;;  %v13390_v2 = vld [vmem:[#allocation20 + $0x94] ss:$8 sps:$4 sm:$0xff]   ;;  %8092 = vmatprep.subr.bf16.mxu1 %v13387_v45 }
0x4200   :  { %v7660_v54 = vpop.f32.mrb[230].mxu0  ;;  %v13388_v60 = vld [vmem:[#allocation20 + $0x90] ss:$8 sps:$4 sm:$0xff]  }
0x4201   :  { %13143 = vrot.lane.b32.xlu0 %v13142_v19, %s14224_s30  ;;  %v12733_v28 = vpop.f32.mrb[231].mxu0  ;;  %v13394_v19 = vld [vmem:[#allocation17 + $0x40] sm:$0xff]  }
0x4202   :  { %v13393_v54 = vld [vmem:[#allocation20 + $0xa4] ss:$8 sps:$4 sm:$0xff]   ;;  %12755 = vmatpush3.bf16.msra.mxu0 %v13394_v19  ;;  %v13397_v28 = vld [vmem:[#allocation20 + $0xb4] ss:$8 sps:$4 sm:$0xff]  }
0x4203   :  { %12756 = vmatprep.subr.bf16.mxu0 %v14221_v1 }
0x4206   :  { %12757 = vmatpush3.bf16.msra.mxu0 %v13398_v0 }
0x4207   :  { %12758 = vmatprep.subr.bf16.mxu0 %v14221_v1 }
0x420a   :  { %12759 = vmatpush3.bf16.msra.mxu0 %v13402_v26 }
0x420b   :  { %12760 = vmatprep.subr.bf16.mxu0 %v14221_v1 }
0x420e   :  { %12761 = vmatpush3.bf16.msra.mxu0 %v13406_v13 }
0x420f   :  { %12762 = vmatprep.subr.bf16.mxu0 %v14221_v1 }
0x4212   :  { %12763 = vmatpush3.bf16.msra.mxu0 %v13410_v50 }
0x4213   :  { %12764 = vmatprep.subr.bf16.mxu0 %v14221_v1 }
0x4216   :  { %12765 = vmatpush3.bf16.msra.mxu0 %v13414_v38 }
0x4217   :  { %12766 = vmatprep.subr.bf16.mxu0 %v14221_v1 }
0x421a   :  { %12767 = vmatpush3.bf16.msra.mxu0 %v13415_v37 }
0x421b   :  { %12768 = vmatprep.subr.bf16.mxu0 %v14221_v1 }
0x421e   :  { %12769 = vmatpush3.bf16.msra.mxu0 %v13416_v53 }
0x421f   :  { %12774 = vmatprep.subr.bf16.mxu0 %v14221_v1 }
0x4273   :  { %v13144_v32 = vpop.permute.xlu0 %13143 }
0x4274   :  { %v13146_v58 = vunpack.i.h.bf16 %v13144_v32  ;;  %v13145_v42 = vunpack.i.l.bf16 %v13144_v32 }
0x4276   :  { %v7732_v4 = vsel %vm2521_vm9, %v7730_v10, %v13146_v58  ;;  %v7731_v44 = vsel %vm2521_vm9, %v7729_v40, %v13145_v42  ;;  %v11413_v42 = vld [vmem:[%s16553_s18 + $0x4] sm:$0x7] }
0x4277   :  { %v7733_v31 = vpack.c.bf16 %v7732_v4, %v7731_v44  ;;  %v7856_v4 = vrot.slane %v11413_v42, %v14664_v51  ;;  %v11414_v44 = vld [vmem:[%s16554_s19 + $0x4] sm:$0x7] }
0x4279   :  { %12751 = vmatmul.mubr.bf16.vlgmr.msra.gmra.mrb[204].mxu1 %v7733_v31 }
0x427a   :  { %8124 = vmatprep.mubr.bf16.mxu1 %v14223_v35  ;;  %8093 = vmatpush1.bf16.msra.mxu1 %v13385_v41 }
0x427b   :  { %8094 = vmatprep.subr.bf16.mxu1 %v13390_v2 }
0x427e   :  { %8095 = vmatpush1.bf16.msra.mxu1 %v13388_v60 }
0x427f   :  { %8096 = vmatprep.subr.bf16.mxu1 %v13393_v54 }
0x434c   :  { %v7822_v7 = vpop.f32.mrb[204].mxu1 }
0x434d   :  { %v7823_v8 = vadd.f32 %v11471_v3, %v7822_v7  ;;  %v12752_v12 = vpop.f32.mrb[205].mxu1 }
0x434e   :  { %v7825_v20 = vpop.f32.mrb[206].mxu1 }
0x434f   :  { %v7829_v34 = vadd.f32 %v7823_v8, %v15567_v55  ;;  %v7826_v36 = vadd.f32 %v11471_v3, %v7825_v20  ;;  %v12753_v11 = vpop.f32.mrb[207].mxu1  ;;  %v13391_v55 = vld [vmem:[#allocation20 + $0xa0] ss:$8 sps:$4 sm:$0xff]   ;;  %v7862_v8 = vrot.slane %v11414_v44, %v14664_v51 }
0x4350   :  { %8097 = vmatpush1.bf16.msra.mxu1 %v13391_v55  ;;  %v11489_v11 = vld [vmem:[%s16550_s15 + $0x2] sm:$0x3] }
0x4351   :  { %v7830_v29 = vadd.f32 %v7826_v36, %v15569_v25  ;;  %7831 = vadd.xlane.f32.xlu1 %v7829_v34  ;;  %v13395_v25 = vld [vmem:[#allocation20 + $0xb0] ss:$8 sps:$4 sm:$0xff]   ;;  %8098 = vmatprep.subr.bf16.mxu1 %v13397_v28  ;;  %v8009_v45 = vrot.slane %v11489_v11, %v14661_v49 }
0x4353   :  { %7833 = vadd.xlane.f32.xlu0 %v7830_v29 }
0x4354   :  { %8099 = vmatpush1.bf16.msra.mxu1 %v13395_v25 }
0x4355   :  { %8100 = vmatprep.subr.bf16.mxu1 %v13401_v16 }
0x4358   :  { %8101 = vmatpush1.bf16.msra.mxu1 %v13399_v59 }
0x4359   :  { %8102 = vmatprep.subr.bf16.mxu1 %v13405_v27 }
0x435c   :  { %8103 = vmatpush1.bf16.msra.mxu1 %v13403_v5 }
0x435d   :  { %8104 = vmatprep.subr.bf16.mxu1 %v13409_v18 }
0x4360   :  { %8105 = vmatpush1.bf16.msra.mxu1 %v13407_v39 }
0x4361   :  { %8106 = vmatprep.subr.bf16.mxu1 %v13413_v15 }
0x4364   :  { %8107 = vmatpush1.bf16.msra.mxu1 %v13411_v30 }
0x4365   :  { %12798 = vmatprep.subr.bf16.mxu1 %v14221_v1 }
0x4367   :  { %8125 = vmatmul.mubr.bf16.vlgmr.msra.gmra.mrb[208].mxu1 %v13795_v57 }
0x4368   :  { %12800 = vmatprep.mubr.msk.bf16.mxu1 %vm14222_vm0, %v14221_v1 }
0x43de   :  { %v7832_v23 = vpop.xlane.xlu1 %7831 }
0x43df   :  { %v7835_v22 = vmul.f32 0.0078125, %v7832_v23 }
0x43e0   :  { %v7834_v14 = vpop.xlane.xlu0 %7833 }
0x43e1   :  { %v7837_v61 = vsub.f32 %v7829_v34, %v7835_v22  ;;  %v7836_v46 = vmul.f32 0.0078125, %v7834_v14  ;;  %v11480_v22 = vld [vmem:[#allocation18 + $0x1] ss:$0 sm:$0xff] }
0x43e3   :  { %v7838_v56 = vsub.f32 %v7830_v29, %v7836_v46  ;;  %v7839_v24 = vmul.f32 %v7837_v61, %v7837_v61  ;;  %v8005_v29 = vrot.slane %v11489_v11, %v14664_v51 }
0x43e5   :  { %7841 = vadd.xlane.f32.xlu0 %v7839_v24  ;;  %v7840_v63 = vmul.f32 %v7838_v56, %v7838_v56 }
0x43e9   :  { %7843 = vadd.xlane.f32.xlu0 %v7840_v63 }
0x443a   :  { %v8126_v41 = vpop.f32.mrb[208].mxu1 }
0x443b   :  { %v8127_v2 = vadd.f32 %v8126_v41, %v8005_v29  ;;  %v8128_v19 = vpop.f32.mrb[209].mxu1 }
0x443c   :  { %v8130_v60 = vpop.f32.mrb[210].mxu1  ;;  %v8129_v26 = vadd.f32 %v8128_v19, %v8009_v45 }
0x443d   :  { %v16011_v54 = vpack.c.bf16 %v8127_v2, %v8127_v2  ;;  %v8131_v55 = vadd.f32 %v8130_v60, %v8005_v29  ;;  %v8132_v28 = vpop.f32.mrb[211].mxu1 }
0x443e   :  { %v16013_v25 = vadd.f32 %v8132_v28, %v8009_v45  ;;  %v16029_v13 = vpack.c.bf16 %v8129_v26, %v8129_v26 }
0x443f   :  { %v8164_v23 = vsel %vm693_vm3, %v16011_v54, 0  ;;  %v16018_v24 = vpack.c.bf16 %v8131_v55, %v8131_v55 }
0x4440   :  { %v8280_v39 = vsel %vm337_vm1, %v16029_v13, 0  ;;  %v16058_v45 = vpack.c.bf16 %v16013_v25, %v16013_v25 }
0x4441   :  { %v8210_v27 = vsel %vm693_vm3, %v16018_v24, 0 }
0x4442   :  { %v8326_v55 = vsel %vm337_vm1, %v16058_v45, 0 }
0x4472   :  { %v7842_v43 = vpop.xlane.xlu0 %7841 }
0x4473   :  { %v7845_v9 = vmul.f32 0.0078125, %v7842_v43 }
0x4475   :  { %v7847_v21 = vadd.f32 1e-05, %v7845_v9 }
0x4476   :  { %v7844_v33 = vpop.xlane.xlu0 %7843 }
0x4477   :  { %13717 = vrsqrt.f32 %v7847_v21  ;;  %v7846_v32 = vmul.f32 0.0078125, %v7844_v33 }
0x4479   :  { %v7848_v58 = vadd.f32 1e-05, %v7846_v32 }
0x447b   :  { %13719 = vrsqrt.f32 %v7848_v58 }
0x4481   :  { %v13718_v40 = vpop.eup %13717 }
0x4482   :  { %v7851_v10 = vmul.f32 %v13718_v40, %v7837_v61 }
0x4484   :  { %v7857_v7 = vmul.f32 %v7856_v4, %v7851_v10 }
0x4485   :  { %v13720_v31 = vpop.eup %13719 }
0x4486   :  { %v7852_v3 = vmul.f32 %v13720_v31, %v7838_v56  ;;  %v15998_v20 = vadd.f32 %v7862_v8, %v7857_v7 }
0x4488   :  { %v7858_v12 = vmul.f32 %v7856_v4, %v7852_v3 }
0x448a   :  { %v16000_v34 = vadd.f32 %v7862_v8, %v7858_v12 }
0x448c   :  { %v7865_v36 = vpack.c.bf16 %v16000_v34, %v15998_v20 }
0x448e   :  { %12771 = vmatmul.mubr.bf16.vlgmr.msra.gmra.mrb[232].mxu0 %v7865_v36 }
0x448f   :  { %12776 = vmatprep.mubr.msk.bf16.mxu0 %vm14222_vm0, %v14221_v1  ;;  %12775 = vmatpush3.bf16.xpose.msra.mxu0 %v8164_v23 }
0x4490   :  { %12780 = vmatprep.subr.bf16.mxu0 %v14221_v1 }
0x4561   :  { %v7973_v14 = vpop.f32.mrb[232].mxu0 }
0x4562   :  { %v7974_v61 = vadd.f32 %v11480_v22, %v7973_v14  ;;  %v12772_v46 = vpop.f32.mrb[233].mxu0 }
0x4563   :  { %v7976_v56 = vpop.f32.mrb[234].mxu0 }
0x4564   :  { %v7980_v63 = vmul.f32 0.25, %v7974_v61  ;;  %v12773_v0 = vpop.f32.mrb[235].mxu0  ;;  %v7977_v59 = vadd.f32 %v11480_v22, %v7976_v56 }
0x4566   :  { %v16020_v16 = vpack.c.bf16 %v7980_v63, %v7980_v63  ;;  %v7981_v5 = vmul.f32 0.25, %v7977_v59 }
0x4568   :  { %12777 = vmatmul.mubr.msk.bf16.vlgmr.msra.gmra.mrb[236].mxu0 %vm693_vm3, %v16020_v16  ;;  %v16031_v18 = vpack.c.bf16 %v7981_v5, %v7981_v5 }
0x4569   :  { %12781 = vmatpush3.bf16.xpose.msra.mxu0 %v8210_v27  ;;  %12782 = vmatprep.mubr.msk.bf16.mxu0 %vm14222_vm0, %v14221_v1 }
0x456a   :  { %12786 = vmatprep.subr.bf16.mxu0 %v14221_v1 }
0x4570   :  { %12783 = vmatmul.mubr.msk.bf16.vlgmr.msra.gmra.mrb[240].mxu0 %vm693_vm3, %v16031_v18 }
0x4571   :  { %12787 = vmatpush3.bf16.msra.mxu0 %v8280_v39  ;;  %12788 = vmatprep.mubr.msk.bf16.mxu0 %vm14222_vm0, %v14221_v1 }
0x4572   :  { %12792 = vmatprep.subr.bf16.mxu0 %v14221_v1 }
0x463b   :  { %v8200_v50 = vpop.f32.mrb[236].mxu0 }
0x463c   :  { %v8201_v15 = vadd.f32 %v8200_v50, %v15138_v17  ;;  %v12778_v30 = vpop.f32.mrb[237].mxu0 }
0x463d   :  { %v8203_v38 = vpop.f32.mrb[238].mxu0 }
0x463e   :  { %v12779_v57 = vpop.f32.mrb[239].mxu0  ;;  %v8252_v37 = vsel %vm333_vm2, %v8201_v15, -inf }
0x463f   :  { %8253 = vmax.xlane.f32.xlu1 %v8252_v37 }
0x4643   :  { %v8246_v53 = vpop.f32.mrb[240].mxu0 }
0x4644   :  { %v8247_v43 = vadd.f32 %v8246_v53, %v15143_v62  ;;  %v12784_v9 = vpop.f32.mrb[241].mxu0 }
0x4645   :  { %v8249_v21 = vpop.f32.mrb[242].mxu0 }
0x4646   :  { %v12785_v33 = vpop.f32.mrb[243].mxu0  ;;  %v8255_v32 = vsel %vm333_vm2, %v8247_v43, -inf }
0x4647   :  { %8256 = vmax.xlane.f32.xlu0 %v8255_v32 }
0x46cc   :  { %v8254_v58 = vpop.xlane.xlu1 %8253 }
0x46cd   :  { %v8258_v42 = vsub.f32 %v8201_v15, %v8254_v58 }
0x46cf   :  { %v8260_v40 = vmul.f32 1.442695, %v8258_v42 }
0x46d1   :  { %13721 = vpow2.f32 %v8260_v40 }
0x46d4   :  { %v8257_v10 = vpop.xlane.xlu0 %8256 }
0x46d5   :  { %v8259_v4 = vsub.f32 %v8247_v43, %v8257_v10 }
0x46d7   :  { %v8262_v44 = vmul.f32 1.442695, %v8259_v4 }
0x46d9   :  { %13723 = vpow2.f32 %v8262_v44 }
0x46db   :  { %v13722_v31 = vpop.eup %13721 }
0x46dc   :  { %v8264_v3 = vsel %vm333_vm2, %v13722_v31, 0.0 }
0x46dd   :  { %8265 = vadd.xlane.f32.xlu1 %v8264_v3 }
0x46e3   :  { %v13724_v7 = vpop.eup %13723 }
0x46e4   :  { %v8267_v8 = vsel %vm333_vm2, %v13724_v7, 0.0 }
0x46e5   :  { %8268 = vadd.xlane.f32.xlu0 %v8267_v8 }
0x46ee   :  { %8372 = vrot.lane.b32.xlu1 %v16011_v54, %s14224_s30 }
0x46f2   :  { %8369 = vrot.lane.b32.xlu1 %v16020_v16, %s14224_s30 }
0x46f6   :  { %8421 = vrot.lane.b32.xlu1 %v16031_v18, %s14224_s30 }
0x46fb   :  { %8424 = vrot.lane.b32.xlu0 %v16018_v24, %s14224_s30 }
0x476a   :  { %v8266_v12 = vpop.xlane.xlu1 %8265 }
0x476b   :  { %13725 = vrcp.f32 %v8266_v12 }
0x476e   :  { %v8373_v36 = vpop.permute.xlu1 %8372 }
0x476f   :  { %v8378_v11 = vsel %vm693_vm3, %v8373_v36, 0 }
0x4770   :  { %12799 = vmatpush3.bf16.xpose.msra.mxu1 %v8378_v11 }
0x4771   :  { %12810 = vmatprep.subr.bf16.mxu1 %v14221_v1 }
0x4772   :  { %v8269_v29 = vpop.xlane.xlu0 %8268  ;;  %v8370_v19 = vpop.permute.xlu1 %8369 }
0x4773   :  { %13727 = vrcp.f32 %v8269_v29 }
0x4775   :  { %v13726_v41 = vpop.eup %13725 }
0x4776   :  { %v8272_v2 = vmul.f32 %v13726_v41, %v13722_v31  ;;  %v8425_v23 = vpop.permute.xlu0 %8424  ;;  %v8422_v61 = vpop.permute.xlu1 %8421 }
0x4777   :  { %12801 = vmatmul.mubr.msk.bf16.vlgmr.msra.gmra.mrb[212].mxu1 %vm693_vm3, %v8370_v19  ;;  %v8430_v14 = vsel %vm693_vm3, %v8425_v23, 0 }
0x4778   :  { %v8274_v60 = vpack.c.bf16 %v8272_v2, %v8272_v2  ;;  %12812 = vmatprep.mubr.msk.bf16.mxu1 %vm14222_vm0, %v14221_v1 }
0x477a   :  { %12789 = vmatmul.mubr.msk.bf16.vlgmr.msra.gmra.mrb[244].mxu0 %vm333_vm2, %v8274_v60 }
0x477b   :  { %12793 = vmatpush3.bf16.msra.mxu0 %v8326_v55  ;;  %12794 = vmatprep.mubr.msk.bf16.mxu0 %vm14222_vm0, %v14221_v1 }
0x477c   :  { %12804 = vmatprep.subr.bf16.mxu0 %v14221_v1 }
0x477d   :  { %v13728_v28 = vpop.eup %13727 }
0x477e   :  { %v8273_v25 = vmul.f32 %v13728_v28, %v13724_v7 }
0x4780   :  { %v8275_v22 = vpack.c.bf16 %v8273_v25, %v8273_v25 }
0x4782   :  { %12795 = vmatmul.mubr.msk.bf16.vlgmr.msra.gmra.mrb[248].mxu0 %vm333_vm2, %v8275_v22 }
0x4783   :  { %12806 = vmatprep.mubr.msk.bf16.mxu0 %vm14222_vm0, %v14221_v1 }
0x4784   :  { %12805 = vmatpush3.bf16.xpose.msra.mxu0 %v8430_v14 }
0x4785   :  { %12816 = vmatprep.subr.bf16.mxu0 %v14221_v1 }
0x478b   :  { %12807 = vmatmul.mubr.msk.bf16.vlgmr.msra.gmra.mrb[252].mxu0 %vm693_vm3, %v8422_v61 }
0x478c   :  { %12818 = vmatprep.mubr.msk.bf16.mxu0 %vm14222_vm0, %v14221_v1 }
0x484a   :  { %v8414_v46 = vpop.f32.mrb[212].mxu1 }
0x484b   :  { %v8415_v56 = vadd.f32 %v8414_v46, %v15138_v17  ;;  %v12802_v63 = vpop.f32.mrb[213].mxu1 }
0x484c   :  { %v8417_v0 = vpop.f32.mrb[214].mxu1 }
0x484d   :  { %v16078_v59 = vpop.f32.mrb[244].mxu0  ;;  %v12803_v26 = vpop.f32.mrb[215].mxu1  ;;  %v8472_v27 = vsel %vm333_vm2, %v8415_v56, -inf }
0x484e   :  { %8473 = vmax.xlane.f32.xlu1 %v8472_v27  ;;  %v12790_v5 = vpop.f32.mrb[245].mxu0 }
0x484f   :  { %v8319_v39 = vpop.f32.mrb[246].mxu0 }
0x4850   :  { %v12791_v50 = vpop.f32.mrb[247].mxu0 }
0x4855   :  { %v16081_v15 = vpop.f32.mrb[248].mxu0 }
0x4856   :  { %v12796_v30 = vpop.f32.mrb[249].mxu0 }
0x4857   :  { %v8365_v38 = vpop.f32.mrb[250].mxu0 }
0x4858   :  { %v12797_v57 = vpop.f32.mrb[251].mxu0 }
0x485e   :  { %v8466_v37 = vpop.f32.mrb[252].mxu0 }
0x485f   :  { %v8467_v53 = vadd.f32 %v8466_v37, %v15143_v62  ;;  %v12808_v43 = vpop.f32.mrb[253].mxu0  ;;  %8497 = vrot.lane.b32.xlu1 %v16029_v13, %s14224_s30 }
0x4860   :  { %v8469_v9 = vpop.f32.mrb[254].mxu0 }
0x4861   :  { %v12809_v21 = vpop.f32.mrb[255].mxu0  ;;  %v8475_v33 = vsel %vm333_vm2, %v8467_v53, -inf }
0x4862   :  { %8476 = vmax.xlane.f32.xlu0 %v8475_v33 }
0x4863   :  { %8596 = vrot.lane.b32.xlu1 %v16011_v54, %s14225_s28 }
0x4867   :  { %8646 = vrot.lane.b32.xlu1 %v16018_v24, %s14225_s28 }
0x486b   :  { %8594 = vrot.lane.b32.xlu1 %v16020_v16, %s14225_s28 }
0x48db   :  { %v8474_v32 = vpop.xlane.xlu1 %8473 }
0x48dc   :  { %v8478_v58 = vsub.f32 %v8415_v56, %v8474_v32 }
0x48de   :  { %v8480_v42 = vmul.f32 1.442695, %v8478_v58 }
0x48df   :  { %v8498_v40 = vpop.permute.xlu1 %8497 }
0x48e0   :  { %13729 = vpow2.f32 %v8480_v42  ;;  %v8503_v10 = vsel %vm337_vm1, %v8498_v40, 0 }
0x48e1   :  { %12811 = vmatpush3.bf16.msra.mxu1 %v8503_v10 }
0x48e2   :  { %12822 = vmatprep.subr.bf16.mxu1 %v14221_v1 }
0x48e3   :  { %v8597_v29 = vpop.permute.xlu1 %8596 }
0x48e4   :  { %v8602_v19 = vsel %vm693_vm3, %v8597_v29, 0 }
0x48e7   :  { %v8647_v60 = vpop.permute.xlu1 %8646 }
0x48e8   :  { %v8652_v46 = vsel %vm693_vm3, %v8647_v60, 0 }
0x48ea   :  { %v13730_v4 = vpop.eup %13729 }
0x48eb   :  { %v8484_v44 = vsel %vm333_vm2, %v13730_v4, 0.0  ;;  %v8595_v28 = vpop.permute.xlu1 %8594 }
0x48ec   :  { %8485 = vadd.xlane.f32.xlu0 %v8484_v44 }
0x48ef   :  { %v8477_v31 = vpop.xlane.xlu0 %8476 }
0x48f0   :  { %v8479_v3 = vsub.f32 %v8467_v53, %v8477_v31 }
0x48f2   :  { %v8482_v7 = vmul.f32 1.442695, %v8479_v3 }
0x48f4   :  { %13731 = vpow2.f32 %v8482_v7 }
0x48fe   :  { %v13732_v8 = vpop.eup %13731 }
0x48ff   :  { %v8487_v12 = vsel %vm333_vm2, %v13732_v8, 0.0 }
0x4900   :  { %8488 = vadd.xlane.f32.xlu0 %v8487_v12 }
0x4916   :  { %8546 = vrot.lane.b32.xlu0 %v16058_v45, %s14224_s30 }
0x491a   :  { %8644 = vrot.lane.b32.xlu0 %v16031_v18, %s14225_s28 }
0x4979   :  { %v8486_v36 = vpop.xlane.xlu0 %8485 }
0x497a   :  { %13733 = vrcp.f32 %v8486_v36 }
0x4984   :  { %v13734_v11 = vpop.eup %13733 }
0x4985   :  { %v8492_v41 = vmul.f32 %v13734_v11, %v13730_v4 }
0x4987   :  { %v8494_v2 = vpack.c.bf16 %v8492_v41, %v8492_v41 }
0x4989   :  { %12813 = vmatmul.mubr.msk.bf16.vlgmr.msra.gmra.mrb[216].mxu1 %vm333_vm2, %v8494_v2 }
0x498a   :  { %12823 = vmatpush3.bf16.xpose.msra.mxu1 %v8602_v19  ;;  %12824 = vmatprep.mubr.msk.bf16.mxu1 %vm14222_vm0, %v14221_v1 }
0x498b   :  { %12834 = vmatprep.subr.bf16.mxu1 %v14221_v1 }
0x498d   :  { %v8489_v55 = vpop.xlane.xlu0 %8488 }
0x498e   :  { %13735 = vrcp.f32 %v8489_v55 }
0x4991   :  { %v8547_v25 = vpop.permute.xlu0 %8546  ;;  %12825 = vmatmul.mubr.msk.bf16.vlgmr.msra.gmra.mrb[220].mxu1 %vm693_vm3, %v8595_v28 }
0x4992   :  { %v8552_v23 = vsel %vm337_vm1, %v8547_v25, 0  ;;  %12836 = vmatprep.mubr.msk.bf16.mxu1 %vm14222_vm0, %v14221_v1 }
0x4993   :  { %12817 = vmatpush3.bf16.msra.mxu0 %v8552_v23 }
0x4994   :  { %12828 = vmatprep.subr.bf16.mxu0 %v14221_v1 }
0x4995   :  { %v8645_v56 = vpop.permute.xlu0 %8644 }
0x4998   :  { %v13736_v22 = vpop.eup %13735 }
0x4999   :  { %v8493_v14 = vmul.f32 %v13736_v22, %v13732_v8 }
0x499b   :  { %v8495_v61 = vpack.c.bf16 %v8493_v14, %v8493_v14 }
0x499d   :  { %12819 = vmatmul.mubr.msk.bf16.vlgmr.msra.gmra.mrb[0].mxu0 %vm333_vm2, %v8495_v61 }
0x499e   :  { %12829 = vmatpush3.bf16.xpose.msra.mxu0 %v8652_v46  ;;  %12830 = vmatprep.mubr.msk.bf16.mxu0 %vm14222_vm0, %v14221_v1 }
0x499f   :  { %12840 = vmatprep.subr.bf16.mxu0 %v14221_v1 }
0x49a5   :  { %12831 = vmatmul.mubr.msk.bf16.vlgmr.msra.gmra.mrb[4].mxu0 %vm693_vm3, %v8645_v56 }
0x49a6   :  { %12842 = vmatprep.mubr.msk.bf16.mxu0 %vm14222_vm0, %v14221_v1 }
0x4a5c   :  { %v16119_v63 = vpop.f32.mrb[216].mxu1 }
0x4a5d   :  { %v12814_v0 = vpop.f32.mrb[217].mxu1 }
0x4a5e   :  { %v8542_v26 = vpop.f32.mrb[218].mxu1 }
0x4a5f   :  { %v12815_v27 = vpop.f32.mrb[219].mxu1 }
0x4a64   :  { %v8638_v5 = vpop.f32.mrb[220].mxu1 }
0x4a65   :  { %v8639_v39 = vadd.f32 %v8638_v5, %v15138_v17  ;;  %v12826_v50 = vpop.f32.mrb[221].mxu1 }
0x4a66   :  { %v8641_v30 = vpop.f32.mrb[222].mxu1 }
0x4a67   :  { %v12827_v38 = vpop.f32.mrb[223].mxu1  ;;  %v8694_v57 = vsel %vm333_vm2, %v8639_v39, -inf }
0x4a68   :  { %8695 = vmax.xlane.f32.xlu1 %v8694_v57 }
0x4a70   :  { %v16123_v37 = vpop.f32.mrb[0].mxu0 }
0x4a71   :  { %v13147_v53 = vpack.i.bf16 %v16123_v37, %v16119_v63  ;;  %v12820_v43 = vpop.f32.mrb[1].mxu0 }
0x4a72   :  { %v8591_v9 = vpop.f32.mrb[2].mxu0 }
0x4a73   :  { %v12821_v21 = vpop.f32.mrb[3].mxu0 }
0x4a78   :  { %v8688_v33 = vpop.f32.mrb[4].mxu0 }
0x4a79   :  { %v8689_v32 = vadd.f32 %v8688_v33, %v15143_v62  ;;  %v12832_v58 = vpop.f32.mrb[5].mxu0  ;;  %8718 = vrot.lane.b32.xlu1 %v16029_v13, %s14225_s28 }
0x4a7a   :  { %v8691_v42 = vpop.f32.mrb[6].mxu0 }
0x4a7b   :  { %v12833_v40 = vpop.f32.mrb[7].mxu0  ;;  %v8697_v10 = vsel %vm333_vm2, %v8689_v32, -inf }
0x4a7c   :  { %8698 = vmax.xlane.f32.xlu0 %v8697_v10 }
0x4a7d   :  { %8816 = vrot.lane.b32.xlu1 %v16011_v54, %s14226_s2 }
0x4a81   :  { %8866 = vrot.lane.b32.xlu1 %v16018_v24, %s14226_s2 }
0x4a85   :  { %8814 = vrot.lane.b32.xlu1 %v16020_v16, %s14226_s2 }
0x4af5   :  { %v8696_v4 = vpop.xlane.xlu1 %8695 }
0x4af6   :  { %v8700_v44 = vsub.f32 %v8639_v39, %v8696_v4 }
0x4af8   :  { %v8702_v31 = vmul.f32 1.442695, %v8700_v44 }
0x4af9   :  { %v8719_v3 = vpop.permute.xlu1 %8718 }
0x4afa   :  { %13737 = vpow2.f32 %v8702_v31  ;;  %v8724_v7 = vsel %vm337_vm1, %v8719_v3, 0 }
0x4afb   :  { %12835 = vmatpush3.bf16.msra.mxu1 %v8724_v7 }
0x4afc   :  { %12846 = vmatprep.subr.bf16.mxu1 %v14221_v1 }
0x4afd   :  { %v8817_v55 = vpop.permute.xlu1 %8816 }
0x4afe   :  { %v8822_v23 = vsel %vm693_vm3, %v8817_v55, 0 }
0x4b01   :  { %v8867_v22 = vpop.permute.xlu1 %8866 }
0x4b02   :  { %v8872_v5 = vsel %vm693_vm3, %v8867_v22, 0 }
0x4b04   :  { %v13738_v8 = vpop.eup %13737 }
0x4b05   :  { %v8706_v12 = vsel %vm333_vm2, %v13738_v8, 0.0  ;;  %v8815_v61 = vpop.permute.xlu1 %8814 }
0x4b06   :  { %8707 = vadd.xlane.f32.xlu0 %v8706_v12 }
0x4b09   :  { %v8699_v36 = vpop.xlane.xlu0 %8698 }
0x4b0a   :  { %v8701_v11 = vsub.f32 %v8689_v32, %v8699_v36 }
0x4b0c   :  { %v8704_v29 = vmul.f32 1.442695, %v8701_v11 }
0x4b0e   :  { %13739 = vpow2.f32 %v8704_v29 }
0x4b18   :  { %v13740_v41 = vpop.eup %13739 }
0x4b19   :  { %v8709_v2 = vsel %vm333_vm2, %v13740_v41, 0.0 }
0x4b1a   :  { %8710 = vadd.xlane.f32.xlu0 %v8709_v2 }
0x4b30   :  { %8766 = vrot.lane.b32.xlu0 %v16058_v45, %s14225_s28 }
0x4b34   :  { %8864 = vrot.lane.b32.xlu0 %v16031_v18, %s14226_s2 }
0x4b93   :  { %v8708_v19 = vpop.xlane.xlu0 %8707 }
0x4b94   :  { %13741 = vrcp.f32 %v8708_v19 }
0x4b9e   :  { %v13742_v60 = vpop.eup %13741 }
0x4b9f   :  { %v8714_v28 = vmul.f32 %v13742_v60, %v13738_v8 }
0x4ba1   :  { %v8716_v25 = vpack.c.bf16 %v8714_v28, %v8714_v28 }
0x4ba3   :  { %12837 = vmatmul.mubr.msk.bf16.vlgmr.msra.gmra.mrb[224].mxu1 %vm333_vm2, %v8716_v25 }
0x4ba4   :  { %12847 = vmatpush3.bf16.xpose.msra.mxu1 %v8822_v23  ;;  %12848 = vmatprep.mubr.msk.bf16.mxu1 %vm14222_vm0, %v14221_v1 }
0x4ba5   :  { %12858 = vmatprep.subr.bf16.mxu1 %v14221_v1 }
0x4ba7   :  { %v8711_v14 = vpop.xlane.xlu0 %8710 }
0x4ba8   :  { %13743 = vrcp.f32 %v8711_v14 }
0x4bab   :  { %v8767_v46 = vpop.permute.xlu0 %8766  ;;  %12849 = vmatmul.mubr.msk.bf16.vlgmr.msra.gmra.mrb[228].mxu1 %vm693_vm3, %v8815_v61 }
0x4bac   :  { %v8772_v56 = vsel %vm337_vm1, %v8767_v46, 0  ;;  %12860 = vmatprep.mubr.msk.bf16.mxu1 %vm14222_vm0, %v14221_v1 }
0x4bad   :  { %12841 = vmatpush3.bf16.msra.mxu0 %v8772_v56 }
0x4bae   :  { %12852 = vmatprep.subr.bf16.mxu0 %v14221_v1 }
0x4baf   :  { %v8865_v39 = vpop.permute.xlu0 %8864 }
0x4bb2   :  { %v13744_v0 = vpop.eup %13743 }
0x4bb3   :  { %v8715_v26 = vmul.f32 %v13744_v0, %v13740_v41 }
0x4bb5   :  { %v8717_v27 = vpack.c.bf16 %v8715_v26, %v8715_v26 }
0x4bb7   :  { %12843 = vmatmul.mubr.msk.bf16.vlgmr.msra.gmra.mrb[8].mxu0 %vm333_vm2, %v8717_v27 }
0x4bb8   :  { %12853 = vmatpush3.bf16.xpose.msra.mxu0 %v8872_v5  ;;  %12854 = vmatprep.mubr.msk.bf16.mxu0 %vm14222_vm0, %v14221_v1 }
0x4bb9   :  { %12864 = vmatprep.subr.bf16.mxu0 %v14221_v1 }
0x4bbf   :  { %12855 = vmatmul.mubr.msk.bf16.vlgmr.msra.gmra.mrb[12].mxu0 %vm693_vm3, %v8865_v39 }
0x4bc0   :  { %12866 = vmatprep.mubr.msk.bf16.mxu0 %vm14222_vm0, %v14221_v1 }
0x4c76   :  { %v16163_v50 = vpop.f32.mrb[224].mxu1 }
0x4c77   :  { %v12838_v30 = vpop.f32.mrb[225].mxu1 }
0x4c78   :  { %v8763_v38 = vpop.f32.mrb[226].mxu1 }
0x4c79   :  { %v12839_v57 = vpop.f32.mrb[227].mxu1 }
0x4c7e   :  { %v8858_v43 = vpop.f32.mrb[228].mxu1 }
0x4c7f   :  { %v8859_v9 = vadd.f32 %v8858_v43, %v15138_v17  ;;  %v12850_v21 = vpop.f32.mrb[229].mxu1 }
0x4c80   :  { %v8861_v33 = vpop.f32.mrb[230].mxu1 }
0x4c81   :  { %v12851_v32 = vpop.f32.mrb[231].mxu1  ;;  %v8914_v58 = vsel %vm333_vm2, %v8859_v9, -inf }
0x4c82   :  { %8915 = vmax.xlane.f32.xlu1 %v8914_v58 }
0x4c8a   :  { %v16167_v42 = vpop.f32.mrb[8].mxu0 }
0x4c8b   :  { %v13152_v40 = vpack.i.bf16 %v16167_v42, %v16163_v50  ;;  %v12844_v10 = vpop.f32.mrb[9].mxu0 }
0x4c8c   :  { %v8811_v4 = vpop.f32.mrb[10].mxu0 }
0x4c8d   :  { %v12845_v44 = vpop.f32.mrb[11].mxu0 }
0x4c92   :  { %v8908_v31 = vpop.f32.mrb[12].mxu0 }
0x4c93   :  { %v8909_v3 = vadd.f32 %v8908_v31, %v15143_v62  ;;  %v12856_v7 = vpop.f32.mrb[13].mxu0  ;;  %8938 = vrot.lane.b32.xlu1 %v16029_v13, %s14226_s2 }
0x4c94   :  { %v8911_v8 = vpop.f32.mrb[14].mxu0 }
0x4c95   :  { %v12857_v12 = vpop.f32.mrb[15].mxu0  ;;  %v8917_v36 = vsel %vm333_vm2, %v8909_v3, -inf }
0x4c96   :  { %8918 = vmax.xlane.f32.xlu0 %v8917_v36 }
0x4c97   :  { %9036 = vrot.lane.b32.xlu1 %v16011_v54, %s16609_s16 }
0x4c9b   :  { %9086 = vrot.lane.b32.xlu1 %v16018_v24, %s16609_s16 }
0x4c9f   :  { %9034 = vrot.lane.b32.xlu1 %v16020_v16, %s16609_s16 }
0x4d0f   :  { %v8916_v11 = vpop.xlane.xlu1 %8915 }
0x4d10   :  { %v8920_v29 = vsub.f32 %v8859_v9, %v8916_v11 }
0x4d12   :  { %v8922_v41 = vmul.f32 1.442695, %v8920_v29 }
0x4d13   :  { %v8939_v2 = vpop.permute.xlu1 %8938 }
0x4d14   :  { %13745 = vpow2.f32 %v8922_v41  ;;  %v8944_v19 = vsel %vm337_vm1, %v8939_v2, 0 }
0x4d15   :  { %12859 = vmatpush3.bf16.msra.mxu1 %v8944_v19 }
0x4d16   :  { %12870 = vmatprep.subr.bf16.mxu1 %v14221_v1 }
0x4d17   :  { %v9037_v56 = vpop.permute.xlu1 %9036 }
0x4d18   :  { %v9042_v27 = vsel %vm693_vm3, %v9037_v56, 0 }
0x4d1b   :  { %v9087_v5 = vpop.permute.xlu1 %9086 }
0x4d1c   :  { %v9092_v33 = vsel %vm693_vm3, %v9087_v5, 0 }
0x4d1e   :  { %v13746_v60 = vpop.eup %13745 }
0x4d1f   :  { %v8926_v55 = vsel %vm333_vm2, %v13746_v60, 0.0  ;;  %v9035_v30 = vpop.permute.xlu1 %9034 }
0x4d20   :  { %8927 = vadd.xlane.f32.xlu0 %v8926_v55 }
0x4d23   :  { %v8919_v28 = vpop.xlane.xlu0 %8918 }
0x4d24   :  { %v8921_v25 = vsub.f32 %v8909_v3, %v8919_v28 }
0x4d26   :  { %v8924_v23 = vmul.f32 1.442695, %v8921_v25 }
0x4d28   :  { %13747 = vpow2.f32 %v8924_v23 }
0x4d32   :  { %v13748_v22 = vpop.eup %13747 }
0x4d33   :  { %v8929_v14 = vsel %vm333_vm2, %v13748_v22, 0.0 }
0x4d34   :  { %8930 = vadd.xlane.f32.xlu0 %v8929_v14 }
0x4d4a   :  { %8986 = vrot.lane.b32.xlu0 %v16058_v45, %s14226_s2 }
0x4d4e   :  { %9084 = vrot.lane.b32.xlu0 %v16031_v18, %s16609_s16 }
0x4dad   :  { %v8928_v61 = vpop.xlane.xlu0 %8927 }
0x4dae   :  { %13749 = vrcp.f32 %v8928_v61 }
0x4db8   :  { %v13750_v46 = vpop.eup %13749 }
0x4db9   :  { %v8934_v0 = vmul.f32 %v13750_v46, %v13746_v60 }
0x4dbb   :  { %v8936_v26 = vpack.c.bf16 %v8934_v0, %v8934_v0 }
0x4dbd   :  { %12861 = vmatmul.mubr.msk.bf16.vlgmr.msra.gmra.mrb[232].mxu1 %vm333_vm2, %v8936_v26 }
0x4dbe   :  { %12871 = vmatpush3.bf16.xpose.msra.mxu1 %v9042_v27  ;;  %12872 = vmatprep.mubr.msk.bf16.mxu1 %vm14222_vm0, %v14221_v1 }
0x4dbf   :  { %12882 = vmatprep.subr.bf16.mxu1 %v14221_v1 }
0x4dc1   :  { %v8931_v39 = vpop.xlane.xlu0 %8930 }
0x4dc2   :  { %13751 = vrcp.f32 %v8931_v39 }
0x4dc5   :  { %v8987_v38 = vpop.permute.xlu0 %8986  ;;  %12873 = vmatmul.mubr.msk.bf16.vlgmr.msra.gmra.mrb[236].mxu1 %vm693_vm3, %v9035_v30 }
0x4dc6   :  { %v8992_v57 = vsel %vm337_vm1, %v8987_v38, 0  ;;  %12884 = vmatprep.mubr.msk.bf16.mxu1 %vm14222_vm0, %v14221_v1 }
0x4dc7   :  { %12865 = vmatpush3.bf16.msra.mxu0 %v8992_v57 }
0x4dc8   :  { %12876 = vmatprep.subr.bf16.mxu0 %v14221_v1 }
0x4dc9   :  { %v9085_v32 = vpop.permute.xlu0 %9084 }
0x4dcc   :  { %v13752_v43 = vpop.eup %13751 }
0x4dcd   :  { %v8935_v9 = vmul.f32 %v13752_v43, %v13748_v22 }
0x4dcf   :  { %v8937_v21 = vpack.c.bf16 %v8935_v9, %v8935_v9 }
0x4dd1   :  { %12867 = vmatmul.mubr.msk.bf16.vlgmr.msra.gmra.mrb[16].mxu0 %vm333_vm2, %v8937_v21 }
0x4dd2   :  { %12877 = vmatpush3.bf16.xpose.msra.mxu0 %v9092_v33  ;;  %12878 = vmatprep.mubr.msk.bf16.mxu0 %vm14222_vm0, %v14221_v1 }
0x4dd3   :  { %12888 = vmatprep.subr.bf16.mxu0 %v14221_v1 }
0x4dd9   :  { %12879 = vmatmul.mubr.msk.bf16.vlgmr.msra.gmra.mrb[20].mxu0 %vm693_vm3, %v9085_v32 }
0x4dda   :  { %12890 = vmatprep.mubr.msk.bf16.mxu0 %vm14222_vm0, %v14221_v1 }
0x4e90   :  { %v16207_v58 = vpop.f32.mrb[232].mxu1 }
0x4e91   :  { %v12862_v10 = vpop.f32.mrb[233].mxu1 }
0x4e92   :  { %v8983_v4 = vpop.f32.mrb[234].mxu1 }
0x4e93   :  { %v12863_v44 = vpop.f32.mrb[235].mxu1 }
0x4e98   :  { %v9078_v31 = vpop.f32.mrb[236].mxu1 }
0x4e99   :  { %v9079_v3 = vadd.f32 %v9078_v31, %v15138_v17  ;;  %v12874_v7 = vpop.f32.mrb[237].mxu1 }
0x4e9a   :  { %v9081_v8 = vpop.f32.mrb[238].mxu1 }
0x4e9b   :  { %v12875_v12 = vpop.f32.mrb[239].mxu1  ;;  %v9134_v36 = vsel %vm333_vm2, %v9079_v3, -inf }
0x4e9c   :  { %9135 = vmax.xlane.f32.xlu1 %v9134_v36 }
0x4ea4   :  { %v16211_v11 = vpop.f32.mrb[16].mxu0 }
0x4ea5   :  { %v13157_v29 = vpack.i.bf16 %v16211_v11, %v16207_v58  ;;  %v12868_v41 = vpop.f32.mrb[17].mxu0 }
0x4ea6   :  { %v9031_v2 = vpop.f32.mrb[18].mxu0 }
0x4ea7   :  { %v12869_v19 = vpop.f32.mrb[19].mxu0 }
0x4eac   :  { %v9128_v60 = vpop.f32.mrb[20].mxu0 }
0x4ead   :  { %v9129_v55 = vadd.f32 %v9128_v60, %v15143_v62  ;;  %v12880_v28 = vpop.f32.mrb[21].mxu0  ;;  %9158 = vrot.lane.b32.xlu1 %v16029_v13, %s16609_s16 }
0x4eae   :  { %v9131_v25 = vpop.f32.mrb[22].mxu0 }
0x4eaf   :  { %v12881_v23 = vpop.f32.mrb[23].mxu0  ;;  %v9137_v22 = vsel %vm333_vm2, %v9129_v55, -inf }
0x4eb0   :  { %9138 = vmax.xlane.f32.xlu0 %v9137_v22 }
0x4eb1   :  { %9256 = vrot.lane.b32.xlu1 %v16011_v54, %s16614_s10 }
0x4eb5   :  { %9306 = vrot.lane.b32.xlu1 %v16018_v24, %s16614_s10 }
0x4eb9   :  { %9254 = vrot.lane.b32.xlu1 %v16020_v16, %s16614_s10 }
0x4f29   :  { %v9136_v14 = vpop.xlane.xlu1 %9135 }
0x4f2a   :  { %v9140_v61 = vsub.f32 %v9079_v3, %v9136_v14 }
0x4f2c   :  { %v9142_v46 = vmul.f32 1.442695, %v9140_v61 }
0x4f2d   :  { %v9159_v56 = vpop.permute.xlu1 %9158 }
0x4f2e   :  { %13753 = vpow2.f32 %v9142_v46  ;;  %v9164_v0 = vsel %vm337_vm1, %v9159_v56, 0 }
0x4f2f   :  { %12883 = vmatpush3.bf16.msra.mxu1 %v9164_v0 }
0x4f30   :  { %12894 = vmatprep.subr.bf16.mxu1 %v14221_v1 }
0x4f31   :  { %v9257_v21 = vpop.permute.xlu1 %9256 }
0x4f32   :  { %v9262_v10 = vsel %vm693_vm3, %v9257_v21, 0 }
0x4f35   :  { %v9307_v4 = vpop.permute.xlu1 %9306 }
0x4f36   :  { %v9312_v41 = vsel %vm693_vm3, %v9307_v4, 0 }
0x4f38   :  { %v13754_v26 = vpop.eup %13753 }
0x4f39   :  { %v9146_v27 = vsel %vm333_vm2, %v13754_v26, 0.0  ;;  %v9255_v31 = vpop.permute.xlu1 %9254 }
0x4f3a   :  { %9147 = vadd.xlane.f32.xlu0 %v9146_v27 }
0x4f3d   :  { %v9139_v5 = vpop.xlane.xlu0 %9138 }
0x4f3e   :  { %v9141_v39 = vsub.f32 %v9129_v55, %v9139_v5 }
0x4f40   :  { %v9144_v30 = vmul.f32 1.442695, %v9141_v39 }
0x4f42   :  { %13755 = vpow2.f32 %v9144_v30 }
0x4f4c   :  { %v13756_v38 = vpop.eup %13755 }
0x4f4d   :  { %v9149_v57 = vsel %vm333_vm2, %v13756_v38, 0.0 }
0x4f4e   :  { %9150 = vadd.xlane.f32.xlu0 %v9149_v57 }
0x4f64   :  { %9206 = vrot.lane.b32.xlu0 %v16058_v45, %s16609_s16 }
0x4f68   :  { %9304 = vrot.lane.b32.xlu0 %v16031_v18, %s16614_s10 }
0x4fc7   :  { %v9148_v43 = vpop.xlane.xlu0 %9147 }
0x4fc8   :  { %13757 = vrcp.f32 %v9148_v43 }
0x4fd2   :  { %v13758_v9 = vpop.eup %13757 }
0x4fd3   :  { %v9154_v33 = vmul.f32 %v13758_v9, %v13754_v26 }
0x4fd5   :  { %v9156_v32 = vpack.c.bf16 %v9154_v33, %v9154_v33 }
0x4fd7   :  { %12885 = vmatmul.mubr.msk.bf16.vlgmr.msra.gmra.mrb[240].mxu1 %vm333_vm2, %v9156_v32 }
0x4fd8   :  { %12895 = vmatpush3.bf16.xpose.msra.mxu1 %v9262_v10  ;;  %12896 = vmatprep.mubr.msk.bf16.mxu1 %vm14222_vm0, %v14221_v1 }
0x4fd9   :  { %12906 = vmatprep.subr.bf16.mxu1 %v14221_v1 }
0x4fdb   :  { %v9151_v44 = vpop.xlane.xlu0 %9150 }
0x4fdc   :  { %13759 = vrcp.f32 %v9151_v44 }
0x4fdf   :  { %v9207_v3 = vpop.permute.xlu0 %9206  ;;  %12897 = vmatmul.mubr.msk.bf16.vlgmr.msra.gmra.mrb[244].mxu1 %vm693_vm3, %v9255_v31 }
0x4fe0   :  { %v9212_v7 = vsel %vm337_vm1, %v9207_v3, 0  ;;  %12908 = vmatprep.mubr.msk.bf16.mxu1 %vm14222_vm0, %v14221_v1 }
0x4fe1   :  { %12889 = vmatpush3.bf16.msra.mxu0 %v9212_v7 }
0x4fe2   :  { %12900 = vmatprep.subr.bf16.mxu0 %v14221_v1 }
0x4fe3   :  { %v9305_v2 = vpop.permute.xlu0 %9304 }
0x4fe6   :  { %v13760_v8 = vpop.eup %13759 }
0x4fe7   :  { %v9155_v12 = vmul.f32 %v13760_v8, %v13756_v38 }
0x4fe9   :  { %v9157_v36 = vpack.c.bf16 %v9155_v12, %v9155_v12 }
0x4feb   :  { %12891 = vmatmul.mubr.msk.bf16.vlgmr.msra.gmra.mrb[24].mxu0 %vm333_vm2, %v9157_v36 }
0x4fec   :  { %12901 = vmatpush3.bf16.xpose.msra.mxu0 %v9312_v41  ;;  %12902 = vmatprep.mubr.msk.bf16.mxu0 %vm14222_vm0, %v14221_v1 }
0x4fed   :  { %12912 = vmatprep.subr.bf16.mxu0 %v14221_v1 }
0x4ff3   :  { %12903 = vmatmul.mubr.msk.bf16.vlgmr.msra.gmra.mrb[28].mxu0 %vm693_vm3, %v9305_v2 }
0x4ff4   :  { %12914 = vmatprep.mubr.msk.bf16.mxu0 %vm14222_vm0, %v14221_v1 }
0x50aa   :  { %v16251_v19 = vpop.f32.mrb[240].mxu1 }
0x50ab   :  { %v12886_v60 = vpop.f32.mrb[241].mxu1 }
0x50ac   :  { %v9203_v55 = vpop.f32.mrb[242].mxu1 }
0x50ad   :  { %v12887_v28 = vpop.f32.mrb[243].mxu1 }
0x50b2   :  { %v9298_v25 = vpop.f32.mrb[244].mxu1 }
0x50b3   :  { %v9299_v23 = vadd.f32 %v9298_v25, %v15138_v17  ;;  %v12898_v22 = vpop.f32.mrb[245].mxu1 }
0x50b4   :  { %v9301_v14 = vpop.f32.mrb[246].mxu1 }
0x50b5   :  { %v12899_v61 = vpop.f32.mrb[247].mxu1  ;;  %v9354_v46 = vsel %vm333_vm2, %v9299_v23, -inf }
0x50b6   :  { %9355 = vmax.xlane.f32.xlu1 %v9354_v46 }
0x50be   :  { %v16255_v56 = vpop.f32.mrb[24].mxu0 }
0x50bf   :  { %v13162_v0 = vpack.i.bf16 %v16255_v56, %v16251_v19  ;;  %v12892_v26 = vpop.f32.mrb[25].mxu0 }
0x50c0   :  { %v9251_v27 = vpop.f32.mrb[26].mxu0 }
0x50c1   :  { %v12893_v5 = vpop.f32.mrb[27].mxu0 }
0x50c6   :  { %v9348_v39 = vpop.f32.mrb[28].mxu0 }
0x50c7   :  { %v9349_v30 = vadd.f32 %v9348_v39, %v15143_v62  ;;  %v12904_v38 = vpop.f32.mrb[29].mxu0  ;;  %9378 = vrot.lane.b32.xlu1 %v16029_v13, %s16614_s10 }
0x50c8   :  { %v9351_v57 = vpop.f32.mrb[30].mxu0 }
0x50c9   :  { %v12905_v43 = vpop.f32.mrb[31].mxu0  ;;  %v9357_v9 = vsel %vm333_vm2, %v9349_v30, -inf }
0x50ca   :  { %9358 = vmax.xlane.f32.xlu0 %v9357_v9 }
0x50cb   :  { %9476 = vrot.lane.b32.xlu1 %v16011_v54, %s14227_s11 }
0x50cf   :  { %9526 = vrot.lane.b32.xlu1 %v16018_v24, %s14227_s11 }
0x50d3   :  { %9474 = vrot.lane.b32.xlu1 %v16020_v16, %s14227_s11 }
0x5143   :  { %v9356_v21 = vpop.xlane.xlu1 %9355 }
0x5144   :  { %v9360_v33 = vsub.f32 %v9299_v23, %v9356_v21 }
0x5146   :  { %v9362_v32 = vmul.f32 1.442695, %v9360_v33 }
0x5147   :  { %v9379_v10 = vpop.permute.xlu1 %9378 }
0x5148   :  { %13761 = vpow2.f32 %v9362_v32  ;;  %v9384_v4 = vsel %vm337_vm1, %v9379_v10, 0 }
0x5149   :  { %12907 = vmatpush3.bf16.msra.mxu1 %v9384_v4 }
0x514a   :  { %12918 = vmatprep.subr.bf16.mxu1 %v14221_v1 }
0x514b   :  { %v9477_v60 = vpop.permute.xlu1 %9476 }
0x514c   :  { %v9482_v25 = vsel %vm693_vm3, %v9477_v60, 0 }
0x514f   :  { %v9527_v23 = vpop.permute.xlu1 %9526 }
0x5150   :  { %v9532_v39 = vsel %vm693_vm3, %v9527_v23, 0 }
0x5152   :  { %v13762_v44 = vpop.eup %13761 }
0x5153   :  { %v9366_v31 = vsel %vm333_vm2, %v13762_v44, 0.0  ;;  %v9475_v14 = vpop.permute.xlu1 %9474 }
0x5154   :  { %9367 = vadd.xlane.f32.xlu0 %v9366_v31 }
0x5157   :  { %v9359_v3 = vpop.xlane.xlu0 %9358 }
0x5158   :  { %v9361_v7 = vsub.f32 %v9349_v30, %v9359_v3 }
0x515a   :  { %v9364_v8 = vmul.f32 1.442695, %v9361_v7 }
0x515c   :  { %13763 = vpow2.f32 %v9364_v8 }
0x5166   :  { %v13764_v12 = vpop.eup %13763 }
0x5167   :  { %v9369_v36 = vsel %vm333_vm2, %v13764_v12, 0.0 }
0x5168   :  { %9370 = vadd.xlane.f32.xlu0 %v9369_v36 }
0x517e   :  { %9426 = vrot.lane.b32.xlu0 %v16058_v45, %s16614_s10 }
0x5182   :  { %9524 = vrot.lane.b32.xlu0 %v16031_v18, %s14227_s11 }
0x51e1   :  { %v9368_v41 = vpop.xlane.xlu0 %9367 }
0x51e2   :  { %13765 = vrcp.f32 %v9368_v41 }
0x51ec   :  { %v13766_v2 = vpop.eup %13765 }
0x51ed   :  { %v9374_v55 = vmul.f32 %v13766_v2, %v13762_v44 }
0x51ef   :  { %v9376_v28 = vpack.c.bf16 %v9374_v55, %v9374_v55 }
0x51f1   :  { %12909 = vmatmul.mubr.msk.bf16.vlgmr.msra.gmra.mrb[248].mxu1 %vm333_vm2, %v9376_v28 }
0x51f2   :  { %12919 = vmatpush3.bf16.xpose.msra.mxu1 %v9482_v25  ;;  %12920 = vmatprep.mubr.msk.bf16.mxu1 %vm14222_vm0, %v14221_v1 }
0x51f3   :  { %12930 = vmatprep.subr.bf16.mxu1 %v14221_v1 }
0x51f5   :  { %v9371_v22 = vpop.xlane.xlu0 %9370 }
0x51f6   :  { %13767 = vrcp.f32 %v9371_v22 }
0x51f9   :  { %v9427_v61 = vpop.permute.xlu0 %9426  ;;  %12921 = vmatmul.mubr.msk.bf16.vlgmr.msra.gmra.mrb[252].mxu1 %vm693_vm3, %v9475_v14 }
0x51fa   :  { %v9432_v46 = vsel %vm337_vm1, %v9427_v61, 0  ;;  %12932 = vmatprep.mubr.msk.bf16.mxu1 %vm14222_vm0, %v14221_v1 }
0x51fb   :  { %12913 = vmatpush3.bf16.msra.mxu0 %v9432_v46 }
0x51fc   :  { %12924 = vmatprep.subr.bf16.mxu0 %v14221_v1 }
0x51fd   :  { %v9525_v30 = vpop.permute.xlu0 %9524 }
0x5200   :  { %v13768_v26 = vpop.eup %13767 }
0x5201   :  { %v9375_v27 = vmul.f32 %v13768_v26, %v13764_v12 }
0x5203   :  { %v9377_v5 = vpack.c.bf16 %v9375_v27, %v9375_v27 }
0x5205   :  { %12915 = vmatmul.mubr.msk.bf16.vlgmr.msra.gmra.mrb[32].mxu0 %vm333_vm2, %v9377_v5 }
0x5206   :  { %12925 = vmatpush3.bf16.xpose.msra.mxu0 %v9532_v39  ;;  %12926 = vmatprep.mubr.msk.bf16.mxu0 %vm14222_vm0, %v14221_v1 }
0x5207   :  { %12936 = vmatprep.subr.bf16.mxu0 %v14221_v1 }
0x520d   :  { %12927 = vmatmul.mubr.msk.bf16.vlgmr.msra.gmra.mrb[36].mxu0 %vm693_vm3, %v9525_v30 }
0x520e   :  { %12938 = vmatprep.mubr.msk.bf16.mxu0 %vm14222_vm0, %v14221_v1 }
0x52c4   :  { %v16295_v38 = vpop.f32.mrb[248].mxu1 }
0x52c5   :  { %v12910_v57 = vpop.f32.mrb[249].mxu1 }
0x52c6   :  { %v9423_v43 = vpop.f32.mrb[250].mxu1 }
0x52c7   :  { %v12911_v9 = vpop.f32.mrb[251].mxu1 }
0x52cc   :  { %v9518_v21 = vpop.f32.mrb[252].mxu1 }
0x52cd   :  { %v9519_v33 = vadd.f32 %v9518_v21, %v15138_v17  ;;  %v12922_v32 = vpop.f32.mrb[253].mxu1 }
0x52ce   :  { %v9521_v10 = vpop.f32.mrb[254].mxu1 }
0x52cf   :  { %v12923_v4 = vpop.f32.mrb[255].mxu1  ;;  %v9574_v44 = vsel %vm333_vm2, %v9519_v33, -inf }
0x52d0   :  { %9575 = vmax.xlane.f32.xlu1 %v9574_v44 }
0x52d8   :  { %v16299_v31 = vpop.f32.mrb[32].mxu0 }
0x52d9   :  { %v13167_v3 = vpack.i.bf16 %v16299_v31, %v16295_v38  ;;  %v12916_v7 = vpop.f32.mrb[33].mxu0 }
0x52da   :  { %v9471_v8 = vpop.f32.mrb[34].mxu0 }
0x52db   :  { %v12917_v12 = vpop.f32.mrb[35].mxu0 }
0x52e0   :  { %v9568_v36 = vpop.f32.mrb[36].mxu0 }
0x52e1   :  { %v9569_v41 = vadd.f32 %v9568_v36, %v15143_v62  ;;  %v12928_v2 = vpop.f32.mrb[37].mxu0  ;;  %9598 = vrot.lane.b32.xlu1 %v16029_v13, %s14227_s11 }
0x52e2   :  { %v9571_v60 = vpop.f32.mrb[38].mxu0 }
0x52e3   :  { %v12929_v55 = vpop.f32.mrb[39].mxu0  ;;  %v9577_v28 = vsel %vm333_vm2, %v9569_v41, -inf }
0x52e4   :  { %9578 = vmax.xlane.f32.xlu0 %v9577_v28 }
0x52e5   :  { %9696 = vrot.lane.b32.xlu1 %v16011_v54, %s16604_s27 }
0x52e9   :  { %9746 = vrot.lane.b32.xlu1 %v16018_v24, %s16604_s27 }
0x52ed   :  { %9694 = vrot.lane.b32.xlu1 %v16020_v16, %s16604_s27 }
0x535d   :  { %v9576_v25 = vpop.xlane.xlu1 %9575 }
0x535e   :  { %v9580_v23 = vsub.f32 %v9519_v33, %v9576_v25 }
0x5360   :  { %v9582_v22 = vmul.f32 1.442695, %v9580_v23 }
0x5361   :  { %v9599_v14 = vpop.permute.xlu1 %9598 }
0x5362   :  { %13769 = vpow2.f32 %v9582_v22  ;;  %v9604_v61 = vsel %vm337_vm1, %v9599_v14, 0 }
0x5363   :  { %12931 = vmatpush3.bf16.msra.mxu1 %v9604_v61 }
0x5364   :  { %12942 = vmatprep.subr.bf16.mxu1 %v14221_v1 }
0x5365   :  { %v9697_v57 = vpop.permute.xlu1 %9696 }
0x5366   :  { %v9702_v21 = vsel %vm693_vm3, %v9697_v57, 0 }
0x5369   :  { %v9747_v33 = vpop.permute.xlu1 %9746 }
0x536a   :  { %v9752_v12 = vsel %vm693_vm3, %v9747_v33, 0 }
0x536c   :  { %v13770_v46 = vpop.eup %13769 }
0x536d   :  { %v9586_v26 = vsel %vm333_vm2, %v13770_v46, 0.0 }
0x536e   :  { %9587 = vadd.xlane.f32.xlu0 %v9586_v26 }
0x5371   :  { %v9579_v54 = vpop.xlane.xlu0 %9578 }
0x5372   :  { %v9581_v27 = vsub.f32 %v9569_v41, %v9579_v54 }
0x5374   :  { %v9584_v24 = vmul.f32 1.442695, %v9581_v27 }
0x5376   :  { %13771 = vpow2.f32 %v9584_v24 }
0x5380   :  { %v13772_v5 = vpop.eup %13771 }
0x5381   :  { %v9589_v16 = vsel %vm333_vm2, %v13772_v5, 0.0 }
0x5382   :  { %9590 = vadd.xlane.f32.xlu0 %v9589_v16 }
0x5398   :  { %9646 = vrot.lane.b32.xlu0 %v16058_v45, %s14227_s11 }
0x539c   :  { %9744 = vrot.lane.b32.xlu0 %v16031_v18, %s16604_s27  ;;  %v9695_v18 = vpop.permute.xlu1 %9694 }
0x53fb   :  { %v9588_v39 = vpop.xlane.xlu0 %9587 }
0x53fc   :  { %13773 = vrcp.f32 %v9588_v39 }
0x5406   :  { %v13774_v30 = vpop.eup %13773 }
0x5407   :  { %v9594_v43 = vmul.f32 %v13774_v30, %v13770_v46 }
0x5409   :  { %v9596_v9 = vpack.c.bf16 %v9594_v43, %v9594_v43 }
0x540b   :  { %12933 = vmatmul.mubr.msk.bf16.vlgmr.msra.gmra.mrb[0].mxu1 %vm333_vm2, %v9596_v9 }
0x540c   :  { %12943 = vmatpush3.bf16.xpose.msra.mxu1 %v9702_v21  ;;  %12944 = vmatprep.mubr.msk.bf16.mxu1 %vm14222_vm0, %v14221_v1 }
0x540d   :  { %12954 = vmatprep.subr.bf16.mxu1 %v14221_v1 }
0x540f   :  { %v9591_v32 = vpop.xlane.xlu0 %9590 }
0x5410   :  { %13775 = vrcp.f32 %v9591_v32  ;;  %v13417_v32 = vld [vmem:[#allocation21 + $0x40] sm:$0xff]  }
0x5413   :  { %v9647_v10 = vpop.permute.xlu0 %9646  ;;  %12945 = vmatmul.mubr.msk.bf16.vlgmr.msra.gmra.mrb[4].mxu1 %vm693_vm3, %v9695_v18  ;;  %v13418_v18 = vld [vmem:[#allocation21 + $0x48] sm:$0xff]  }
0x5414   :  { %v9652_v4 = vsel %vm337_vm1, %v9647_v10, 0  ;;  %12956 = vmatprep.mubr.msk.bf16.mxu1 %vm14222_vm0, %v14221_v1  ;;  %v13419_v10 = vld [vmem:[#allocation21 + $0x50] sm:$0xff]  }
0x5415   :  { %12937 = vmatpush3.bf16.msra.mxu0 %v9652_v4  ;;  %v13420_v4 = vld [vmem:[#allocation21 + $0x58] sm:$0xff]  }
0x5416   :  { %12948 = vmatprep.subr.bf16.mxu0 %v14221_v1 }
0x5417   :  { %v9745_v36 = vpop.permute.xlu0 %9744 }
0x541a   :  { %v13776_v44 = vpop.eup %13775 }
0x541b   :  { %v9595_v7 = vmul.f32 %v13776_v44, %v13772_v5  ;;  %v13421_v44 = vld [vmem:[#allocation21 + $0x60] sm:$0xff]  }
0x541d   :  { %v9597_v8 = vpack.c.bf16 %v9595_v7, %v9595_v7  ;;  %v13422_v7 = vld [vmem:[#allocation21 + $0x68] sm:$0xff]  }
0x541f   :  { %12939 = vmatmul.mubr.msk.bf16.vlgmr.msra.gmra.mrb[40].mxu0 %vm333_vm2, %v9597_v8  ;;  %v13423_v8 = vld [vmem:[#allocation21 + $0x70] sm:$0xff]  }
0x5420   :  { %12949 = vmatpush3.bf16.xpose.msra.mxu0 %v9752_v12  ;;  %12950 = vmatprep.mubr.msk.bf16.mxu0 %vm14222_vm0, %v14221_v1 }
0x5421   :  { %12960 = vmatprep.subr.bf16.mxu0 %v14221_v1 }
0x5427   :  { %12951 = vmatmul.mubr.msk.bf16.vlgmr.msra.gmra.mrb[44].mxu0 %vm693_vm3, %v9745_v36 }
0x5428   :  { %12962 = vmatprep.mubr.msk.bf16.mxu0 %vm14222_vm0, %v14221_v1 }
0x54de   :  { %v9640_v41 = vpop.f32.mrb[0].mxu1 }
0x54df   :  { %v12934_v2 = vpop.f32.mrb[1].mxu1 }
0x54e0   :  { %v9643_v60 = vpop.f32.mrb[2].mxu1 }
0x54e1   :  { %v12935_v55 = vpop.f32.mrb[3].mxu1  ;;  %v13424_v60 = vld [vmem:[#allocation21 + $0x78] sm:$0xff]  }
0x54e6   :  { %v9738_v28 = vpop.f32.mrb[4].mxu1 }
0x54e7   :  { %v9739_v25 = vadd.f32 %v9738_v28, %v15138_v17  ;;  %v12946_v23 = vpop.f32.mrb[5].mxu1 }
0x54e8   :  { %v9741_v22 = vpop.f32.mrb[6].mxu1 }
0x54e9   :  { %v12947_v14 = vpop.f32.mrb[7].mxu1  ;;  %v9794_v61 = vsel %vm333_vm2, %v9739_v25, -inf }
0x54ea   :  { %9795 = vmax.xlane.f32.xlu1 %v9794_v61 }
0x54f2   :  { %v9688_v46 = vpop.f32.mrb[40].mxu0 }
0x54f3   :  { %v13172_v26 = vpack.i.bf16 %v9688_v46, %v9640_v41  ;;  %v12940_v54 = vpop.f32.mrb[41].mxu0 }
0x54f4   :  { %v9691_v27 = vpop.f32.mrb[42].mxu0 }
0x54f5   :  { %v12941_v24 = vpop.f32.mrb[43].mxu0 }
0x54fa   :  { %v9788_v5 = vpop.f32.mrb[44].mxu0 }
0x54fb   :  { %v9789_v16 = vadd.f32 %v9788_v5, %v15143_v62  ;;  %v12952_v39 = vpop.f32.mrb[45].mxu0  ;;  %9818 = vrot.lane.b32.xlu1 %v16029_v13, %s16604_s27 }
0x54fc   :  { %v9791_v30 = vpop.f32.mrb[46].mxu0 }
0x54fd   :  { %v12953_v17 = vpop.f32.mrb[47].mxu0  ;;  %v9797_v57 = vsel %vm333_vm2, %v9789_v16, -inf }
0x54fe   :  { %9798 = vmax.xlane.f32.xlu0 %v9797_v57 }
0x54ff   :  { %13148 = vrot.lane.b32.xlu1 %v13147_v53, %s16604_s27 }
0x5503   :  { %13153 = vrot.lane.b32.xlu1 %v13152_v40, %s14227_s11 }
0x5507   :  { %13158 = vrot.lane.b32.xlu1 %v13157_v29, %s16614_s10 }
0x550b   :  { %13168 = vrot.lane.b32.xlu1 %v13167_v3, %s14226_s2 }
0x5577   :  { %v9796_v62 = vpop.xlane.xlu1 %9795 }
0x5578   :  { %v9800_v13 = vsub.f32 %v9739_v25, %v9796_v62 }
0x557a   :  { %v9802_v43 = vmul.f32 1.442695, %v9800_v13 }
0x557b   :  { %v9819_v63 = vpop.permute.xlu1 %9818 }
0x557c   :  { %13777 = vpow2.f32 %v9802_v43  ;;  %v9824_v37 = vsel %vm337_vm1, %v9819_v63, 0 }
0x557d   :  { %12955 = vmatpush3.bf16.msra.mxu1 %v9824_v37 }
0x557e   :  { %12966 = vmatprep.subr.bf16.mxu1 %v14221_v1 }
0x557f   :  { %v13149_v14 = vpop.permute.xlu1 %13148 }
0x5580   :  { %v13151_v54 = vunpack.i.h.bf16 %v13149_v14  ;;  %v13150_v27 = vunpack.i.l.bf16 %v13149_v14 }
0x5582   :  { %v9971_v57 = vsel %vm693_vm3, %v16081_v15, %v13151_v54  ;;  %v9970_v62 = vsel %vm693_vm3, %v16078_v59, %v13150_v27  ;;  %v13439_v54 = vld [vmem:[#allocation24 + $0x144] ss:$16 sps:$4 sm:$0xff]   ;;  %v13442_v27 = vld [vmem:[#allocation24 + $0x14c] ss:$16 sps:$4 sm:$0xff]  }
0x5583   :  { %v13154_v61 = vpop.permute.xlu1 %13153 }
0x5584   :  { %v13156_v24 = vunpack.i.h.bf16 %v13154_v61  ;;  %v13155_v5 = vunpack.i.l.bf16 %v13154_v61 }
0x5586   :  { %v13778_v53 = vpop.eup %13777  ;;  %v9972_v43 = vsel %vm2506_vm4, %v9970_v62, %v13155_v5  ;;  %v9973_v63 = vsel %vm2506_vm4, %v9971_v57, %v13156_v24  ;;  %v13437_v24 = vld [vmem:[#allocation24 + $0x140] ss:$16 sps:$4 sm:$0xff]   ;;  %v13440_v5 = vld [vmem:[#allocation24 + $0x148] ss:$16 sps:$4 sm:$0xff]   ;;  %v13451_v57 = vld [vmem:[#allocation24 + $0x184] ss:$16 sps:$4 sm:$0xff]  }
0x5587   :  { %v9806_v50 = vsel %vm333_vm2, %v13778_v53, 0.0  ;;  %v13454_v62 = vld [vmem:[#allocation24 + $0x18c] ss:$16 sps:$4 sm:$0xff]  }
0x5588   :  { %9807 = vadd.xlane.f32.xlu0 %v9806_v50 }
0x558b   :  { %v9799_v42 = vpop.xlane.xlu0 %9798 }
0x558c   :  { %v9801_v40 = vsub.f32 %v9789_v16, %v9799_v42 }
0x558e   :  { %v9804_v58 = vmul.f32 1.442695, %v9801_v40 }
0x5590   :  { %13779 = vpow2.f32 %v9804_v58 }
0x559a   :  { %v13780_v11 = vpop.eup %13779 }
0x559b   :  { %v9809_v29 = vsel %vm333_vm2, %v13780_v11, 0.0 }
0x559c   :  { %9810 = vadd.xlane.f32.xlu0 %v9809_v29 }
0x55b2   :  { %9866 = vrot.lane.b32.xlu0 %v16058_v45, %s16604_s27 }
0x55b6   :  { %13163 = vrot.lane.b32.xlu0 %v13162_v0, %s16609_s16 }
0x55ba   :  { %13173 = vrot.lane.b32.xlu0 %v13172_v26, %s14225_s28  ;;  %v13159_v26 = vpop.permute.xlu1 %13158 }
0x55bb   :  { %v13161_v16 = vunpack.i.h.bf16 %v13159_v26  ;;  %v13160_v39 = vunpack.i.l.bf16 %v13159_v26 }
0x55bd   :  { %v9975_v50 = vsel %vm2509_vm5, %v9973_v63, %v13161_v16  ;;  %v13445_v16 = vld [vmem:[#allocation24 + $0x164] ss:$16 sps:$4 sm:$0xff]  }
0x55be   :  { %v13169_v37 = vpop.permute.xlu1 %13168  ;;  %v13457_v63 = vld [vmem:[#allocation24 + $0x1a4] ss:$16 sps:$4 sm:$0xff]  }
0x55bf   :  { %v13171_v15 = vunpack.i.h.bf16 %v13169_v37  ;;  %v13170_v29 = vunpack.i.l.bf16 %v13169_v37  ;;  %v13460_v37 = vld [vmem:[#allocation24 + $0x1ac] ss:$16 sps:$4 sm:$0xff]  }
0x5615   :  { %v9808_v38 = vpop.xlane.xlu0 %9807 }
0x5616   :  { %13781 = vrcp.f32 %v9808_v38 }
0x5620   :  { %v13782_v31 = vpop.eup %13781 }
0x5621   :  { %v9814_v3 = vmul.f32 %v13782_v31, %v13778_v53  ;;  %v9974_v53 = vsel %vm2509_vm5, %v9972_v43, %v13160_v39  ;;  %v13448_v39 = vld [vmem:[#allocation24 + $0x16c] ss:$16 sps:$4 sm:$0xff]   ;;  %v13452_v43 = vld [vmem:[#allocation24 + $0x188] ss:$16 sps:$4 sm:$0xff]  }
0x5623   :  { %v9816_v9 = vpack.c.bf16 %v9814_v3, %v9814_v3 }
0x5625   :  { %12957 = vmatmul.mubr.msk.bf16.vlgmr.msra.gmra.mrb[8].mxu1 %vm333_vm2, %v9816_v9 }
0x5626   :  { %12982 = vmatprep.mubr.msk.bf16.mxu1 %vm14222_vm0, %v14221_v1  ;;  %12967 = vmatpush3.bf16.msra.mxu1 %v13417_v32 }
0x5627   :  { %12968 = vmatprep.subr.bf16.mxu1 %v14221_v1 }
0x5629   :  { %v9811_v21 = vpop.xlane.xlu0 %9810 }
0x562a   :  { %13783 = vrcp.f32 %v9811_v21  ;;  %12969 = vmatpush3.bf16.msra.mxu1 %v13418_v18 }
0x562b   :  { %12970 = vmatprep.subr.bf16.mxu1 %v14221_v1 }
0x562d   :  { %v9867_v45 = vpop.permute.xlu0 %9866 }
0x562e   :  { %v9872_v33 = vsel %vm337_vm1, %v9867_v45, 0  ;;  %12971 = vmatpush3.bf16.msra.mxu1 %v13419_v10 }
0x562f   :  { %12961 = vmatpush3.bf16.msra.mxu0 %v9872_v33  ;;  %12972 = vmatprep.subr.bf16.mxu1 %v14221_v1 }
0x5631   :  { %v13164_v46 = vpop.permute.xlu0 %13163 }
0x5632   :  { %12973 = vmatpush3.bf16.msra.mxu1 %v13420_v4  ;;  %v13166_v30 = vunpack.i.h.bf16 %v13164_v46  ;;  %v13165_v17 = vunpack.i.l.bf16 %v13164_v46 }
0x5633   :  { %12974 = vmatprep.subr.bf16.mxu1 %v14221_v1 }
0x5634   :  { %v13784_v19 = vpop.eup %13783  ;;  %v9977_v42 = vsel %vm2512_vm6, %v9975_v50, %v13166_v30  ;;  %v9976_v40 = vsel %vm2512_vm6, %v9974_v53, %v13165_v17  ;;  %v13443_v30 = vld [vmem:[#allocation24 + $0x160] ss:$16 sps:$4 sm:$0xff]   ;;  %v13446_v17 = vld [vmem:[#allocation24 + $0x168] ss:$16 sps:$4 sm:$0xff]  }
0x5635   :  { %v9815_v56 = vmul.f32 %v13784_v19, %v13780_v11  ;;  %v13174_v13 = vpop.permute.xlu0 %13173  ;;  %v9978_v59 = vsel %vm2515_vm7, %v9976_v40, %v13170_v29  ;;  %v9979_v31 = vsel %vm2515_vm7, %v9977_v42, %v13171_v15  ;;  %v13455_v53 = vld [vmem:[#allocation24 + $0x1a0] ss:$16 sps:$4 sm:$0xff]   ;;  %v13458_v50 = vld [vmem:[#allocation24 + $0x1a8] ss:$16 sps:$4 sm:$0xff]   ;;  %v13463_v42 = vld [vmem:[#allocation24 + $0x1c4] ss:$16 sps:$4 sm:$0xff]  }
0x5636   :  { %12975 = vmatpush3.bf16.msra.mxu1 %v13421_v44  ;;  %v13176_v58 = vunpack.i.h.bf16 %v13174_v13  ;;  %v13175_v11 = vunpack.i.l.bf16 %v13174_v13  ;;  %v13449_v13 = vld [vmem:[#allocation24 + $0x180] ss:$16 sps:$4 sm:$0xff]   ;;  %v13466_v40 = vld [vmem:[#allocation24 + $0x1cc] ss:$16 sps:$4 sm:$0xff]   ;;  %v13469_v15 = vld [vmem:[#allocation24 + $0x1e4] ss:$16 sps:$4 sm:$0xff]  }
0x5637   :  { %v9817_v0 = vpack.c.bf16 %v9815_v56, %v9815_v56  ;;  %12976 = vmatprep.subr.bf16.mxu1 %v14221_v1  ;;  %v13472_v29 = vld [vmem:[#allocation24 + $0x1ec] ss:$16 sps:$4 sm:$0xff]  }
0x5638   :  { %v9980_v21 = vsel %vm2518_vm8, %v9978_v59, %v13175_v11  ;;  %v9981_v45 = vsel %vm2518_vm8, %v9979_v31, %v13176_v58  ;;  %v13461_v58 = vld [vmem:[#allocation24 + $0x1c0] ss:$16 sps:$4 sm:$0xff]   ;;  %v13464_v11 = vld [vmem:[#allocation24 + $0x1c8] ss:$16 sps:$4 sm:$0xff]  }
0x5639   :  { %12963 = vmatmul.mubr.msk.bf16.vlgmr.msra.gmra.mrb[48].mxu0 %vm333_vm2, %v9817_v0  ;;  %v11538_v0 = vld [vmem:[#allocation23 + $0x1] ss:$0 sm:$0xff]  ;;  %v13470_v59 = vld [vmem:[#allocation24 + $0x1e8] ss:$16 sps:$4 sm:$0xff]   ;;  %v13473_v31 = vld [vmem:[#allocation26 + $0x140] sm:$0xff]  }
0x563a   :  { %10365 = vmatprep.mubr.bf16.mxu0 %v14223_v35  ;;  %12977 = vmatpush3.bf16.msra.mxu1 %v13422_v7 }
0x563b   :  { %12978 = vmatprep.subr.bf16.mxu1 %v14221_v1 }
0x563e   :  { %12979 = vmatpush3.bf16.msra.mxu1 %v13423_v8 }
0x563f   :  { %12980 = vmatprep.subr.bf16.mxu1 %v14221_v1 }
0x5642   :  { %12981 = vmatpush3.bf16.msra.mxu1 %v13424_v60  ;;  %v13430_v60 = vld [vmem:[#allocation24 + $0x10c] ss:$16 sps:$4 sm:$0xff]  }
0x5643   :  { %10376 = vmatprep.subr.bf16.mxu1 %v13430_v60  ;;  %v13475_v60 = vld [vmem:[#allocation26 + $0x100] sm:$0xff]  }
0x56f8   :  { %v9860_v12 = vpop.f32.mrb[8].mxu1 }
0x56f9   :  { %v12958_v36 = vpop.f32.mrb[9].mxu1 }
0x56fa   :  { %v9863_v41 = vpop.f32.mrb[10].mxu1  ;;  %v13425_v36 = vld [vmem:[#allocation24 + $0x100] ss:$16 sps:$4 sm:$0xff]  }
0x56fb   :  { %v12959_v2 = vpop.f32.mrb[11].mxu1  ;;  %v13427_v41 = vld [vmem:[#allocation24 + $0x104] ss:$16 sps:$4 sm:$0xff]  }
0x56fc   :  { %v13428_v2 = vld [vmem:[#allocation24 + $0x108] ss:$16 sps:$4 sm:$0xff]   ;;  %10333 = vmatprep.subr.bf16.mxu0 %v13427_v41 }
0x56fd   :  { %10334 = vmatpush1.bf16.msra.mxu0 %v13425_v36 }
0x570c   :  { %v9908_v55 = vpop.f32.mrb[48].mxu0 }
0x570d   :  { %v13177_v28 = vpack.i.bf16 %v9908_v55, %v9860_v12  ;;  %v12964_v25 = vpop.f32.mrb[49].mxu0  ;;  %v13433_v55 = vld [vmem:[#allocation24 + $0x124] ss:$16 sps:$4 sm:$0xff]  }
0x570e   :  { %v9911_v23 = vpop.f32.mrb[50].mxu0  ;;  %10335 = vmatprep.subr.bf16.mxu0 %v13433_v55  ;;  %v13434_v25 = vld [vmem:[#allocation24 + $0x128] ss:$16 sps:$4 sm:$0xff]   ;;  %v13476_v55 = vld [vmem:[#allocation26 + $0x180] sm:$0xff]  }
0x570f   :  { %13178 = vrot.lane.b32.xlu1 %v13177_v28, %s14224_s30  ;;  %v12965_v22 = vpop.f32.mrb[51].mxu0  ;;  %v13431_v28 = vld [vmem:[#allocation24 + $0x120] ss:$16 sps:$4 sm:$0xff]  }
0x5710   :  { %10336 = vmatpush1.bf16.msra.mxu0 %v13431_v28  ;;  %v13477_v28 = vld [vmem:[#allocation26 + $0x148] sm:$0xff]  }
0x5711   :  { %10337 = vmatprep.subr.bf16.mxu0 %v13439_v54  ;;  %v13487_v54 = vld [vmem:[#allocation26 + $0x118] sm:$0xff]  }
0x5714   :  { %10338 = vmatpush1.bf16.msra.mxu0 %v13437_v24  ;;  %v13489_v24 = vld [vmem:[#allocation26 + $0x160] sm:$0xff]  }
0x5715   :  { %10339 = vmatprep.subr.bf16.mxu0 %v13445_v16  ;;  %v13491_v16 = vld [vmem:[#allocation26 + $0x120] sm:$0xff]  }
0x5718   :  { %10340 = vmatpush1.bf16.msra.mxu0 %v13443_v30  ;;  %v13493_v30 = vld [vmem:[#allocation26 + $0x168] sm:$0xff]  }
0x5719   :  { %10341 = vmatprep.subr.bf16.mxu0 %v13451_v57  ;;  %v13495_v57 = vld [vmem:[#allocation26 + $0x128] sm:$0xff]  }
0x571c   :  { %10342 = vmatpush1.bf16.msra.mxu0 %v13449_v13  ;;  %v13497_v13 = vld [vmem:[#allocation26 + $0x170] sm:$0xff]  }
0x571d   :  { %10343 = vmatprep.subr.bf16.mxu0 %v13457_v63  ;;  %v13499_v63 = vld [vmem:[#allocation26 + $0x130] sm:$0xff]  }
0x5720   :  { %10344 = vmatpush1.bf16.msra.mxu0 %v13455_v53  ;;  %v13501_v53 = vld [vmem:[#allocation26 + $0x178] sm:$0xff]  }
0x5721   :  { %10345 = vmatprep.subr.bf16.mxu0 %v13463_v42  ;;  %v13503_v42 = vld [vmem:[#allocation26 + $0x138] sm:$0xff]  }
0x5724   :  { %10346 = vmatpush1.bf16.msra.mxu0 %v13461_v58  ;;  %v11547_v58 = vld [vmem:[%s16556_s21 + $0x4] sm:$0xf] }
0x5725   :  { %10347 = vmatprep.subr.bf16.mxu0 %v13469_v15  ;;  %v10164_v15 = vrot.slane %v11547_v58, %v14667_v52 }
0x5781   :  { %v13179_v38 = vpop.permute.xlu1 %13178 }
0x5782   :  { %v13181_v3 = vunpack.i.h.bf16 %v13179_v38  ;;  %v13180_v9 = vunpack.i.l.bf16 %v13179_v38  ;;  %v13467_v38 = vld [vmem:[#allocation24 + $0x1e0] ss:$16 sps:$4 sm:$0xff]  }
0x5783   :  { %10348 = vmatpush1.bf16.msra.mxu0 %v13467_v38  ;;  %v10168_v38 = vrot.slane %v11547_v58, %v15543_v6 }
0x5784   :  { %v9983_v33 = vsel %vm2521_vm9, %v9981_v45, %v13181_v3  ;;  %v9982_v19 = vsel %vm2521_vm9, %v9980_v21, %v13180_v9  ;;  %v13474_v3 = vld [vmem:[#allocation26 + $0x1c0] sm:$0xff]   ;;  %11999 = vmatprep.subr.bf16.mxu0 %v13473_v31 }
0x5785   :  { %v9984_v56 = vpack.c.bf16 %v9983_v33, %v9982_v19 }
0x5787   :  { %12983 = vmatmul.mubr.bf16.vlgmr.msra.gmra.mrb[12].mxu1 %v9984_v56 }
0x5788   :  { %10408 = vmatprep.mubr.bf16.mxu1 %v14223_v35  ;;  %v13436_v35 = vld [vmem:[#allocation24 + $0x12c] ss:$16 sps:$4 sm:$0xff]   ;;  %10377 = vmatpush1.bf16.msra.mxu1 %v13428_v2 }
0x5789   :  { %10378 = vmatprep.subr.bf16.mxu1 %v13436_v35 }
0x578c   :  { %10379 = vmatpush1.bf16.msra.mxu1 %v13434_v25  ;;  %v13478_v25 = vld [vmem:[#allocation26 + $0x1c8] sm:$0xff]  }
0x578d   :  { %10380 = vmatprep.subr.bf16.mxu1 %v13442_v27  ;;  %v13488_v27 = vld [vmem:[#allocation26 + $0x198] sm:$0xff]  }
0x5790   :  { %10381 = vmatpush1.bf16.msra.mxu1 %v13440_v5  ;;  %v13490_v5 = vld [vmem:[#allocation26 + $0x1e0] sm:$0xff]  }
0x5791   :  { %10382 = vmatprep.subr.bf16.mxu1 %v13448_v39  ;;  %v13492_v39 = vld [vmem:[#allocation26 + $0x1a0] sm:$0xff]  }
0x5794   :  { %10383 = vmatpush1.bf16.msra.mxu1 %v13446_v17  ;;  %v13494_v17 = vld [vmem:[#allocation26 + $0x1e8] sm:$0xff]  }
0x5795   :  { %10384 = vmatprep.subr.bf16.mxu1 %v13454_v62  ;;  %v13496_v62 = vld [vmem:[#allocation26 + $0x1a8] sm:$0xff]  }
0x5798   :  { %10385 = vmatpush1.bf16.msra.mxu1 %v13452_v43  ;;  %v13498_v43 = vld [vmem:[#allocation26 + $0x1f0] sm:$0xff]  }
0x5799   :  { %10386 = vmatprep.subr.bf16.mxu1 %v13460_v37  ;;  %v13500_v37 = vld [vmem:[#allocation26 + $0x1b0] sm:$0xff]  }
0x579c   :  { %10387 = vmatpush1.bf16.msra.mxu1 %v13458_v50  ;;  %v13502_v50 = vld [vmem:[#allocation26 + $0x1f8] sm:$0xff]  }
0x579d   :  { %10388 = vmatprep.subr.bf16.mxu1 %v13466_v40  ;;  %v13504_v40 = vld [vmem:[#allocation26 + $0x1b8] sm:$0xff]  }
0x57a0   :  { %10389 = vmatpush1.bf16.msra.mxu1 %v13464_v11  ;;  %v10156_v11 = vrot.slane %v11547_v58, %v14664_v51 }
0x57a1   :  { %10390 = vmatprep.subr.bf16.mxu1 %v13472_v29  ;;  %v10160_v29 = vrot.slane %v11547_v58, %v14661_v49  ;;  %v13506_v58 = vld [vmem:[%s16559_s24 + $0x8] sm:$0xff]  }
0x57a4   :  { %10391 = vmatpush1.bf16.msra.mxu1 %v13470_v59 }
0x57a5   :  { %12021 = vmatprep.subr.bf16.mxu1 %v13474_v3 }
0x585a   :  { %v10073_v32 = vpop.f32.mrb[12].mxu1 }
0x585b   :  { %v10074_v18 = vadd.f32 %v11538_v0, %v10073_v32  ;;  %v12984_v10 = vpop.f32.mrb[13].mxu1  ;;  %v16416_v32 = vld [vmem:[%s16553_s18 + $0x4] sm:$0x7] }
0x585c   :  { %v10076_v4 = vpop.f32.mrb[14].mxu1 }
0x585d   :  { %v10080_v44 = vadd.f32 %v10074_v18, %v15998_v20  ;;  %v10077_v7 = vadd.f32 %v11538_v0, %v10076_v4  ;;  %v12985_v8 = vpop.f32.mrb[15].mxu1  ;;  %v10107_v18 = vrot.slane %v16416_v32, %v14661_v49 }
0x585f   :  { %v10081_v12 = vadd.f32 %v10077_v7, %v16000_v34  ;;  %10082 = vadd.xlane.f32.xlu0 %v10080_v44 }
0x5861   :  { %10084 = vadd.xlane.f32.xlu1 %v10081_v12 }
0x58ec   :  { %v10083_v20 = vpop.xlane.xlu0 %10082 }
0x58ed   :  { %v10086_v34 = vmul.f32 0.0078125, %v10083_v20  ;;  %v13479_v20 = vld [vmem:[#allocation26 + $0x108] sm:$0xff]  }
0x58ee   :  { %v10085_v23 = vpop.xlane.xlu1 %10084 }
0x58ef   :  { %v16405_v22 = vsub.f32 %v10080_v44, %v10086_v34  ;;  %v10087_v14 = vmul.f32 0.0078125, %v10085_v23  ;;  %v16424_v44 = vld [vmem:[%s16554_s19 + $0x4] sm:$0x7]  ;;  %v13481_v23 = vld [vmem:[#allocation26 + $0x150] sm:$0xff]  }
0x58f0   :  { %v10113_v7 = vrot.slane %v16424_v44, %v14661_v49  ;;  %v13480_v34 = vld [vmem:[#allocation26 + $0x188] sm:$0xff]  }
0x58f1   :  { %v16407_v61 = vsub.f32 %v10081_v12, %v10087_v14  ;;  %v10090_v46 = vmul.f32 %v16405_v22, %v16405_v22  ;;  %v13483_v14 = vld [vmem:[#allocation26 + $0x110] sm:$0xff]  }
0x58f3   :  { %10092 = vadd.xlane.f32.xlu0 %v10090_v46  ;;  %v10091_v26 = vmul.f32 %v16407_v61, %v16407_v61  ;;  %v13485_v46 = vld [vmem:[#allocation26 + $0x158] sm:$0xff]  }
0x58f7   :  { %10094 = vadd.xlane.f32.xlu0 %v10091_v26  ;;  %v13486_v26 = vld [vmem:[#allocation26 + $0x1d8] sm:$0xff]  }
0x5980   :  { %v10093_v9 = vpop.xlane.xlu0 %10092 }
0x5981   :  { %v10096_v21 = vmul.f32 0.0078125, %v10093_v9 }
0x5983   :  { %v10098_v45 = vadd.f32 1e-05, %v10096_v21 }
0x5984   :  { %v10095_v33 = vpop.xlane.xlu0 %10094 }
0x5985   :  { %13785 = vrsqrt.f32 %v10098_v45  ;;  %v10097_v19 = vmul.f32 0.0078125, %v10095_v33 }
0x5987   :  { %v10099_v56 = vadd.f32 1e-05, %v10097_v19 }
0x5989   :  { %13787 = vrsqrt.f32 %v10099_v56 }
0x598f   :  { %v13786_v0 = vpop.eup %13785 }
0x5990   :  { %v10102_v10 = vmul.f32 %v13786_v0, %v16405_v22  ;;  %v13482_v22 = vld [vmem:[#allocation26 + $0x1d0] sm:$0xff]  }
0x5992   :  { %v10108_v8 = vmul.f32 %v10107_v18, %v10102_v10 }
0x5993   :  { %v13788_v4 = vpop.eup %13787 }
0x5994   :  { %v10103_v12 = vmul.f32 %v13788_v4, %v16407_v61  ;;  %v16429_v41 = vadd.f32 %v10113_v7, %v10108_v8  ;;  %v13484_v61 = vld [vmem:[#allocation26 + $0x190] sm:$0xff]  }
0x5996   :  { %v10109_v36 = vmul.f32 %v10107_v18, %v10103_v12 }
0x5998   :  { %v16431_v2 = vadd.f32 %v10113_v7, %v10109_v36 }
0x599a   :  { %v10116_v35 = vpack.c.bf16 %v16431_v2, %v16429_v41 }
0x599c   :  { %10366 = vmatmul.mubr.bf16.vlgmr.msra.gmra.mrb[52].mxu0 %v10116_v35  ;;  %10409 = vmatmul.mubr.bf16.vlgmr.msra.gmra.mrb[16].mxu1 %v10116_v35 }
0x599d   :  { %12000 = vmatpush3.bf16.msra.mxu0 %v13475_v60  ;;  %12022 = vmatpush3.bf16.msra.mxu1 %v13476_v55 }
0x599e   :  { %12001 = vmatprep.subr.bf16.mxu0 %v13477_v28  ;;  %12023 = vmatprep.subr.bf16.mxu1 %v13478_v25 }
0x59a1   :  { %12002 = vmatpush3.bf16.msra.mxu0 %v13479_v20  ;;  %12024 = vmatpush3.bf16.msra.mxu1 %v13480_v34 }
0x59a2   :  { %12003 = vmatprep.subr.bf16.mxu0 %v13481_v23  ;;  %12025 = vmatprep.subr.bf16.mxu1 %v13482_v22 }
0x59a5   :  { %12004 = vmatpush3.bf16.msra.mxu0 %v13483_v14  ;;  %12026 = vmatpush3.bf16.msra.mxu1 %v13484_v61 }
0x59a6   :  { %12005 = vmatprep.subr.bf16.mxu0 %v13485_v46  ;;  %12027 = vmatprep.subr.bf16.mxu1 %v13486_v26 }
0x59a9   :  { %12006 = vmatpush3.bf16.msra.mxu0 %v13487_v54  ;;  %12028 = vmatpush3.bf16.msra.mxu1 %v13488_v27  ;;  %v11580_v54 = vld [vmem:[#allocation27 + $0x1] ss:$0 sm:$0xff] }
0x59aa   :  { %12007 = vmatprep.subr.bf16.mxu0 %v13489_v24  ;;  %12029 = vmatprep.subr.bf16.mxu1 %v13490_v5 }
0x59ad   :  { %12008 = vmatpush3.bf16.msra.mxu0 %v13491_v16  ;;  %12030 = vmatpush3.bf16.msra.mxu1 %v13492_v39 }
0x59ae   :  { %12009 = vmatprep.subr.bf16.mxu0 %v13493_v30  ;;  %12031 = vmatprep.subr.bf16.mxu1 %v13494_v17 }
0x59b1   :  { %12010 = vmatpush3.bf16.msra.mxu0 %v13495_v57  ;;  %12032 = vmatpush3.bf16.msra.mxu1 %v13496_v62 }
0x59b2   :  { %12011 = vmatprep.subr.bf16.mxu0 %v13497_v13  ;;  %12033 = vmatprep.subr.bf16.mxu1 %v13498_v43 }
0x59b5   :  { %12012 = vmatpush3.bf16.msra.mxu0 %v13499_v63  ;;  %12034 = vmatpush3.bf16.msra.mxu1 %v13500_v37 }
0x59b6   :  { %12013 = vmatprep.subr.bf16.mxu0 %v13501_v53  ;;  %12035 = vmatprep.subr.bf16.mxu1 %v13502_v50 }
0x59b9   :  { %12014 = vmatpush3.bf16.msra.mxu0 %v13503_v42  ;;  %12036 = vmatpush3.bf16.msra.mxu1 %v13504_v40  ;;  %v13505_v40 = vld [vmem:[%s16559_s24] sm:$0xff]  }
0x59ba   :  { %12986 = vmatprep.subr.bf16.mxu0 %v14221_v1 }
0x5a6f   :  { %v10367_v59 = vpop.f32.mrb[52].mxu0  ;;  %v10410_v31 = vpop.f32.mrb[16].mxu1 }
0x5a70   :  { %v10368_v3 = vadd.f32 %v10367_v59, %v10156_v11  ;;  %v10411_v9 = vadd.f32 %v10410_v31, %v10164_v15  ;;  %v10369_v21 = vpop.f32.mrb[53].mxu0  ;;  %v10412_v45 = vpop.f32.mrb[17].mxu1 }
0x5a71   :  { %v10370_v33 = vadd.f32 %v10369_v21, %v10160_v29  ;;  %v10413_v19 = vadd.f32 %v10412_v45, %v10168_v38  ;;  %v10371_v56 = vpop.f32.mrb[54].mxu0  ;;  %v10414_v0 = vpop.f32.mrb[18].mxu1  ;;  %v13509_v21 = vld [vmem:[%s16559_s24 + $0x20] sm:$0xff]   ;;  %v13510_v45 = vld [vmem:[%s16559_s24 + $0x28] sm:$0xff]  }
0x5a72   :  { %v10372_v18 = vadd.f32 %v10371_v56, %v10156_v11  ;;  %v10415_v10 = vadd.f32 %v10414_v0, %v10164_v15  ;;  %v10373_v4 = vpop.f32.mrb[55].mxu0  ;;  %v10416_v7 = vpop.f32.mrb[19].mxu1  ;;  %v10419_v36 = vmax.f32 %v10368_v3, 0.0  ;;  %v10421_v60 = vmax.f32 %v10411_v9, 0.0  ;;  %v13507_v3 = vld [vmem:[%s16559_s24 + $0x10] sm:$0xff]   ;;  %v13508_v9 = vld [vmem:[%s16559_s24 + $0x18] sm:$0xff]  }
0x5a73   :  { %v10374_v8 = vadd.f32 %v10373_v4, %v10160_v29  ;;  %v10417_v12 = vadd.f32 %v10416_v7, %v10168_v38  ;;  %v10420_v28 = vmax.f32 %v10370_v33, 0.0  ;;  %v10422_v25 = vmax.f32 %v10413_v19, 0.0  ;;  %v13511_v33 = vld [vmem:[%s16559_s24 + $0x30] sm:$0xff]   ;;  %v13512_v19 = vld [vmem:[%s16559_s24 + $0x38] sm:$0xff]  }
0x5a74   :  { %v10423_v55 = vmax.f32 %v10372_v18, 0.0  ;;  %v10425_v35 = vmax.f32 %v10415_v10, 0.0 }
0x5a75   :  { %v10424_v20 = vmax.f32 %v10374_v8, 0.0  ;;  %v10426_v34 = vmax.f32 %v10417_v12, 0.0  ;;  %v10805_v8 = vrot.slane %v16416_v32, %v14667_v52 }
0x5a76   :  { %v10427_v23 = vpack.c.bf16 %v10423_v55, %v10419_v36  ;;  %v10429_v22 = vpack.c.bf16 %v10425_v35, %v10421_v60 }
0x5a77   :  { %v10428_v14 = vpack.c.bf16 %v10424_v20, %v10420_v28  ;;  %v10430_v61 = vpack.c.bf16 %v10426_v34, %v10422_v25 }
0x5a79   :  { %10728 = vmatprep.mubr.bf16.mxu0 %v10428_v14  ;;  %10769 = vmatprep.mubr.bf16.mxu1 %v10430_v61  ;;  %v11622_v61 = vld [vmem:[%s16616_s8] ss:$0 sm:$0xff] }
0x5a7a   :  { %10729 = vmatmul.mubr.bf16.vlgmr.msra.gmra.mrb[56].mxu0 %v10427_v23  ;;  %10770 = vmatmul.mubr.bf16.vlgmr.msra.gmra.mrb[20].mxu1 %v10429_v22  ;;  %v11613_v23 = vld [vmem:[%s16560_s25] ss:$0 sm:$0xff]  ;;  %s14229_s25 = smov [#allocation29]  }
0x5a7b   :  { %13002 = vmatprep.mubr.msk.bf16.mxu0 %vm14222_vm0, %v14221_v1  ;;  %12987 = vmatpush3.bf16.msra.mxu0 %v13505_v40  ;;  %s11194_s5 = sshll.u32 %s14229_s25, 4  ;;  %s11195_s5 = int_to_ptr.vmem [resolvable:$true] %s11194_s5 }
0x5a7c   :  { %12988 = vmatprep.subr.bf16.mxu0 %v14221_v1  ;;  %s14152_s20 = scalar_lea.vmem %s11195_s5, 32  ;;  %p14157_p3 = scmp.lt.s32.totalorder %s11195_s5, %s11195_s5 }
0x5a7d   :  { %p14153_p2 = scmp.ne.s32.totalorder %s11195_s5, %s14152_s20  ;;  %p14158_p4 = scmp.lt.s32.totalorder %s14152_s20, %s14152_s20 }
0x5a7f   :  { %12989 = vmatpush3.bf16.msra.mxu0 %v13506_v58  ;;  %p14159_p5 = por %p14158_p4, %p14157_p3 }
0x5a80   :  { %12990 = vmatprep.subr.bf16.mxu0 %v14221_v1 }
0x5a81   :  { %p14160_p6 = pnand %p14159_p5, %p14153_p2 }
0x5a83   :  { %12991 = vmatpush3.bf16.msra.mxu0 %v13507_v3 }
0x5a84   :  { %12992 = vmatprep.subr.bf16.mxu0 %v14221_v1 }
0x5a87   :  { %12993 = vmatpush3.bf16.msra.mxu0 %v13508_v9 }
0x5a88   :  { %12994 = vmatprep.subr.bf16.mxu0 %v14221_v1 }
0x5a8b   :  { %12995 = vmatpush3.bf16.msra.mxu0 %v13509_v21 }
0x5a8c   :  { %12996 = vmatprep.subr.bf16.mxu0 %v14221_v1 }
0x5a8f   :  { %12997 = vmatpush3.bf16.msra.mxu0 %v13510_v45 }
0x5a90   :  { %12998 = vmatprep.subr.bf16.mxu0 %v14221_v1 }
0x5a93   :  { %12999 = vmatpush3.bf16.msra.mxu0 %v13511_v33 }
0x5a94   :  { %13000 = vmatprep.subr.bf16.mxu0 %v14221_v1  ;;  %v10811_v1 = vrot.slane %v16424_v44, %v14667_v52 }
0x5a97   :  { %13001 = vmatpush3.bf16.msra.mxu0 %v13512_v19 }
0x5b4d   :  { %v12015_v46 = vpop.f32.mrb[56].mxu0  ;;  %v12037_v26 = vpop.f32.mrb[20].mxu1 }
0x5b4e   :  { %v12016_v27 = vpop.f32.mrb[57].mxu0  ;;  %v12038_v24 = vpop.f32.mrb[21].mxu1 }
0x5b4f   :  { %v12017_v5 = vadd.f32 %v12016_v27, %v12015_v46  ;;  %v12039_v16 = vadd.f32 %v12038_v24, %v12037_v26  ;;  %v12018_v39 = vpop.f32.mrb[58].mxu0  ;;  %v12040_v30 = vpop.f32.mrb[22].mxu1 }
0x5b50   :  { %v12019_v17 = vpop.f32.mrb[59].mxu0  ;;  %v12041_v57 = vpop.f32.mrb[23].mxu1 }
0x5b51   :  { %v10731_v62 = vadd.f32 %v12017_v5, %v11580_v54  ;;  %v12020_v13 = vadd.f32 %v12019_v17, %v12018_v39  ;;  %v12042_v43 = vadd.f32 %v12041_v57, %v12040_v30  ;;  %v14228_v39 = vmov 1966171168  }
0x5b52   :  { %v11027_v30 = vunpack.c.l.s4 %v14228_v39 }
0x5b53   :  { %v10772_v63 = vadd.f32 %v12039_v16, %v10731_v62  ;;  %v10734_v37 = vadd.f32 %v12020_v13, %v11580_v54  ;;  %v11623_v16 = vld [vmem:[#allocation2] ss:$0 sm:$0xff] }
0x5b54   :  { %v11028_v57 = vunpack.c.0.s8 %v11027_v30 }
0x5b55   :  { %v10775_v53 = vadd.f32 %v12042_v43, %v10734_v37  ;;  %v10778_v50 = vadd.f32 %v10772_v63, %v16429_v41  ;;  %v10976_v43 = vsub.s32 4, %v14658_v48  ;;  %v10980_v63 = vsub.s32 5, %v14658_v48 }
0x5b56   :  { %v10984_v37 = vsub.s32 6, %v14658_v48  ;;  %v16493_v40 = vsub.s32 %v11028_v57, %v14658_v48  ;;  %v13799_v57 = vld [vmem:[#allocation3 + $0x1] sm:$0x1] }
0x5b57   :  { %10780 = vadd.xlane.f32.xlu0 %v10778_v50  ;;  %v10779_v42 = vadd.f32 %v10775_v53, %v16431_v2  ;;  %v10988_v53 = vsub.s32 7, %v14658_v48  ;;  %vm10955_vm11 = vcmp.gt.f32.partialorder %v13799_v57, 0.0 }
0x5b59   :  { %10782 = vadd.xlane.f32.xlu1 %v10779_v42 }
0x5be4   :  { %v10781_v11 = vpop.xlane.xlu0 %10780 }
0x5be5   :  { %v10784_v41 = vmul.f32 0.0078125, %v10781_v11 }
0x5be6   :  { %v10783_v15 = vpop.xlane.xlu1 %10782 }
0x5be7   :  { %v10786_v29 = vsub.f32 %v10778_v50, %v10784_v41  ;;  %v10785_v2 = vmul.f32 0.0078125, %v10783_v15 }
0x5be9   :  { %v10787_v38 = vsub.f32 %v10779_v42, %v10785_v2  ;;  %v10788_v59 = vmul.f32 %v10786_v29, %v10786_v29 }
0x5beb   :  { %10790 = vadd.xlane.f32.xlu0 %v10788_v59  ;;  %v10789_v31 = vmul.f32 %v10787_v38, %v10787_v38 }
0x5bed   :  { %10792 = vadd.xlane.f32.xlu1 %v10789_v31 }
0x5c78   :  { %v10791_v56 = vpop.xlane.xlu0 %10790 }
0x5c79   :  { %v10794_v0 = vmul.f32 0.0078125, %v10791_v56 }
0x5c7a   :  { %v10793_v18 = vpop.xlane.xlu1 %10792 }
0x5c7b   :  { %v10796_v10 = vadd.f32 1e-05, %v10794_v0  ;;  %v10795_v4 = vmul.f32 0.0078125, %v10793_v18 }
0x5c7d   :  { %13789 = vrsqrt.f32 %v10796_v10  ;;  %v10797_v7 = vadd.f32 1e-05, %v10795_v4 }
0x5c7f   :  { %13791 = vrsqrt.f32 %v10797_v7 }
0x5c87   :  { %v13790_v12 = vpop.eup %13789 }
0x5c88   :  { %v10800_v36 = vmul.f32 %v13790_v12, %v10786_v29 }
0x5c89   :  { %v13792_v60 = vpop.eup %13791 }
0x5c8a   :  { %v10806_v55 = vmul.f32 %v10805_v8, %v10800_v36  ;;  %v10801_v35 = vmul.f32 %v13792_v60, %v10787_v38 }
0x5c8c   :  { %v10807_v28 = vmul.f32 %v10805_v8, %v10801_v35  ;;  %v10812_v25 = vadd.f32 %v10811_v1, %v10806_v55 }
0x5c8e   :  { %v10813_v20 = vadd.f32 %v10811_v1, %v10807_v28 }
0x5c90   :  { %v10814_v34 = vpack.c.bf16 %v10813_v20, %v10812_v25 }
0x5c92   :  { %13003 = vmatmul.mubr.bf16.vlgmr.msra.gmra.mrb[60].mxu0 %v10814_v34 }
0x5d65   :  { %v10920_v22 = vpop.f32.mrb[60].mxu0 }
0x5d66   :  { %v10921_v14 = vadd.f32 %v11613_v23, %v10920_v22  ;;  %v13004_v32 = vpop.f32.mrb[61].mxu0 }
0x5d67   :  { %v10923_v46 = vpop.f32.mrb[62].mxu0 }
0x5d68   :  { %v10927_v44 = vmax.f32 %v10921_v14, 0.0  ;;  %v10924_v26 = vadd.f32 %v11613_v23, %v10923_v46  ;;  %v13005_v54 = vpop.f32.mrb[63].mxu0 }
0x5d6a   :  { %v10936_v27 = vmul.f32 %v11622_v61, %v10927_v44  ;;  %v10928_v24 = vmax.f32 %v10924_v26, 0.0  ;;  %v11127_v44 = vand.u32 127, %v390_v47 }
0x5d6c   :  { %v10937_v5 = vmul.f32 %v11622_v61, %v10928_v24  ;;  %10938 = vadd.xlane.f32.xlu0 %v10936_v27  ;;  %v11130_v26 = vsub.s32 %v11127_v44, %v14658_v48 }
0x5d6e   :  { %10940 = vadd.xlane.f32.xlu1 %v10937_v5 }
0x5d82   :  { %10949 = vperm.xlu0 %13182, %v11623_v16  }
0x5df9   :  { %v10939_v17 = vpop.xlane.xlu0 %10938 }
0x5dfb   :  { %v10941_v62 = vpop.xlane.xlu1 %10940 }
0x5e01   :  { %v10950_v13 = vpop.permute.xlu0 %10949 }
0x5e02   :  { %v10952_v50 = vadd.f32 %v10950_v13, %v10939_v17  ;;  %v10953_v42 = vadd.f32 %v10950_v13, %v10941_v62  ;;  %v13798_v17 = vld [vmem:[#allocation3] sm:$0x1] }
0x5e03   :  { %vm10954_vm10 = vcmp.gt.f32.partialorder %v13798_v17, 0.0 }
0x5e04   :  { %v10961_v58 = vrot.slane %v10952_v50, %v14664_v51  ;;  %v10965_v11 = vrot.slane %v10952_v50, %v14661_v49  ;;  %v10969_v41 = vrot.slane %v10952_v50, %v14667_v52  ;;  %v10973_v15 = vrot.slane %v10952_v50, %v15543_v6 }
0x5e05   :  { %v10977_v29 = vrot.slane %v10952_v50, %v10976_v43  ;;  %v10981_v2 = vrot.slane %v10952_v50, %v10980_v63  ;;  %v10985_v38 = vrot.slane %v10952_v50, %v10984_v37  ;;  %v10989_v59 = vrot.slane %v10952_v50, %v10988_v53 }
0x5e06   :  { %v11022_v31 = vcombine.low %v10961_v58, %v10965_v11  ;;  %v11023_v3 = vcombine.low %v10969_v41, %v10973_v15  ;;  %v10993_v9 = vrot.slane %v10953_v42, %v14664_v51  ;;  %v10997_v21 = vrot.slane %v10953_v42, %v14661_v49 }
0x5e07   :  { %v11024_v45 = vcombine.low %v10977_v29, %v10981_v2  ;;  %v11025_v33 = vcombine.low %v10985_v38, %v10989_v59  ;;  %v11001_v19 = vrot.slane %v10953_v42, %v14667_v52  ;;  %v11005_v56 = vrot.slane %v10953_v42, %v15543_v6 }
0x5e08   :  { %v11032_v0 = vrot.slane %v11022_v31, %v16493_v40  ;;  %v11039_v18 = vrot.slane %v11023_v3, %v16493_v40  ;;  %v11009_v10 = vrot.slane %v10953_v42, %v10976_v43  ;;  %v11013_v4 = vrot.slane %v10953_v42, %v10980_v63 }
0x5e09   :  { %v11046_v7 = vrot.slane %v11024_v45, %v16493_v40  ;;  %v11053_v8 = vrot.slane %v11025_v33, %v16493_v40  ;;  %v11017_v12 = vrot.slane %v10953_v42, %v10984_v37  ;;  %v11021_v51 = vrot.slane %v10953_v42, %v10988_v53 }
0x5e0a   :  { %v11054_v36 = vcombine.low %v11032_v0, %v11039_v18  ;;  %v11071_v49 = vcombine.low %v10993_v9, %v10997_v21  ;;  %v11072_v60 = vcombine.low %v11001_v19, %v11005_v56  ;;  %v11073_v1 = vcombine.low %v11009_v10, %v11013_v4 }
0x5e0b   :  { %v11055_v55 = vcombine.low %v11046_v7, %v11053_v8  ;;  %v11074_v52 = vcombine.low %v11017_v12, %v11021_v51 }
0x5e0c   :  { %v11062_v6 = vrot.slane %v11054_v36, %v16493_v40  ;;  %v11081_v35 = vrot.slane %v11071_v49, %v16493_v40  ;;  %v11088_v28 = vrot.slane %v11072_v60, %v16493_v40  ;;  %v11095_v25 = vrot.slane %v11073_v1, %v16493_v40 }
0x5e0d   :  { %v11069_v20 = vrot.slane %v11055_v55, %v16493_v40  ;;  %v11102_v34 = vrot.slane %v11074_v52, %v16493_v40 }
0x5e0e   :  { %v11103_v23 = vcombine.low %v11081_v35, %v11088_v28 }
0x5e0f   :  { %v11070_v22 = vcombine.low %v11062_v6, %v11069_v20  ;;  %v11104_v14 = vcombine.low %v11095_v25, %v11102_v34 }
0x5e10   :  { %v11111_v32 = vrot.slane %v11103_v23, %v16493_v40 }
0x5e11   :  { %11121 = vperm.xlu1 %13183, %v11070_v22   ;;  %v11118_v61 = vrot.slane %v11104_v14, %v16493_v40 }
0x5e13   :  { %v11119_v46 = vcombine.low %v11111_v32, %v11118_v61 }
0x5e15   :  { %11124 = vperm.xlu1 %13183, %v11119_v46  }
0x5e90   :  { %v11122_v54 = vpop.permute.xlu1 %11121 }
0x5e91   :  { %v11131_v27 = vrot.slane %v11122_v54, %v11130_v26 }
0x5e93   :  { %v11142_v24 = vrot.slane %v11131_v27, %v16493_v40 }
0x5e94   :  { %v11125_v5 = vpop.permute.xlu1 %11124 }
0x5e95   :  { %v11135_v16 = vrot.slane %v11125_v5, %v11130_v26  ;;  %v11149_v39 = vrot.slane %v11142_v24, %v16493_v40 }
0x5e97   :  { %v11156_v30 = vrot.slane %v11135_v16, %v16493_v40  ;;  %v11166_v13 = vsel %vm10954_vm10, -1.0, %v11149_v39 }
0x5e99   :  { %v11163_v62 = vrot.slane %v11156_v30, %v16493_v40 }
0x5e9b   :  { %v11167_v47 = vsel %vm10955_vm11, -1.0, %v11163_v62 }
0x5e9c   :  { %v11170_v43 = vcombine.low %v11166_v13, %v11167_v47 }
0x5e9e   :  { %v11177_v48 = vrot.slane %v11170_v43, %v16493_v40 }
0x5ea0   :  { %v11184_v63 = vrot.slane %v11177_v48, %v16493_v40 }
0x5ea2   :  { %11187 = vst.msk [vmem:[#allocation29] sm:$0x3] %vm11186_vm12, %v11184_v63 }
0x5ea3   :  { %14163 = shalt.err (!%p14160_p6)
}
0x5ea4   :  { %s16617_s27 = sld [smem:[#allocation54_spill]] }
0x5eaa   :  { %s14164_s16 = scalar_lea.hbm %s16617_s27, 32 }
0x5eab   :  { %p14165_p7 = scmp.ne.s32.totalorder %s16617_s27, %s14164_s16  ;;  %p14168_p8 = scmp.lt.u32.totalorder %s14164_s16, %s16617_s27 }
0x5ead   :  { %p14170_p9 = pnand %p14168_p8, %p14165_p7 }
0x5eaf   :  { %14173 = shalt.err (!%p14170_p9)
}
0x5eb0   :  { %11197 = dma.vmem_to_hbm [thread:$0]  %s11195_s5, 32, %s16617_s27, [#allocation5]  }
0x5eb1   :  { %14192 = dma.done.wait [#allocation5], 32  }
0x5eb2   :  { %14193 = vsyncadd [#allocation5], 4294967264 }
0x5eb3   :  { %11201 = vsyncpa [#allocation4], 1 }
0x5eb4   :  { %11202 = vsyncpa [#allocation7], 1 }
0x5eb5   :  { %11203 = vsyncpa [#allocation10], 1 }
0x5eb6   :  { %11204 = vsyncpa [#allocation13], 1 }
0x5eb7   :  { %11205 = vsyncpa [#allocation16], 1 }
0x5eb8   :  { %11206 = vsyncpa [#allocation19], 1 }
0x5eb9   :  { %11207 = vsyncpa [#allocation22], 1 }
0x5eba   :  { %11208 = vsyncpa [#allocation25], 1 }
0x5ebb   :  { %11209 = vsyncpa [#allocation28], 1 }
0x5ebc   :  { %11210 = vsyncpa [#allocation5], 1 }

</bundles_post_ra>
